<compile_context>
chip_gen: v7x
topology: tpu7x:2x2x1
jax: 0.10.0
libtpu: 0.0.40
codegen_flags: <defaults>
</compile_context>

<pallas_src>
import functools

import jax
import jax.numpy as jnp
from jax.experimental import pallas as pl
from jax.experimental.pallas import tpu as pltpu

NEG_SLOPE = 0.01   # PyTorch F.leaky_relu default
BN_EPS = 1e-4      # BatchNorm2d(eps=0.0001)
Z_DIM = 32


# ----------------------------------------------------------------------------
# Fused Pallas kernel: matmul (+BN) (+leaky|sigmoid) (+2x2 maxpool)
# ----------------------------------------------------------------------------
def _fused_matmul_kernel(w_ref, p_ref, o_ref, *, bn, act, pool):
    # w: [Cout, K] bf16, p: [K, M] bf16  ->  y: [Cout, M] f32 (lane-dense)
    y = jnp.dot(w_ref[...], p_ref[...], preferred_element_type=jnp.float32)
    if bn:
        # BatchNorm2d training-mode forward: biased batch stats per channel
        # (axis 1 enumerates every (n, h, w) position exactly once).
        mean = jnp.mean(y, axis=1, keepdims=True)
        var = jnp.mean(jnp.square(y - mean), axis=1, keepdims=True)
        y = (y - mean) * jax.lax.rsqrt(var + BN_EPS)
    if act == "leaky":
        y = jnp.where(y > 0, y, NEG_SLOPE * y)
    elif act == "sigmoid":
        y = jax.nn.sigmoid(y)
    if pool:
        # M is ordered (pool_window, n, i, j): max over the 4 major lane chunks.
        mp = y.shape[1] // 4
        y = jnp.maximum(jnp.maximum(y[:, :mp], y[:, mp:2 * mp]),
                        jnp.maximum(y[:, 2 * mp:3 * mp], y[:, 3 * mp:]))
    o_ref[...] = y.astype(o_ref.dtype)


def fused_matmul(w_mat, patches, *, bn=False, act="none", pool=False):
    """out = [pool2x2 o] act( BN?( W @ P ) );  W: [Cout, K], P: [K, M]."""
    k_dim = w_mat.shape[1]
    k_pad = (-k_dim) % 8                      # sublane-align the contraction dim
    if k_pad:
        w_mat = jnp.pad(w_mat, ((0, 0), (0, k_pad)))
        patches = jnp.pad(patches, ((0, k_pad), (0, 0)))
    w_mat = w_mat.astype(jnp.bfloat16)        # bf16 MXU inputs, f32 accumulate
    patches = patches.astype(jnp.bfloat16)

    cout, k = w_mat.shape
    m = patches.shape[1]
    out_m = m // 4 if pool else m

    return pl.pallas_call(
        functools.partial(_fused_matmul_kernel, bn=bn, act=act, pool=pool),
        out_shape=jax.ShapeDtypeStruct((cout, out_m), jnp.float32),
        grid=(1,),                            # whole problem fits one VMEM block
        in_specs=[
            pl.BlockSpec((cout, k), lambda i: (0, 0)),
            pl.BlockSpec((k, m), lambda i: (0, 0)),
        ],
        out_specs=pl.BlockSpec((cout, out_m), lambda i: (0, 0)),
        compiler_params=pltpu.CompilerParams(
            dimension_semantics=("arbitrary",)),
    )(w_mat, patches)


# ----------------------------------------------------------------------------
# Host-side layout plumbing (channel-major, no big transposes)
# ----------------------------------------------------------------------------
def _encoder_patches(x_cm, k, pad):
    """im2col for a stride-1 conv followed by a 2x2 maxpool.

    x_cm: [C, N, H, W] -> patches [C*k*k, 4*N*(Ho/2)*(Wo/2)] with K ordered
    (c, dy, dx) and M ordered (pool_window=(wy,wx), n, i, j) so the fused
    kernel can max-pool with static lane-chunk slices.
    """
    c, n, h, w = x_cm.shape
    ho = h + 2 * pad - k + 1
    wo = w + 2 * pad - k + 1
    hp2, wp2 = ho // 2, wo // 2
    xp = jnp.pad(x_cm, ((0, 0), (0, 0), (pad, pad), (pad, pad)))
    windows = []
    for wy in (0, 1):
        for wx in (0, 1):
            shifts = []
            for dy in range(k):
                for dx in range(k):
                    sy, sx = wy + dy, wx + dx
                    shifts.append(jax.lax.slice(
                        xp, (0, 0, sy, sx),
                        (c, n, sy + 2 * hp2 - 1, sx + 2 * wp2 - 1),
                        (1, 1, 2, 2)))                       # [C, N, hp2, wp2]
            windows.append(jnp.stack(shifts, axis=1))        # [C, kk, N, hp2, wp2]
    p = jnp.stack(windows, axis=2)                           # [C, kk, 4, N, hp2, wp2]
    return p.reshape(c * k * k, 4 * n * hp2 * wp2), (n, hp2, wp2)


def _conv_patches(x_cm, k, pad):
    """Plain stride-1 im2col: [C, N, H, W] -> [C*k*k, N*Ho*Wo] (M = (n, r, c))."""
    c, n, h, w = x_cm.shape
    ho = h + 2 * pad - k + 1
    wo = w + 2 * pad - k + 1
    xp = jnp.pad(x_cm, ((0, 0), (0, 0), (pad, pad), (pad, pad)))
    shifts = [xp[:, :, dy:dy + ho, dx:dx + wo]
              for dy in range(k) for dx in range(k)]
    p = jnp.stack(shifts, axis=1)                            # [C, kk, N, Ho, Wo]
    return p.reshape(c * k * k, n * ho * wo), (n, ho, wo)


def _deconv_weight_mat(w):
    """ConvTranspose2d weight [Cin, Cout, k, k] -> equivalent conv mat [Cout, Cin*k*k]."""
    cin, cout, k, _ = w.shape
    wc = jnp.flip(w, axis=(2, 3)).transpose(1, 0, 2, 3)      # [Cout, Cin, k, k]
    return wc.reshape(cout, cin * k * k)


def _upsample2_dilate2(x_cm):
    """Fold F.interpolate(scale=2, 'nearest') + stride-2 zero dilation into one
    scatter: [C, N, H, W] -> [C, N, 4H-1, 4W-1] with values on the even grid."""
    c, n, h, w = x_cm.shape
    d = jnp.zeros((c, n, 4 * h - 1, 4 * w - 1), x_cm.dtype)
    for oy in (0, 2):
        for ox in (0, 2):
            d = d.at[:, :, oy::4, ox::4].set(x_cm)
    return d


# ----------------------------------------------------------------------------
# Model
# ----------------------------------------------------------------------------
def init_params(key):
    ks = jax.random.split(key, 6)
    s = 0.1
    return {
        "conv1":   s * jax.random.normal(ks[0], (8, 1, 5, 5), jnp.float32),
        "conv2":   s * jax.random.normal(ks[1], (4, 8, 5, 5), jnp.float32),
        "fc1":     s * jax.random.normal(ks[2], (Z_DIM, 4 * 16 * 16), jnp.float32),
        "deconv1": s * jax.random.normal(ks[3], (32, 4, 4, 4), jnp.float32),
        "deconv2": s * jax.random.normal(ks[4], (4, 8, 4, 4), jnp.float32),
        "deconv3": s * jax.random.normal(ks[5], (8, 1, 4, 4), jnp.float32),
    }


def forward(params, x):
    n = x.shape[0]
    x_cm = jnp.transpose(x, (1, 0, 2, 3))                    # [1, N, 64, 64]

    # ---- encoder: conv1 + BN1 + leaky + pool (one fused kernel) ----
    p1, (_, hs, ws) = _encoder_patches(x_cm, 5, 2)
    h = fused_matmul(params["conv1"].reshape(8, 25), p1,
                     bn=True, act="leaky", pool=True)        # [8, N*32*32]
    h = h.reshape(8, n, hs, ws)

    # ---- conv2 + BN2 + leaky + pool ----
    p2, (_, hs, ws) = _encoder_patches(h, 5, 2)
    h = fused_matmul(params["conv2"].reshape(4, 200), p2,
                     bn=True, act="leaky", pool=True)        # [4, N*16*16]
    h = h.reshape(4, n, hs, ws)

    # ---- fc1 (decoder-entry leaky fused in) ----
    h_flat_t = jnp.transpose(h, (0, 2, 3, 1)).reshape(4 * hs * ws, n)  # [1024, N]
    z = fused_matmul(params["fc1"], h_flat_t, act="leaky")   # [32, N]

    # ---- decoder ----
    d = z.reshape(Z_DIM, n, 1, 1)
    d = _upsample2_dilate2(d)                                # [32, N, 3, 3]
    pd, (_, ho, wo) = _conv_patches(d, 4, 2)                 # extra pad = k-1-p = 2
    d = fused_matmul(_deconv_weight_mat(params["deconv1"]), pd,
                     bn=True, act="leaky")                   # [4, N*4*4]
    d = d.reshape(4, n, ho, wo)

    d = _upsample2_dilate2(d)                                # [4, N, 15, 15]
    pd, (_, ho, wo) = _conv_patches(d, 4, 2)
    d = fused_matmul(_deconv_weight_mat(params["deconv2"]), pd,
                     bn=True, act="leaky")                   # [8, N*16*16]
    d = d.reshape(8, n, ho, wo)

    d = _upsample2_dilate2(d)                                # [8, N, 63, 63]
    pd, (_, ho, wo) = _conv_patches(d, 4, 2)
    d = fused_matmul(_deconv_weight_mat(params["deconv3"]), pd,
                     act="sigmoid")                          # [1, N*64*64]
    return d.reshape(1, n, ho, wo).transpose(1, 0, 2, 3)     # [N, 1, 64, 64]


if __name__ == "__main__":
    key = jax.random.PRNGKey(0)
    pkey, xkey = jax.random.split(key)
    params = init_params(pkey)
    # fc1 = Linear(4*16*16, z_dim) forces 64x64 spatial input with 1 channel.
    x = jax.random.uniform(xkey, (2, 1, 64, 64), jnp.float32)

    y = jax.jit(forward)(params, x)
    y = jax.block_until_ready(y)

    assert y.shape == (2, 1, 64, 64), y.shape
    assert bool(jnp.all(jnp.isfinite(y)))
    assert bool(jnp.all((y >= 0.0) & (y <= 1.0)))  # sigmoid output range
    print("KERNEL_OK")
</pallas_src>

<mosaic_0001>
module attributes {stable_mosaic.version = 11 : i64} {
  func.func @_fused_matmul_kernel(%arg0: i32, %arg1: memref<8x32xbf16, #tpu.memory_space<vmem>>, %arg2: memref<32x8192xbf16, #tpu.memory_space<vmem>>, %arg3: memref<8x2048xf32, #tpu.memory_space<vmem>>) attributes {dimension_semantics = [#tpu.dimension_semantics<arbitrary>], iteration_bounds = array<i64: 1>, scalar_prefetch = 0 : i64, scratch_operands = 0 : i64, tpu.core_type = #tpu.core_type<tc>, window_params = [{pipeline_mode = #tpu.pipeline_mode<synchronous>, transform_indices = @transform_0, window_bounds = array<i64: 8, 32>}, {pipeline_mode = #tpu.pipeline_mode<synchronous>, transform_indices = @transform_1, window_bounds = array<i64: 32, 8192>}, {pipeline_mode = #tpu.pipeline_mode<synchronous>, transform_indices = @transform_2, window_bounds = array<i64: 8, 2048>}]} {
    %c0 = arith.constant 0 : index
    %c0_0 = arith.constant 0 : index
    %0 = vector.load %arg1[%c0, %c0_0] : memref<8x32xbf16, #tpu.memory_space<vmem>>, vector<8x32xbf16>
    %c0_1 = arith.constant 0 : index
    %c0_2 = arith.constant 0 : index
    %1 = vector.load %arg2[%c0_1, %c0_2] : memref<32x8192xbf16, #tpu.memory_space<vmem>>, vector<32x8192xbf16>
    %cst = arith.constant dense<0.000000e+00> : vector<8x8192xf32>
    %2 = tpu.matmul %0, %1, %cst {dimension_numbers = #tpu.dot_dimension_numbers<[1], [0], [0], [1], [0, 0, 1, 1], [], []>} : vector<8x32xbf16>, vector<32x8192xbf16>, vector<8x8192xf32> -> vector<8x8192xf32>
    %cst_3 = arith.constant dense<0.000000e+00> : vector<8xf32>
    %3 = vector.multi_reduction <add>, %2, %cst_3 [1] : vector<8x8192xf32> to vector<8xf32>
    %4 = vector.shape_cast %3 : vector<8xf32> to vector<8x1xf32>
    %cst_4 = arith.constant 8.192000e+03 : f32
    %5 = vector.broadcast %cst_4 : f32 to vector<8x1xf32>
    %6 = arith.divf %4, %5 : vector<8x1xf32>
    %7 = vector.broadcast %6 : vector<8x1xf32> to vector<8x8192xf32>
    %8 = arith.subf %2, %7 : vector<8x8192xf32>
    %9 = arith.mulf %8, %8 : vector<8x8192xf32>
    %cst_5 = arith.constant dense<0.000000e+00> : vector<8xf32>
    %10 = vector.multi_reduction <add>, %9, %cst_5 [1] : vector<8x8192xf32> to vector<8xf32>
    %11 = vector.shape_cast %10 : vector<8xf32> to vector<8x1xf32>
    %cst_6 = arith.constant 8.192000e+03 : f32
    %12 = vector.broadcast %cst_6 : f32 to vector<8x1xf32>
    %13 = arith.divf %11, %12 : vector<8x1xf32>
    %14 = vector.broadcast %6 : vector<8x1xf32> to vector<8x8192xf32>
    %15 = arith.subf %2, %14 : vector<8x8192xf32>
    %cst_7 = arith.constant 9.99999974E-5 : f32
    %16 = vector.broadcast %cst_7 : f32 to vector<8x1xf32>
    %17 = arith.addf %13, %16 : vector<8x1xf32>
    %18 = math.rsqrt %17 : vector<8x1xf32>
    %19 = vector.broadcast %18 : vector<8x1xf32> to vector<8x8192xf32>
    %20 = arith.mulf %15, %19 : vector<8x8192xf32>
    %cst_8 = arith.constant 0.000000e+00 : f32
    %21 = vector.broadcast %cst_8 : f32 to vector<8x8192xf32>
    %22 = arith.cmpf ogt, %20, %21 : vector<8x8192xf32>
    %cst_9 = arith.constant 0.00999999977 : f32
    %23 = vector.broadcast %cst_9 : f32 to vector<8x8192xf32>
    %24 = arith.mulf %23, %20 : vector<8x8192xf32>
    %25 = arith.select %22, %20, %24 : vector<8x8192xi1>, vector<8x8192xf32>
    %26 = vector.extract_strided_slice %25 {offsets = [0, 0], sizes = [8, 2048], strides = [1, 1]} : vector<8x8192xf32> to vector<8x2048xf32>
    %27 = vector.extract_strided_slice %25 {offsets = [0, 2048], sizes = [8, 2048], strides = [1, 1]} : vector<8x8192xf32> to vector<8x2048xf32>
    %28 = arith.maximumf %26, %27 : vector<8x2048xf32>
    %29 = vector.extract_strided_slice %25 {offsets = [0, 4096], sizes = [8, 2048], strides = [1, 1]} : vector<8x8192xf32> to vector<8x2048xf32>
    %30 = vector.extract_strided_slice %25 {offsets = [0, 6144], sizes = [8, 2048], strides = [1, 1]} : vector<8x8192xf32> to vector<8x2048xf32>
    %31 = arith.maximumf %29, %30 : vector<8x2048xf32>
    %32 = arith.maximumf %28, %31 : vector<8x2048xf32>
    %c0_10 = arith.constant 0 : index
    %c0_11 = arith.constant 0 : index
    %33 = vector.load %arg3[%c0_10, %c0_11] : memref<8x2048xf32, #tpu.memory_space<vmem>>, vector<8x2048xf32>
    tpu.vector_store %arg3[%c0_10, %c0_11], %32 {strides = array<i32>} : memref<8x2048xf32, #tpu.memory_space<vmem>>, vector<8x2048xf32>,
    return
  }
  func.func @transform_0(%arg0: i32) -> (i32, i32) {
    %c0_i32 = arith.constant 0 : i32
    %c0_i32_0 = arith.constant 0 : i32
    %c0_i32_1 = arith.constant 0 : i32
    return %c0_i32, %c0_i32_0 : i32, i32
  }
  func.func @transform_1(%arg0: i32) -> (i32, i32) {
    %c0_i32 = arith.constant 0 : i32
    %c0_i32_0 = arith.constant 0 : i32
    %c0_i32_1 = arith.constant 0 : i32
    return %c0_i32, %c0_i32_0 : i32, i32
  }
  func.func @transform_2(%arg0: i32) -> (i32, i32) {
    %c0_i32 = arith.constant 0 : i32
    %c0_i32_0 = arith.constant 0 : i32
    %c0_i32_1 = arith.constant 0 : i32
    return %c0_i32, %c0_i32_0 : i32, i32
  }
}

module attributes {stable_mosaic.version = 11 : i64} {
  func.func @_fused_matmul_kernel(%arg0: i32, %arg1: memref<4x200xbf16, #tpu.memory_space<vmem>>, %arg2: memref<200x2048xbf16, #tpu.memory_space<vmem>>, %arg3: memref<4x512xf32, #tpu.memory_space<vmem>>) attributes {dimension_semantics = [#tpu.dimension_semantics<arbitrary>], iteration_bounds = array<i64: 1>, scalar_prefetch = 0 : i64, scratch_operands = 0 : i64, tpu.core_type = #tpu.core_type<tc>, window_params = [{pipeline_mode = #tpu.pipeline_mode<synchronous>, transform_indices = @transform_0, window_bounds = array<i64: 4, 200>}, {pipeline_mode = #tpu.pipeline_mode<synchronous>, transform_indices = @transform_1, window_bounds = array<i64: 200, 2048>}, {pipeline_mode = #tpu.pipeline_mode<synchronous>, transform_indices = @transform_2, window_bounds = array<i64: 4, 512>}]} {
    %c0 = arith.constant 0 : index
    %c0_0 = arith.constant 0 : index
    %0 = vector.load %arg1[%c0, %c0_0] : memref<4x200xbf16, #tpu.memory_space<vmem>>, vector<4x200xbf16>
    %c0_1 = arith.constant 0 : index
    %c0_2 = arith.constant 0 : index
    %1 = vector.load %arg2[%c0_1, %c0_2] : memref<200x2048xbf16, #tpu.memory_space<vmem>>, vector<200x2048xbf16>
    %cst = arith.constant dense<0.000000e+00> : vector<4x2048xf32>
    %2 = tpu.matmul %0, %1, %cst {dimension_numbers = #tpu.dot_dimension_numbers<[1], [0], [0], [1], [0, 0, 1, 1], [], []>} : vector<4x200xbf16>, vector<200x2048xbf16>, vector<4x2048xf32> -> vector<4x2048xf32>
    %cst_3 = arith.constant dense<0.000000e+00> : vector<4xf32>
    %3 = vector.multi_reduction <add>, %2, %cst_3 [1] : vector<4x2048xf32> to vector<4xf32>
    %4 = vector.shape_cast %3 : vector<4xf32> to vector<4x1xf32>
    %cst_4 = arith.constant 2.048000e+03 : f32
    %5 = vector.broadcast %cst_4 : f32 to vector<4x1xf32>
    %6 = arith.divf %4, %5 : vector<4x1xf32>
    %7 = vector.broadcast %6 : vector<4x1xf32> to vector<4x2048xf32>
    %8 = arith.subf %2, %7 : vector<4x2048xf32>
    %9 = arith.mulf %8, %8 : vector<4x2048xf32>
    %cst_5 = arith.constant dense<0.000000e+00> : vector<4xf32>
    %10 = vector.multi_reduction <add>, %9, %cst_5 [1] : vector<4x2048xf32> to vector<4xf32>
    %11 = vector.shape_cast %10 : vector<4xf32> to vector<4x1xf32>
    %cst_6 = arith.constant 2.048000e+03 : f32
    %12 = vector.broadcast %cst_6 : f32 to vector<4x1xf32>
    %13 = arith.divf %11, %12 : vector<4x1xf32>
    %14 = vector.broadcast %6 : vector<4x1xf32> to vector<4x2048xf32>
    %15 = arith.subf %2, %14 : vector<4x2048xf32>
    %cst_7 = arith.constant 9.99999974E-5 : f32
    %16 = vector.broadcast %cst_7 : f32 to vector<4x1xf32>
    %17 = arith.addf %13, %16 : vector<4x1xf32>
    %18 = math.rsqrt %17 : vector<4x1xf32>
    %19 = vector.broadcast %18 : vector<4x1xf32> to vector<4x2048xf32>
    %20 = arith.mulf %15, %19 : vector<4x2048xf32>
    %cst_8 = arith.constant 0.000000e+00 : f32
    %21 = vector.broadcast %cst_8 : f32 to vector<4x2048xf32>
    %22 = arith.cmpf ogt, %20, %21 : vector<4x2048xf32>
    %cst_9 = arith.constant 0.00999999977 : f32
    %23 = vector.broadcast %cst_9 : f32 to vector<4x2048xf32>
    %24 = arith.mulf %23, %20 : vector<4x2048xf32>
    %25 = arith.select %22, %20, %24 : vector<4x2048xi1>, vector<4x2048xf32>
    %26 = vector.extract_strided_slice %25 {offsets = [0, 0], sizes = [4, 512], strides = [1, 1]} : vector<4x2048xf32> to vector<4x512xf32>
    %27 = vector.extract_strided_slice %25 {offsets = [0, 512], sizes = [4, 512], strides = [1, 1]} : vector<4x2048xf32> to vector<4x512xf32>
    %28 = arith.maximumf %26, %27 : vector<4x512xf32>
    %29 = vector.extract_strided_slice %25 {offsets = [0, 1024], sizes = [4, 512], strides = [1, 1]} : vector<4x2048xf32> to vector<4x512xf32>
    %30 = vector.extract_strided_slice %25 {offsets = [0, 1536], sizes = [4, 512], strides = [1, 1]} : vector<4x2048xf32> to vector<4x512xf32>
    %31 = arith.maximumf %29, %30 : vector<4x512xf32>
    %32 = arith.maximumf %28, %31 : vector<4x512xf32>
    %c0_10 = arith.constant 0 : index
    %c0_11 = arith.constant 0 : index
    %33 = vector.load %arg3[%c0_10, %c0_11] : memref<4x512xf32, #tpu.memory_space<vmem>>, vector<4x512xf32>
    tpu.vector_store %arg3[%c0_10, %c0_11], %32 {strides = array<i32>} : memref<4x512xf32, #tpu.memory_space<vmem>>, vector<4x512xf32>,
    return
  }
  func.func @transform_0(%arg0: i32) -> (i32, i32) {
    %c0_i32 = arith.constant 0 : i32
    %c0_i32_0 = arith.constant 0 : i32
    %c0_i32_1 = arith.constant 0 : i32
    return %c0_i32, %c0_i32_0 : i32, i32
  }
  func.func @transform_1(%arg0: i32) -> (i32, i32) {
    %c0_i32 = arith.constant 0 : i32
    %c0_i32_0 = arith.constant 0 : i32
    %c0_i32_1 = arith.constant 0 : i32
    return %c0_i32, %c0_i32_0 : i32, i32
  }
  func.func @transform_2(%arg0: i32) -> (i32, i32) {
    %c0_i32 = arith.constant 0 : i32
    %c0_i32_0 = arith.constant 0 : i32
    %c0_i32_1 = arith.constant 0 : i32
    return %c0_i32, %c0_i32_0 : i32, i32
  }
}

module attributes {stable_mosaic.version = 11 : i64} {
  func.func @_fused_matmul_kernel(%arg0: i32, %arg1: memref<32x1024xbf16, #tpu.memory_space<vmem>>, %arg2: memref<1024x2xbf16, #tpu.memory_space<vmem>>, %arg3: memref<32x2xf32, #tpu.memory_space<vmem>>) attributes {dimension_semantics = [#tpu.dimension_semantics<arbitrary>], iteration_bounds = array<i64: 1>, scalar_prefetch = 0 : i64, scratch_operands = 0 : i64, tpu.core_type = #tpu.core_type<tc>, window_params = [{pipeline_mode = #tpu.pipeline_mode<synchronous>, transform_indices = @transform_0, window_bounds = array<i64: 32, 1024>}, {pipeline_mode = #tpu.pipeline_mode<synchronous>, transform_indices = @transform_1, window_bounds = array<i64: 1024, 2>}, {pipeline_mode = #tpu.pipeline_mode<synchronous>, transform_indices = @transform_2, window_bounds = array<i64: 32, 2>}]} {
    %c0 = arith.constant 0 : index
    %c0_0 = arith.constant 0 : index
    %0 = vector.load %arg1[%c0, %c0_0] : memref<32x1024xbf16, #tpu.memory_space<vmem>>, vector<32x1024xbf16>
    %c0_1 = arith.constant 0 : index
    %c0_2 = arith.constant 0 : index
    %1 = vector.load %arg2[%c0_1, %c0_2] : memref<1024x2xbf16, #tpu.memory_space<vmem>>, vector<1024x2xbf16>
    %cst = arith.constant dense<0.000000e+00> : vector<32x2xf32>
    %2 = tpu.matmul %0, %1, %cst {dimension_numbers = #tpu.dot_dimension_numbers<[1], [0], [0], [1], [0, 0, 1, 1], [], []>} : vector<32x1024xbf16>, vector<1024x2xbf16>, vector<32x2xf32> -> vector<32x2xf32>
    %cst_3 = arith.constant 0.000000e+00 : f32
    %3 = vector.broadcast %cst_3 : f32 to vector<32x2xf32>
    %4 = arith.cmpf ogt, %2, %3 : vector<32x2xf32>
    %cst_4 = arith.constant 0.00999999977 : f32
    %5 = vector.broadcast %cst_4 : f32 to vector<32x2xf32>
    %6 = arith.mulf %5, %2 : vector<32x2xf32>
    %7 = arith.select %4, %2, %6 : vector<32x2xi1>, vector<32x2xf32>
    %c0_5 = arith.constant 0 : index
    %c0_6 = arith.constant 0 : index
    %8 = vector.load %arg3[%c0_5, %c0_6] : memref<32x2xf32, #tpu.memory_space<vmem>>, vector<32x2xf32>
    tpu.vector_store %arg3[%c0_5, %c0_6], %7 {strides = array<i32>} : memref<32x2xf32, #tpu.memory_space<vmem>>, vector<32x2xf32>,
    return
  }
  func.func @transform_0(%arg0: i32) -> (i32, i32) {
    %c0_i32 = arith.constant 0 : i32
    %c0_i32_0 = arith.constant 0 : i32
    %c0_i32_1 = arith.constant 0 : i32
    return %c0_i32, %c0_i32_0 : i32, i32
  }
  func.func @transform_1(%arg0: i32) -> (i32, i32) {
    %c0_i32 = arith.constant 0 : i32
    %c0_i32_0 = arith.constant 0 : i32
    %c0_i32_1 = arith.constant 0 : i32
    return %c0_i32, %c0_i32_0 : i32, i32
  }
  func.func @transform_2(%arg0: i32) -> (i32, i32) {
    %c0_i32 = arith.constant 0 : i32
    %c0_i32_0 = arith.constant 0 : i32
    %c0_i32_1 = arith.constant 0 : i32
    return %c0_i32, %c0_i32_0 : i32, i32
  }
}

module attributes {stable_mosaic.version = 11 : i64} {
  func.func @_fused_matmul_kernel(%arg0: i32, %arg1: memref<4x512xbf16, #tpu.memory_space<vmem>>, %arg2: memref<512x32xbf16, #tpu.memory_space<vmem>>, %arg3: memref<4x32xf32, #tpu.memory_space<vmem>>) attributes {dimension_semantics = [#tpu.dimension_semantics<arbitrary>], iteration_bounds = array<i64: 1>, scalar_prefetch = 0 : i64, scratch_operands = 0 : i64, tpu.core_type = #tpu.core_type<tc>, window_params = [{pipeline_mode = #tpu.pipeline_mode<synchronous>, transform_indices = @transform_0, window_bounds = array<i64: 4, 512>}, {pipeline_mode = #tpu.pipeline_mode<synchronous>, transform_indices = @transform_1, window_bounds = array<i64: 512, 32>}, {pipeline_mode = #tpu.pipeline_mode<synchronous>, transform_indices = @transform_2, window_bounds = array<i64: 4, 32>}]} {
    %c0 = arith.constant 0 : index
    %c0_0 = arith.constant 0 : index
    %0 = vector.load %arg1[%c0, %c0_0] : memref<4x512xbf16, #tpu.memory_space<vmem>>, vector<4x512xbf16>
    %c0_1 = arith.constant 0 : index
    %c0_2 = arith.constant 0 : index
    %1 = vector.load %arg2[%c0_1, %c0_2] : memref<512x32xbf16, #tpu.memory_space<vmem>>, vector<512x32xbf16>
    %cst = arith.constant dense<0.000000e+00> : vector<4x32xf32>
    %2 = tpu.matmul %0, %1, %cst {dimension_numbers = #tpu.dot_dimension_numbers<[1], [0], [0], [1], [0, 0, 1, 1], [], []>} : vector<4x512xbf16>, vector<512x32xbf16>, vector<4x32xf32> -> vector<4x32xf32>
    %cst_3 = arith.constant dense<0.000000e+00> : vector<4xf32>
    %3 = vector.multi_reduction <add>, %2, %cst_3 [1] : vector<4x32xf32> to vector<4xf32>
    %4 = vector.shape_cast %3 : vector<4xf32> to vector<4x1xf32>
    %cst_4 = arith.constant 3.200000e+01 : f32
    %5 = vector.broadcast %cst_4 : f32 to vector<4x1xf32>
    %6 = arith.divf %4, %5 : vector<4x1xf32>
    %7 = vector.broadcast %6 : vector<4x1xf32> to vector<4x32xf32>
    %8 = arith.subf %2, %7 : vector<4x32xf32>
    %9 = arith.mulf %8, %8 : vector<4x32xf32>
    %cst_5 = arith.constant dense<0.000000e+00> : vector<4xf32>
    %10 = vector.multi_reduction <add>, %9, %cst_5 [1] : vector<4x32xf32> to vector<4xf32>
    %11 = vector.shape_cast %10 : vector<4xf32> to vector<4x1xf32>
    %cst_6 = arith.constant 3.200000e+01 : f32
    %12 = vector.broadcast %cst_6 : f32 to vector<4x1xf32>
    %13 = arith.divf %11, %12 : vector<4x1xf32>
    %14 = vector.broadcast %6 : vector<4x1xf32> to vector<4x32xf32>
    %15 = arith.subf %2, %14 : vector<4x32xf32>
    %cst_7 = arith.constant 9.99999974E-5 : f32
    %16 = vector.broadcast %cst_7 : f32 to vector<4x1xf32>
    %17 = arith.addf %13, %16 : vector<4x1xf32>
    %18 = math.rsqrt %17 : vector<4x1xf32>
    %19 = vector.broadcast %18 : vector<4x1xf32> to vector<4x32xf32>
    %20 = arith.mulf %15, %19 : vector<4x32xf32>
    %cst_8 = arith.constant 0.000000e+00 : f32
    %21 = vector.broadcast %cst_8 : f32 to vector<4x32xf32>
    %22 = arith.cmpf ogt, %20, %21 : vector<4x32xf32>
    %cst_9 = arith.constant 0.00999999977 : f32
    %23 = vector.broadcast %cst_9 : f32 to vector<4x32xf32>
    %24 = arith.mulf %23, %20 : vector<4x32xf32>
    %25 = arith.select %22, %20, %24 : vector<4x32xi1>, vector<4x32xf32>
    %c0_10 = arith.constant 0 : index
    %c0_11 = arith.constant 0 : index
    %26 = vector.load %arg3[%c0_10, %c0_11] : memref<4x32xf32, #tpu.memory_space<vmem>>, vector<4x32xf32>
    tpu.vector_store %arg3[%c0_10, %c0_11], %25 {strides = array<i32>} : memref<4x32xf32, #tpu.memory_space<vmem>>, vector<4x32xf32>,
    return
  }
  func.func @transform_0(%arg0: i32) -> (i32, i32) {
    %c0_i32 = arith.constant 0 : i32
    %c0_i32_0 = arith.constant 0 : i32
    %c0_i32_1 = arith.constant 0 : i32
    return %c0_i32, %c0_i32_0 : i32, i32
  }
  func.func @transform_1(%arg0: i32) -> (i32, i32) {
    %c0_i32 = arith.constant 0 : i32
    %c0_i32_0 = arith.constant 0 : i32
    %c0_i32_1 = arith.constant 0 : i32
    return %c0_i32, %c0_i32_0 : i32, i32
  }
  func.func @transform_2(%arg0: i32) -> (i32, i32) {
    %c0_i32 = arith.constant 0 : i32
    %c0_i32_0 = arith.constant 0 : i32
    %c0_i32_1 = arith.constant 0 : i32
    return %c0_i32, %c0_i32_0 : i32, i32
  }
}

module attributes {stable_mosaic.version = 11 : i64} {
  func.func @_fused_matmul_kernel(%arg0: i32, %arg1: memref<8x64xbf16, #tpu.memory_space<vmem>>, %arg2: memref<64x512xbf16, #tpu.memory_space<vmem>>, %arg3: memref<8x512xf32, #tpu.memory_space<vmem>>) attributes {dimension_semantics = [#tpu.dimension_semantics<arbitrary>], iteration_bounds = array<i64: 1>, scalar_prefetch = 0 : i64, scratch_operands = 0 : i64, tpu.core_type = #tpu.core_type<tc>, window_params = [{pipeline_mode = #tpu.pipeline_mode<synchronous>, transform_indices = @transform_0, window_bounds = array<i64: 8, 64>}, {pipeline_mode = #tpu.pipeline_mode<synchronous>, transform_indices = @transform_1, window_bounds = array<i64: 64, 512>}, {pipeline_mode = #tpu.pipeline_mode<synchronous>, transform_indices = @transform_2, window_bounds = array<i64: 8, 512>}]} {
    %c0 = arith.constant 0 : index
    %c0_0 = arith.constant 0 : index
    %0 = vector.load %arg1[%c0, %c0_0] : memref<8x64xbf16, #tpu.memory_space<vmem>>, vector<8x64xbf16>
    %c0_1 = arith.constant 0 : index
    %c0_2 = arith.constant 0 : index
    %1 = vector.load %arg2[%c0_1, %c0_2] : memref<64x512xbf16, #tpu.memory_space<vmem>>, vector<64x512xbf16>
    %cst = arith.constant dense<0.000000e+00> : vector<8x512xf32>
    %2 = tpu.matmul %0, %1, %cst {dimension_numbers = #tpu.dot_dimension_numbers<[1], [0], [0], [1], [0, 0, 1, 1], [], []>} : vector<8x64xbf16>, vector<64x512xbf16>, vector<8x512xf32> -> vector<8x512xf32>
    %cst_3 = arith.constant dense<0.000000e+00> : vector<8xf32>
    %3 = vector.multi_reduction <add>, %2, %cst_3 [1] : vector<8x512xf32> to vector<8xf32>
    %4 = vector.shape_cast %3 : vector<8xf32> to vector<8x1xf32>
    %cst_4 = arith.constant 5.120000e+02 : f32
    %5 = vector.broadcast %cst_4 : f32 to vector<8x1xf32>
    %6 = arith.divf %4, %5 : vector<8x1xf32>
    %7 = vector.broadcast %6 : vector<8x1xf32> to vector<8x512xf32>
    %8 = arith.subf %2, %7 : vector<8x512xf32>
    %9 = arith.mulf %8, %8 : vector<8x512xf32>
    %cst_5 = arith.constant dense<0.000000e+00> : vector<8xf32>
    %10 = vector.multi_reduction <add>, %9, %cst_5 [1] : vector<8x512xf32> to vector<8xf32>
    %11 = vector.shape_cast %10 : vector<8xf32> to vector<8x1xf32>
    %cst_6 = arith.constant 5.120000e+02 : f32
    %12 = vector.broadcast %cst_6 : f32 to vector<8x1xf32>
    %13 = arith.divf %11, %12 : vector<8x1xf32>
    %14 = vector.broadcast %6 : vector<8x1xf32> to vector<8x512xf32>
    %15 = arith.subf %2, %14 : vector<8x512xf32>
    %cst_7 = arith.constant 9.99999974E-5 : f32
    %16 = vector.broadcast %cst_7 : f32 to vector<8x1xf32>
    %17 = arith.addf %13, %16 : vector<8x1xf32>
    %18 = math.rsqrt %17 : vector<8x1xf32>
    %19 = vector.broadcast %18 : vector<8x1xf32> to vector<8x512xf32>
    %20 = arith.mulf %15, %19 : vector<8x512xf32>
    %cst_8 = arith.constant 0.000000e+00 : f32
    %21 = vector.broadcast %cst_8 : f32 to vector<8x512xf32>
    %22 = arith.cmpf ogt, %20, %21 : vector<8x512xf32>
    %cst_9 = arith.constant 0.00999999977 : f32
    %23 = vector.broadcast %cst_9 : f32 to vector<8x512xf32>
    %24 = arith.mulf %23, %20 : vector<8x512xf32>
    %25 = arith.select %22, %20, %24 : vector<8x512xi1>, vector<8x512xf32>
    %c0_10 = arith.constant 0 : index
    %c0_11 = arith.constant 0 : index
    %26 = vector.load %arg3[%c0_10, %c0_11] : memref<8x512xf32, #tpu.memory_space<vmem>>, vector<8x512xf32>
    tpu.vector_store %arg3[%c0_10, %c0_11], %25 {strides = array<i32>} : memref<8x512xf32, #tpu.memory_space<vmem>>, vector<8x512xf32>,
    return
  }
  func.func @transform_0(%arg0: i32) -> (i32, i32) {
    %c0_i32 = arith.constant 0 : i32
    %c0_i32_0 = arith.constant 0 : i32
    %c0_i32_1 = arith.constant 0 : i32
    return %c0_i32, %c0_i32_0 : i32, i32
  }
  func.func @transform_1(%arg0: i32) -> (i32, i32) {
    %c0_i32 = arith.constant 0 : i32
    %c0_i32_0 = arith.constant 0 : i32
    %c0_i32_1 = arith.constant 0 : i32
    return %c0_i32, %c0_i32_0 : i32, i32
  }
  func.func @transform_2(%arg0: i32) -> (i32, i32) {
    %c0_i32 = arith.constant 0 : i32
    %c0_i32_0 = arith.constant 0 : i32
    %c0_i32_1 = arith.constant 0 : i32
    return %c0_i32, %c0_i32_0 : i32, i32
  }
}

module attributes {stable_mosaic.version = 11 : i64} {
  func.func @_fused_matmul_kernel(%arg0: i32, %arg1: memref<1x128xbf16, #tpu.memory_space<vmem>>, %arg2: memref<128x8192xbf16, #tpu.memory_space<vmem>>, %arg3: memref<1x8192xf32, #tpu.memory_space<vmem>>) attributes {dimension_semantics = [#tpu.dimension_semantics<arbitrary>], iteration_bounds = array<i64: 1>, scalar_prefetch = 0 : i64, scratch_operands = 0 : i64, tpu.core_type = #tpu.core_type<tc>, window_params = [{pipeline_mode = #tpu.pipeline_mode<synchronous>, transform_indices = @transform_0, window_bounds = array<i64: 1, 128>}, {pipeline_mode = #tpu.pipeline_mode<synchronous>, transform_indices = @transform_1, window_bounds = array<i64: 128, 8192>}, {pipeline_mode = #tpu.pipeline_mode<synchronous>, transform_indices = @transform_2, window_bounds = array<i64: 1, 8192>}]} {
    %c0 = arith.constant 0 : index
    %c0_0 = arith.constant 0 : index
    %0 = vector.load %arg1[%c0, %c0_0] : memref<1x128xbf16, #tpu.memory_space<vmem>>, vector<1x128xbf16>
    %c0_1 = arith.constant 0 : index
    %c0_2 = arith.constant 0 : index
    %1 = vector.load %arg2[%c0_1, %c0_2] : memref<128x8192xbf16, #tpu.memory_space<vmem>>, vector<128x8192xbf16>
    %cst = arith.constant dense<0.000000e+00> : vector<1x8192xf32>
    %2 = tpu.matmul %0, %1, %cst {dimension_numbers = #tpu.dot_dimension_numbers<[1], [0], [0], [1], [0, 0, 1, 1], [], []>} : vector<1x128xbf16>, vector<128x8192xbf16>, vector<1x8192xf32> -> vector<1x8192xf32>
    %3 = arith.negf %2 : vector<1x8192xf32>
    %4 = math.exp %3 : vector<1x8192xf32>
    %cst_3 = arith.constant 1.000000e+00 : f32
    %5 = vector.broadcast %cst_3 : f32 to vector<1x8192xf32>
    %6 = arith.addf %5, %4 : vector<1x8192xf32>
    %7 = arith.divf %5, %6 : vector<1x8192xf32>
    %c0_4 = arith.constant 0 : index
    %c0_5 = arith.constant 0 : index
    %8 = vector.load %arg3[%c0_4, %c0_5] : memref<1x8192xf32, #tpu.memory_space<vmem>>, vector<1x8192xf32>
    tpu.vector_store %arg3[%c0_4, %c0_5], %7 {strides = array<i32>} : memref<1x8192xf32, #tpu.memory_space<vmem>>, vector<1x8192xf32>,
    return
  }
  func.func @transform_0(%arg0: i32) -> (i32, i32) {
    %c0_i32 = arith.constant 0 : i32
    %c0_i32_0 = arith.constant 0 : i32
    %c0_i32_1 = arith.constant 0 : i32
    return %c0_i32, %c0_i32_0 : i32, i32
  }
  func.func @transform_1(%arg0: i32) -> (i32, i32) {
    %c0_i32 = arith.constant 0 : i32
    %c0_i32_0 = arith.constant 0 : i32
    %c0_i32_1 = arith.constant 0 : i32
    return %c0_i32, %c0_i32_0 : i32, i32
  }
  func.func @transform_2(%arg0: i32) -> (i32, i32) {
    %c0_i32 = arith.constant 0 : i32
    %c0_i32_0 = arith.constant 0 : i32
    %c0_i32_1 = arith.constant 0 : i32
    return %c0_i32, %c0_i32_0 : i32, i32
  }
}

</mosaic_0001>

<bundles_post_ra>
// kernel: forward.6
= control target key start
LH: loop header
LB: loop body
LE: loop exit
PB: predicated region body
PF: predicated region fallthrough
CT: control target
= control target key end

     0   :  { %v2847_v3 = vmov 0   ;;  %vm781_vm0 = vcmask 261120   ;;  %s4777_s1 = inlined_call_operand.vmem [shape: bf16[32,8192], index: 1, kind: input, shape index: {}]   ;;  %s4778_s0 = inlined_call_operand.vmem [shape: bf16[8,32], index: 0, kind: input, shape index: {}]   ;;  %s4779_s2 = inlined_call_operand.vmem [shape: f32[8,2048], index: 2, kind: output, shape index: {}]  }
   0x1   :  { %v13_v0 = vld [vmem:[%s4777_s1] sm:$0xff]  ;;  %v14_v2 = vld [vmem:[%s4777_s1 + $0x8] sm:$0xff]  ;;  %817 = vmatprep.mubr.bf16.mxu0 %v2847_v3  ;;  %858 = vmatprep.mubr.bf16.mxu1 %v2847_v3  ;;  %v15_v15 = vld [vmem:[%s4777_s1 + $0x10] sm:$0xff] }
   0x2   :  { %v45_v1 = vld [vmem:[%s4777_s1 + $0x100] sm:$0xff]  ;;  %v46_v6 = vld [vmem:[%s4777_s1 + $0x108] sm:$0xff]  ;;  %v47_v16 = vld [vmem:[%s4777_s1 + $0x110] sm:$0xff] }
   0x3   :  { %v2685_v4 = vcombine.high %v13_v0, %v45_v1  ;;  %v2684_v5 = vcombine.low %v13_v0, %v45_v1  ;;  %v77_v7 = vld [vmem:[%s4777_s1 + $0x200] sm:$0xff]  ;;  %v2687_v9 = vcombine.high %v14_v2, %v46_v6  ;;  %v2686_v10 = vcombine.low %v14_v2, %v46_v6  ;;  %v78_v12 = vld [vmem:[%s4777_s1 + $0x208] sm:$0xff]  ;;  %v16_v17 = vld [vmem:[%s4777_s1 + $0x18] sm:$0xff] }
   0x4   :  { %v109_v8 = vld [vmem:[%s4777_s1 + $0x300] sm:$0xff]  ;;  %v110_v13 = vld [vmem:[%s4777_s1 + $0x308] sm:$0xff]  ;;  %v48_v19 = vld [vmem:[%s4777_s1 + $0x118] sm:$0xff]  ;;  %v2689_v21 = vcombine.high %v15_v15, %v47_v16  ;;  %v2688_v28 = vcombine.low %v15_v15, %v47_v16 }
   0x5   :  { %v2749_v11 = vcombine.high %v77_v7, %v109_v8  ;;  %785 = vmatprep.subr.bf16.mxu0 %v2685_v4  ;;  %v2751_v14 = vcombine.high %v78_v12, %v110_v13  ;;  %826 = vmatprep.subr.bf16.mxu1 %v2687_v9  ;;  %v2748_v18 = vcombine.low %v77_v7, %v109_v8  ;;  %v79_v23 = vld [vmem:[%s4777_s1 + $0x210] sm:$0xff]  ;;  %v80_v25 = vld [vmem:[%s4777_s1 + $0x218] sm:$0xff]  ;;  %v2916_v27 = vld [vmem:[%s4778_s0] sm:$0xf] }
   0x6   :  { %786 = vmatpush1.bf16.msra.mxu0 %v2684_v5  ;;  %827 = vmatpush1.bf16.msra.mxu1 %v2686_v10  ;;  %v2750_v20 = vcombine.low %v78_v12, %v110_v13  ;;  %v2691_v22 = vcombine.high %v16_v17, %v48_v19  ;;  %v111_v24 = vld [vmem:[%s4777_s1 + $0x310] sm:$0xff]  ;;  %v112_v26 = vld [vmem:[%s4777_s1 + $0x318] sm:$0xff]  ;;  %v2690_v29 = vcombine.low %v16_v17, %v48_v19  ;;  %v17_v32 = vld [vmem:[%s4777_s1 + $0x20] sm:$0xff] }
   0x7   :  { %787 = vmatprep.subr.bf16.mxu0 %v2749_v11  ;;  %828 = vmatprep.subr.bf16.mxu1 %v2751_v14  ;;  %v2753_v30 = vcombine.high %v79_v23, %v111_v24  ;;  %v2755_v31 = vcombine.high %v80_v25, %v112_v26  ;;  %v49_v33 = vld [vmem:[%s4777_s1 + $0x120] sm:$0xff]  ;;  %v18_v34 = vld [vmem:[%s4777_s1 + $0x28] sm:$0xff]  ;;  %v2752_v36 = vcombine.low %v79_v23, %v111_v24  ;;  %v19_v48 = vld [vmem:[%s4777_s1 + $0x30] sm:$0xff] }
   0x8   :  { %v50_v35 = vld [vmem:[%s4777_s1 + $0x128] sm:$0xff]  ;;  %v2754_v37 = vcombine.low %v80_v25, %v112_v26  ;;  %v2693_v38 = vcombine.high %v17_v32, %v49_v33  ;;  %v81_v40 = vld [vmem:[%s4777_s1 + $0x220] sm:$0xff]  ;;  %v2692_v44 = vcombine.low %v17_v32, %v49_v33  ;;  %v51_v49 = vld [vmem:[%s4777_s1 + $0x130] sm:$0xff] }
   0x9   :  { %v2695_v39 = vcombine.high %v18_v34, %v50_v35  ;;  %v113_v41 = vld [vmem:[%s4777_s1 + $0x320] sm:$0xff]  ;;  %v82_v42 = vld [vmem:[%s4777_s1 + $0x228] sm:$0xff]  ;;  %v2694_v45 = vcombine.low %v18_v34, %v50_v35  ;;  %v20_v50 = vld [vmem:[%s4777_s1 + $0x38] sm:$0xff]  ;;  %v2697_v54 = vcombine.high %v19_v48, %v51_v49  ;;  %v2696_v60 = vcombine.low %v19_v48, %v51_v49 }
   0xa   :  { %788 = vmatpush1.bf16.msra.mxu0 %v2748_v18  ;;  %829 = vmatpush1.bf16.msra.mxu1 %v2750_v20  ;;  %v114_v43 = vld [vmem:[%s4777_s1 + $0x328] sm:$0xff]  ;;  %v2757_v46 = vcombine.high %v81_v40, %v113_v41  ;;  %v52_v51 = vld [vmem:[%s4777_s1 + $0x138] sm:$0xff]  ;;  %v2756_v52 = vcombine.low %v81_v40, %v113_v41  ;;  %v83_v56 = vld [vmem:[%s4777_s1 + $0x230] sm:$0xff] }
   0xb   :  { %867 = vmatprep.subr.bf16.mxu0 %v2689_v21  ;;  %908 = vmatprep.subr.bf16.mxu1 %v2691_v22  ;;  %v2759_v47 = vcombine.high %v82_v42, %v114_v43  ;;  %v2758_v53 = vcombine.low %v82_v42, %v114_v43  ;;  %v2699_v55 = vcombine.high %v20_v50, %v52_v51  ;;  %v115_v57 = vld [vmem:[%s4777_s1 + $0x330] sm:$0xff]  ;;  %v84_v58 = vld [vmem:[%s4777_s1 + $0x238] sm:$0xff]  ;;  %v21_v0 = vld [vmem:[%s4777_s1 + $0x40] sm:$0xff] }
   0xc   :  { %v116_v59 = vld [vmem:[%s4777_s1 + $0x338] sm:$0xff]  ;;  %v2698_v61 = vcombine.low %v20_v50, %v52_v51  ;;  %v2761_v62 = vcombine.high %v83_v56, %v115_v57  ;;  %v53_v1 = vld [vmem:[%s4777_s1 + $0x140] sm:$0xff]  ;;  %v22_v2 = vld [vmem:[%s4777_s1 + $0x48] sm:$0xff]  ;;  %v2760_v5 = vcombine.low %v83_v56, %v115_v57 }
   0xd   :  { %2812 = vmatmul.mubr.msk.bf16.vlgmr.msra.gmra.mrb[0].mxu0 %vm781_vm0, %v2916_v27  ;;  %2813 = vmatmul.mubr.msk.bf16.vlgmr.msra.gmra.mrb[0].mxu1 %vm781_vm0, %v2916_v27  ;;  %v2763_v63 = vcombine.high %v84_v58, %v116_v59  ;;  %v54_v4 = vld [vmem:[%s4777_s1 + $0x148] sm:$0xff]  ;;  %v2762_v6 = vcombine.low %v84_v58, %v116_v59  ;;  %v2701_v7 = vcombine.high %v21_v0, %v53_v1  ;;  %v85_v9 = vld [vmem:[%s4777_s1 + $0x240] sm:$0xff]  ;;  %v23_v17 = vld [vmem:[%s4777_s1 + $0x50] sm:$0xff] }
   0xe   :  { %868 = vmatpush1.bf16.msra.mxu0 %v2688_v28  ;;  %909 = vmatpush1.bf16.msra.mxu1 %v2690_v29  ;;  %v2703_v8 = vcombine.high %v22_v2, %v54_v4  ;;  %v117_v10 = vld [vmem:[%s4777_s1 + $0x340] sm:$0xff]  ;;  %v86_v11 = vld [vmem:[%s4777_s1 + $0x248] sm:$0xff]  ;;  %v2700_v13 = vcombine.low %v21_v0, %v53_v1  ;;  %v2702_v14 = vcombine.low %v22_v2, %v54_v4  ;;  %v55_v18 = vld [vmem:[%s4777_s1 + $0x150] sm:$0xff] }
   0xf   :  { %869 = vmatprep.subr.bf16.mxu0 %v2753_v30  ;;  %910 = vmatprep.subr.bf16.mxu1 %v2755_v31  ;;  %v118_v12 = vld [vmem:[%s4777_s1 + $0x348] sm:$0xff]  ;;  %v2765_v15 = vcombine.high %v85_v9, %v117_v10  ;;  %v24_v19 = vld [vmem:[%s4777_s1 + $0x58] sm:$0xff]  ;;  %v2764_v21 = vcombine.low %v85_v9, %v117_v10  ;;  %v2705_v23 = vcombine.high %v23_v17, %v55_v18  ;;  %v87_v25 = vld [vmem:[%s4777_s1 + $0x250] sm:$0xff] }
  0x10   :  { %899 = vmatprep.mubr.bf16.mxu0 %v2847_v3  ;;  %940 = vmatprep.mubr.bf16.mxu1 %v2847_v3  ;;  %v2767_v16 = vcombine.high %v86_v11, %v118_v12  ;;  %v56_v20 = vld [vmem:[%s4777_s1 + $0x158] sm:$0xff]  ;;  %v2766_v22 = vcombine.low %v86_v11, %v118_v12  ;;  %v119_v26 = vld [vmem:[%s4777_s1 + $0x350] sm:$0xff]  ;;  %v2704_v30 = vcombine.low %v23_v17, %v55_v18  ;;  %v25_v34 = vld [vmem:[%s4777_s1 + $0x60] sm:$0xff] }
  0x11   :  { %v2707_v24 = vcombine.high %v24_v19, %v56_v20  ;;  %v88_v28 = vld [vmem:[%s4777_s1 + $0x258] sm:$0xff]  ;;  %v2706_v31 = vcombine.low %v24_v19, %v56_v20  ;;  %v2769_v32 = vcombine.high %v87_v25, %v119_v26  ;;  %v57_v35 = vld [vmem:[%s4777_s1 + $0x160] sm:$0xff]  ;;  %v27_v50 = vld [vmem:[%s4777_s1 + $0x70] sm:$0xff] }
  0x12   :  { %870 = vmatpush1.bf16.msra.mxu0 %v2752_v36  ;;  %911 = vmatpush1.bf16.msra.mxu1 %v2754_v37  ;;  %v120_v29 = vld [vmem:[%s4777_s1 + $0x358] sm:$0xff]  ;;  %v26_v36 = vld [vmem:[%s4777_s1 + $0x68] sm:$0xff]  ;;  %v2709_v40 = vcombine.high %v25_v34, %v57_v35  ;;  %v89_v42 = vld [vmem:[%s4777_s1 + $0x260] sm:$0xff] }
  0x13   :  { %949 = vmatprep.subr.bf16.mxu0 %v2693_v38  ;;  %990 = vmatprep.subr.bf16.mxu1 %v2695_v39  ;;  %v2771_v33 = vcombine.high %v88_v28, %v120_v29  ;;  %v58_v37 = vld [vmem:[%s4777_s1 + $0x168] sm:$0xff]  ;;  %v2768_v38 = vcombine.low %v87_v25, %v119_v26  ;;  %v2770_v39 = vcombine.low %v88_v28, %v120_v29  ;;  %v121_v43 = vld [vmem:[%s4777_s1 + $0x360] sm:$0xff]  ;;  %v59_v51 = vld [vmem:[%s4777_s1 + $0x170] sm:$0xff] }
  0x14   :  { %v2711_v41 = vcombine.high %v26_v36, %v58_v37  ;;  %v2773_v48 = vcombine.high %v89_v42, %v121_v43  ;;  %v2713_v56 = vcombine.high %v27_v50, %v59_v51  ;;  %v91_v58 = vld [vmem:[%s4777_s1 + $0x270] sm:$0xff]  ;;  %v29_v2 = vld [vmem:[%s4777_s1 + $0x80] sm:$0xff] }
  0x15   :  { %2814 = vmatmul.mubr.msk.bf16.vlgmr.msra.gmra.mrb[4].mxu0 %vm781_vm0, %v2916_v27  ;;  %2815 = vmatmul.mubr.msk.bf16.vlgmr.msra.gmra.mrb[4].mxu1 %vm781_vm0, %v2916_v27  ;;  %v123_v59 = vld [vmem:[%s4777_s1 + $0x370] sm:$0xff]  ;;  %v61_v4 = vld [vmem:[%s4777_s1 + $0x180] sm:$0xff] }
  0x16   :  { %950 = vmatpush1.bf16.msra.mxu0 %v2692_v44  ;;  %991 = vmatpush1.bf16.msra.mxu1 %v2694_v45  ;;  %v90_v44 = vld [vmem:[%s4777_s1 + $0x268] sm:$0xff]  ;;  %v2777_v0 = vcombine.high %v91_v58, %v123_v59  ;;  %v2717_v9 = vcombine.high %v29_v2, %v61_v4  ;;  %v93_v11 = vld [vmem:[%s4777_s1 + $0x280] sm:$0xff]  ;;  %v31_v19 = vld [vmem:[%s4777_s1 + $0x90] sm:$0xff] }
  0x17   :  { %951 = vmatprep.subr.bf16.mxu0 %v2757_v46  ;;  %992 = vmatprep.subr.bf16.mxu1 %v2759_v47  ;;  %v122_v45 = vld [vmem:[%s4777_s1 + $0x368] sm:$0xff]  ;;  %v2708_v46 = vcombine.low %v25_v34, %v57_v35  ;;  %v2710_v47 = vcombine.low %v26_v36, %v58_v37  ;;  %v125_v12 = vld [vmem:[%s4777_s1 + $0x380] sm:$0xff]  ;;  %v63_v20 = vld [vmem:[%s4777_s1 + $0x190] sm:$0xff] }
  0x18   :  { %981 = vmatprep.mubr.bf16.mxu0 %v2847_v3  ;;  %1022 = vmatprep.mubr.bf16.mxu1 %v2847_v3  ;;  %v2775_v49 = vcombine.high %v90_v44, %v122_v45  ;;  %v2781_v17 = vcombine.high %v93_v11, %v125_v12  ;;  %v2721_v25 = vcombine.high %v31_v19, %v63_v20  ;;  %v95_v28 = vld [vmem:[%s4777_s1 + $0x290] sm:$0xff]  ;;  %v33_v36 = vld [vmem:[%s4777_s1 + $0xa0] sm:$0xff] }
  0x19   :  { %v127_v29 = vld [vmem:[%s4777_s1 + $0x390] sm:$0xff]  ;;  %v65_v37 = vld [vmem:[%s4777_s1 + $0x1a0] sm:$0xff] }
  0x1a   :  { %952 = vmatpush1.bf16.msra.mxu0 %v2756_v52  ;;  %993 = vmatpush1.bf16.msra.mxu1 %v2758_v53  ;;  %v28_v52 = vld [vmem:[%s4777_s1 + $0x78] sm:$0xff]  ;;  %v2785_v34 = vcombine.high %v95_v28, %v127_v29 }
  0x1b   :  { %1031 = vmatprep.subr.bf16.mxu0 %v2697_v54  ;;  %1072 = vmatprep.subr.bf16.mxu1 %v2699_v55  ;;  %v60_v53 = vld [vmem:[%s4777_s1 + $0x178] sm:$0xff]  ;;  %v2772_v54 = vcombine.low %v89_v42, %v121_v43  ;;  %v2774_v55 = vcombine.low %v90_v44, %v122_v45  ;;  %v2725_v42 = vcombine.high %v33_v36, %v65_v37  ;;  %v97_v44 = vld [vmem:[%s4777_s1 + $0x2a0] sm:$0xff] }
  0x1c   :  { %v2715_v57 = vcombine.high %v28_v52, %v60_v53  ;;  %v129_v45 = vld [vmem:[%s4777_s1 + $0x3a0] sm:$0xff] }
  0x1d   :  { %2816 = vmatmul.mubr.msk.bf16.vlgmr.msra.gmra.mrb[8].mxu0 %vm781_vm0, %v2916_v27  ;;  %2817 = vmatmul.mubr.msk.bf16.vlgmr.msra.gmra.mrb[8].mxu1 %vm781_vm0, %v2916_v27 }
  0x1e   :  { %1032 = vmatpush1.bf16.msra.mxu0 %v2696_v60  ;;  %1073 = vmatpush1.bf16.msra.mxu1 %v2698_v61  ;;  %v92_v60 = vld [vmem:[%s4777_s1 + $0x278] sm:$0xff] }
  0x1f   :  { %1033 = vmatprep.subr.bf16.mxu0 %v2761_v62  ;;  %1074 = vmatprep.subr.bf16.mxu1 %v2763_v63  ;;  %v124_v61 = vld [vmem:[%s4777_s1 + $0x378] sm:$0xff]  ;;  %v2712_v62 = vcombine.low %v27_v50, %v59_v51  ;;  %v2714_v63 = vcombine.low %v28_v52, %v60_v53  ;;  %v2789_v50 = vcombine.high %v97_v44, %v129_v45  ;;  %v35_v52 = vld [vmem:[%s4777_s1 + $0xb0] sm:$0xff] }
  0x20   :  { %1063 = vmatprep.mubr.bf16.mxu0 %v2847_v3  ;;  %1104 = vmatprep.mubr.bf16.mxu1 %v2847_v3  ;;  %v2779_v1 = vcombine.high %v92_v60, %v124_v61  ;;  %v67_v53 = vld [vmem:[%s4777_s1 + $0x1b0] sm:$0xff] }
  0x22   :  { %1034 = vmatpush1.bf16.msra.mxu0 %v2760_v5  ;;  %1075 = vmatpush1.bf16.msra.mxu1 %v2762_v6  ;;  %v30_v5 = vld [vmem:[%s4777_s1 + $0x88] sm:$0xff] }
  0x23   :  { %1113 = vmatprep.subr.bf16.mxu0 %v2701_v7  ;;  %1154 = vmatprep.subr.bf16.mxu1 %v2703_v8  ;;  %v62_v6 = vld [vmem:[%s4777_s1 + $0x188] sm:$0xff]  ;;  %v2776_v7 = vcombine.low %v91_v58, %v123_v59  ;;  %v2778_v8 = vcombine.low %v92_v60, %v124_v61  ;;  %v2729_v58 = vcombine.high %v35_v52, %v67_v53  ;;  %v99_v60 = vld [vmem:[%s4777_s1 + $0x2b0] sm:$0xff] }
  0x24   :  { %v2719_v10 = vcombine.high %v30_v5, %v62_v6  ;;  %v131_v61 = vld [vmem:[%s4777_s1 + $0x3b0] sm:$0xff] }
  0x25   :  { %2818 = vmatmul.mubr.msk.bf16.vlgmr.msra.gmra.mrb[12].mxu0 %vm781_vm0, %v2916_v27  ;;  %2819 = vmatmul.mubr.msk.bf16.vlgmr.msra.gmra.mrb[12].mxu1 %vm781_vm0, %v2916_v27 }
  0x26   :  { %1114 = vmatpush1.bf16.msra.mxu0 %v2700_v13  ;;  %1155 = vmatpush1.bf16.msra.mxu1 %v2702_v14  ;;  %v94_v13 = vld [vmem:[%s4777_s1 + $0x288] sm:$0xff] }
  0x27   :  { %1115 = vmatprep.subr.bf16.mxu0 %v2765_v15  ;;  %1156 = vmatprep.subr.bf16.mxu1 %v2767_v16  ;;  %v126_v14 = vld [vmem:[%s4777_s1 + $0x388] sm:$0xff]  ;;  %v2716_v15 = vcombine.low %v29_v2, %v61_v4  ;;  %v2718_v16 = vcombine.low %v30_v5, %v62_v6  ;;  %v2793_v2 = vcombine.high %v99_v60, %v131_v61  ;;  %v37_v5 = vld [vmem:[%s4777_s1 + $0xc0] sm:$0xff] }
  0x28   :  { %1145 = vmatprep.mubr.bf16.mxu0 %v2847_v3  ;;  %1186 = vmatprep.mubr.bf16.mxu1 %v2847_v3  ;;  %v2783_v18 = vcombine.high %v94_v13, %v126_v14  ;;  %v69_v6 = vld [vmem:[%s4777_s1 + $0x1c0] sm:$0xff] }
  0x2a   :  { %1116 = vmatpush1.bf16.msra.mxu0 %v2764_v21  ;;  %1157 = vmatpush1.bf16.msra.mxu1 %v2766_v22  ;;  %v32_v21 = vld [vmem:[%s4777_s1 + $0x98] sm:$0xff] }
  0x2b   :  { %1195 = vmatprep.subr.bf16.mxu0 %v2705_v23  ;;  %1236 = vmatprep.subr.bf16.mxu1 %v2707_v24  ;;  %v64_v22 = vld [vmem:[%s4777_s1 + $0x198] sm:$0xff]  ;;  %v2780_v23 = vcombine.low %v93_v11, %v125_v12  ;;  %v2782_v24 = vcombine.low %v94_v13, %v126_v14  ;;  %v2733_v11 = vcombine.high %v37_v5, %v69_v6  ;;  %v101_v13 = vld [vmem:[%s4777_s1 + $0x2c0] sm:$0xff] }
  0x2c   :  { %v2723_v26 = vcombine.high %v32_v21, %v64_v22  ;;  %v133_v14 = vld [vmem:[%s4777_s1 + $0x3c0] sm:$0xff] }
  0x2d   :  { %2820 = vmatmul.mubr.msk.bf16.vlgmr.msra.gmra.mrb[16].mxu0 %vm781_vm0, %v2916_v27  ;;  %2821 = vmatmul.mubr.msk.bf16.vlgmr.msra.gmra.mrb[16].mxu1 %vm781_vm0, %v2916_v27 }
  0x2e   :  { %1196 = vmatpush1.bf16.msra.mxu0 %v2704_v30  ;;  %1237 = vmatpush1.bf16.msra.mxu1 %v2706_v31  ;;  %v96_v30 = vld [vmem:[%s4777_s1 + $0x298] sm:$0xff] }
  0x2f   :  { %1197 = vmatprep.subr.bf16.mxu0 %v2769_v32  ;;  %1238 = vmatprep.subr.bf16.mxu1 %v2771_v33  ;;  %v128_v31 = vld [vmem:[%s4777_s1 + $0x398] sm:$0xff]  ;;  %v2720_v32 = vcombine.low %v31_v19, %v63_v20  ;;  %v2722_v33 = vcombine.low %v32_v21, %v64_v22  ;;  %v2797_v19 = vcombine.high %v101_v13, %v133_v14  ;;  %v39_v21 = vld [vmem:[%s4777_s1 + $0xd0] sm:$0xff] }
  0x30   :  { %1227 = vmatprep.mubr.bf16.mxu0 %v2847_v3  ;;  %1268 = vmatprep.mubr.bf16.mxu1 %v2847_v3  ;;  %v2787_v35 = vcombine.high %v96_v30, %v128_v31  ;;  %v71_v22 = vld [vmem:[%s4777_s1 + $0x1d0] sm:$0xff] }
  0x32   :  { %1198 = vmatpush1.bf16.msra.mxu0 %v2768_v38  ;;  %1239 = vmatpush1.bf16.msra.mxu1 %v2770_v39  ;;  %v34_v38 = vld [vmem:[%s4777_s1 + $0xa8] sm:$0xff] }
  0x33   :  { %1277 = vmatprep.subr.bf16.mxu0 %v2709_v40  ;;  %1318 = vmatprep.subr.bf16.mxu1 %v2711_v41  ;;  %v66_v39 = vld [vmem:[%s4777_s1 + $0x1a8] sm:$0xff]  ;;  %v2784_v40 = vcombine.low %v95_v28, %v127_v29  ;;  %v2786_v41 = vcombine.low %v96_v30, %v128_v31  ;;  %v2737_v28 = vcombine.high %v39_v21, %v71_v22  ;;  %v103_v30 = vld [vmem:[%s4777_s1 + $0x2d0] sm:$0xff] }
  0x34   :  { %v2727_v43 = vcombine.high %v34_v38, %v66_v39  ;;  %v135_v31 = vld [vmem:[%s4777_s1 + $0x3d0] sm:$0xff] }
  0x35   :  { %2822 = vmatmul.mubr.msk.bf16.vlgmr.msra.gmra.mrb[20].mxu0 %vm781_vm0, %v2916_v27  ;;  %2823 = vmatmul.mubr.msk.bf16.vlgmr.msra.gmra.mrb[20].mxu1 %vm781_vm0, %v2916_v27 }
  0x36   :  { %1278 = vmatpush1.bf16.msra.mxu0 %v2708_v46  ;;  %1319 = vmatpush1.bf16.msra.mxu1 %v2710_v47  ;;  %v98_v46 = vld [vmem:[%s4777_s1 + $0x2a8] sm:$0xff] }
  0x37   :  { %1279 = vmatprep.subr.bf16.mxu0 %v2773_v48  ;;  %1320 = vmatprep.subr.bf16.mxu1 %v2775_v49  ;;  %v130_v47 = vld [vmem:[%s4777_s1 + $0x3a8] sm:$0xff]  ;;  %v2724_v48 = vcombine.low %v33_v36, %v65_v37  ;;  %v2726_v49 = vcombine.low %v34_v38, %v66_v39  ;;  %v2801_v36 = vcombine.high %v103_v30, %v135_v31  ;;  %v41_v38 = vld [vmem:[%s4777_s1 + $0xe0] sm:$0xff] }
  0x38   :  { %1309 = vmatprep.mubr.bf16.mxu0 %v2847_v3  ;;  %1350 = vmatprep.mubr.bf16.mxu1 %v2847_v3  ;;  %v2791_v51 = vcombine.high %v98_v46, %v130_v47  ;;  %v73_v39 = vld [vmem:[%s4777_s1 + $0x1e0] sm:$0xff] }
  0x3a   :  { %1280 = vmatpush1.bf16.msra.mxu0 %v2772_v54  ;;  %1321 = vmatpush1.bf16.msra.mxu1 %v2774_v55  ;;  %v36_v54 = vld [vmem:[%s4777_s1 + $0xb8] sm:$0xff] }
  0x3b   :  { %1359 = vmatprep.subr.bf16.mxu0 %v2713_v56  ;;  %1400 = vmatprep.subr.bf16.mxu1 %v2715_v57  ;;  %v68_v55 = vld [vmem:[%s4777_s1 + $0x1b8] sm:$0xff]  ;;  %v2788_v56 = vcombine.low %v97_v44, %v129_v45  ;;  %v2790_v57 = vcombine.low %v98_v46, %v130_v47  ;;  %v2741_v44 = vcombine.high %v41_v38, %v73_v39  ;;  %v105_v46 = vld [vmem:[%s4777_s1 + $0x2e0] sm:$0xff] }
  0x3c   :  { %v2731_v59 = vcombine.high %v36_v54, %v68_v55  ;;  %v137_v47 = vld [vmem:[%s4777_s1 + $0x3e0] sm:$0xff] }
  0x3d   :  { %2824 = vmatmul.mubr.msk.bf16.vlgmr.msra.gmra.mrb[24].mxu0 %vm781_vm0, %v2916_v27  ;;  %2825 = vmatmul.mubr.msk.bf16.vlgmr.msra.gmra.mrb[24].mxu1 %vm781_vm0, %v2916_v27 }
  0x3e   :  { %1360 = vmatpush1.bf16.msra.mxu0 %v2712_v62  ;;  %1401 = vmatpush1.bf16.msra.mxu1 %v2714_v63  ;;  %v100_v62 = vld [vmem:[%s4777_s1 + $0x2b8] sm:$0xff] }
  0x3f   :  { %1361 = vmatprep.subr.bf16.mxu0 %v2777_v0  ;;  %1402 = vmatprep.subr.bf16.mxu1 %v2779_v1  ;;  %v132_v63 = vld [vmem:[%s4777_s1 + $0x3b8] sm:$0xff]  ;;  %v2728_v0 = vcombine.low %v35_v52, %v67_v53  ;;  %v2730_v1 = vcombine.low %v36_v54, %v68_v55  ;;  %v2805_v52 = vcombine.high %v105_v46, %v137_v47  ;;  %v43_v54 = vld [vmem:[%s4777_s1 + $0xf0] sm:$0xff] }
  0x40   :  { %1391 = vmatprep.mubr.bf16.mxu0 %v2847_v3  ;;  %1432 = vmatprep.mubr.bf16.mxu1 %v2847_v3  ;;  %v2795_v4 = vcombine.high %v100_v62, %v132_v63  ;;  %v75_v55 = vld [vmem:[%s4777_s1 + $0x1f0] sm:$0xff] }
  0x42   :  { %1362 = vmatpush1.bf16.msra.mxu0 %v2776_v7  ;;  %1403 = vmatpush1.bf16.msra.mxu1 %v2778_v8  ;;  %v38_v7 = vld [vmem:[%s4777_s1 + $0xc8] sm:$0xff] }
  0x43   :  { %1441 = vmatprep.subr.bf16.mxu0 %v2717_v9  ;;  %1482 = vmatprep.subr.bf16.mxu1 %v2719_v10  ;;  %v70_v8 = vld [vmem:[%s4777_s1 + $0x1c8] sm:$0xff]  ;;  %v2792_v9 = vcombine.low %v99_v60, %v131_v61  ;;  %v2794_v10 = vcombine.low %v100_v62, %v132_v63  ;;  %v2745_v60 = vcombine.high %v43_v54, %v75_v55  ;;  %v107_v62 = vld [vmem:[%s4777_s1 + $0x2f0] sm:$0xff] }
  0x44   :  { %v2735_v12 = vcombine.high %v38_v7, %v70_v8  ;;  %v139_v63 = vld [vmem:[%s4777_s1 + $0x3f0] sm:$0xff] }
  0x45   :  { %2826 = vmatmul.mubr.msk.bf16.vlgmr.msra.gmra.mrb[28].mxu0 %vm781_vm0, %v2916_v27  ;;  %2827 = vmatmul.mubr.msk.bf16.vlgmr.msra.gmra.mrb[28].mxu1 %vm781_vm0, %v2916_v27 }
  0x46   :  { %1442 = vmatpush1.bf16.msra.mxu0 %v2716_v15  ;;  %1483 = vmatpush1.bf16.msra.mxu1 %v2718_v16  ;;  %v102_v15 = vld [vmem:[%s4777_s1 + $0x2c8] sm:$0xff] }
  0x47   :  { %1443 = vmatprep.subr.bf16.mxu0 %v2781_v17  ;;  %1484 = vmatprep.subr.bf16.mxu1 %v2783_v18  ;;  %v134_v16 = vld [vmem:[%s4777_s1 + $0x3c8] sm:$0xff]  ;;  %v2732_v17 = vcombine.low %v37_v5, %v69_v6  ;;  %v2734_v18 = vcombine.low %v38_v7, %v70_v8  ;;  %v2809_v5 = vcombine.high %v107_v62, %v139_v63 }
  0x48   :  { %1473 = vmatprep.mubr.bf16.mxu0 %v2847_v3  ;;  %1514 = vmatprep.mubr.bf16.mxu1 %v2847_v3  ;;  %v2799_v20 = vcombine.high %v102_v15, %v134_v16  ;;  %v2808_v7 = vcombine.low %v107_v62, %v139_v63 }
  0x4a   :  { %1444 = vmatpush1.bf16.msra.mxu0 %v2780_v23  ;;  %1485 = vmatpush1.bf16.msra.mxu1 %v2782_v24  ;;  %v40_v23 = vld [vmem:[%s4777_s1 + $0xd8] sm:$0xff] }
  0x4b   :  { %1523 = vmatprep.subr.bf16.mxu0 %v2721_v25  ;;  %1564 = vmatprep.subr.bf16.mxu1 %v2723_v26  ;;  %v72_v24 = vld [vmem:[%s4777_s1 + $0x1d8] sm:$0xff]  ;;  %v2796_v25 = vcombine.low %v101_v13, %v133_v14  ;;  %v2798_v26 = vcombine.low %v102_v15, %v134_v16 }
  0x4c   :  { %v2739_v29 = vcombine.high %v40_v23, %v72_v24 }
  0x4d   :  { %2828 = vmatmul.mubr.msk.bf16.vlgmr.msra.gmra.mrb[32].mxu0 %vm781_vm0, %v2916_v27  ;;  %2829 = vmatmul.mubr.msk.bf16.vlgmr.msra.gmra.mrb[32].mxu1 %vm781_vm0, %v2916_v27 }
  0x4e   :  { %1524 = vmatpush1.bf16.msra.mxu0 %v2720_v32  ;;  %1565 = vmatpush1.bf16.msra.mxu1 %v2722_v33  ;;  %v104_v32 = vld [vmem:[%s4777_s1 + $0x2d8] sm:$0xff] }
  0x4f   :  { %1525 = vmatprep.subr.bf16.mxu0 %v2785_v34  ;;  %1566 = vmatprep.subr.bf16.mxu1 %v2787_v35  ;;  %v136_v33 = vld [vmem:[%s4777_s1 + $0x3d8] sm:$0xff]  ;;  %v2736_v34 = vcombine.low %v39_v21, %v71_v22  ;;  %v2738_v35 = vcombine.low %v40_v23, %v72_v24 }
  0x50   :  { %1555 = vmatprep.mubr.bf16.mxu0 %v2847_v3  ;;  %1596 = vmatprep.mubr.bf16.mxu1 %v2847_v3  ;;  %v2803_v37 = vcombine.high %v104_v32, %v136_v33 }
  0x52   :  { %1526 = vmatpush1.bf16.msra.mxu0 %v2784_v40  ;;  %1567 = vmatpush1.bf16.msra.mxu1 %v2786_v41  ;;  %v42_v40 = vld [vmem:[%s4777_s1 + $0xe8] sm:$0xff] }
  0x53   :  { %1605 = vmatprep.subr.bf16.mxu0 %v2725_v42  ;;  %1646 = vmatprep.subr.bf16.mxu1 %v2727_v43  ;;  %v74_v41 = vld [vmem:[%s4777_s1 + $0x1e8] sm:$0xff]  ;;  %v2800_v42 = vcombine.low %v103_v30, %v135_v31  ;;  %v2802_v43 = vcombine.low %v104_v32, %v136_v33 }
  0x54   :  { %v2743_v45 = vcombine.high %v42_v40, %v74_v41 }
  0x55   :  { %2830 = vmatmul.mubr.msk.bf16.vlgmr.msra.gmra.mrb[36].mxu0 %vm781_vm0, %v2916_v27  ;;  %2831 = vmatmul.mubr.msk.bf16.vlgmr.msra.gmra.mrb[36].mxu1 %vm781_vm0, %v2916_v27 }
  0x56   :  { %1606 = vmatpush1.bf16.msra.mxu0 %v2724_v48  ;;  %1647 = vmatpush1.bf16.msra.mxu1 %v2726_v49  ;;  %v106_v48 = vld [vmem:[%s4777_s1 + $0x2e8] sm:$0xff] }
  0x57   :  { %1607 = vmatprep.subr.bf16.mxu0 %v2789_v50  ;;  %1648 = vmatprep.subr.bf16.mxu1 %v2791_v51  ;;  %v138_v49 = vld [vmem:[%s4777_s1 + $0x3e8] sm:$0xff]  ;;  %v2740_v50 = vcombine.low %v41_v38, %v73_v39  ;;  %v2742_v51 = vcombine.low %v42_v40, %v74_v41 }
  0x58   :  { %1637 = vmatprep.mubr.bf16.mxu0 %v2847_v3  ;;  %1678 = vmatprep.mubr.bf16.mxu1 %v2847_v3  ;;  %v2807_v53 = vcombine.high %v106_v48, %v138_v49 }
  0x5a   :  { %1608 = vmatpush1.bf16.msra.mxu0 %v2788_v56  ;;  %1649 = vmatpush1.bf16.msra.mxu1 %v2790_v57  ;;  %v44_v56 = vld [vmem:[%s4777_s1 + $0xf8] sm:$0xff] }
  0x5b   :  { %1687 = vmatprep.subr.bf16.mxu0 %v2729_v58  ;;  %1728 = vmatprep.subr.bf16.mxu1 %v2731_v59  ;;  %v76_v57 = vld [vmem:[%s4777_s1 + $0x1f8] sm:$0xff]  ;;  %v2804_v58 = vcombine.low %v105_v46, %v137_v47  ;;  %v2806_v59 = vcombine.low %v106_v48, %v138_v49 }
  0x5c   :  { %v2747_v61 = vcombine.high %v44_v56, %v76_v57 }
  0x5d   :  { %2832 = vmatmul.mubr.msk.bf16.vlgmr.msra.gmra.mrb[40].mxu0 %vm781_vm0, %v2916_v27  ;;  %2833 = vmatmul.mubr.msk.bf16.vlgmr.msra.gmra.mrb[40].mxu1 %vm781_vm0, %v2916_v27 }
  0x5e   :  { %1688 = vmatpush1.bf16.msra.mxu0 %v2728_v0  ;;  %1729 = vmatpush1.bf16.msra.mxu1 %v2730_v1  ;;  %v108_v0 = vld [vmem:[%s4777_s1 + $0x2f8] sm:$0xff] }
  0x5f   :  { %1689 = vmatprep.subr.bf16.mxu0 %v2793_v2  ;;  %1730 = vmatprep.subr.bf16.mxu1 %v2795_v4  ;;  %v140_v1 = vld [vmem:[%s4777_s1 + $0x3f8] sm:$0xff]  ;;  %v2744_v2 = vcombine.low %v43_v54, %v75_v55  ;;  %v2746_v4 = vcombine.low %v44_v56, %v76_v57 }
  0x60   :  { %1719 = vmatprep.mubr.bf16.mxu0 %v2847_v3  ;;  %1760 = vmatprep.mubr.bf16.mxu1 %v2847_v3  ;;  %v2811_v6 = vcombine.high %v108_v0, %v140_v1  ;;  %v2810_v8 = vcombine.low %v108_v0, %v140_v1 }
  0x62   :  { %1690 = vmatpush1.bf16.msra.mxu0 %v2792_v9  ;;  %1731 = vmatpush1.bf16.msra.mxu1 %v2794_v10 }
  0x63   :  { %1769 = vmatprep.subr.bf16.mxu0 %v2733_v11  ;;  %1810 = vmatprep.subr.bf16.mxu1 %v2735_v12 }
  0x65   :  { %2834 = vmatmul.mubr.msk.bf16.vlgmr.msra.gmra.mrb[44].mxu0 %vm781_vm0, %v2916_v27  ;;  %2835 = vmatmul.mubr.msk.bf16.vlgmr.msra.gmra.mrb[44].mxu1 %vm781_vm0, %v2916_v27 }
  0x66   :  { %1770 = vmatpush1.bf16.msra.mxu0 %v2732_v17  ;;  %1811 = vmatpush1.bf16.msra.mxu1 %v2734_v18 }
  0x67   :  { %1771 = vmatprep.subr.bf16.mxu0 %v2797_v19  ;;  %1812 = vmatprep.subr.bf16.mxu1 %v2799_v20 }
  0x68   :  { %1801 = vmatprep.mubr.bf16.mxu0 %v2847_v3  ;;  %1842 = vmatprep.mubr.bf16.mxu1 %v2847_v3 }
  0x6a   :  { %1772 = vmatpush1.bf16.msra.mxu0 %v2796_v25  ;;  %1813 = vmatpush1.bf16.msra.mxu1 %v2798_v26 }
  0x6b   :  { %1851 = vmatprep.subr.bf16.mxu0 %v2737_v28  ;;  %1892 = vmatprep.subr.bf16.mxu1 %v2739_v29 }
  0x6d   :  { %2836 = vmatmul.mubr.msk.bf16.vlgmr.msra.gmra.mrb[48].mxu0 %vm781_vm0, %v2916_v27  ;;  %2837 = vmatmul.mubr.msk.bf16.vlgmr.msra.gmra.mrb[48].mxu1 %vm781_vm0, %v2916_v27 }
  0x6e   :  { %1852 = vmatpush1.bf16.msra.mxu0 %v2736_v34  ;;  %1893 = vmatpush1.bf16.msra.mxu1 %v2738_v35 }
  0x6f   :  { %1853 = vmatprep.subr.bf16.mxu0 %v2801_v36  ;;  %1894 = vmatprep.subr.bf16.mxu1 %v2803_v37 }
  0x70   :  { %1883 = vmatprep.mubr.bf16.mxu0 %v2847_v3  ;;  %1924 = vmatprep.mubr.bf16.mxu1 %v2847_v3 }
  0x72   :  { %1854 = vmatpush1.bf16.msra.mxu0 %v2800_v42  ;;  %1895 = vmatpush1.bf16.msra.mxu1 %v2802_v43 }
  0x73   :  { %1933 = vmatprep.subr.bf16.mxu0 %v2741_v44  ;;  %1974 = vmatprep.subr.bf16.mxu1 %v2743_v45 }
  0x75   :  { %2838 = vmatmul.mubr.msk.bf16.vlgmr.msra.gmra.mrb[52].mxu0 %vm781_vm0, %v2916_v27  ;;  %2839 = vmatmul.mubr.msk.bf16.vlgmr.msra.gmra.mrb[52].mxu1 %vm781_vm0, %v2916_v27 }
  0x76   :  { %1934 = vmatpush1.bf16.msra.mxu0 %v2740_v50  ;;  %1975 = vmatpush1.bf16.msra.mxu1 %v2742_v51 }
  0x77   :  { %1935 = vmatprep.subr.bf16.mxu0 %v2805_v52  ;;  %1976 = vmatprep.subr.bf16.mxu1 %v2807_v53 }
  0x78   :  { %1965 = vmatprep.mubr.bf16.mxu0 %v2847_v3  ;;  %2006 = vmatprep.mubr.bf16.mxu1 %v2847_v3 }
  0x7a   :  { %1936 = vmatpush1.bf16.msra.mxu0 %v2804_v58  ;;  %1977 = vmatpush1.bf16.msra.mxu1 %v2806_v59 }
  0x7b   :  { %2015 = vmatprep.subr.bf16.mxu0 %v2745_v60  ;;  %2056 = vmatprep.subr.bf16.mxu1 %v2747_v61 }
  0x7d   :  { %2840 = vmatmul.mubr.msk.bf16.vlgmr.msra.gmra.mrb[56].mxu0 %vm781_vm0, %v2916_v27  ;;  %2841 = vmatmul.mubr.msk.bf16.vlgmr.msra.gmra.mrb[56].mxu1 %vm781_vm0, %v2916_v27 }
  0x7e   :  { %2016 = vmatpush1.bf16.msra.mxu0 %v2744_v2  ;;  %2057 = vmatpush1.bf16.msra.mxu1 %v2746_v4 }
  0x7f   :  { %2017 = vmatprep.subr.bf16.mxu0 %v2809_v5  ;;  %2058 = vmatprep.subr.bf16.mxu1 %v2811_v6 }
  0x80   :  { %2047 = vmatprep.mubr.bf16.mxu0 %v2847_v3  ;;  %2088 = vmatprep.mubr.bf16.mxu1 %v2847_v3 }
  0x82   :  { %2018 = vmatpush1.bf16.msra.mxu0 %v2808_v7  ;;  %2059 = vmatpush1.bf16.msra.mxu1 %v2810_v8 }
  0x85   :  { %2842 = vmatmul.mubr.msk.bf16.vlgmr.msra.gmra.mrb[60].mxu0 %vm781_vm0, %v2916_v27  ;;  %2843 = vmatmul.mubr.msk.bf16.vlgmr.msra.gmra.mrb[60].mxu1 %vm781_vm0, %v2916_v27 }
  0xe0   :  { %v3348_v9 = vpop.f32.mrb[0].mxu0  ;;  %v3352_v11 = vpop.f32.mrb[0].mxu1 }
  0xe1   :  { %v3350_v10 = vpop.f32.mrb[1].mxu0  ;;  %v3356_v14 = vpop.f32.mrb[1].mxu1 }
  0xe2   :  { %v2097_v12 = vadd.f32 %v3350_v10, %v3348_v9  ;;  %v823_v13 = vpop.f32.mrb[2].mxu0  ;;  %v864_v15 = vpop.f32.mrb[2].mxu1 }
  0xe3   :  { %v824_v3 = vpop.f32.mrb[3].mxu0  ;;  %v865_v17 = vpop.f32.mrb[3].mxu1 }
  0xe4   :  { %v2098_v16 = vadd.f32 %v2097_v12, %v3352_v11 }
  0xe6   :  { %v2099_v18 = vadd.f32 %v2098_v16, %v3356_v14 }
  0xe8   :  { %v3360_v27 = vpop.f32.mrb[4].mxu0  ;;  %v3365_v21 = vpop.f32.mrb[4].mxu1 }
  0xe9   :  { %v2100_v19 = vadd.f32 %v2099_v18, %v3360_v27  ;;  %v3363_v20 = vpop.f32.mrb[5].mxu0  ;;  %v3367_v23 = vpop.f32.mrb[5].mxu1 }
  0xea   :  { %v905_v22 = vpop.f32.mrb[6].mxu0  ;;  %v946_v26 = vpop.f32.mrb[6].mxu1 }
  0xeb   :  { %v2101_v24 = vadd.f32 %v2100_v19, %v3363_v20  ;;  %v906_v25 = vpop.f32.mrb[7].mxu0  ;;  %v947_v28 = vpop.f32.mrb[7].mxu1 }
  0xed   :  { %v2102_v29 = vadd.f32 %v2101_v24, %v3365_v21 }
  0xef   :  { %v2103_v30 = vadd.f32 %v2102_v29, %v3367_v23 }
  0xf0   :  { %v3372_v31 = vpop.f32.mrb[8].mxu0  ;;  %v3377_v34 = vpop.f32.mrb[8].mxu1 }
  0xf1   :  { %v2104_v32 = vadd.f32 %v2103_v30, %v3372_v31  ;;  %v3375_v33 = vpop.f32.mrb[9].mxu0  ;;  %v3379_v36 = vpop.f32.mrb[9].mxu1 }
  0xf2   :  { %v987_v35 = vpop.f32.mrb[10].mxu0  ;;  %v1028_v39 = vpop.f32.mrb[10].mxu1 }
  0xf3   :  { %v2105_v37 = vadd.f32 %v2104_v32, %v3375_v33  ;;  %v988_v38 = vpop.f32.mrb[11].mxu0  ;;  %v1029_v40 = vpop.f32.mrb[11].mxu1 }
  0xf5   :  { %v2106_v41 = vadd.f32 %v2105_v37, %v3377_v34 }
  0xf7   :  { %v2107_v42 = vadd.f32 %v2106_v41, %v3379_v36 }
  0xf8   :  { %v3384_v43 = vpop.f32.mrb[12].mxu0  ;;  %v3389_v46 = vpop.f32.mrb[12].mxu1 }
  0xf9   :  { %v2108_v44 = vadd.f32 %v2107_v42, %v3384_v43  ;;  %v3387_v45 = vpop.f32.mrb[13].mxu0  ;;  %v3391_v48 = vpop.f32.mrb[13].mxu1 }
  0xfa   :  { %v1069_v47 = vpop.f32.mrb[14].mxu0  ;;  %v1110_v51 = vpop.f32.mrb[14].mxu1 }
  0xfb   :  { %v2109_v49 = vadd.f32 %v2108_v44, %v3387_v45  ;;  %v1070_v50 = vpop.f32.mrb[15].mxu0  ;;  %v1111_v52 = vpop.f32.mrb[15].mxu1 }
  0xfd   :  { %v2110_v53 = vadd.f32 %v2109_v49, %v3389_v46 }
  0xff   :  { %v2111_v54 = vadd.f32 %v2110_v53, %v3391_v48 }
 0x100   :  { %v3396_v55 = vpop.f32.mrb[16].mxu0  ;;  %v3401_v58 = vpop.f32.mrb[16].mxu1 }
 0x101   :  { %v2112_v56 = vadd.f32 %v2111_v54, %v3396_v55  ;;  %v3399_v57 = vpop.f32.mrb[17].mxu0  ;;  %4851 = vst [vmem:[#allocation3_spill] sm:$0xff] %v3401_v58  ;;  %v3403_v60 = vpop.f32.mrb[17].mxu1 }
 0x102   :  { %4850 = vst [vmem:[#allocation2_spill] sm:$0xff] %v3399_v57  ;;  %v1151_v59 = vpop.f32.mrb[18].mxu0  ;;  %4852 = vst [vmem:[#allocation4_spill] sm:$0xff] %v3403_v60  ;;  %v1192_v63 = vpop.f32.mrb[18].mxu1 }
 0x103   :  { %v2113_v61 = vadd.f32 %v2112_v56, %v3399_v57  ;;  %v1152_v62 = vpop.f32.mrb[19].mxu0  ;;  %v1193_v0 = vpop.f32.mrb[19].mxu1 }
 0x105   :  { %v2114_v1 = vadd.f32 %v2113_v61, %v3401_v58 }
 0x107   :  { %v2115_v2 = vadd.f32 %v2114_v1, %v3403_v60 }
 0x108   :  { %v3408_v4 = vpop.f32.mrb[20].mxu0  ;;  %v3413_v7 = vpop.f32.mrb[20].mxu1 }
 0x109   :  { %4853 = vst [vmem:[#allocation5_spill] sm:$0xff] %v3408_v4  ;;  %v2116_v5 = vadd.f32 %v2115_v2, %v3408_v4  ;;  %v3411_v6 = vpop.f32.mrb[21].mxu0  ;;  %4855 = vst [vmem:[#allocation7_spill] sm:$0xff] %v3413_v7  ;;  %v3415_v12 = vpop.f32.mrb[21].mxu1 }
 0x10a   :  { %4854 = vst [vmem:[#allocation6_spill] sm:$0xff] %v3411_v6  ;;  %v1233_v8 = vpop.f32.mrb[22].mxu0  ;;  %4856 = vst [vmem:[#allocation8_spill] sm:$0xff] %v3415_v12  ;;  %v1274_v15 = vpop.f32.mrb[22].mxu1 }
 0x10b   :  { %v2117_v13 = vadd.f32 %v2116_v5, %v3411_v6  ;;  %v1234_v3 = vpop.f32.mrb[23].mxu0  ;;  %v1275_v16 = vpop.f32.mrb[23].mxu1 }
 0x10d   :  { %v2118_v17 = vadd.f32 %v2117_v13, %v3413_v7 }
 0x10f   :  { %v2119_v18 = vadd.f32 %v2118_v17, %v3415_v12 }
 0x110   :  { %v3420_v19 = vpop.f32.mrb[24].mxu0  ;;  %v3425_v25 = vpop.f32.mrb[24].mxu1 }
 0x111   :  { %4857 = vst [vmem:[#allocation9_spill] sm:$0xff] %v3420_v19  ;;  %v2120_v22 = vadd.f32 %v2119_v18, %v3420_v19  ;;  %v3423_v24 = vpop.f32.mrb[25].mxu0  ;;  %4859 = vst [vmem:[#allocation11_spill] sm:$0xff] %v3425_v25  ;;  %v3427_v28 = vpop.f32.mrb[25].mxu1 }
 0x112   :  { %4858 = vst [vmem:[#allocation10_spill] sm:$0xff] %v3423_v24  ;;  %v1315_v26 = vpop.f32.mrb[26].mxu0  ;;  %4860 = vst [vmem:[#allocation12_spill] sm:$0xff] %v3427_v28  ;;  %v1356_v32 = vpop.f32.mrb[26].mxu1 }
 0x113   :  { %v2121_v29 = vadd.f32 %v2120_v22, %v3423_v24  ;;  %v1316_v30 = vpop.f32.mrb[27].mxu0  ;;  %v1357_v35 = vpop.f32.mrb[27].mxu1 }
 0x115   :  { %v2122_v37 = vadd.f32 %v2121_v29, %v3425_v25 }
 0x117   :  { %v2123_v38 = vadd.f32 %v2122_v37, %v3427_v28 }
 0x118   :  { %v3432_v39 = vpop.f32.mrb[28].mxu0  ;;  %v3437_v42 = vpop.f32.mrb[28].mxu1 }
 0x119   :  { %4861 = vst [vmem:[#allocation13_spill] sm:$0xff] %v3432_v39  ;;  %v2124_v40 = vadd.f32 %v2123_v38, %v3432_v39  ;;  %v3435_v41 = vpop.f32.mrb[29].mxu0  ;;  %4863 = vst [vmem:[#allocation15_spill] sm:$0xff] %v3437_v42  ;;  %v3439_v47 = vpop.f32.mrb[29].mxu1 }
 0x11a   :  { %4862 = vst [vmem:[#allocation14_spill] sm:$0xff] %v3435_v41  ;;  %v1397_v44 = vpop.f32.mrb[30].mxu0  ;;  %4864 = vst [vmem:[#allocation16_spill] sm:$0xff] %v3439_v47  ;;  %v1438_v51 = vpop.f32.mrb[30].mxu1 }
 0x11b   :  { %v2125_v49 = vadd.f32 %v2124_v40, %v3435_v41  ;;  %v1398_v50 = vpop.f32.mrb[31].mxu0  ;;  %v1439_v52 = vpop.f32.mrb[31].mxu1 }
 0x11d   :  { %v2126_v53 = vadd.f32 %v2125_v49, %v3437_v42 }
 0x11f   :  { %v2127_v54 = vadd.f32 %v2126_v53, %v3439_v47 }
 0x120   :  { %v3444_v56 = vpop.f32.mrb[32].mxu0  ;;  %v3449_v62 = vpop.f32.mrb[32].mxu1 }
 0x121   :  { %4865 = vst [vmem:[#allocation17_spill] sm:$0xff] %v3444_v56  ;;  %v2128_v59 = vadd.f32 %v2127_v54, %v3444_v56  ;;  %v3447_v61 = vpop.f32.mrb[33].mxu0  ;;  %v3451_v0 = vpop.f32.mrb[33].mxu1 }
 0x122   :  { %v1479_v63 = vpop.f32.mrb[34].mxu0  ;;  %v1520_v5 = vpop.f32.mrb[34].mxu1 }
 0x123   :  { %v2129_v1 = vadd.f32 %v2128_v59, %v3447_v61  ;;  %v1480_v2 = vpop.f32.mrb[35].mxu0  ;;  %v1521_v8 = vpop.f32.mrb[35].mxu1 }
 0x125   :  { %v2130_v13 = vadd.f32 %v2129_v1, %v3449_v62 }
 0x127   :  { %v2131_v3 = vadd.f32 %v2130_v13, %v3451_v0 }
 0x128   :  { %v3456_v15 = vpop.f32.mrb[36].mxu0  ;;  %v3461_v18 = vpop.f32.mrb[36].mxu1 }
 0x129   :  { %v2132_v16 = vadd.f32 %v2131_v3, %v3456_v15  ;;  %v3459_v17 = vpop.f32.mrb[37].mxu0  ;;  %v3463_v26 = vpop.f32.mrb[37].mxu1 }
 0x12a   :  { %v1561_v22 = vpop.f32.mrb[38].mxu0  ;;  %v1602_v32 = vpop.f32.mrb[38].mxu1 }
 0x12b   :  { %v2133_v29 = vadd.f32 %v2132_v16, %v3459_v17  ;;  %v1562_v30 = vpop.f32.mrb[39].mxu0  ;;  %v1603_v35 = vpop.f32.mrb[39].mxu1 }
 0x12d   :  { %v2134_v37 = vadd.f32 %v2133_v29, %v3461_v18 }
 0x12f   :  { %v2135_v38 = vadd.f32 %v2134_v37, %v3463_v26 }
 0x130   :  { %v3468_v40 = vpop.f32.mrb[40].mxu0  ;;  %v3473_v50 = vpop.f32.mrb[40].mxu1 }
 0x131   :  { %v2136_v44 = vadd.f32 %v2135_v38, %v3468_v40  ;;  %v3471_v49 = vpop.f32.mrb[41].mxu0  ;;  %v3475_v52 = vpop.f32.mrb[41].mxu1 }
 0x132   :  { %v1643_v51 = vpop.f32.mrb[42].mxu0  ;;  %v1684_v59 = vpop.f32.mrb[42].mxu1 }
 0x133   :  { %v2137_v53 = vadd.f32 %v2136_v44, %v3471_v49  ;;  %v1644_v54 = vpop.f32.mrb[43].mxu0  ;;  %v1685_v63 = vpop.f32.mrb[43].mxu1 }
 0x135   :  { %v2138_v1 = vadd.f32 %v2137_v53, %v3473_v50 }
 0x137   :  { %v2139_v2 = vadd.f32 %v2138_v1, %v3475_v52 }
 0x138   :  { %v3480_v5 = vpop.f32.mrb[44].mxu0  ;;  %v3485_v3 = vpop.f32.mrb[44].mxu1 }
 0x139   :  { %v2140_v8 = vadd.f32 %v2139_v2, %v3480_v5  ;;  %v3483_v13 = vpop.f32.mrb[45].mxu0  ;;  %v3487_v22 = vpop.f32.mrb[45].mxu1 }
 0x13a   :  { %v1725_v16 = vpop.f32.mrb[46].mxu0  ;;  %v1766_v32 = vpop.f32.mrb[46].mxu1 }
 0x13b   :  { %v2141_v29 = vadd.f32 %v2140_v8, %v3483_v13  ;;  %v1726_v30 = vpop.f32.mrb[47].mxu0  ;;  %v1767_v35 = vpop.f32.mrb[47].mxu1 }
 0x13d   :  { %v2142_v37 = vadd.f32 %v2141_v29, %v3485_v3 }
 0x13f   :  { %v2143_v38 = vadd.f32 %v2142_v37, %v3487_v22 }
 0x140   :  { %v3492_v44 = vpop.f32.mrb[48].mxu0  ;;  %v3497_v54 = vpop.f32.mrb[48].mxu1 }
 0x141   :  { %v2144_v51 = vadd.f32 %v2143_v38, %v3492_v44  ;;  %v3495_v53 = vpop.f32.mrb[49].mxu0  ;;  %v3499_v63 = vpop.f32.mrb[49].mxu1 }
 0x142   :  { %v1807_v59 = vpop.f32.mrb[50].mxu0  ;;  %v1848_v8 = vpop.f32.mrb[50].mxu1 }
 0x143   :  { %v2145_v1 = vadd.f32 %v2144_v51, %v3495_v53  ;;  %v1808_v2 = vpop.f32.mrb[51].mxu0  ;;  %v1849_v16 = vpop.f32.mrb[51].mxu1 }
 0x145   :  { %v2146_v29 = vadd.f32 %v2145_v1, %v3497_v54 }
 0x147   :  { %v2147_v30 = vadd.f32 %v2146_v29, %v3499_v63 }
 0x148   :  { %v1885_v32 = vpop.f32.mrb[52].mxu0  ;;  %v1926_v38 = vpop.f32.mrb[52].mxu1 }
 0x149   :  { %v2148_v35 = vadd.f32 %v2147_v30, %v1885_v32  ;;  %v1887_v37 = vpop.f32.mrb[53].mxu0  ;;  %v1928_v47 = vpop.f32.mrb[53].mxu1 }
 0x14a   :  { %v1889_v56 = vpop.f32.mrb[54].mxu0  ;;  %v1930_v59 = vpop.f32.mrb[54].mxu1 }
 0x14b   :  { %v2149_v42 = vadd.f32 %v2148_v35, %v1887_v37  ;;  %v1890_v41 = vpop.f32.mrb[55].mxu0  ;;  %v1931_v39 = vpop.f32.mrb[55].mxu1 }
 0x14d   :  { %v2150_v28 = vadd.f32 %v2149_v42, %v1926_v38 }
 0x14f   :  { %v2151_v25 = vadd.f32 %v2150_v28, %v1928_v47 }
 0x150   :  { %v1967_v51 = vpop.f32.mrb[56].mxu0  ;;  %v2008_v16 = vpop.f32.mrb[56].mxu1 }
 0x151   :  { %v2152_v2 = vadd.f32 %v2151_v25, %v1967_v51  ;;  %v1969_v8 = vpop.f32.mrb[57].mxu0  ;;  %v2010_v1 = vpop.f32.mrb[57].mxu1 }
 0x152   :  { %v1971_v24 = vpop.f32.mrb[58].mxu0  ;;  %v2012_v12 = vpop.f32.mrb[58].mxu1 }
 0x153   :  { %v2153_v19 = vadd.f32 %v2152_v2, %v1969_v8  ;;  %v1972_v29 = vpop.f32.mrb[59].mxu0  ;;  %v2013_v30 = vpop.f32.mrb[59].mxu1 }
 0x155   :  { %v2154_v7 = vadd.f32 %v2153_v19, %v2008_v16 }
 0x157   :  { %v2155_v6 = vadd.f32 %v2154_v7, %v2010_v1 }
 0x158   :  { %v2049_v56 = vpop.f32.mrb[60].mxu0  ;;  %v2090_v41 = vpop.f32.mrb[60].mxu1 }
 0x159   :  { %v2156_v4 = vadd.f32 %v2155_v6, %v2049_v56  ;;  %v2051_v35 = vpop.f32.mrb[61].mxu0  ;;  %v2092_v39 = vpop.f32.mrb[61].mxu1 }
 0x15a   :  { %v2053_v59 = vpop.f32.mrb[62].mxu0  ;;  %v2094_v60 = vpop.f32.mrb[62].mxu1 }
 0x15b   :  { %v2157_v42 = vadd.f32 %v2156_v4, %v2051_v35  ;;  %v2054_v28 = vpop.f32.mrb[63].mxu0  ;;  %v2095_v25 = vpop.f32.mrb[63].mxu1 }
 0x15d   :  { %v2158_v58 = vadd.f32 %v2157_v42, %v2090_v41 }
 0x15f   :  { %v2159_v57 = vadd.f32 %v2158_v58, %v2092_v39 }
 0x161   :  { %2160 = vadd.xlane.f32.xlu0 %v2159_v57 }
 0x1ee   :  { %v2161_v24 = vpop.xlane.xlu0 %2160 }
 0x1ef   :  { %v3504_v2 = vmul.f32 0.00012207031, %v2161_v24 }
 0x1f1   :  { %v3508_v12 = vsub.f32 %v3447_v61, %v3504_v2  ;;  %v3512_v6 = vsub.f32 %v3449_v62, %v3504_v2  ;;  %v3516_v4 = vsub.f32 %v3451_v0, %v3504_v2  ;;  %v3520_v60 = vsub.f32 %v3456_v15, %v3504_v2 }
 0x1f2   :  { %v3524_v57 = vsub.f32 %v3459_v17, %v3504_v2  ;;  %v3528_v58 = vsub.f32 %v3461_v18, %v3504_v2  ;;  %v3532_v7 = vsub.f32 %v3463_v26, %v3504_v2  ;;  %v3536_v19 = vsub.f32 %v3468_v40, %v3504_v2 }
 0x1f3   :  { %v3540_v61 = vsub.f32 %v3471_v49, %v3504_v2  ;;  %v3544_v62 = vsub.f32 %v3473_v50, %v3504_v2  ;;  %v3548_v0 = vsub.f32 %v3475_v52, %v3504_v2  ;;  %v3552_v15 = vsub.f32 %v3480_v5, %v3504_v2 }
 0x1f4   :  { %v3556_v17 = vsub.f32 %v3483_v13, %v3504_v2  ;;  %v3560_v18 = vsub.f32 %v3485_v3, %v3504_v2  ;;  %v3564_v26 = vsub.f32 %v3487_v22, %v3504_v2  ;;  %v3568_v40 = vsub.f32 %v3492_v44, %v3504_v2 }
 0x1f5   :  { %v3572_v49 = vsub.f32 %v3495_v53, %v3504_v2  ;;  %v3576_v50 = vsub.f32 %v3497_v54, %v3504_v2  ;;  %v3580_v52 = vsub.f32 %v3499_v63, %v3504_v2  ;;  %v3583_v5 = vsub.f32 %v1885_v32, %v3504_v2 }
 0x1f6   :  { %v3586_v13 = vsub.f32 %v1887_v37, %v3504_v2  ;;  %v3589_v3 = vsub.f32 %v1926_v38, %v3504_v2  ;;  %v3592_v22 = vsub.f32 %v1928_v47, %v3504_v2  ;;  %v3595_v44 = vsub.f32 %v1967_v51, %v3504_v2 }
 0x1f7   :  { %v3598_v53 = vsub.f32 %v1969_v8, %v3504_v2  ;;  %v3601_v54 = vsub.f32 %v2008_v16, %v3504_v2  ;;  %v3604_v63 = vsub.f32 %v2010_v1, %v3504_v2  ;;  %v3607_v32 = vsub.f32 %v2049_v56, %v3504_v2 }
 0x1f8   :  { %v3610_v37 = vsub.f32 %v2051_v35, %v3504_v2  ;;  %v3613_v47 = vsub.f32 %v2090_v41, %v3504_v2  ;;  %v3616_v38 = vsub.f32 %v2092_v39, %v3504_v2  ;;  %v3620_v51 = vsub.f32 %v3348_v9, %v3504_v2 }
 0x1f9   :  { %4866 = vst [vmem:[#allocation18_spill] sm:$0xff] %v3604_v63  ;;  %4867 = vst [vmem:[#allocation19_spill] sm:$0xff] %v3607_v32  ;;  %v3624_v8 = vsub.f32 %v3350_v10, %v3504_v2  ;;  %v3628_v16 = vsub.f32 %v3352_v11, %v3504_v2  ;;  %v3636_v30 = vsub.f32 %v3356_v14, %v3504_v2 }
 0x1fa   :  { %v2228_v1 = vmul.f32 %v3620_v51, %v3620_v51  ;;  %v3640_v9 = vsub.f32 %v3360_v27, %v3504_v2  ;;  %v3646_v11 = vsub.f32 %v3363_v20, %v3504_v2  ;;  %v3652_v14 = vsub.f32 %v3365_v21, %v3504_v2 }
 0x1fb   :  { %v2229_v29 = vmul.f32 %v3624_v8, %v3624_v8  ;;  %v2230_v10 = vmul.f32 %v3628_v16, %v3628_v16  ;;  %v2231_v35 = vmul.f32 %v3636_v30, %v3636_v30  ;;  %v3658_v39 = vsub.f32 %v3367_v23, %v3504_v2 }
 0x1fc   :  { %v2232_v27 = vmul.f32 %v3640_v9, %v3640_v9  ;;  %v2233_v20 = vmul.f32 %v3646_v11, %v3646_v11  ;;  %v3664_v28 = vsub.f32 %v3372_v31, %v3504_v2  ;;  %v2234_v21 = vmul.f32 %v3652_v14, %v3652_v14 }
 0x1fd   :  { %v2292_v56 = vadd.f32 %v2229_v29, %v2228_v1  ;;  %v3670_v24 = vsub.f32 %v3375_v33, %v3504_v2  ;;  %v2235_v23 = vmul.f32 %v3658_v39, %v3658_v39  ;;  %v3676_v29 = vsub.f32 %v3377_v34, %v3504_v2 }
 0x1fe   :  { %v2236_v31 = vmul.f32 %v3664_v28, %v3664_v28 }
 0x1ff   :  { %v2293_v41 = vadd.f32 %v2292_v56, %v2230_v10  ;;  %v3682_v56 = vsub.f32 %v3379_v36, %v3504_v2  ;;  %v2237_v33 = vmul.f32 %v3670_v24, %v3670_v24  ;;  %v2238_v34 = vmul.f32 %v3676_v29, %v3676_v29 }
 0x201   :  { %v2294_v59 = vadd.f32 %v2293_v41, %v2231_v35  ;;  %v3688_v41 = vsub.f32 %v3384_v43, %v3504_v2  ;;  %v2239_v36 = vmul.f32 %v3682_v56, %v3682_v56 }
 0x203   :  { %v2295_v42 = vadd.f32 %v2294_v59, %v2232_v27  ;;  %v3694_v59 = vsub.f32 %v3387_v45, %v3504_v2  ;;  %v2240_v43 = vmul.f32 %v3688_v41, %v3688_v41 }
 0x205   :  { %v2296_v25 = vadd.f32 %v2295_v42, %v2233_v20  ;;  %v3700_v42 = vsub.f32 %v3389_v46, %v3504_v2  ;;  %v2241_v45 = vmul.f32 %v3694_v59, %v3694_v59 }
 0x207   :  { %v2297_v1 = vadd.f32 %v2296_v25, %v2234_v21  ;;  %v3706_v25 = vsub.f32 %v3391_v48, %v3504_v2  ;;  %v2242_v46 = vmul.f32 %v3700_v42, %v3700_v42 }
 0x209   :  { %v2298_v10 = vadd.f32 %v2297_v1, %v2235_v23  ;;  %v3712_v1 = vsub.f32 %v3396_v55, %v3504_v2  ;;  %v2243_v48 = vmul.f32 %v3706_v25, %v3706_v25 }
 0x20b   :  { %v2299_v35 = vadd.f32 %v2298_v10, %v2236_v31  ;;  %4868 = vst [vmem:[#allocation20_spill] sm:$0xff] %v3712_v1  ;;  %v4869_v10 = vld [vmem:[#allocation2_spill] sm:$0xff]  ;;  %v2244_v55 = vmul.f32 %v3712_v1, %v3712_v1 }
 0x20d   :  { %v2300_v27 = vadd.f32 %v2299_v35, %v2237_v33  ;;  %v3718_v33 = vsub.f32 %v4869_v10, %v3504_v2 }
 0x20f   :  { %v2301_v20 = vadd.f32 %v2300_v27, %v2238_v34  ;;  %4870 = vst [vmem:[#allocation2_spill] sm:$0xff] %v3718_v33  ;;  %v4871_v34 = vld [vmem:[#allocation3_spill] sm:$0xff] }
 0x210   :  { %v3724_v27 = vsub.f32 %v4871_v34, %v3504_v2  ;;  %v4877_v34 = vld [vmem:[#allocation6_spill] sm:$0xff] }
 0x211   :  { %v2302_v21 = vadd.f32 %v2301_v20, %v2239_v36  ;;  %v4873_v20 = vld [vmem:[#allocation4_spill] sm:$0xff]  ;;  %v3742_v1 = vsub.f32 %v4877_v34, %v3504_v2  ;;  %v4883_v34 = vld [vmem:[#allocation9_spill] sm:$0xff] }
 0x212   :  { %4872 = vst [vmem:[#allocation3_spill] sm:$0xff] %v3724_v27 }
 0x213   :  { %v2303_v23 = vadd.f32 %v2302_v21, %v2240_v43  ;;  %v3730_v43 = vsub.f32 %v4873_v20, %v3504_v2  ;;  %v2245_v21 = vmul.f32 %v3718_v33, %v3718_v33  ;;  %4878 = vst [vmem:[#allocation6_spill] sm:$0xff] %v3742_v1  ;;  %v4879_v20 = vld [vmem:[#allocation7_spill] sm:$0xff] }
 0x214   :  { %v3748_v33 = vsub.f32 %v4879_v20, %v3504_v2  ;;  %v4885_v20 = vld [vmem:[#allocation10_spill] sm:$0xff] }
 0x215   :  { %v2304_v31 = vadd.f32 %v2303_v23, %v2241_v45  ;;  %4874 = vst [vmem:[#allocation4_spill] sm:$0xff] %v3730_v43  ;;  %v4875_v23 = vld [vmem:[#allocation5_spill] sm:$0xff] }
 0x216   :  { %v3736_v10 = vsub.f32 %v4875_v23, %v3504_v2  ;;  %4880 = vst [vmem:[#allocation7_spill] sm:$0xff] %v3748_v33  ;;  %v4881_v23 = vld [vmem:[#allocation8_spill] sm:$0xff] }
 0x217   :  { %v2305_v35 = vadd.f32 %v2304_v31, %v2242_v46  ;;  %v2246_v46 = vmul.f32 %v3724_v27, %v3724_v27  ;;  %v3754_v27 = vsub.f32 %v4881_v23, %v3504_v2  ;;  %v4887_v23 = vld [vmem:[#allocation11_spill] sm:$0xff] }
 0x218   :  { %4876 = vst [vmem:[#allocation5_spill] sm:$0xff] %v3736_v10 }
 0x219   :  { %v2306_v36 = vadd.f32 %v2305_v35, %v2243_v48  ;;  %v2247_v48 = vmul.f32 %v3730_v43, %v3730_v43  ;;  %4882 = vst [vmem:[#allocation8_spill] sm:$0xff] %v3754_v27  ;;  %v3760_v43 = vsub.f32 %v4883_v34, %v3504_v2  ;;  %v4889_v34 = vld [vmem:[#allocation12_spill] sm:$0xff] }
 0x21b   :  { %v2307_v45 = vadd.f32 %v2306_v36, %v2244_v55  ;;  %v2248_v55 = vmul.f32 %v3736_v10, %v3736_v10  ;;  %4884 = vst [vmem:[#allocation9_spill] sm:$0xff] %v3760_v43  ;;  %v3766_v10 = vsub.f32 %v4885_v20, %v3504_v2  ;;  %v4891_v20 = vld [vmem:[#allocation13_spill] sm:$0xff] }
 0x21d   :  { %v2308_v31 = vadd.f32 %v2307_v45, %v2245_v21  ;;  %v2249_v21 = vmul.f32 %v3742_v1, %v3742_v1  ;;  %4886 = vst [vmem:[#allocation10_spill] sm:$0xff] %v3766_v10  ;;  %v3772_v1 = vsub.f32 %v4887_v23, %v3504_v2  ;;  %v4892_v23 = vld [vmem:[#allocation14_spill] sm:$0xff] }
 0x21f   :  { %v2309_v35 = vadd.f32 %v2308_v31, %v2246_v46  ;;  %v2250_v46 = vmul.f32 %v3748_v33, %v3748_v33  ;;  %4888 = vst [vmem:[#allocation11_spill] sm:$0xff] %v3772_v1  ;;  %v3778_v33 = vsub.f32 %v4889_v34, %v3504_v2  ;;  %v4894_v34 = vld [vmem:[#allocation15_spill] sm:$0xff] }
 0x221   :  { %v2310_v36 = vadd.f32 %v2309_v35, %v2247_v48  ;;  %v2251_v48 = vmul.f32 %v3754_v27, %v3754_v27  ;;  %4890 = vst [vmem:[#allocation12_spill] sm:$0xff] %v3778_v33  ;;  %v3784_v27 = vsub.f32 %v4891_v20, %v3504_v2  ;;  %v4895_v20 = vld [vmem:[#allocation16_spill] sm:$0xff] }
 0x223   :  { %v2311_v45 = vadd.f32 %v2310_v36, %v2248_v55  ;;  %v2252_v55 = vmul.f32 %v3760_v43, %v3760_v43  ;;  %v3790_v43 = vsub.f32 %v4892_v23, %v3504_v2  ;;  %v4896_v23 = vld [vmem:[#allocation17_spill] sm:$0xff] }
 0x225   :  { %v2312_v31 = vadd.f32 %v2311_v45, %v2249_v21  ;;  %v2253_v21 = vmul.f32 %v3766_v10, %v3766_v10  ;;  %4893 = vst [vmem:[#allocation13_spill] sm:$0xff] %v3790_v43  ;;  %v3796_v10 = vsub.f32 %v4894_v34, %v3504_v2 }
 0x227   :  { %v2313_v35 = vadd.f32 %v2312_v31, %v2250_v46  ;;  %v2254_v46 = vmul.f32 %v3772_v1, %v3772_v1  ;;  %v3802_v1 = vsub.f32 %v4895_v20, %v3504_v2 }
 0x229   :  { %v2314_v36 = vadd.f32 %v2313_v35, %v2251_v48  ;;  %v2255_v48 = vmul.f32 %v3778_v33, %v3778_v33  ;;  %v3808_v33 = vsub.f32 %v4896_v23, %v3504_v2  ;;  %v2259_v34 = vmul.f32 %v3802_v1, %v3802_v1 }
 0x22a   :  { %v2262_v2 = vmul.f32 %v3512_v6, %v3512_v6  ;;  %v2263_v23 = vmul.f32 %v3516_v4, %v3516_v4 }
 0x22b   :  { %v2315_v45 = vadd.f32 %v2314_v36, %v2252_v55  ;;  %v2256_v55 = vmul.f32 %v3784_v27, %v3784_v27 }
 0x22d   :  { %v2316_v31 = vadd.f32 %v2315_v45, %v2253_v21  ;;  %v2257_v21 = vmul.f32 %v3790_v43, %v3790_v43  ;;  %v2261_v43 = vmul.f32 %v3508_v12, %v3508_v12 }
 0x22f   :  { %v2317_v35 = vadd.f32 %v2316_v31, %v2254_v46  ;;  %v2258_v46 = vmul.f32 %v3796_v10, %v3796_v10 }
 0x231   :  { %v2318_v36 = vadd.f32 %v2317_v35, %v2255_v48  ;;  %v2260_v35 = vmul.f32 %v3808_v33, %v3808_v33 }
 0x233   :  { %v2319_v45 = vadd.f32 %v2318_v36, %v2256_v55 }
 0x235   :  { %v2320_v31 = vadd.f32 %v2319_v45, %v2257_v21  ;;  %v2264_v45 = vmul.f32 %v3520_v60, %v3520_v60 }
 0x237   :  { %v2321_v48 = vadd.f32 %v2320_v31, %v2258_v46  ;;  %v2265_v31 = vmul.f32 %v3524_v57, %v3524_v57 }
 0x239   :  { %v2322_v20 = vadd.f32 %v2321_v48, %v2259_v34  ;;  %v2266_v48 = vmul.f32 %v3528_v58, %v3528_v58 }
 0x23b   :  { %v2323_v55 = vadd.f32 %v2322_v20, %v2260_v35  ;;  %v2267_v20 = vmul.f32 %v3532_v7, %v3532_v7 }
 0x23d   :  { %v2324_v36 = vadd.f32 %v2323_v55, %v2261_v43  ;;  %v2268_v55 = vmul.f32 %v3536_v19, %v3536_v19 }
 0x23f   :  { %v2325_v21 = vadd.f32 %v2324_v36, %v2262_v2  ;;  %v2269_v36 = vmul.f32 %v3540_v61, %v3540_v61 }
 0x241   :  { %v2326_v46 = vadd.f32 %v2325_v21, %v2263_v23  ;;  %v2270_v21 = vmul.f32 %v3544_v62, %v3544_v62 }
 0x243   :  { %v2327_v34 = vadd.f32 %v2326_v46, %v2264_v45  ;;  %v2271_v46 = vmul.f32 %v3548_v0, %v3548_v0 }
 0x245   :  { %v2328_v35 = vadd.f32 %v2327_v34, %v2265_v31  ;;  %v2272_v34 = vmul.f32 %v3552_v15, %v3552_v15 }
 0x247   :  { %v2329_v43 = vadd.f32 %v2328_v35, %v2266_v48  ;;  %v2273_v35 = vmul.f32 %v3556_v17, %v3556_v17 }
 0x249   :  { %v2330_v2 = vadd.f32 %v2329_v43, %v2267_v20  ;;  %v2274_v43 = vmul.f32 %v3560_v18, %v3560_v18 }
 0x24b   :  { %v2331_v23 = vadd.f32 %v2330_v2, %v2268_v55  ;;  %v2275_v2 = vmul.f32 %v3564_v26, %v3564_v26 }
 0x24d   :  { %v2332_v45 = vadd.f32 %v2331_v23, %v2269_v36  ;;  %v2276_v23 = vmul.f32 %v3568_v40, %v3568_v40 }
 0x24f   :  { %v2333_v31 = vadd.f32 %v2332_v45, %v2270_v21  ;;  %v2277_v45 = vmul.f32 %v3572_v49, %v3572_v49 }
 0x251   :  { %v2334_v48 = vadd.f32 %v2333_v31, %v2271_v46  ;;  %v2278_v31 = vmul.f32 %v3576_v50, %v3576_v50 }
 0x253   :  { %v2335_v20 = vadd.f32 %v2334_v48, %v2272_v34  ;;  %v2279_v48 = vmul.f32 %v3580_v52, %v3580_v52 }
 0x255   :  { %v2336_v55 = vadd.f32 %v2335_v20, %v2273_v35  ;;  %v2280_v20 = vmul.f32 %v3583_v5, %v3583_v5 }
 0x257   :  { %v2337_v36 = vadd.f32 %v2336_v55, %v2274_v43  ;;  %v2281_v55 = vmul.f32 %v3586_v13, %v3586_v13 }
 0x259   :  { %v2338_v21 = vadd.f32 %v2337_v36, %v2275_v2  ;;  %v2282_v36 = vmul.f32 %v3589_v3, %v3589_v3 }
 0x25b   :  { %v2339_v46 = vadd.f32 %v2338_v21, %v2276_v23  ;;  %v2283_v21 = vmul.f32 %v3592_v22, %v3592_v22 }
 0x25d   :  { %v2340_v34 = vadd.f32 %v2339_v46, %v2277_v45  ;;  %v2284_v46 = vmul.f32 %v3595_v44, %v3595_v44 }
 0x25f   :  { %v2341_v35 = vadd.f32 %v2340_v34, %v2278_v31  ;;  %v2285_v34 = vmul.f32 %v3598_v53, %v3598_v53 }
 0x261   :  { %v2342_v43 = vadd.f32 %v2341_v35, %v2279_v48  ;;  %v2286_v35 = vmul.f32 %v3601_v54, %v3601_v54 }
 0x263   :  { %v2343_v2 = vadd.f32 %v2342_v43, %v2280_v20  ;;  %v2287_v43 = vmul.f32 %v3604_v63, %v3604_v63 }
 0x265   :  { %v2344_v23 = vadd.f32 %v2343_v2, %v2281_v55  ;;  %v2288_v2 = vmul.f32 %v3607_v32, %v3607_v32 }
 0x267   :  { %v2345_v45 = vadd.f32 %v2344_v23, %v2282_v36  ;;  %v2289_v23 = vmul.f32 %v3610_v37, %v3610_v37 }
 0x269   :  { %v2346_v31 = vadd.f32 %v2345_v45, %v2283_v21  ;;  %v2290_v45 = vmul.f32 %v3613_v47, %v3613_v47 }
 0x26b   :  { %v2347_v48 = vadd.f32 %v2346_v31, %v2284_v46  ;;  %v2291_v31 = vmul.f32 %v3616_v38, %v3616_v38 }
 0x26d   :  { %v2348_v20 = vadd.f32 %v2347_v48, %v2285_v34 }
 0x26f   :  { %v2349_v55 = vadd.f32 %v2348_v20, %v2286_v35 }
 0x271   :  { %v2350_v36 = vadd.f32 %v2349_v55, %v2287_v43 }
 0x273   :  { %v2351_v21 = vadd.f32 %v2350_v36, %v2288_v2 }
 0x275   :  { %v2352_v46 = vadd.f32 %v2351_v21, %v2289_v23  ;;  %v4897_v23 = vld [vmem:[#allocation20_spill] sm:$0xff]  ;;  %v4898_v21 = vld [vmem:[#allocation2_spill] sm:$0xff] }
 0x277   :  { %v2353_v34 = vadd.f32 %v2352_v46, %v2290_v45  ;;  %v4899_v45 = vld [vmem:[#allocation3_spill] sm:$0xff]  ;;  %v4900_v46 = vld [vmem:[#allocation4_spill] sm:$0xff] }
 0x279   :  { %v2354_v48 = vadd.f32 %v2353_v34, %v2291_v31  ;;  %v4902_v31 = vld [vmem:[#allocation5_spill] sm:$0xff]  ;;  %v4904_v34 = vld [vmem:[#allocation6_spill] sm:$0xff] }
 0x27b   :  { %2355 = vadd.xlane.f32.xlu0 %v2354_v48 }
 0x308   :  { %v2356_v63 = vpop.xlane.xlu0 %2355 }
 0x309   :  { %v2357_v35 = vmul.f32 0.00012207031, %v2356_v63 }
 0x30b   :  { %v2358_v20 = vadd.f32 0.0001, %v2357_v35  ;;  %v4906_v35 = vld [vmem:[#allocation7_spill] sm:$0xff] }
 0x30d   :  { %2845 = vrsqrt.f32 %v2358_v20 }
 0x317   :  { %v3878_v32 = vpop.eup %2845 }
 0x318   :  { %v3882_v43 = vmul.f32 %v3878_v32, %v3620_v51  ;;  %v3886_v55 = vmul.f32 %v3878_v32, %v3624_v8  ;;  %v3890_v2 = vmul.f32 %v3878_v32, %v3628_v16  ;;  %v3894_v36 = vmul.f32 %v3878_v32, %v3636_v30 }
 0x319   :  { %v3898_v63 = vmul.f32 %v3878_v32, %v3640_v9  ;;  %v3902_v51 = vmul.f32 %v3878_v32, %v3646_v11  ;;  %v3906_v8 = vmul.f32 %v3878_v32, %v3652_v14  ;;  %v3910_v16 = vmul.f32 %v3878_v32, %v3658_v39 }
 0x31a   :  { %v3914_v30 = vmul.f32 %v3878_v32, %v3664_v28  ;;  %v3918_v9 = vmul.f32 %v3878_v32, %v3670_v24  ;;  %v3922_v11 = vmul.f32 %v3878_v32, %v3676_v29  ;;  %v3926_v14 = vmul.f32 %v3878_v32, %v3682_v56 }
 0x31b   :  { %v3930_v39 = vmul.f32 %v3878_v32, %v3688_v41  ;;  %v3934_v28 = vmul.f32 %v3878_v32, %v3694_v59  ;;  %v3938_v24 = vmul.f32 %v3878_v32, %v3700_v42  ;;  %v3942_v29 = vmul.f32 %v3878_v32, %v3706_v25 }
 0x31c   :  { %v3946_v56 = vmul.f32 %v3878_v32, %v4897_v23  ;;  %v3950_v41 = vmul.f32 %v3878_v32, %v4898_v21  ;;  %v3954_v59 = vmul.f32 %v3878_v32, %v4899_v45  ;;  %v3958_v42 = vmul.f32 %v3878_v32, %v4900_v46  ;;  %v4907_v23 = vld [vmem:[#allocation8_spill] sm:$0xff]  ;;  %v4909_v45 = vld [vmem:[#allocation9_spill] sm:$0xff] }
 0x31d   :  { %v3962_v25 = vmul.f32 %v3878_v32, %v4902_v31  ;;  %v3966_v48 = vmul.f32 %v3878_v32, %v4904_v34  ;;  %v3970_v20 = vmul.f32 %v3878_v32, %v4906_v35  ;;  %v3974_v21 = vmul.f32 %v3878_v32, %v4907_v23 }
 0x31e   :  { %4901 = vst [vmem:[#allocation14_spill] sm:$0xff] %v3958_v42  ;;  %v3978_v46 = vmul.f32 %v3878_v32, %v4909_v45  ;;  %v4910_v42 = vld [vmem:[#allocation10_spill] sm:$0xff]  ;;  %v3994_v23 = vmul.f32 %v3878_v32, %v3784_v27  ;;  %v4014_v27 = vmul.f32 %v3878_v32, %v3508_v12  ;;  %v4034_v12 = vmul.f32 %v3878_v32, %v3528_v58 }
 0x31f   :  { %4903 = vst [vmem:[#allocation15_spill] sm:$0xff] %v3962_v25  ;;  %4905 = vst [vmem:[#allocation16_spill] sm:$0xff] %v3966_v48  ;;  %v3982_v31 = vmul.f32 %v3878_v32, %v4910_v42  ;;  %v4911_v25 = vld [vmem:[#allocation11_spill] sm:$0xff]  ;;  %v4912_v48 = vld [vmem:[#allocation12_spill] sm:$0xff]  ;;  %v4002_v42 = vmul.f32 %v3878_v32, %v3796_v10  ;;  %v4022_v10 = vmul.f32 %v3878_v32, %v3516_v4  ;;  %vm2424_vm1 = vcmp.gt.f32.partialorder %v3882_v43, 0.0 }
 0x320   :  { %4908 = vst [vmem:[#allocation17_spill] sm:$0xff] %v3974_v21  ;;  %v3986_v34 = vmul.f32 %v3878_v32, %v4911_v25  ;;  %v3990_v35 = vmul.f32 %v3878_v32, %v4912_v48  ;;  %v4913_v21 = vld [vmem:[#allocation13_spill] sm:$0xff]  ;;  %v4006_v25 = vmul.f32 %v3878_v32, %v3802_v1  ;;  %v4010_v48 = vmul.f32 %v3878_v32, %v3808_v33 }
 0x321   :  { %v3998_v45 = vmul.f32 %v3878_v32, %v4913_v21  ;;  %v4018_v21 = vmul.f32 %v3878_v32, %v3512_v6  ;;  %v4026_v1 = vmul.f32 %v3878_v32, %v3520_v60  ;;  %v4030_v33 = vmul.f32 %v3878_v32, %v3524_v57 }
 0x322   :  { %v4038_v6 = vmul.f32 %v3878_v32, %v3532_v7  ;;  %v4042_v4 = vmul.f32 %v3878_v32, %v3536_v19  ;;  %v4046_v60 = vmul.f32 %v3878_v32, %v3540_v61  ;;  %v4050_v57 = vmul.f32 %v3878_v32, %v3544_v62 }
 0x323   :  { %v4054_v58 = vmul.f32 %v3878_v32, %v3548_v0  ;;  %v4058_v7 = vmul.f32 %v3878_v32, %v3552_v15  ;;  %v4062_v19 = vmul.f32 %v3878_v32, %v3556_v17  ;;  %v4066_v61 = vmul.f32 %v3878_v32, %v3560_v18 }
 0x324   :  { %v4070_v62 = vmul.f32 %v3878_v32, %v3564_v26  ;;  %v4074_v0 = vmul.f32 %v3878_v32, %v3568_v40  ;;  %v4078_v15 = vmul.f32 %v3878_v32, %v3572_v49  ;;  %v4082_v17 = vmul.f32 %v3878_v32, %v3576_v50 }
 0x325   :  { %4914 = vst [vmem:[#allocation20_spill] sm:$0xff] %v4062_v19  ;;  %4915 = vst [vmem:[#allocation2_spill] sm:$0xff] %v4066_v61  ;;  %v4086_v18 = vmul.f32 %v3878_v32, %v3580_v52  ;;  %v4090_v26 = vmul.f32 %v3878_v32, %v3583_v5  ;;  %v4094_v40 = vmul.f32 %v3878_v32, %v3586_v13  ;;  %vm2425_vm2 = vcmp.gt.f32.partialorder %v3886_v55, 0.0 }
 0x326   :  { %4916 = vst [vmem:[#allocation3_spill] sm:$0xff] %v4070_v62  ;;  %4917 = vst [vmem:[#allocation4_spill] sm:$0xff] %v4074_v0  ;;  %v4098_v49 = vmul.f32 %v3878_v32, %v3589_v3  ;;  %v4102_v50 = vmul.f32 %v3878_v32, %v3592_v22  ;;  %v4106_v52 = vmul.f32 %v3878_v32, %v3595_v44  ;;  %vm2426_vm3 = vcmp.gt.f32.partialorder %v3890_v2, 0.0 }
 0x327   :  { %4918 = vst [vmem:[#allocation5_spill] sm:$0xff] %v4078_v15  ;;  %4919 = vst [vmem:[#allocation6_spill] sm:$0xff] %v4082_v17  ;;  %v4110_v5 = vmul.f32 %v3878_v32, %v3598_v53  ;;  %v4114_v13 = vmul.f32 %v3878_v32, %v3601_v54  ;;  %v4126_v44 = vmul.f32 %v3878_v32, %v3610_v37  ;;  %vm2427_vm4 = vcmp.gt.f32.partialorder %v3894_v36, 0.0 }
 0x328   :  { %4920 = vst [vmem:[#allocation7_spill] sm:$0xff] %v4086_v18  ;;  %4921 = vst [vmem:[#allocation8_spill] sm:$0xff] %v4090_v26  ;;  %vm2428_vm5 = vcmp.gt.f32.partialorder %v3898_v63, 0.0  ;;  %vm2429_vm6 = vcmp.gt.f32.partialorder %v3902_v51, 0.0  ;;  %vm2430_vm7 = vcmp.gt.f32.partialorder %v3906_v8, 0.0  ;;  %vm2431_vm8 = vcmp.gt.f32.partialorder %v3910_v16, 0.0 }
 0x329   :  { %4922 = vst [vmem:[#allocation9_spill] sm:$0xff] %v4094_v40  ;;  %4923 = vst [vmem:[#allocation10_spill] sm:$0xff] %v4098_v49  ;;  %v4928_v40 = vld [vmem:[#allocation18_spill] sm:$0xff]  ;;  %v4930_v49 = vld [vmem:[#allocation19_spill] sm:$0xff]  ;;  %vm2432_vm9 = vcmp.gt.f32.partialorder %v3914_v30, 0.0  ;;  %v4139_v53 = vmul.f32 %v3878_v32, %v3613_v47  ;;  %vm2433_vm10 = vcmp.gt.f32.partialorder %v3918_v9, 0.0 }
 0x32a   :  { %4924 = vst [vmem:[#allocation11_spill] sm:$0xff] %v4102_v50  ;;  %4925 = vst [vmem:[#allocation12_spill] sm:$0xff] %v4106_v52  ;;  %v4118_v3 = vmul.f32 %v3878_v32, %v4928_v40  ;;  %v4122_v22 = vmul.f32 %v3878_v32, %v4930_v49  ;;  %v2488_v54 = vmul.f32 0.01, %v3882_v43  ;;  %v2489_v37 = vmul.f32 0.01, %v3886_v55 }
 0x32b   :  { %4926 = vst [vmem:[#allocation13_spill] sm:$0xff] %v4110_v5  ;;  %4927 = vst [vmem:[#allocation21_spill] sm:$0xff] %v4114_v13  ;;  %v2490_v40 = vmul.f32 0.01, %v3890_v2  ;;  %v4147_v49 = vmul.f32 %v3878_v32, %v3616_v38  ;;  %vm2434_vm11 = vcmp.gt.f32.partialorder %v3922_v11, 0.0  ;;  %vm2435_vm12 = vcmp.gt.f32.partialorder %v3926_v14, 0.0 }
 0x32c   :  { %4929 = vst [vmem:[#allocation18_spill] sm:$0xff] %v4118_v3  ;;  %4931 = vst [vmem:[#allocation19_spill] sm:$0xff] %v4122_v22  ;;  %v2492_v22 = vmul.f32 0.01, %v3898_v63  ;;  %v2493_v47 = vmul.f32 0.01, %v3902_v51  ;;  %v4160_v32 = vsel %vm2424_vm1, %v3882_v43, %v2488_v54  ;;  %v4171_v52 = vsel %vm2425_vm2, %v3886_v55, %v2489_v37 }
 0x32d   :  { %4932 = vst [vmem:[#allocation22_spill] sm:$0xff] %v4126_v44  ;;  %4933 = vst [vmem:[#allocation23_spill] sm:$0xff] %v4139_v53  ;;  %v2491_v44 = vmul.f32 0.01, %v3894_v36  ;;  %v2494_v53 = vmul.f32 0.01, %v3906_v8 }
 0x32e   :  { %4934 = vst [vmem:[#allocation24_spill] sm:$0xff] %v4147_v49  ;;  %v2495_v3 = vmul.f32 0.01, %v3910_v16  ;;  %v2496_v13 = vmul.f32 0.01, %v3914_v30  ;;  %4935 = vst [vmem:[#allocation25_spill] sm:$0xff] %v4160_v32  ;;  %v4186_v32 = vsel %vm2426_vm3, %v3890_v2, %v2490_v40 }
 0x32f   :  { %vm2436_vm13 = vcmp.gt.f32.partialorder %v3930_v39, 0.0  ;;  %v2497_v38 = vmul.f32 0.01, %v3918_v9  ;;  %v2498_v49 = vmul.f32 0.01, %v3922_v11  ;;  %4936 = vst [vmem:[#allocation26_spill] sm:$0xff] %v4171_v52  ;;  %v4201_v26 = vsel %vm2427_vm4, %v3894_v36, %v2491_v44 }
 0x330   :  { %v4166_v5 = vmul.f32 0.01, %v3926_v14  ;;  %vm2437_vm14 = vcmp.gt.f32.partialorder %v3934_v28, 0.0  ;;  %v4175_v50 = vmul.f32 0.01, %v3930_v39  ;;  %4937 = vst [vmem:[#allocation27_spill] sm:$0xff] %v4186_v32 }
 0x331   :  { %v4178_v43 = vmul.f32 0.01, %v3934_v28  ;;  %v4181_v54 = vmul.f32 0.01, %v3938_v24  ;;  %vm2438_vm15 = vcmp.gt.f32.partialorder %v3938_v24, 0.0  ;;  %4941 = vst [vmem:[#allocation31_spill] sm:$0xff] %v4201_v26 }
 0x332   :  { %v4190_v55 = vmul.f32 0.01, %v3942_v29  ;;  %v4193_v37 = vmul.f32 0.01, %v3946_v56  ;;  %v4196_v52 = vmul.f32 0.01, %v3950_v41 }
 0x333   :  { %vm2439_vm0 = vcmp.gt.f32.partialorder %v3942_v29, 0.0  ;;  %v4205_v2 = vmul.f32 0.01, %v3954_v59  ;;  %v4943_v40 = vld [vmem:[#allocation14_spill] sm:$0xff]  ;;  %vm2440_vm1 = vcmp.gt.f32.partialorder %v3946_v56, 0.0  ;;  %v4947_v36 = vld [vmem:[#allocation16_spill] sm:$0xff] }
 0x334   :  { %4938 = vst [vmem:[#allocation28_spill] sm:$0xff] %v4190_v55  ;;  %4939 = vst [vmem:[#allocation29_spill] sm:$0xff] %v4193_v37  ;;  %v4208_v32 = vmul.f32 0.01, %v4943_v40  ;;  %v4944_v55 = vld [vmem:[#allocation15_spill] sm:$0xff]  ;;  %vm2441_vm2 = vcmp.gt.f32.partialorder %v3950_v41, 0.0 }
 0x335   :  { %4940 = vst [vmem:[#allocation30_spill] sm:$0xff] %v4196_v52  ;;  %4942 = vst [vmem:[#allocation32_spill] sm:$0xff] %v4205_v2  ;;  %v4211_v18 = vmul.f32 0.01, %v4944_v55  ;;  %v4216_v52 = vsel %vm2428_vm5, %v3898_v63, %v2492_v22  ;;  %v4220_v44 = vmul.f32 0.01, %v4947_v36 }
 0x336   :  { %4946 = vst [vmem:[#allocation15_spill] sm:$0xff] %v4216_v52  ;;  %v4223_v26 = vmul.f32 0.01, %v3970_v20  ;;  %v4948_v2 = vld [vmem:[#allocation17_spill] sm:$0xff]  ;;  %v4235_v63 = vmul.f32 0.01, %v3978_v46 }
 0x337   :  { %4945 = vst [vmem:[#allocation14_spill] sm:$0xff] %v4211_v18  ;;  %v4226_v37 = vmul.f32 0.01, %v4948_v2  ;;  %v4231_v18 = vsel %vm2429_vm6, %v3902_v51, %v2493_v47  ;;  %v4238_v22 = vmul.f32 0.01, %v3982_v31  ;;  %vm2442_vm3 = vcmp.gt.f32.partialorder %v3954_v59, 0.0 }
 0x338   :  { %4950 = vst [vmem:[#allocation17_spill] sm:$0xff] %v4231_v18  ;;  %v4241_v52 = vmul.f32 0.01, %v3986_v34  ;;  %v4250_v51 = vmul.f32 0.01, %v3990_v35  ;;  %vm2443_vm4 = vcmp.gt.f32.partialorder %v4943_v40, 0.0 }
 0x339   :  { %4949 = vst [vmem:[#allocation16_spill] sm:$0xff] %v4226_v37  ;;  %v4246_v37 = vsel %vm2430_vm7, %v3906_v8, %v2494_v53  ;;  %v4253_v47 = vmul.f32 0.01, %v3994_v23  ;;  %v4256_v18 = vmul.f32 0.01, %v3998_v45  ;;  %vm2446_vm7 = vcmp.gt.f32.partialorder %v3970_v20, 0.0 }
 0x33a   :  { %4951 = vst [vmem:[#allocation33_spill] sm:$0xff] %v4241_v52  ;;  %4952 = vst [vmem:[#allocation34_spill] sm:$0xff] %v4246_v37  ;;  %v4261_v52 = vsel %vm2431_vm8, %v3910_v16, %v2495_v3  ;;  %v4267_v8 = vmul.f32 0.01, %v4002_v42  ;;  %v4270_v53 = vmul.f32 0.01, %v4006_v25  ;;  %v4278_v16 = vsel %vm2432_vm9, %v3914_v30, %v2496_v13 }
 0x33b   :  { %4953 = vst [vmem:[#allocation35_spill] sm:$0xff] %v4261_v52  ;;  %v4273_v37 = vmul.f32 0.01, %v4010_v48  ;;  %4955 = vst [vmem:[#allocation37_spill] sm:$0xff] %v4278_v16  ;;  %v4285_v3 = vmul.f32 0.01, %v4014_v27  ;;  %v4296_v30 = vsel %vm2433_vm10, %v3918_v9, %v2497_v38  ;;  %v4314_v9 = vsel %vm2434_vm11, %v3922_v11, %v2498_v49 }
 0x33c   :  { %v4288_v52 = vmul.f32 0.01, %v4018_v21  ;;  %4957 = vst [vmem:[#allocation39_spill] sm:$0xff] %v4296_v30  ;;  %vm2450_vm9 = vcmp.gt.f32.partialorder %v3986_v34, 0.0  ;;  %v4303_v13 = vmul.f32 0.01, %v4026_v1  ;;  %v4333_v11 = vsel %vm2435_vm12, %v3926_v14, %v4166_v5 }
 0x33d   :  { %4954 = vst [vmem:[#allocation36_spill] sm:$0xff] %v4273_v37  ;;  %v4291_v37 = vmul.f32 0.01, %v4022_v10  ;;  %v4306_v16 = vmul.f32 0.01, %v4030_v33  ;;  %4959 = vst [vmem:[#allocation41_spill] sm:$0xff] %v4314_v9  ;;  %v4352_v14 = vsel %vm2436_vm13, %v3930_v39, %v4175_v50  ;;  %v4371_v39 = vsel %vm2437_vm14, %v3934_v28, %v4178_v43 }
 0x33e   :  { %vm2454_vm10 = vcmp.gt.f32.partialorder %v4002_v42, 0.0  ;;  %v4321_v38 = vmul.f32 0.01, %v4038_v6  ;;  %v4324_v30 = vmul.f32 0.01, %v4042_v4  ;;  %4961 = vst [vmem:[#allocation43_spill] sm:$0xff] %v4333_v11  ;;  %v4390_v28 = vsel %vm2438_vm15, %v3938_v24, %v4181_v54 }
 0x33f   :  { %4956 = vst [vmem:[#allocation38_spill] sm:$0xff] %v4291_v37  ;;  %v4309_v37 = vmul.f32 0.01, %v4034_v12  ;;  %vm2458_vm11 = vcmp.gt.f32.partialorder %v4018_v21, 0.0  ;;  %v4340_v49 = vmul.f32 0.01, %v4050_v57 }
 0x340   :  { %v4343_v9 = vmul.f32 0.01, %v4054_v58  ;;  %4963 = vst [vmem:[#allocation45_spill] sm:$0xff] %v4352_v14  ;;  %vm2462_vm12 = vcmp.gt.f32.partialorder %v4034_v12, 0.0  ;;  %v4359_v5 = vmul.f32 0.01, %v4062_v19 }
 0x341   :  { %4958 = vst [vmem:[#allocation40_spill] sm:$0xff] %v4309_v37  ;;  %v4327_v37 = vmul.f32 0.01, %v4046_v60  ;;  %v4362_v11 = vmul.f32 0.01, %v4066_v61  ;;  %4966 = vst [vmem:[#allocation48_spill] sm:$0xff] %v4371_v39 }
 0x342   :  { %vm2466_vm13 = vcmp.gt.f32.partialorder %v4050_v57, 0.0  ;;  %v4378_v50 = vmul.f32 0.01, %v4074_v0  ;;  %v4381_v14 = vmul.f32 0.01, %v4078_v15  ;;  %4970 = vst [vmem:[#allocation52_spill] sm:$0xff] %v4390_v28 }
 0x343   :  { %4960 = vst [vmem:[#allocation42_spill] sm:$0xff] %v4327_v37  ;;  %v4346_v37 = vmul.f32 0.01, %v4058_v7  ;;  %4964 = vst [vmem:[#allocation46_spill] sm:$0xff] %v4362_v11  ;;  %vm2470_vm14 = vcmp.gt.f32.partialorder %v4066_v61, 0.0  ;;  %v4971_v43 = vld [vmem:[#allocation7_spill] sm:$0xff] }
 0x344   :  { %4967 = vst [vmem:[#allocation49_spill] sm:$0xff] %v4378_v50  ;;  %4968 = vst [vmem:[#allocation50_spill] sm:$0xff] %v4381_v14  ;;  %v4397_v39 = vmul.f32 0.01, %v4971_v43  ;;  %v4973_v14 = vld [vmem:[#allocation8_spill] sm:$0xff]  ;;  %vm2474_vm15 = vcmp.gt.f32.partialorder %v4082_v17, 0.0 }
 0x345   :  { %4962 = vst [vmem:[#allocation44_spill] sm:$0xff] %v4346_v37  ;;  %v4365_v37 = vmul.f32 0.01, %v4070_v62  ;;  %v4400_v50 = vmul.f32 0.01, %v4973_v14  ;;  %v4977_v19 = vld [vmem:[#allocation28_spill] sm:$0xff] }
 0x346   :  { %4972 = vst [vmem:[#allocation53_spill] sm:$0xff] %v4397_v39  ;;  %v4409_v24 = vsel %vm2439_vm0, %v3942_v29, %v4977_v19  ;;  %v4979_v54 = vld [vmem:[#allocation10_spill] sm:$0xff]  ;;  %v4981_v15 = vld [vmem:[#allocation12_spill] sm:$0xff]  ;;  %v4982_v0 = vld [vmem:[#allocation29_spill] sm:$0xff]  ;;  %vm4995_vm8 = vcmp.gt.f32.partialorder %v4944_v55, 0.0 }
 0x347   :  { %4965 = vst [vmem:[#allocation47_spill] sm:$0xff] %v4365_v37  ;;  %v4384_v37 = vmul.f32 0.01, %v4082_v17  ;;  %4974 = vst [vmem:[#allocation54_spill] sm:$0xff] %v4400_v50  ;;  %v2542_v28 = vmul.f32 0.01, %v4979_v54  ;;  %v4422_v29 = vsel %vm2440_vm1, %v3946_v56, %v4982_v0 }
 0x348   :  { %4978 = vst [vmem:[#allocation28_spill] sm:$0xff] %v4409_v24  ;;  %v4980_v50 = vld [vmem:[#allocation11_spill] sm:$0xff]  ;;  %4983 = vst [vmem:[#allocation29_spill] sm:$0xff] %v4422_v29  ;;  %vm2478_vm0 = vcmp.gt.f32.partialorder %v4979_v54, 0.0  ;;  %v4984_v19 = vld [vmem:[#allocation13_spill] sm:$0xff] }
 0x349   :  { %4969 = vst [vmem:[#allocation51_spill] sm:$0xff] %v4384_v37  ;;  %v4975_v37 = vld [vmem:[#allocation9_spill] sm:$0xff]  ;;  %v2543_v39 = vmul.f32 0.01, %v4980_v50  ;;  %v2545_v24 = vmul.f32 0.01, %v4984_v19 }
 0x34a   :  { %v4403_v11 = vmul.f32 0.01, %v4975_v37  ;;  %v4985_v37 = vld [vmem:[#allocation21_spill] sm:$0xff]  ;;  %v4986_v43 = vld [vmem:[#allocation18_spill] sm:$0xff]  ;;  %v4989_v0 = vld [vmem:[#allocation19_spill] sm:$0xff] }
 0x34b   :  { %v2546_v14 = vmul.f32 0.01, %v4985_v37  ;;  %v2547_v17 = vmul.f32 0.01, %v4986_v43  ;;  %v4987_v62 = vld [vmem:[#allocation30_spill] sm:$0xff]  ;;  %vm2482_vm1 = vcmp.gt.f32.partialorder %v4985_v37, 0.0 }
 0x34c   :  { %4976 = vst [vmem:[#allocation55_spill] sm:$0xff] %v4403_v11  ;;  %v2544_v11 = vmul.f32 0.01, %v4981_v15  ;;  %v4435_v56 = vsel %vm2441_vm2, %v3950_v41, %v4987_v62  ;;  %vm2484_vm5 = vcmp.gt.f32.partialorder %v4989_v0, 0.0  ;;  %v4990_v29 = vld [vmem:[#allocation22_spill] sm:$0xff]  ;;  %v4991_v50 = vld [vmem:[#allocation23_spill] sm:$0xff] }
 0x34d   :  { %4988 = vst [vmem:[#allocation21_spill] sm:$0xff] %v4435_v56  ;;  %v2548_v19 = vmul.f32 0.01, %v4989_v0  ;;  %v2549_v15 = vmul.f32 0.01, %v4990_v29  ;;  %v4992_v61 = vld [vmem:[#allocation32_spill] sm:$0xff]  ;;  %v4457_v0 = vsel %vm2443_vm4, %v4943_v40, %v4208_v32 }
 0x34e   :  { %v2550_v54 = vmul.f32 0.01, %v4991_v50  ;;  %v4448_v41 = vsel %vm2442_vm3, %v3954_v59, %v4992_v61  ;;  %vm2486_vm2 = vcmp.gt.f32.partialorder %v4991_v50, 0.0  ;;  %v4993_v62 = vld [vmem:[#allocation24_spill] sm:$0xff]  ;;  %v4994_v29 = vld [vmem:[#allocation14_spill] sm:$0xff]  ;;  %vm4996_vm3 = vcmp.gt.f32.partialorder %v4947_v36, 0.0 }
 0x34f   :  { %vm2487_vm6 = vcmp.gt.f32.partialorder %v4993_v62, 0.0  ;;  %v2551_v56 = vmul.f32 0.01, %v4993_v62  ;;  %v4463_v43 = vsel %vm4995_vm8, %v4944_v55, %v4994_v29  ;;  %v4469_v59 = vsel %vm4996_vm3, %v4947_v36, %v4220_v44  ;;  %v4997_v32 = vld [vmem:[#allocation16_spill] sm:$0xff] }
 0x350   :  { %v4475_v61 = vsel %vm2446_vm7, %v3970_v20, %v4223_v26  ;;  %vm4998_vm4 = vcmp.gt.f32.partialorder %v4948_v2, 0.0  ;;  %vm4999_vm8 = vcmp.gt.f32.partialorder %v3978_v46, 0.0  ;;  %vm5000_vm3 = vcmp.gt.f32.partialorder %v3982_v31, 0.0  ;;  %v5001_v20 = vld [vmem:[#allocation33_spill] sm:$0xff] }
 0x351   :  { %v4481_v40 = vsel %vm4998_vm4, %v4948_v2, %v4997_v32  ;;  %v4487_v55 = vsel %vm4999_vm8, %v3978_v46, %v4235_v63  ;;  %v4493_v36 = vsel %vm5000_vm3, %v3982_v31, %v4238_v22  ;;  %v4499_v26 = vsel %vm2450_vm9, %v3986_v34, %v5001_v20  ;;  %v5036_v32 = vld [vmem:[#allocation53_spill] sm:$0xff]  ;;  %v5037_v20 = vld [vmem:[#allocation7_spill] sm:$0xff] }
 0x352   :  { %vm5002_vm7 = vcmp.gt.f32.partialorder %v3990_v35, 0.0  ;;  %vm5003_vm4 = vcmp.gt.f32.partialorder %v3994_v23, 0.0  ;;  %vm5004_vm8 = vcmp.gt.f32.partialorder %v3998_v45, 0.0  ;;  %v4523_v34 = vsel %vm2454_vm10, %v4002_v42, %v4267_v8 }
 0x353   :  { %v4505_v2 = vsel %vm5002_vm7, %v3990_v35, %v4250_v51  ;;  %v4511_v46 = vsel %vm5003_vm4, %v3994_v23, %v4253_v47  ;;  %v4517_v31 = vsel %vm5004_vm8, %v3998_v45, %v4256_v18  ;;  %vm5005_vm9 = vcmp.gt.f32.partialorder %v4006_v25, 0.0  ;;  %v5006_v23 = vld [vmem:[#allocation36_spill] sm:$0xff]  ;;  %v5024_v47 = vld [vmem:[#allocation2_spill] sm:$0xff] }
 0x354   :  { %v4529_v35 = vsel %vm5005_vm9, %v4006_v25, %v4270_v53  ;;  %vm5007_vm3 = vcmp.gt.f32.partialorder %v4010_v48, 0.0  ;;  %vm5008_vm7 = vcmp.gt.f32.partialorder %v4014_v27, 0.0  ;;  %v4547_v42 = vsel %vm2458_vm11, %v4018_v21, %v4288_v52  ;;  %v5009_v25 = vld [vmem:[#allocation38_spill] sm:$0xff]  ;;  %v5013_v21 = vld [vmem:[#allocation40_spill] sm:$0xff]  ;;  %v5026_v53 = vld [vmem:[#allocation3_spill] sm:$0xff] }
 0x355   :  { %v4535_v44 = vsel %vm5007_vm3, %v4010_v48, %v5006_v23  ;;  %v4541_v45 = vsel %vm5008_vm7, %v4014_v27, %v4285_v3  ;;  %vm5010_vm10 = vcmp.gt.f32.partialorder %v4022_v10, 0.0  ;;  %vm5011_vm4 = vcmp.gt.f32.partialorder %v4026_v1, 0.0  ;;  %v5029_v3 = vld [vmem:[#allocation4_spill] sm:$0xff] }
 0x356   :  { %v4553_v18 = vsel %vm5010_vm10, %v4022_v10, %v5009_v25  ;;  %v4559_v48 = vsel %vm5011_vm4, %v4026_v1, %v4303_v13  ;;  %vm5012_vm8 = vcmp.gt.f32.partialorder %v4030_v33, 0.0  ;;  %v4571_v52 = vsel %vm2462_vm12, %v4034_v12, %v5013_v21  ;;  %v5031_v13 = vld [vmem:[#allocation50_spill] sm:$0xff]  ;;  %v5040_v21 = vld [vmem:[#allocation8_spill] sm:$0xff] }
 0x357   :  { %v4565_v27 = vsel %vm5012_vm8, %v4030_v33, %v4306_v16  ;;  %vm5014_vm11 = vcmp.gt.f32.partialorder %v4038_v6, 0.0  ;;  %vm5015_vm9 = vcmp.gt.f32.partialorder %v4042_v4, 0.0  ;;  %v5016_v33 = vld [vmem:[#allocation42_spill] sm:$0xff]  ;;  %vm5017_vm3 = vcmp.gt.f32.partialorder %v4046_v60, 0.0 }
 0x358   :  { %v4577_v10 = vsel %vm5014_vm11, %v4038_v6, %v4321_v38  ;;  %v4583_v1 = vsel %vm5015_vm9, %v4042_v4, %v4324_v30  ;;  %v4589_v63 = vsel %vm5017_vm3, %v4046_v60, %v5016_v33  ;;  %v4595_v12 = vsel %vm2466_vm13, %v4050_v57, %v4340_v49  ;;  %v5019_v4 = vld [vmem:[#allocation44_spill] sm:$0xff]  ;;  %v5023_v57 = vld [vmem:[#allocation46_spill] sm:$0xff]  ;;  %v5034_v49 = vld [vmem:[#allocation51_spill] sm:$0xff] }
 0x359   :  { %vm5018_vm12 = vcmp.gt.f32.partialorder %v4054_v58, 0.0  ;;  %vm5020_vm7 = vcmp.gt.f32.partialorder %v4058_v7, 0.0  ;;  %v5021_v60 = vld [vmem:[#allocation20_spill] sm:$0xff]  ;;  %v4619_v8 = vsel %vm2470_vm14, %v5024_v47, %v5023_v57  ;;  %vm5027_vm13 = vcmp.gt.f32.partialorder %v5026_v53, 0.0  ;;  %v5039_v25 = vld [vmem:[#allocation54_spill] sm:$0xff] }
 0x35a   :  { %v4601_v6 = vsel %vm5018_vm12, %v4054_v58, %v4343_v9  ;;  %v4607_v22 = vsel %vm5020_vm7, %v4058_v7, %v5019_v4  ;;  %vm5022_vm10 = vcmp.gt.f32.partialorder %v5021_v60, 0.0  ;;  %v5025_v58 = vld [vmem:[#allocation47_spill] sm:$0xff]  ;;  %v5028_v7 = vld [vmem:[#allocation49_spill] sm:$0xff]  ;;  %vm5030_vm4 = vcmp.gt.f32.partialorder %v5029_v3, 0.0  ;;  %v5045_v47 = vld [vmem:[#allocation10_spill] sm:$0xff] }
 0x35b   :  { %v4613_v51 = vsel %vm5022_vm10, %v5021_v60, %v4359_v5  ;;  %v4625_v16 = vsel %vm5027_vm13, %v5026_v53, %v5025_v58  ;;  %v2600_v30 = vsel %vm5030_vm4, %v5029_v3, %v5028_v7  ;;  %v5032_v9 = vld [vmem:[#allocation5_spill] sm:$0xff]  ;;  %v5035_v5 = vld [vmem:[#allocation6_spill] sm:$0xff]  ;;  %vm5038_vm14 = vcmp.gt.f32.partialorder %v5037_v20, 0.0  ;;  %v5042_v4 = vld [vmem:[#allocation55_spill] sm:$0xff] }
 0x35c   :  { %vm5033_vm8 = vcmp.gt.f32.partialorder %v5032_v9, 0.0  ;;  %v2602_v29 = vsel %vm2474_vm15, %v5035_v5, %v5034_v49  ;;  %v2603_v23 = vsel %vm5038_vm14, %v5037_v20, %v5036_v32  ;;  %vm5041_vm11 = vcmp.gt.f32.partialorder %v5040_v21, 0.0  ;;  %v5043_v60 = vld [vmem:[#allocation9_spill] sm:$0xff]  ;;  %v5046_v53 = vld [vmem:[#allocation11_spill] sm:$0xff]  ;;  %v5048_v3 = vld [vmem:[#allocation12_spill] sm:$0xff] }
 0x35d   :  { %v2601_v38 = vsel %vm5033_vm8, %v5032_v9, %v5031_v13  ;;  %v2604_v33 = vsel %vm5041_vm11, %v5040_v21, %v5039_v25  ;;  %vm5044_vm9 = vcmp.gt.f32.partialorder %v5043_v60, 0.0  ;;  %v2606_v58 = vsel %vm2478_vm0, %v5045_v47, %v2542_v28  ;;  %v5050_v9 = vld [vmem:[#allocation13_spill] sm:$0xff]  ;;  %v5052_v32 = vld [vmem:[#allocation18_spill] sm:$0xff]  ;;  %v5054_v20 = vld [vmem:[#allocation19_spill] sm:$0xff] }
 0x35e   :  { %v2605_v57 = vsel %vm5044_vm9, %v5043_v60, %v5042_v4  ;;  %vm5047_vm15 = vcmp.gt.f32.partialorder %v5046_v53, 0.0  ;;  %vm5049_vm3 = vcmp.gt.f32.partialorder %v5048_v3, 0.0  ;;  %vm5051_vm12 = vcmp.gt.f32.partialorder %v5050_v9, 0.0  ;;  %v5055_v25 = vld [vmem:[#allocation22_spill] sm:$0xff]  ;;  %v5058_v21 = vld [vmem:[#allocation25_spill] sm:$0xff] }
 0x35f   :  { %v2607_v7 = vsel %vm5047_vm15, %v5046_v53, %v2543_v39  ;;  %v2608_v13 = vsel %vm5049_vm3, %v5048_v3, %v2544_v11  ;;  %v2609_v49 = vsel %vm5051_vm12, %v5050_v9, %v2545_v24  ;;  %v2610_v5 = vsel %vm2482_vm1, %v4985_v37, %v2546_v14  ;;  %v5057_v14 = vld [vmem:[#allocation29_spill] sm:$0xff]  ;;  %v5060_v60 = vld [vmem:[#allocation26_spill] sm:$0xff]  ;;  %v5062_v3 = vld [vmem:[#allocation31_spill] sm:$0xff] }
 0x360   :  { %vm5053_vm7 = vcmp.gt.f32.partialorder %v5052_v32, 0.0  ;;  %v2612_v39 = vsel %vm2484_vm5, %v5054_v20, %v2548_v19  ;;  %vm5056_vm0 = vcmp.gt.f32.partialorder %v5055_v25, 0.0  ;;  %v2614_v24 = vsel %vm2486_vm2, %v4991_v50, %v2550_v54  ;;  %v5061_v19 = vld [vmem:[#allocation27_spill] sm:$0xff]  ;;  %v5064_v50 = vld [vmem:[#allocation17_spill] sm:$0xff] }
 0x361   :  { %v2611_v28 = vsel %vm5053_vm7, %v5052_v32, %v2547_v17  ;;  %v2613_v11 = vsel %vm5056_vm0, %v5055_v25, %v2549_v15  ;;  %v2615_v37 = vsel %vm2487_vm6, %v4993_v62, %v2551_v56  ;;  %v2616_v4 = vmax.f32 %v5058_v21, %v5057_v14  ;;  %v5059_v17 = vld [vmem:[#allocation21_spill] sm:$0xff]  ;;  %v5063_v9 = vld [vmem:[#allocation15_spill] sm:$0xff]  ;;  %v5065_v56 = vld [vmem:[#allocation34_spill] sm:$0xff] }
 0x362   :  { %v2617_v47 = vmax.f32 %v5060_v60, %v5059_v17  ;;  %v2618_v53 = vmax.f32 %v5061_v19, %v4448_v41  ;;  %v2619_v15 = vmax.f32 %v5062_v3, %v4457_v0  ;;  %v2620_v32 = vmax.f32 %v5063_v9, %v4463_v43  ;;  %v5066_v20 = vld [vmem:[#allocation35_spill] sm:$0xff]  ;;  %v5067_v14 = vld [vmem:[#allocation37_spill] sm:$0xff] }
 0x363   :  { %v2621_v54 = vmax.f32 %v5064_v50, %v4469_v59  ;;  %v2622_v62 = vmax.f32 %v5065_v56, %v4475_v61  ;;  %v2623_v25 = vmax.f32 %v5066_v20, %v4481_v40  ;;  %v2624_v21 = vmax.f32 %v5067_v14, %v4487_v55  ;;  %v5068_v41 = vld [vmem:[#allocation39_spill] sm:$0xff]  ;;  %v5069_v0 = vld [vmem:[#allocation41_spill] sm:$0xff]  ;;  %v5072_v61 = vld [vmem:[#allocation48_spill] sm:$0xff] }
 0x364   :  { %v2625_v17 = vmax.f32 %v5068_v41, %v4493_v36  ;;  %v2626_v60 = vmax.f32 %v5069_v0, %v4499_v26  ;;  %v5070_v43 = vld [vmem:[#allocation43_spill] sm:$0xff]  ;;  %v5071_v59 = vld [vmem:[#allocation45_spill] sm:$0xff]  ;;  %v2629_v9 = vmax.f32 %v5072_v61, %v4517_v31  ;;  %v5073_v40 = vld [vmem:[#allocation52_spill] sm:$0xff]  ;;  %v2632_v36 = vmax.f32 %v4535_v44, %v2600_v30 }
 0x365   :  { %v2627_v19 = vmax.f32 %v5070_v43, %v4505_v2  ;;  %v2628_v3 = vmax.f32 %v5071_v59, %v4511_v46  ;;  %v2630_v50 = vmax.f32 %v5073_v40, %v4523_v34  ;;  %v5074_v55 = vld [vmem:[#allocation28_spill] sm:$0xff]  ;;  %v2633_v20 = vmax.f32 %v4541_v45, %v2601_v38 }
 0x366   :  { %v2631_v56 = vmax.f32 %v5074_v55, %v4529_v35  ;;  %v2634_v26 = vmax.f32 %v4547_v42, %v2602_v29  ;;  %v2635_v2 = vmax.f32 %v4553_v18, %v2603_v23  ;;  %v2636_v14 = vmax.f32 %v4559_v48, %v2604_v33 }
 0x367   :  { %v2637_v46 = vmax.f32 %v4565_v27, %v2605_v57  ;;  %v2638_v31 = vmax.f32 %v4571_v52, %v2606_v58  ;;  %v2639_v41 = vmax.f32 %v4577_v10, %v2607_v7  ;;  %v2640_v34 = vmax.f32 %v4583_v1, %v2608_v13 }
 0x368   :  { %v2641_v35 = vmax.f32 %v4589_v63, %v2609_v49  ;;  %v2642_v44 = vmax.f32 %v4595_v12, %v2610_v5  ;;  %v2643_v45 = vmax.f32 %v4601_v6, %v2611_v28  ;;  %v2644_v42 = vmax.f32 %v4607_v22, %v2612_v39 }
 0x369   :  { %v2645_v18 = vmax.f32 %v4613_v51, %v2613_v11  ;;  %v2646_v48 = vmax.f32 %v4619_v8, %v2614_v24  ;;  %v2647_v27 = vmax.f32 %v4625_v16, %v2615_v37  ;;  %v2648_v30 = vmax.f32 %v2616_v4, %v2632_v36 }
 0x36a   :  { %v2649_v52 = vmax.f32 %v2617_v47, %v2633_v20  ;;  %v2650_v38 = vmax.f32 %v2618_v53, %v2634_v26  ;;  %v2651_v10 = vmax.f32 %v2619_v15, %v2635_v2  ;;  %v2652_v29 = vmax.f32 %v2620_v32, %v2636_v14 }
 0x36b   :  { %v2653_v1 = vmax.f32 %v2621_v54, %v2637_v46  ;;  %v2654_v23 = vmax.f32 %v2622_v62, %v2638_v31  ;;  %v2655_v63 = vmax.f32 %v2623_v25, %v2639_v41  ;;  %v2656_v33 = vmax.f32 %v2624_v21, %v2640_v34  ;;  %2664 = vst [vmem:[%s4779_s2] sm:$0xff] %v2648_v30 }
 0x36c   :  { %v2657_v12 = vmax.f32 %v2625_v17, %v2641_v35  ;;  %2665 = vst [vmem:[%s4779_s2 + $0x8] sm:$0xff] %v2649_v52  ;;  %v2658_v6 = vmax.f32 %v2626_v60, %v2642_v44  ;;  %v2659_v22 = vmax.f32 %v2627_v19, %v2643_v45  ;;  %v2660_v51 = vmax.f32 %v2628_v3, %v2644_v42 }
 0x36d   :  { %v2661_v8 = vmax.f32 %v2629_v9, %v2645_v18  ;;  %2666 = vst [vmem:[%s4779_s2 + $0x10] sm:$0xff] %v2650_v38  ;;  %2667 = vst [vmem:[%s4779_s2 + $0x18] sm:$0xff] %v2651_v10  ;;  %v2662_v16 = vmax.f32 %v2630_v50, %v2646_v48  ;;  %v2663_v57 = vmax.f32 %v2631_v56, %v2647_v27 }
 0x36e   :  { %2668 = vst [vmem:[%s4779_s2 + $0x20] sm:$0xff] %v2652_v29  ;;  %2669 = vst [vmem:[%s4779_s2 + $0x28] sm:$0xff] %v2653_v1 }
 0x36f   :  { %2670 = vst [vmem:[%s4779_s2 + $0x30] sm:$0xff] %v2654_v23  ;;  %2671 = vst [vmem:[%s4779_s2 + $0x38] sm:$0xff] %v2655_v63 }
 0x370   :  { %2672 = vst [vmem:[%s4779_s2 + $0x40] sm:$0xff] %v2656_v33  ;;  %2673 = vst [vmem:[%s4779_s2 + $0x48] sm:$0xff] %v2657_v12 }
 0x371   :  { %2674 = vst [vmem:[%s4779_s2 + $0x50] sm:$0xff] %v2658_v6  ;;  %2675 = vst [vmem:[%s4779_s2 + $0x58] sm:$0xff] %v2659_v22 }
 0x372   :  { %2676 = vst [vmem:[%s4779_s2 + $0x60] sm:$0xff] %v2660_v51  ;;  %2677 = vst [vmem:[%s4779_s2 + $0x68] sm:$0xff] %v2661_v8 }
 0x373   :  { %2678 = vst [vmem:[%s4779_s2 + $0x70] sm:$0xff] %v2662_v16  ;;  %2679 = vst [vmem:[%s4779_s2 + $0x78] sm:$0xff] %v2663_v57 }

// kernel: forward.7
= control target key start
LH: loop header
LB: loop body
LE: loop exit
PB: predicated region body
PF: predicated region fallthrough
CT: control target
= control target key end

     0   :  { %vm1223_vm0 = vcmask 588800   ;;  %vm1227_vm1 = vcmask 1043456   ;;  %s2802_s1 = inlined_call_operand.vmem [shape: bf16[200,2048], index: 1, kind: input, shape index: {}]   ;;  %s2803_s0 = inlined_call_operand.vmem [shape: bf16[4,200], index: 0, kind: input, shape index: {}]   ;;  %s2804_s2 = inlined_call_operand.vmem [shape: f32[4,512], index: 2, kind: output, shape index: {}]  }
   0x1   :  { %v13_v0 = vld [vmem:[%s2802_s1] sm:$0xff]  ;;  %v14_v2 = vld [vmem:[%s2802_s1 + $0x8] sm:$0xff] }
   0x2   :  { %v21_v1 = vld [vmem:[%s2802_s1 + $0x40] sm:$0xff]  ;;  %v22_v5 = vld [vmem:[%s2802_s1 + $0x48] sm:$0xff] }
   0x3   :  { %v1799_v3 = vcombine.high %v13_v0, %v21_v1  ;;  %v1798_v4 = vcombine.low %v13_v0, %v21_v1  ;;  %v29_v6 = vld [vmem:[%s2802_s1 + $0x80] sm:$0xff]  ;;  %v1801_v8 = vcombine.high %v14_v2, %v22_v5  ;;  %v1800_v9 = vcombine.low %v14_v2, %v22_v5  ;;  %v30_v11 = vld [vmem:[%s2802_s1 + $0x88] sm:$0xff] }
   0x4   :  { %v37_v7 = vld [vmem:[%s2802_s1 + $0xc0] sm:$0xff]  ;;  %v38_v12 = vld [vmem:[%s2802_s1 + $0xc8] sm:$0xff] }
   0x5   :  { %v1815_v10 = vcombine.high %v29_v6, %v37_v7  ;;  %v45_v13 = vld [vmem:[%s2802_s1 + $0x100] sm:$0xff]  ;;  %1276 = vmatprep.subr.bf16.mxu0 %v1799_v3  ;;  %v1817_v14 = vcombine.high %v30_v11, %v38_v12  ;;  %v46_v16 = vld [vmem:[%s2802_s1 + $0x108] sm:$0xff]  ;;  %1317 = vmatprep.subr.bf16.mxu1 %v1801_v8  ;;  %v1814_v18 = vcombine.low %v29_v6, %v37_v7 }
   0x6   :  { %v53_v15 = vld [vmem:[%s2802_s1 + $0x140] sm:$0xff]  ;;  %v54_v17 = vld [vmem:[%s2802_s1 + $0x148] sm:$0xff]  ;;  %1277 = vmatpush1.bf16.msra.mxu0 %v1798_v4  ;;  %1318 = vmatpush1.bf16.msra.mxu1 %v1800_v9  ;;  %v1816_v19 = vcombine.low %v30_v11, %v38_v12 }
   0x7   :  { %1278 = vmatprep.subr.bf16.mxu0 %v1815_v10  ;;  %v1831_v20 = vcombine.high %v45_v13, %v53_v15  ;;  %1319 = vmatprep.subr.bf16.mxu1 %v1817_v14  ;;  %v1833_v21 = vcombine.high %v46_v16, %v54_v17  ;;  %v61_v22 = vld [vmem:[%s2802_s1 + $0x180] sm:$0xff]  ;;  %v62_v24 = vld [vmem:[%s2802_s1 + $0x188] sm:$0xff]  ;;  %v1830_v26 = vcombine.low %v45_v13, %v53_v15 }
   0x8   :  { %v69_v23 = vld [vmem:[%s2802_s1 + $0x1c0] sm:$0xff]  ;;  %v70_v25 = vld [vmem:[%s2802_s1 + $0x1c8] sm:$0xff]  ;;  %v1832_v27 = vcombine.low %v46_v16, %v54_v17 }
   0x9   :  { %v1847_v28 = vcombine.high %v61_v22, %v69_v23  ;;  %v1849_v29 = vcombine.high %v62_v24, %v70_v25  ;;  %v77_v30 = vld [vmem:[%s2802_s1 + $0x200] sm:$0xff]  ;;  %v78_v32 = vld [vmem:[%s2802_s1 + $0x208] sm:$0xff]  ;;  %v1846_v34 = vcombine.low %v61_v22, %v69_v23  ;;  %v1848_v35 = vcombine.low %v62_v24, %v70_v25 }
   0xa   :  { %1279 = vmatpush1.bf16.msra.mxu0 %v1814_v18  ;;  %1320 = vmatpush1.bf16.msra.mxu1 %v1816_v19  ;;  %v85_v31 = vld [vmem:[%s2802_s1 + $0x240] sm:$0xff]  ;;  %v86_v33 = vld [vmem:[%s2802_s1 + $0x248] sm:$0xff] }
   0xb   :  { %1280 = vmatprep.subr.bf16.mxu0 %v1831_v20  ;;  %1321 = vmatprep.subr.bf16.mxu1 %v1833_v21  ;;  %v1863_v36 = vcombine.high %v77_v30, %v85_v31  ;;  %v1865_v37 = vcombine.high %v78_v32, %v86_v33  ;;  %v93_v38 = vld [vmem:[%s2802_s1 + $0x280] sm:$0xff]  ;;  %v94_v40 = vld [vmem:[%s2802_s1 + $0x288] sm:$0xff]  ;;  %v1862_v42 = vcombine.low %v77_v30, %v85_v31 }
   0xc   :  { %v101_v39 = vld [vmem:[%s2802_s1 + $0x2c0] sm:$0xff]  ;;  %v102_v41 = vld [vmem:[%s2802_s1 + $0x2c8] sm:$0xff]  ;;  %v1864_v44 = vcombine.low %v78_v32, %v86_v33 }
   0xd   :  { %v2131_v43 = vld.sshfl [vmem:[%s2803_s0] sm:$0x33 pattern:$0x76325410]  ;;  %v1879_v45 = vcombine.high %v93_v38, %v101_v39  ;;  %v1881_v46 = vcombine.high %v94_v40, %v102_v41  ;;  %v110_v50 = vld [vmem:[%s2802_s1 + $0x308] sm:$0xff]  ;;  %v1878_v52 = vcombine.low %v93_v38, %v101_v39  ;;  %v1880_v53 = vcombine.low %v94_v40, %v102_v41  ;;  %v15_v40 = vld [vmem:[%s2802_s1 + $0x10] sm:$0xff] }
   0xe   :  { %1281 = vmatpush1.bf16.msra.mxu0 %v1830_v26  ;;  %1322 = vmatpush1.bf16.msra.mxu1 %v1832_v27  ;;  %v109_v47 = vld [vmem:[%s2802_s1 + $0x300] sm:$0xff]  ;;  %v2141_v49 = vcombine.high %v2131_v43, %v2131_v43  ;;  %v118_v51 = vld [vmem:[%s2802_s1 + $0x348] sm:$0xff]  ;;  %v23_v41 = vld [vmem:[%s2802_s1 + $0x50] sm:$0xff] }
   0xf   :  { %1282 = vmatprep.subr.bf16.mxu0 %v1847_v28  ;;  %1323 = vmatprep.subr.bf16.mxu1 %v1849_v29  ;;  %v117_v48 = vld [vmem:[%s2802_s1 + $0x340] sm:$0xff]  ;;  %v1897_v55 = vcombine.high %v110_v50, %v118_v51  ;;  %v126_v58 = vld [vmem:[%s2802_s1 + $0x388] sm:$0xff]  ;;  %v1896_v61 = vcombine.low %v110_v50, %v118_v51  ;;  %v31_v50 = vld [vmem:[%s2802_s1 + $0x90] sm:$0xff] }
  0x10   :  { %2007 = vmatprep.mubr.msk.bf16.mxu0 %vm1223_vm0, %v2141_v49  ;;  %v1895_v54 = vcombine.high %v109_v47, %v117_v48  ;;  %v125_v56 = vld [vmem:[%s2802_s1 + $0x380] sm:$0xff]  ;;  %2009 = vmatprep.mubr.msk.bf16.mxu1 %vm1223_vm0, %v2141_v49  ;;  %v134_v59 = vld [vmem:[%s2802_s1 + $0x3c8] sm:$0xff]  ;;  %v1894_v60 = vcombine.low %v109_v47, %v117_v48  ;;  %v39_v51 = vld [vmem:[%s2802_s1 + $0xd0] sm:$0xff] }
  0x11   :  { %v133_v57 = vld [vmem:[%s2802_s1 + $0x3c0] sm:$0xff]  ;;  %v1913_v63 = vcombine.high %v126_v58, %v134_v59  ;;  %v142_v2 = vld [vmem:[%s2802_s1 + $0x408] sm:$0xff]  ;;  %v1912_v5 = vcombine.low %v126_v58, %v134_v59  ;;  %v47_v58 = vld [vmem:[%s2802_s1 + $0x110] sm:$0xff] }
  0x12   :  { %1283 = vmatpush1.bf16.msra.mxu0 %v1846_v34  ;;  %1324 = vmatpush1.bf16.msra.mxu1 %v1848_v35  ;;  %v1911_v62 = vcombine.high %v125_v56, %v133_v57  ;;  %v141_v0 = vld [vmem:[%s2802_s1 + $0x400] sm:$0xff]  ;;  %v150_v3 = vld [vmem:[%s2802_s1 + $0x448] sm:$0xff]  ;;  %v1910_v4 = vcombine.low %v125_v56, %v133_v57  ;;  %v1819_v56 = vcombine.high %v31_v50, %v39_v51  ;;  %v55_v59 = vld [vmem:[%s2802_s1 + $0x150] sm:$0xff] }
  0x13   :  { %1284 = vmatprep.subr.bf16.mxu0 %v1863_v36  ;;  %1325 = vmatprep.subr.bf16.mxu1 %v1865_v37  ;;  %v149_v1 = vld [vmem:[%s2802_s1 + $0x440] sm:$0xff]  ;;  %v1929_v7 = vcombine.high %v142_v2, %v150_v3  ;;  %v158_v10 = vld [vmem:[%s2802_s1 + $0x488] sm:$0xff]  ;;  %v1928_v13 = vcombine.low %v142_v2, %v150_v3  ;;  %v63_v2 = vld [vmem:[%s2802_s1 + $0x190] sm:$0xff] }
  0x14   :  { %v1927_v6 = vcombine.high %v141_v0, %v149_v1  ;;  %v157_v8 = vld [vmem:[%s2802_s1 + $0x480] sm:$0xff]  ;;  %v166_v11 = vld [vmem:[%s2802_s1 + $0x4c8] sm:$0xff]  ;;  %v1926_v12 = vcombine.low %v141_v0, %v149_v1  ;;  %v1835_v0 = vcombine.high %v47_v58, %v55_v59  ;;  %v71_v3 = vld [vmem:[%s2802_s1 + $0x1d0] sm:$0xff] }
  0x15   :  { %v165_v9 = vld [vmem:[%s2802_s1 + $0x4c0] sm:$0xff]  ;;  %v1945_v15 = vcombine.high %v158_v10, %v166_v11  ;;  %v174_v18 = vld [vmem:[%s2802_s1 + $0x508] sm:$0xff]  ;;  %v1944_v21 = vcombine.low %v158_v10, %v166_v11  ;;  %v79_v10 = vld [vmem:[%s2802_s1 + $0x210] sm:$0xff] }
  0x16   :  { %1285 = vmatpush1.bf16.msra.mxu0 %v1862_v42  ;;  %1326 = vmatpush1.bf16.msra.mxu1 %v1864_v44  ;;  %v1943_v14 = vcombine.high %v157_v8, %v165_v9  ;;  %v173_v16 = vld [vmem:[%s2802_s1 + $0x500] sm:$0xff]  ;;  %v182_v19 = vld [vmem:[%s2802_s1 + $0x548] sm:$0xff]  ;;  %v1942_v20 = vcombine.low %v157_v8, %v165_v9  ;;  %v16_v42 = vld [vmem:[%s2802_s1 + $0x18] sm:$0xff]  ;;  %v1851_v8 = vcombine.high %v63_v2, %v71_v3 }
  0x17   :  { %1286 = vmatprep.subr.bf16.mxu0 %v1879_v45  ;;  %1327 = vmatprep.subr.bf16.mxu1 %v1881_v46  ;;  %v181_v17 = vld [vmem:[%s2802_s1 + $0x540] sm:$0xff]  ;;  %v1961_v23 = vcombine.high %v174_v18, %v182_v19  ;;  %v190_v26 = vld [vmem:[%s2802_s1 + $0x588] sm:$0xff]  ;;  %v1960_v29 = vcombine.low %v174_v18, %v182_v19  ;;  %v24_v44 = vld [vmem:[%s2802_s1 + $0x58] sm:$0xff]  ;;  %v1803_v46 = vcombine.high %v15_v40, %v23_v41 }
  0x18   :  { %v1959_v22 = vcombine.high %v173_v16, %v181_v17  ;;  %v189_v24 = vld [vmem:[%s2802_s1 + $0x580] sm:$0xff]  ;;  %v198_v27 = vld [vmem:[%s2802_s1 + $0x5c8] sm:$0xff]  ;;  %v1958_v28 = vcombine.low %v173_v16, %v181_v17  ;;  %v1805_v48 = vcombine.high %v16_v42, %v24_v44  ;;  %v87_v11 = vld [vmem:[%s2802_s1 + $0x250] sm:$0xff] }
  0x19   :  { %v197_v25 = vld [vmem:[%s2802_s1 + $0x5c0] sm:$0xff]  ;;  %v1977_v31 = vcombine.high %v190_v26, %v198_v27  ;;  %v206_v33 = vld [vmem:[%s2802_s1 + $0x608] sm:$0xff]  ;;  %v1976_v35 = vcombine.low %v190_v26, %v198_v27  ;;  %v1867_v16 = vcombine.high %v79_v10, %v87_v11  ;;  %v95_v18 = vld [vmem:[%s2802_s1 + $0x290] sm:$0xff] }
  0x1a   :  { %1287 = vmatpush1.bf16.msra.mxu0 %v1878_v52  ;;  %1328 = vmatpush1.bf16.msra.mxu1 %v1880_v53  ;;  %v1975_v30 = vcombine.high %v189_v24, %v197_v25  ;;  %v205_v32 = vld [vmem:[%s2802_s1 + $0x600] sm:$0xff]  ;;  %v1974_v34 = vcombine.low %v189_v24, %v197_v25  ;;  %v1993_v38 = vcombine.high %v206_v33, %v206_v33  ;;  %v32_v52 = vld [vmem:[%s2802_s1 + $0x98] sm:$0xff]  ;;  %v103_v19 = vld [vmem:[%s2802_s1 + $0x2d0] sm:$0xff] }
  0x1b   :  { %1288 = vmatprep.subr.bf16.mxu0 %v1895_v54  ;;  %1329 = vmatprep.subr.bf16.mxu1 %v1897_v55  ;;  %v1991_v36 = vcombine.high %v205_v32, %v205_v32  ;;  %v1990_v37 = vcombine.low %v205_v32, %v205_v32  ;;  %v1992_v39 = vcombine.low %v206_v33, %v206_v33  ;;  %v40_v53 = vld [vmem:[%s2802_s1 + $0xd8] sm:$0xff]  ;;  %v111_v26 = vld [vmem:[%s2802_s1 + $0x310] sm:$0xff] }
  0x1c   :  { %v1802_v54 = vcombine.low %v15_v40, %v23_v41  ;;  %v1804_v55 = vcombine.low %v16_v42, %v24_v44  ;;  %v1821_v57 = vcombine.high %v32_v52, %v40_v53  ;;  %v1883_v24 = vcombine.high %v95_v18, %v103_v19  ;;  %v119_v27 = vld [vmem:[%s2802_s1 + $0x350] sm:$0xff] }
  0x1d   :  { %v1229_v45 = vsel %vm1227_vm1, %v1990_v37, 0  ;;  %v1235_v47 = vsel %vm1227_vm1, %v1992_v39, 0  ;;  %v1899_v32 = vcombine.high %v111_v26, %v119_v27  ;;  %v136_v37 = vld [vmem:[%s2802_s1 + $0x3d8] sm:$0xff]  ;;  %v143_v42 = vld [vmem:[%s2802_s1 + $0x410] sm:$0xff] }
  0x1e   :  { %1289 = vmatpush1.bf16.msra.mxu0 %v1894_v60  ;;  %1330 = vmatpush1.bf16.msra.mxu1 %v1896_v61  ;;  %v48_v60 = vld [vmem:[%s2802_s1 + $0x118] sm:$0xff]  ;;  %v151_v44 = vld [vmem:[%s2802_s1 + $0x450] sm:$0xff] }
  0x1f   :  { %1290 = vmatprep.subr.bf16.mxu0 %v1911_v62  ;;  %1331 = vmatprep.subr.bf16.mxu1 %v1913_v63  ;;  %v56_v61 = vld [vmem:[%s2802_s1 + $0x158] sm:$0xff]  ;;  %v1818_v62 = vcombine.low %v31_v50, %v39_v51  ;;  %v1820_v63 = vcombine.low %v32_v52, %v40_v53  ;;  %v1931_v50 = vcombine.high %v143_v42, %v151_v44  ;;  %v159_v52 = vld [vmem:[%s2802_s1 + $0x490] sm:$0xff] }
  0x20   :  { %v1837_v1 = vcombine.high %v48_v60, %v56_v61  ;;  %v167_v53 = vld [vmem:[%s2802_s1 + $0x4d0] sm:$0xff] }
  0x22   :  { %1291 = vmatpush1.bf16.msra.mxu0 %v1910_v4  ;;  %1332 = vmatpush1.bf16.msra.mxu1 %v1912_v5  ;;  %v64_v4 = vld [vmem:[%s2802_s1 + $0x198] sm:$0xff] }
  0x23   :  { %1292 = vmatprep.subr.bf16.mxu0 %v1927_v6  ;;  %1333 = vmatprep.subr.bf16.mxu1 %v1929_v7  ;;  %v72_v5 = vld [vmem:[%s2802_s1 + $0x1d8] sm:$0xff]  ;;  %v1834_v6 = vcombine.low %v47_v58, %v55_v59  ;;  %v1836_v7 = vcombine.low %v48_v60, %v56_v61  ;;  %v1947_v58 = vcombine.high %v159_v52, %v167_v53  ;;  %v175_v60 = vld [vmem:[%s2802_s1 + $0x510] sm:$0xff] }
  0x24   :  { %v1853_v9 = vcombine.high %v64_v4, %v72_v5  ;;  %v183_v61 = vld [vmem:[%s2802_s1 + $0x550] sm:$0xff] }
  0x26   :  { %1293 = vmatpush1.bf16.msra.mxu0 %v1926_v12  ;;  %1334 = vmatpush1.bf16.msra.mxu1 %v1928_v13  ;;  %v80_v12 = vld [vmem:[%s2802_s1 + $0x218] sm:$0xff] }
  0x27   :  { %1294 = vmatprep.subr.bf16.mxu0 %v1943_v14  ;;  %1335 = vmatprep.subr.bf16.mxu1 %v1945_v15  ;;  %v88_v13 = vld [vmem:[%s2802_s1 + $0x258] sm:$0xff]  ;;  %v1850_v14 = vcombine.low %v63_v2, %v71_v3  ;;  %v1852_v15 = vcombine.low %v64_v4, %v72_v5  ;;  %v1963_v2 = vcombine.high %v175_v60, %v183_v61  ;;  %v191_v4 = vld [vmem:[%s2802_s1 + $0x590] sm:$0xff] }
  0x28   :  { %v1869_v17 = vcombine.high %v80_v12, %v88_v13  ;;  %v199_v5 = vld [vmem:[%s2802_s1 + $0x5d0] sm:$0xff] }
  0x2a   :  { %1295 = vmatpush1.bf16.msra.mxu0 %v1942_v20  ;;  %1336 = vmatpush1.bf16.msra.mxu1 %v1944_v21  ;;  %v96_v20 = vld [vmem:[%s2802_s1 + $0x298] sm:$0xff] }
  0x2b   :  { %1296 = vmatprep.subr.bf16.mxu0 %v1959_v22  ;;  %1337 = vmatprep.subr.bf16.mxu1 %v1961_v23  ;;  %v104_v21 = vld [vmem:[%s2802_s1 + $0x2d8] sm:$0xff]  ;;  %v1866_v22 = vcombine.low %v79_v10, %v87_v11  ;;  %v1868_v23 = vcombine.low %v80_v12, %v88_v13  ;;  %v1979_v10 = vcombine.high %v191_v4, %v199_v5  ;;  %v207_v12 = vld [vmem:[%s2802_s1 + $0x610] sm:$0xff] }
  0x2c   :  { %v1885_v25 = vcombine.high %v96_v20, %v104_v21  ;;  %v208_v13 = vld [vmem:[%s2802_s1 + $0x618] sm:$0xff] }
  0x2e   :  { %1297 = vmatpush1.bf16.msra.mxu0 %v1958_v28  ;;  %1338 = vmatpush1.bf16.msra.mxu1 %v1960_v29  ;;  %v112_v28 = vld [vmem:[%s2802_s1 + $0x318] sm:$0xff] }
  0x2f   :  { %1298 = vmatprep.subr.bf16.mxu0 %v1975_v30  ;;  %1339 = vmatprep.subr.bf16.mxu1 %v1977_v31  ;;  %v120_v29 = vld [vmem:[%s2802_s1 + $0x358] sm:$0xff]  ;;  %v1882_v30 = vcombine.low %v95_v18, %v103_v19  ;;  %v1884_v31 = vcombine.low %v96_v20, %v104_v21  ;;  %v1997_v18 = vcombine.high %v208_v13, %v208_v13  ;;  %v17_v20 = vld [vmem:[%s2802_s1 + $0x20] sm:$0xff] }
  0x30   :  { %v1901_v33 = vcombine.high %v112_v28, %v120_v29  ;;  %v1900_v39 = vcombine.low %v112_v28, %v120_v29  ;;  %v1996_v19 = vcombine.low %v208_v13, %v208_v13  ;;  %v25_v21 = vld [vmem:[%s2802_s1 + $0x60] sm:$0xff] }
  0x31   :  { %v33_v28 = vld [vmem:[%s2802_s1 + $0xa0] sm:$0xff] }
  0x32   :  { %1299 = vmatpush1.bf16.msra.mxu0 %v1974_v34  ;;  %1340 = vmatpush1.bf16.msra.mxu1 %v1976_v35  ;;  %v127_v34 = vld [vmem:[%s2802_s1 + $0x390] sm:$0xff]  ;;  %v41_v29 = vld [vmem:[%s2802_s1 + $0xe0] sm:$0xff] }
  0x33   :  { %2006 = vmatprep.subr.msk.bf16.mxu0 %vm1227_vm1, %v1991_v36  ;;  %2008 = vmatprep.subr.msk.bf16.mxu1 %vm1227_vm1, %v1993_v38  ;;  %v135_v35 = vld [vmem:[%s2802_s1 + $0x3d0] sm:$0xff]  ;;  %v128_v36 = vld [vmem:[%s2802_s1 + $0x398] sm:$0xff]  ;;  %v1898_v38 = vcombine.low %v111_v26, %v119_v27  ;;  %v1247_v26 = vsel %vm1227_vm1, %v1996_v19, 0 }
  0x34   :  { %v1915_v40 = vcombine.high %v127_v34, %v135_v35  ;;  %v1917_v41 = vcombine.high %v128_v36, %v136_v37 }
  0x36   :  { %1301 = vmatpush1.bf16.msra.mxu0 %v1229_v45  ;;  %1342 = vmatpush1.bf16.msra.mxu1 %v1235_v47  ;;  %v144_v45 = vld [vmem:[%s2802_s1 + $0x418] sm:$0xff]  ;;  %v1914_v47 = vcombine.low %v127_v34, %v135_v35  ;;  %v1823_v34 = vcombine.high %v33_v28, %v41_v29 }
  0x37   :  { %1358 = vmatprep.subr.bf16.mxu0 %v1803_v46  ;;  %1399 = vmatprep.subr.bf16.mxu1 %v1805_v48  ;;  %v152_v46 = vld [vmem:[%s2802_s1 + $0x458] sm:$0xff]  ;;  %v1916_v48 = vcombine.low %v128_v36, %v136_v37  ;;  %v49_v36 = vld [vmem:[%s2802_s1 + $0x120] sm:$0xff] }
  0x38   :  { %v1933_v51 = vcombine.high %v144_v45, %v152_v46  ;;  %v57_v37 = vld [vmem:[%s2802_s1 + $0x160] sm:$0xff] }
  0x39   :  { %1309 = vmatmul.mubr.bf16.vlgmr.msra.gmra.mrb[0].mxu0 %v2131_v43  ;;  %1350 = vmatmul.mubr.bf16.vlgmr.msra.gmra.mrb[0].mxu1 %v2131_v43 }
  0x3a   :  { %1359 = vmatpush1.bf16.msra.mxu0 %v1802_v54  ;;  %1400 = vmatpush1.bf16.msra.mxu1 %v1804_v55  ;;  %v160_v54 = vld [vmem:[%s2802_s1 + $0x498] sm:$0xff] }
  0x3b   :  { %1360 = vmatprep.subr.bf16.mxu0 %v1819_v56  ;;  %1401 = vmatprep.subr.bf16.mxu1 %v1821_v57  ;;  %v168_v55 = vld [vmem:[%s2802_s1 + $0x4d8] sm:$0xff]  ;;  %v1930_v56 = vcombine.low %v143_v42, %v151_v44  ;;  %v1932_v57 = vcombine.low %v144_v45, %v152_v46  ;;  %v1839_v42 = vcombine.high %v49_v36, %v57_v37  ;;  %v65_v45 = vld [vmem:[%s2802_s1 + $0x1a0] sm:$0xff] }
  0x3c   :  { %2011 = vmatprep.mubr.msk.bf16.mxu0 %vm1223_vm0, %v2141_v49  ;;  %2013 = vmatprep.mubr.msk.bf16.mxu1 %vm1223_vm0, %v2141_v49  ;;  %v1949_v59 = vcombine.high %v160_v54, %v168_v55  ;;  %v73_v46 = vld [vmem:[%s2802_s1 + $0x1e0] sm:$0xff] }
  0x3e   :  { %1361 = vmatpush1.bf16.msra.mxu0 %v1818_v62  ;;  %1402 = vmatpush1.bf16.msra.mxu1 %v1820_v63  ;;  %v176_v62 = vld [vmem:[%s2802_s1 + $0x518] sm:$0xff] }
  0x3f   :  { %1362 = vmatprep.subr.bf16.mxu0 %v1835_v0  ;;  %1403 = vmatprep.subr.bf16.mxu1 %v1837_v1  ;;  %v184_v63 = vld [vmem:[%s2802_s1 + $0x558] sm:$0xff]  ;;  %v1946_v0 = vcombine.low %v159_v52, %v167_v53  ;;  %v1948_v1 = vcombine.low %v160_v54, %v168_v55  ;;  %v1855_v52 = vcombine.high %v65_v45, %v73_v46  ;;  %v81_v54 = vld [vmem:[%s2802_s1 + $0x220] sm:$0xff] }
  0x40   :  { %v1965_v3 = vcombine.high %v176_v62, %v184_v63  ;;  %v89_v55 = vld [vmem:[%s2802_s1 + $0x260] sm:$0xff] }
  0x42   :  { %1363 = vmatpush1.bf16.msra.mxu0 %v1834_v6  ;;  %1404 = vmatpush1.bf16.msra.mxu1 %v1836_v7  ;;  %v192_v6 = vld [vmem:[%s2802_s1 + $0x598] sm:$0xff] }
  0x43   :  { %1364 = vmatprep.subr.bf16.mxu0 %v1851_v8  ;;  %1405 = vmatprep.subr.bf16.mxu1 %v1853_v9  ;;  %v200_v7 = vld [vmem:[%s2802_s1 + $0x5d8] sm:$0xff]  ;;  %v1962_v8 = vcombine.low %v175_v60, %v183_v61  ;;  %v1964_v9 = vcombine.low %v176_v62, %v184_v63  ;;  %v1871_v60 = vcombine.high %v81_v54, %v89_v55  ;;  %v97_v62 = vld [vmem:[%s2802_s1 + $0x2a0] sm:$0xff] }
  0x44   :  { %v1981_v11 = vcombine.high %v192_v6, %v200_v7  ;;  %v105_v63 = vld [vmem:[%s2802_s1 + $0x2e0] sm:$0xff] }
  0x46   :  { %1365 = vmatpush1.bf16.msra.mxu0 %v1850_v14  ;;  %1406 = vmatpush1.bf16.msra.mxu1 %v1852_v15  ;;  %v1978_v14 = vcombine.low %v191_v4, %v199_v5  ;;  %v1980_v15 = vcombine.low %v192_v6, %v200_v7  ;;  %v1887_v4 = vcombine.high %v97_v62, %v105_v63  ;;  %v113_v6 = vld [vmem:[%s2802_s1 + $0x320] sm:$0xff] }
  0x47   :  { %1366 = vmatprep.subr.bf16.mxu0 %v1867_v16  ;;  %1407 = vmatprep.subr.bf16.mxu1 %v1869_v17  ;;  %v1995_v16 = vcombine.high %v207_v12, %v207_v12  ;;  %v1994_v17 = vcombine.low %v207_v12, %v207_v12  ;;  %v121_v7 = vld [vmem:[%s2802_s1 + $0x360] sm:$0xff] }
  0x48   :  { %v1903_v12 = vcombine.high %v113_v6, %v121_v7 }
  0x4a   :  { %1367 = vmatpush1.bf16.msra.mxu0 %v1866_v22  ;;  %1408 = vmatpush1.bf16.msra.mxu1 %v1868_v23  ;;  %v18_v22 = vld [vmem:[%s2802_s1 + $0x28] sm:$0xff] }
  0x4b   :  { %1368 = vmatprep.subr.bf16.mxu0 %v1883_v24  ;;  %1409 = vmatprep.subr.bf16.mxu1 %v1885_v25  ;;  %v26_v23 = vld [vmem:[%s2802_s1 + $0x68] sm:$0xff]  ;;  %v1241_v24 = vsel %vm1227_vm1, %v1994_v17, 0  ;;  %v1807_v25 = vcombine.high %v17_v20, %v25_v21 }
  0x4c   :  { %v1809_v27 = vcombine.high %v18_v22, %v26_v23  ;;  %v138_v17 = vld [vmem:[%s2802_s1 + $0x3e8] sm:$0xff] }
  0x4e   :  { %1369 = vmatpush1.bf16.msra.mxu0 %v1882_v30  ;;  %1410 = vmatpush1.bf16.msra.mxu1 %v1884_v31  ;;  %v34_v30 = vld [vmem:[%s2802_s1 + $0xa8] sm:$0xff] }
  0x4f   :  { %1370 = vmatprep.subr.bf16.mxu0 %v1899_v32  ;;  %1411 = vmatprep.subr.bf16.mxu1 %v1901_v33  ;;  %v42_v31 = vld [vmem:[%s2802_s1 + $0xe8] sm:$0xff]  ;;  %v1806_v32 = vcombine.low %v17_v20, %v25_v21  ;;  %v1808_v33 = vcombine.low %v18_v22, %v26_v23  ;;  %v145_v22 = vld [vmem:[%s2802_s1 + $0x420] sm:$0xff] }
  0x50   :  { %v1825_v35 = vcombine.high %v34_v30, %v42_v31  ;;  %v153_v23 = vld [vmem:[%s2802_s1 + $0x460] sm:$0xff] }
  0x52   :  { %1371 = vmatpush1.bf16.msra.mxu0 %v1898_v38  ;;  %1412 = vmatpush1.bf16.msra.mxu1 %v1900_v39  ;;  %v50_v38 = vld [vmem:[%s2802_s1 + $0x128] sm:$0xff] }
  0x53   :  { %1372 = vmatprep.subr.bf16.mxu0 %v1915_v40  ;;  %1413 = vmatprep.subr.bf16.mxu1 %v1917_v41  ;;  %v58_v39 = vld [vmem:[%s2802_s1 + $0x168] sm:$0xff]  ;;  %v1822_v40 = vcombine.low %v33_v28, %v41_v29  ;;  %v1824_v41 = vcombine.low %v34_v30, %v42_v31  ;;  %v1935_v28 = vcombine.high %v145_v22, %v153_v23  ;;  %v161_v30 = vld [vmem:[%s2802_s1 + $0x4a0] sm:$0xff] }
  0x54   :  { %v1841_v44 = vcombine.high %v50_v38, %v58_v39  ;;  %v169_v31 = vld [vmem:[%s2802_s1 + $0x4e0] sm:$0xff] }
  0x56   :  { %1373 = vmatpush1.bf16.msra.mxu0 %v1914_v47  ;;  %1414 = vmatpush1.bf16.msra.mxu1 %v1916_v48  ;;  %v66_v47 = vld [vmem:[%s2802_s1 + $0x1a8] sm:$0xff] }
  0x57   :  { %1374 = vmatprep.subr.bf16.mxu0 %v1931_v50  ;;  %1415 = vmatprep.subr.bf16.mxu1 %v1933_v51  ;;  %v74_v48 = vld [vmem:[%s2802_s1 + $0x1e8] sm:$0xff]  ;;  %v1838_v50 = vcombine.low %v49_v36, %v57_v37  ;;  %v1840_v51 = vcombine.low %v50_v38, %v58_v39  ;;  %v1951_v36 = vcombine.high %v161_v30, %v169_v31  ;;  %v177_v38 = vld [vmem:[%s2802_s1 + $0x520] sm:$0xff] }
  0x58   :  { %v1857_v53 = vcombine.high %v66_v47, %v74_v48  ;;  %v185_v39 = vld [vmem:[%s2802_s1 + $0x560] sm:$0xff] }
  0x5a   :  { %1375 = vmatpush1.bf16.msra.mxu0 %v1930_v56  ;;  %1416 = vmatpush1.bf16.msra.mxu1 %v1932_v57  ;;  %v82_v56 = vld [vmem:[%s2802_s1 + $0x228] sm:$0xff] }
  0x5b   :  { %1376 = vmatprep.subr.bf16.mxu0 %v1947_v58  ;;  %1417 = vmatprep.subr.bf16.mxu1 %v1949_v59  ;;  %v90_v57 = vld [vmem:[%s2802_s1 + $0x268] sm:$0xff]  ;;  %v1854_v58 = vcombine.low %v65_v45, %v73_v46  ;;  %v1856_v59 = vcombine.low %v66_v47, %v74_v48  ;;  %v1967_v45 = vcombine.high %v177_v38, %v185_v39  ;;  %v193_v47 = vld [vmem:[%s2802_s1 + $0x5a0] sm:$0xff] }
  0x5c   :  { %v1873_v61 = vcombine.high %v82_v56, %v90_v57  ;;  %v201_v48 = vld [vmem:[%s2802_s1 + $0x5e0] sm:$0xff] }
  0x5e   :  { %1377 = vmatpush1.bf16.msra.mxu0 %v1946_v0  ;;  %1418 = vmatpush1.bf16.msra.mxu1 %v1948_v1  ;;  %v98_v0 = vld [vmem:[%s2802_s1 + $0x2a8] sm:$0xff] }
  0x5f   :  { %1378 = vmatprep.subr.bf16.mxu0 %v1963_v2  ;;  %1419 = vmatprep.subr.bf16.mxu1 %v1965_v3  ;;  %v106_v1 = vld [vmem:[%s2802_s1 + $0x2e8] sm:$0xff]  ;;  %v1870_v2 = vcombine.low %v81_v54, %v89_v55  ;;  %v1872_v3 = vcombine.low %v82_v56, %v90_v57  ;;  %v1983_v54 = vcombine.high %v193_v47, %v201_v48  ;;  %v209_v56 = vld [vmem:[%s2802_s1 + $0x620] sm:$0xff] }
  0x60   :  { %v1889_v5 = vcombine.high %v98_v0, %v106_v1  ;;  %v210_v57 = vld [vmem:[%s2802_s1 + $0x628] sm:$0xff] }
  0x62   :  { %1379 = vmatpush1.bf16.msra.mxu0 %v1962_v8  ;;  %1420 = vmatpush1.bf16.msra.mxu1 %v1964_v9  ;;  %v114_v8 = vld [vmem:[%s2802_s1 + $0x328] sm:$0xff] }
  0x63   :  { %1380 = vmatprep.subr.bf16.mxu0 %v1979_v10  ;;  %1421 = vmatprep.subr.bf16.mxu1 %v1981_v11  ;;  %v122_v9 = vld [vmem:[%s2802_s1 + $0x368] sm:$0xff]  ;;  %v1886_v10 = vcombine.low %v97_v62, %v105_v63  ;;  %v1888_v11 = vcombine.low %v98_v0, %v106_v1  ;;  %v2001_v62 = vcombine.high %v210_v57, %v210_v57  ;;  %v19_v0 = vld [vmem:[%s2802_s1 + $0x30] sm:$0xff] }
  0x64   :  { %v1905_v13 = vcombine.high %v114_v8, %v122_v9  ;;  %v1904_v19 = vcombine.low %v114_v8, %v122_v9  ;;  %v2000_v63 = vcombine.low %v210_v57, %v210_v57  ;;  %v27_v1 = vld [vmem:[%s2802_s1 + $0x70] sm:$0xff] }
  0x65   :  { %v35_v8 = vld [vmem:[%s2802_s1 + $0xb0] sm:$0xff] }
  0x66   :  { %1381 = vmatpush1.bf16.msra.mxu0 %v1978_v14  ;;  %1422 = vmatpush1.bf16.msra.mxu1 %v1980_v15  ;;  %v129_v14 = vld [vmem:[%s2802_s1 + $0x3a0] sm:$0xff]  ;;  %v43_v9 = vld [vmem:[%s2802_s1 + $0xf0] sm:$0xff] }
  0x67   :  { %2010 = vmatprep.subr.msk.bf16.mxu0 %vm1227_vm1, %v1995_v16  ;;  %2012 = vmatprep.subr.msk.bf16.mxu1 %vm1227_vm1, %v1997_v18  ;;  %v137_v15 = vld [vmem:[%s2802_s1 + $0x3e0] sm:$0xff]  ;;  %v130_v16 = vld [vmem:[%s2802_s1 + $0x3a8] sm:$0xff]  ;;  %v1902_v18 = vcombine.low %v113_v6, %v121_v7  ;;  %v1259_v6 = vsel %vm1227_vm1, %v2000_v63, 0  ;;  %v139_v57 = vld [vmem:[%s2802_s1 + $0x3f0] sm:$0xff] }
  0x68   :  { %v1919_v20 = vcombine.high %v129_v14, %v137_v15  ;;  %v1921_v21 = vcombine.high %v130_v16, %v138_v17 }
  0x6a   :  { %1383 = vmatpush1.bf16.msra.mxu0 %v1241_v24  ;;  %1424 = vmatpush1.bf16.msra.mxu1 %v1247_v26  ;;  %v146_v24 = vld [vmem:[%s2802_s1 + $0x428] sm:$0xff]  ;;  %v1918_v26 = vcombine.low %v129_v14, %v137_v15  ;;  %v1827_v14 = vcombine.high %v35_v8, %v43_v9 }
  0x6b   :  { %1440 = vmatprep.subr.bf16.mxu0 %v1807_v25  ;;  %1481 = vmatprep.subr.bf16.mxu1 %v1809_v27  ;;  %v154_v25 = vld [vmem:[%s2802_s1 + $0x468] sm:$0xff]  ;;  %v1920_v27 = vcombine.low %v130_v16, %v138_v17  ;;  %v51_v16 = vld [vmem:[%s2802_s1 + $0x130] sm:$0xff] }
  0x6c   :  { %v1937_v29 = vcombine.high %v146_v24, %v154_v25  ;;  %v59_v17 = vld [vmem:[%s2802_s1 + $0x170] sm:$0xff] }
  0x6d   :  { %1391 = vmatmul.mubr.bf16.vlgmr.msra.gmra.mrb[4].mxu0 %v2131_v43  ;;  %1432 = vmatmul.mubr.bf16.vlgmr.msra.gmra.mrb[4].mxu1 %v2131_v43 }
  0x6e   :  { %1441 = vmatpush1.bf16.msra.mxu0 %v1806_v32  ;;  %1482 = vmatpush1.bf16.msra.mxu1 %v1808_v33  ;;  %v162_v32 = vld [vmem:[%s2802_s1 + $0x4a8] sm:$0xff] }
  0x6f   :  { %1442 = vmatprep.subr.bf16.mxu0 %v1823_v34  ;;  %1483 = vmatprep.subr.bf16.mxu1 %v1825_v35  ;;  %v170_v33 = vld [vmem:[%s2802_s1 + $0x4e8] sm:$0xff]  ;;  %v1934_v34 = vcombine.low %v145_v22, %v153_v23  ;;  %v1936_v35 = vcombine.low %v146_v24, %v154_v25  ;;  %v1843_v22 = vcombine.high %v51_v16, %v59_v17  ;;  %v67_v24 = vld [vmem:[%s2802_s1 + $0x1b0] sm:$0xff] }
  0x70   :  { %2015 = vmatprep.mubr.msk.bf16.mxu0 %vm1223_vm0, %v2141_v49  ;;  %2017 = vmatprep.mubr.msk.bf16.mxu1 %vm1223_vm0, %v2141_v49  ;;  %v1953_v37 = vcombine.high %v162_v32, %v170_v33  ;;  %v75_v25 = vld [vmem:[%s2802_s1 + $0x1f0] sm:$0xff] }
  0x72   :  { %1443 = vmatpush1.bf16.msra.mxu0 %v1822_v40  ;;  %1484 = vmatpush1.bf16.msra.mxu1 %v1824_v41  ;;  %v178_v40 = vld [vmem:[%s2802_s1 + $0x528] sm:$0xff] }
  0x73   :  { %1444 = vmatprep.subr.bf16.mxu0 %v1839_v42  ;;  %1485 = vmatprep.subr.bf16.mxu1 %v1841_v44  ;;  %v186_v41 = vld [vmem:[%s2802_s1 + $0x568] sm:$0xff]  ;;  %v1950_v42 = vcombine.low %v161_v30, %v169_v31  ;;  %v1952_v44 = vcombine.low %v162_v32, %v170_v33  ;;  %v83_v31 = vld [vmem:[%s2802_s1 + $0x230] sm:$0xff]  ;;  %v92_v33 = vld [vmem:[%s2802_s1 + $0x278] sm:$0xff] }
  0x74   :  { %v1969_v46 = vcombine.high %v178_v40, %v186_v41  ;;  %v91_v32 = vld [vmem:[%s2802_s1 + $0x270] sm:$0xff] }
  0x76   :  { %1445 = vmatpush1.bf16.msra.mxu0 %v1838_v50  ;;  %1486 = vmatpush1.bf16.msra.mxu1 %v1840_v51  ;;  %v194_v50 = vld [vmem:[%s2802_s1 + $0x5a8] sm:$0xff] }
  0x77   :  { %1446 = vmatprep.subr.bf16.mxu0 %v1855_v52  ;;  %1487 = vmatprep.subr.bf16.mxu1 %v1857_v53  ;;  %v202_v51 = vld [vmem:[%s2802_s1 + $0x5e8] sm:$0xff]  ;;  %v1966_v52 = vcombine.low %v177_v38, %v185_v39  ;;  %v1968_v53 = vcombine.low %v178_v40, %v186_v41  ;;  %v99_v38 = vld [vmem:[%s2802_s1 + $0x2b0] sm:$0xff]  ;;  %v100_v40 = vld [vmem:[%s2802_s1 + $0x2b8] sm:$0xff] }
  0x78   :  { %v1985_v55 = vcombine.high %v194_v50, %v202_v51  ;;  %v107_v39 = vld [vmem:[%s2802_s1 + $0x2f0] sm:$0xff]  ;;  %v108_v41 = vld [vmem:[%s2802_s1 + $0x2f8] sm:$0xff] }
  0x7a   :  { %1447 = vmatpush1.bf16.msra.mxu0 %v1854_v58  ;;  %1488 = vmatpush1.bf16.msra.mxu1 %v1856_v59  ;;  %v1982_v58 = vcombine.low %v193_v47, %v201_v48  ;;  %v1984_v59 = vcombine.low %v194_v50, %v202_v51  ;;  %v115_v47 = vld [vmem:[%s2802_s1 + $0x330] sm:$0xff]  ;;  %v116_v50 = vld [vmem:[%s2802_s1 + $0x338] sm:$0xff] }
  0x7b   :  { %1448 = vmatprep.subr.bf16.mxu0 %v1871_v60  ;;  %1489 = vmatprep.subr.bf16.mxu1 %v1873_v61  ;;  %v1999_v60 = vcombine.high %v209_v56, %v209_v56  ;;  %v1998_v61 = vcombine.low %v209_v56, %v209_v56  ;;  %v123_v48 = vld [vmem:[%s2802_s1 + $0x370] sm:$0xff]  ;;  %v124_v51 = vld [vmem:[%s2802_s1 + $0x378] sm:$0xff] }
  0x7c   :  { %v131_v56 = vld [vmem:[%s2802_s1 + $0x3b0] sm:$0xff] }
  0x7e   :  { %1449 = vmatpush1.bf16.msra.mxu0 %v1870_v2  ;;  %1490 = vmatpush1.bf16.msra.mxu1 %v1872_v3  ;;  %v20_v2 = vld [vmem:[%s2802_s1 + $0x38] sm:$0xff] }
  0x7f   :  { %1450 = vmatprep.subr.bf16.mxu0 %v1887_v4  ;;  %1491 = vmatprep.subr.bf16.mxu1 %v1889_v5  ;;  %v28_v3 = vld [vmem:[%s2802_s1 + $0x78] sm:$0xff]  ;;  %v1253_v4 = vsel %vm1227_vm1, %v1998_v61, 0  ;;  %v1811_v5 = vcombine.high %v19_v0, %v27_v1  ;;  %v1908_v61 = vcombine.low %v116_v50, %v124_v51 }
  0x80   :  { %v1813_v7 = vcombine.high %v20_v2, %v28_v3 }
  0x82   :  { %1451 = vmatpush1.bf16.msra.mxu0 %v1886_v10  ;;  %1492 = vmatpush1.bf16.msra.mxu1 %v1888_v11  ;;  %v36_v10 = vld [vmem:[%s2802_s1 + $0xb8] sm:$0xff] }
  0x83   :  { %1452 = vmatprep.subr.bf16.mxu0 %v1903_v12  ;;  %1493 = vmatprep.subr.bf16.mxu1 %v1905_v13  ;;  %v44_v11 = vld [vmem:[%s2802_s1 + $0xf8] sm:$0xff]  ;;  %v1810_v12 = vcombine.low %v19_v0, %v27_v1  ;;  %v1812_v13 = vcombine.low %v20_v2, %v28_v3  ;;  %v147_v0 = vld [vmem:[%s2802_s1 + $0x430] sm:$0xff] }
  0x84   :  { %v1829_v15 = vcombine.high %v36_v10, %v44_v11  ;;  %v155_v1 = vld [vmem:[%s2802_s1 + $0x470] sm:$0xff]  ;;  %v148_v2 = vld [vmem:[%s2802_s1 + $0x438] sm:$0xff] }
  0x85   :  { %v156_v3 = vld [vmem:[%s2802_s1 + $0x478] sm:$0xff] }
  0x86   :  { %1453 = vmatpush1.bf16.msra.mxu0 %v1902_v18  ;;  %1494 = vmatpush1.bf16.msra.mxu1 %v1904_v19  ;;  %v52_v18 = vld [vmem:[%s2802_s1 + $0x138] sm:$0xff] }
  0x87   :  { %1454 = vmatprep.subr.bf16.mxu0 %v1919_v20  ;;  %1495 = vmatprep.subr.bf16.mxu1 %v1921_v21  ;;  %v60_v19 = vld [vmem:[%s2802_s1 + $0x178] sm:$0xff]  ;;  %v1826_v20 = vcombine.low %v35_v8, %v43_v9  ;;  %v1828_v21 = vcombine.low %v36_v10, %v44_v11  ;;  %v163_v8 = vld [vmem:[%s2802_s1 + $0x4b0] sm:$0xff] }
  0x88   :  { %v1845_v23 = vcombine.high %v52_v18, %v60_v19  ;;  %v171_v9 = vld [vmem:[%s2802_s1 + $0x4f0] sm:$0xff]  ;;  %v164_v10 = vld [vmem:[%s2802_s1 + $0x4b8] sm:$0xff] }
  0x89   :  { %v172_v11 = vld [vmem:[%s2802_s1 + $0x4f8] sm:$0xff] }
  0x8a   :  { %1455 = vmatpush1.bf16.msra.mxu0 %v1918_v26  ;;  %1496 = vmatpush1.bf16.msra.mxu1 %v1920_v27  ;;  %v76_v26 = vld [vmem:[%s2802_s1 + $0x1f8] sm:$0xff]  ;;  %v1842_v27 = vcombine.low %v51_v16, %v59_v17  ;;  %v179_v16 = vld [vmem:[%s2802_s1 + $0x530] sm:$0xff] }
  0x8b   :  { %1456 = vmatprep.subr.bf16.mxu0 %v1935_v28  ;;  %1497 = vmatprep.subr.bf16.mxu1 %v1937_v29  ;;  %v1844_v28 = vcombine.low %v52_v18, %v60_v19  ;;  %v1859_v29 = vcombine.high %v67_v24, %v75_v25  ;;  %v187_v17 = vld [vmem:[%s2802_s1 + $0x570] sm:$0xff]  ;;  %v180_v18 = vld [vmem:[%s2802_s1 + $0x538] sm:$0xff] }
  0x8c   :  { %v188_v19 = vld [vmem:[%s2802_s1 + $0x578] sm:$0xff] }
  0x8e   :  { %1457 = vmatpush1.bf16.msra.mxu0 %v1934_v34  ;;  %1498 = vmatpush1.bf16.msra.mxu1 %v1936_v35  ;;  %v1858_v34 = vcombine.low %v67_v24, %v75_v25  ;;  %v195_v24 = vld [vmem:[%s2802_s1 + $0x5b0] sm:$0xff] }
  0x8f   :  { %1458 = vmatprep.subr.bf16.mxu0 %v1951_v36  ;;  %1499 = vmatprep.subr.bf16.mxu1 %v1953_v37  ;;  %v1875_v36 = vcombine.high %v83_v31, %v91_v32  ;;  %v203_v25 = vld [vmem:[%s2802_s1 + $0x5f0] sm:$0xff] }
  0x92   :  { %1459 = vmatpush1.bf16.msra.mxu0 %v1950_v42  ;;  %1500 = vmatpush1.bf16.msra.mxu1 %v1952_v44  ;;  %v1874_v42 = vcombine.low %v83_v31, %v91_v32  ;;  %v211_v31 = vld [vmem:[%s2802_s1 + $0x630] sm:$0xff]  ;;  %v212_v32 = vld [vmem:[%s2802_s1 + $0x638] sm:$0xff] }
  0x93   :  { %1460 = vmatprep.subr.bf16.mxu0 %v1967_v45  ;;  %1501 = vmatprep.subr.bf16.mxu1 %v1969_v46  ;;  %v1891_v45 = vcombine.high %v99_v38, %v107_v39  ;;  %v1893_v46 = vcombine.high %v100_v40, %v108_v41 }
  0x96   :  { %1461 = vmatpush1.bf16.msra.mxu0 %v1966_v52  ;;  %1502 = vmatpush1.bf16.msra.mxu1 %v1968_v53  ;;  %v1890_v52 = vcombine.low %v99_v38, %v107_v39  ;;  %v1892_v53 = vcombine.low %v100_v40, %v108_v41  ;;  %v2040_v40 = vld.sshfl [vmem:[%s2803_s0] sm:$0x33 pattern:$0x76325410] }
  0x97   :  { %1462 = vmatprep.subr.bf16.mxu0 %v1983_v54  ;;  %1503 = vmatprep.subr.bf16.mxu1 %v1985_v55  ;;  %v1907_v54 = vcombine.high %v115_v47, %v123_v48  ;;  %v1909_v55 = vcombine.high %v116_v50, %v124_v51 }
  0x9a   :  { %1463 = vmatpush1.bf16.msra.mxu0 %v1982_v58  ;;  %1504 = vmatpush1.bf16.msra.mxu1 %v1984_v59  ;;  %v132_v58 = vld [vmem:[%s2802_s1 + $0x3b8] sm:$0xff] }
  0x9b   :  { %2014 = vmatprep.subr.msk.bf16.mxu0 %vm1227_vm1, %v1999_v60  ;;  %2016 = vmatprep.subr.msk.bf16.mxu1 %vm1227_vm1, %v2001_v62  ;;  %v140_v59 = vld [vmem:[%s2802_s1 + $0x3f8] sm:$0xff]  ;;  %v1906_v60 = vcombine.low %v115_v47, %v123_v48  ;;  %v1923_v62 = vcombine.high %v131_v56, %v139_v57 }
  0x9c   :  { %v1925_v63 = vcombine.high %v132_v58, %v140_v59 }
  0x9e   :  { %1465 = vmatpush1.bf16.msra.mxu0 %v1253_v4  ;;  %1506 = vmatpush1.bf16.msra.mxu1 %v1259_v6  ;;  %v1922_v4 = vcombine.low %v131_v56, %v139_v57  ;;  %v1939_v6 = vcombine.high %v147_v0, %v155_v1 }
  0x9f   :  { %1522 = vmatprep.subr.bf16.mxu0 %v1811_v5  ;;  %1563 = vmatprep.subr.bf16.mxu1 %v1813_v7  ;;  %v1924_v5 = vcombine.low %v132_v58, %v140_v59  ;;  %v1941_v7 = vcombine.high %v148_v2, %v156_v3 }
  0xa1   :  { %1473 = vmatmul.mubr.bf16.vlgmr.msra.gmra.mrb[8].mxu0 %v2131_v43  ;;  %1514 = vmatmul.mubr.bf16.vlgmr.msra.gmra.mrb[8].mxu1 %v2131_v43  ;;  %v68_v43 = vld [vmem:[%s2802_s1 + $0x1b8] sm:$0xff] }
  0xa2   :  { %1523 = vmatpush1.bf16.msra.mxu0 %v1810_v12  ;;  %1564 = vmatpush1.bf16.msra.mxu1 %v1812_v13  ;;  %v1861_v30 = vcombine.high %v68_v43, %v76_v26  ;;  %v1860_v35 = vcombine.low %v68_v43, %v76_v26  ;;  %v1938_v12 = vcombine.low %v147_v0, %v155_v1  ;;  %v196_v43 = vld [vmem:[%s2802_s1 + $0x5b8] sm:$0xff] }
  0xa3   :  { %1524 = vmatprep.subr.bf16.mxu0 %v1827_v14  ;;  %1565 = vmatprep.subr.bf16.mxu1 %v1829_v15  ;;  %v1940_v13 = vcombine.low %v148_v2, %v156_v3  ;;  %v1955_v14 = vcombine.high %v163_v8, %v171_v9  ;;  %v1957_v15 = vcombine.high %v164_v10, %v172_v11  ;;  %v204_v26 = vld [vmem:[%s2802_s1 + $0x5f8] sm:$0xff] }
  0xa4   :  { %2019 = vmatprep.mubr.msk.bf16.mxu0 %vm1223_vm0, %v2141_v49  ;;  %2021 = vmatprep.mubr.msk.bf16.mxu1 %vm1223_vm0, %v2141_v49  ;;  %v84_v49 = vld [vmem:[%s2802_s1 + $0x238] sm:$0xff] }
  0xa5   :  { %v1877_v37 = vcombine.high %v84_v49, %v92_v33  ;;  %v1876_v44 = vcombine.low %v84_v49, %v92_v33  ;;  %v1986_v49 = vcombine.low %v195_v24, %v203_v25  ;;  %v1988_v33 = vcombine.low %v196_v43, %v204_v26 }
  0xa6   :  { %1525 = vmatpush1.bf16.msra.mxu0 %v1826_v20  ;;  %1566 = vmatpush1.bf16.msra.mxu1 %v1828_v21  ;;  %v1954_v20 = vcombine.low %v163_v8, %v171_v9  ;;  %v1956_v21 = vcombine.low %v164_v10, %v172_v11 }
  0xa7   :  { %1526 = vmatprep.subr.bf16.mxu0 %v1843_v22  ;;  %1567 = vmatprep.subr.bf16.mxu1 %v1845_v23  ;;  %v1971_v22 = vcombine.high %v179_v16, %v187_v17  ;;  %v1973_v23 = vcombine.high %v180_v18, %v188_v19 }
  0xaa   :  { %1527 = vmatpush1.bf16.msra.mxu0 %v1842_v27  ;;  %1568 = vmatpush1.bf16.msra.mxu1 %v1844_v28  ;;  %v1970_v27 = vcombine.low %v179_v16, %v187_v17  ;;  %v1972_v28 = vcombine.low %v180_v18, %v188_v19 }
  0xab   :  { %1528 = vmatprep.subr.bf16.mxu0 %v1859_v29  ;;  %1569 = vmatprep.subr.bf16.mxu1 %v1861_v30  ;;  %v1987_v29 = vcombine.high %v195_v24, %v203_v25  ;;  %v1989_v30 = vcombine.high %v196_v43, %v204_v26 }
  0xae   :  { %1529 = vmatpush1.bf16.msra.mxu0 %v1858_v34  ;;  %1570 = vmatpush1.bf16.msra.mxu1 %v1860_v35  ;;  %v2003_v34 = vcombine.high %v211_v31, %v211_v31  ;;  %v2002_v35 = vcombine.low %v211_v31, %v211_v31 }
  0xaf   :  { %1530 = vmatprep.subr.bf16.mxu0 %v1875_v36  ;;  %1571 = vmatprep.subr.bf16.mxu1 %v1877_v37  ;;  %v2005_v36 = vcombine.high %v212_v32, %v212_v32  ;;  %v2004_v37 = vcombine.low %v212_v32, %v212_v32 }
  0xb0   :  { %v1265_v38 = vsel %vm1227_vm1, %v2002_v35, 0 }
  0xb1   :  { %v1271_v39 = vsel %vm1227_vm1, %v2004_v37, 0 }
  0xb2   :  { %1531 = vmatpush1.bf16.msra.mxu0 %v1874_v42  ;;  %1572 = vmatpush1.bf16.msra.mxu1 %v1876_v44 }
  0xb3   :  { %1532 = vmatprep.subr.bf16.mxu0 %v1891_v45  ;;  %1573 = vmatprep.subr.bf16.mxu1 %v1893_v46 }
  0xb6   :  { %1533 = vmatpush1.bf16.msra.mxu0 %v1890_v52  ;;  %1574 = vmatpush1.bf16.msra.mxu1 %v1892_v53 }
  0xb7   :  { %1534 = vmatprep.subr.bf16.mxu0 %v1907_v54  ;;  %1575 = vmatprep.subr.bf16.mxu1 %v1909_v55 }
  0xba   :  { %1535 = vmatpush1.bf16.msra.mxu0 %v1906_v60  ;;  %1576 = vmatpush1.bf16.msra.mxu1 %v1908_v61 }
  0xbb   :  { %1536 = vmatprep.subr.bf16.mxu0 %v1923_v62  ;;  %1577 = vmatprep.subr.bf16.mxu1 %v1925_v63 }
  0xbe   :  { %1537 = vmatpush1.bf16.msra.mxu0 %v1922_v4  ;;  %1578 = vmatpush1.bf16.msra.mxu1 %v1924_v5 }
  0xbf   :  { %1538 = vmatprep.subr.bf16.mxu0 %v1939_v6  ;;  %1579 = vmatprep.subr.bf16.mxu1 %v1941_v7 }
  0xc2   :  { %1539 = vmatpush1.bf16.msra.mxu0 %v1938_v12  ;;  %1580 = vmatpush1.bf16.msra.mxu1 %v1940_v13 }
  0xc3   :  { %1540 = vmatprep.subr.bf16.mxu0 %v1955_v14  ;;  %1581 = vmatprep.subr.bf16.mxu1 %v1957_v15 }
  0xc6   :  { %1541 = vmatpush1.bf16.msra.mxu0 %v1954_v20  ;;  %1582 = vmatpush1.bf16.msra.mxu1 %v1956_v21 }
  0xc7   :  { %1542 = vmatprep.subr.bf16.mxu0 %v1971_v22  ;;  %1583 = vmatprep.subr.bf16.mxu1 %v1973_v23 }
  0xca   :  { %1543 = vmatpush1.bf16.msra.mxu0 %v1970_v27  ;;  %1584 = vmatpush1.bf16.msra.mxu1 %v1972_v28 }
  0xcb   :  { %1544 = vmatprep.subr.bf16.mxu0 %v1987_v29  ;;  %1585 = vmatprep.subr.bf16.mxu1 %v1989_v30 }
  0xce   :  { %1545 = vmatpush1.bf16.msra.mxu0 %v1986_v49  ;;  %1586 = vmatpush1.bf16.msra.mxu1 %v1988_v33 }
  0xcf   :  { %2018 = vmatprep.subr.msk.bf16.mxu0 %vm1227_vm1, %v2003_v34  ;;  %2020 = vmatprep.subr.msk.bf16.mxu1 %vm1227_vm1, %v2005_v36 }
  0xd2   :  { %1547 = vmatpush1.bf16.msra.mxu0 %v1265_v38  ;;  %1588 = vmatpush1.bf16.msra.mxu1 %v1271_v39 }
  0xd5   :  { %1555 = vmatmul.mubr.bf16.vlgmr.msra.gmra.mrb[12].mxu0 %v2040_v40  ;;  %1596 = vmatmul.mubr.bf16.vlgmr.msra.gmra.mrb[12].mxu1 %v2040_v40 }
 0x10c   :  { %v2706_v41 = vpop.f32.mrb[0].mxu0  ;;  %v2712_v45 = vpop.f32.mrb[0].mxu1 }
 0x10d   :  { %v1604_v42 = vsel %vm1227_vm1, %v2706_v41, 0.0  ;;  %v2710_v44 = vpop.f32.mrb[1].mxu0  ;;  %v1607_v48 = vsel %vm1227_vm1, %v2712_v45, 0.0  ;;  %v1353_v50 = vpop.f32.mrb[1].mxu1 }
 0x10e   :  { %v1605_v46 = vsel %vm1227_vm1, %v2710_v44, 0.0  ;;  %v1314_v47 = vpop.f32.mrb[2].mxu0  ;;  %v1355_v53 = vpop.f32.mrb[2].mxu1  ;;  %v1609_v54 = vsel %vm1227_vm1, %v1353_v50, 0.0 }
 0x10f   :  { %v1606_v51 = vadd.f32 %v1605_v46, %v1604_v42  ;;  %v1315_v52 = vpop.f32.mrb[3].mxu0  ;;  %v1356_v55 = vpop.f32.mrb[3].mxu1 }
 0x111   :  { %v1608_v56 = vadd.f32 %v1607_v48, %v1606_v51 }
 0x113   :  { %v1610_v57 = vadd.f32 %v1609_v54, %v1608_v56 }
 0x140   :  { %v1392_v58 = vpop.f32.mrb[4].mxu0  ;;  %v1433_v61 = vpop.f32.mrb[4].mxu1 }
 0x141   :  { %v1611_v59 = vsel %vm1227_vm1, %v1392_v58, 0.0  ;;  %v1394_v60 = vpop.f32.mrb[5].mxu0  ;;  %v1435_v1 = vpop.f32.mrb[5].mxu1  ;;  %v1615_v2 = vsel %vm1227_vm1, %v1433_v61, 0.0 }
 0x142   :  { %v1612_v62 = vadd.f32 %v1611_v59, %v1610_v57  ;;  %v1613_v63 = vsel %vm1227_vm1, %v1394_v60, 0.0  ;;  %v1396_v0 = vpop.f32.mrb[6].mxu0  ;;  %v1437_v4 = vpop.f32.mrb[6].mxu1  ;;  %v1617_v7 = vsel %vm1227_vm1, %v1435_v1, 0.0 }
 0x143   :  { %v1397_v3 = vpop.f32.mrb[7].mxu0  ;;  %v1438_v6 = vpop.f32.mrb[7].mxu1 }
 0x144   :  { %v1614_v5 = vadd.f32 %v1613_v63, %v1612_v62 }
 0x146   :  { %v1616_v8 = vadd.f32 %v1615_v2, %v1614_v5 }
 0x148   :  { %v1618_v9 = vadd.f32 %v1617_v7, %v1616_v8 }
 0x174   :  { %v1474_v10 = vpop.f32.mrb[8].mxu0  ;;  %v1515_v13 = vpop.f32.mrb[8].mxu1 }
 0x175   :  { %v1619_v11 = vsel %vm1227_vm1, %v1474_v10, 0.0  ;;  %v1476_v12 = vpop.f32.mrb[9].mxu0  ;;  %v1517_v17 = vpop.f32.mrb[9].mxu1  ;;  %v1623_v18 = vsel %vm1227_vm1, %v1515_v13, 0.0 }
 0x176   :  { %v1620_v14 = vadd.f32 %v1619_v11, %v1618_v9  ;;  %v1621_v15 = vsel %vm1227_vm1, %v1476_v12, 0.0  ;;  %v1478_v16 = vpop.f32.mrb[10].mxu0  ;;  %v1519_v20 = vpop.f32.mrb[10].mxu1  ;;  %v1625_v23 = vsel %vm1227_vm1, %v1517_v17, 0.0 }
 0x177   :  { %v1479_v19 = vpop.f32.mrb[11].mxu0  ;;  %v1520_v22 = vpop.f32.mrb[11].mxu1 }
 0x178   :  { %v1622_v21 = vadd.f32 %v1621_v15, %v1620_v14 }
 0x17a   :  { %v1624_v24 = vadd.f32 %v1623_v18, %v1622_v21 }
 0x17c   :  { %v1626_v25 = vadd.f32 %v1625_v23, %v1624_v24 }
 0x1a8   :  { %v1556_v43 = vpop.f32.mrb[12].mxu0  ;;  %v1597_v28 = vpop.f32.mrb[12].mxu1 }
 0x1a9   :  { %v1627_v26 = vsel %vm1227_vm1, %v1556_v43, 0.0  ;;  %v1558_v27 = vpop.f32.mrb[13].mxu0  ;;  %v1599_v32 = vpop.f32.mrb[13].mxu1  ;;  %v1631_v49 = vsel %vm1227_vm1, %v1597_v28, 0.0 }
 0x1aa   :  { %v1628_v29 = vadd.f32 %v1627_v26, %v1626_v25  ;;  %v1629_v30 = vsel %vm1227_vm1, %v1558_v27, 0.0  ;;  %v1560_v31 = vpop.f32.mrb[14].mxu0  ;;  %v1601_v34 = vpop.f32.mrb[14].mxu1  ;;  %v1633_v38 = vsel %vm1227_vm1, %v1599_v32, 0.0 }
 0x1ab   :  { %v1561_v33 = vpop.f32.mrb[15].mxu0  ;;  %v1602_v36 = vpop.f32.mrb[15].mxu1 }
 0x1ac   :  { %v1630_v35 = vadd.f32 %v1629_v30, %v1628_v29 }
 0x1ae   :  { %v1632_v37 = vadd.f32 %v1631_v49, %v1630_v35 }
 0x1b0   :  { %v1634_v39 = vadd.f32 %v1633_v38, %v1632_v37 }
 0x1b2   :  { %1635 = vadd.xlane.f32.xlu0 %v1634_v39 }
 0x23f   :  { %v1636_v40 = vpop.xlane.xlu0 %1635 }
 0x240   :  { %v1638_v42 = vmul.f32 0.00048828125, %v1636_v40 }
 0x242   :  { %v2732_v46 = vsub.f32 %v2706_v41, %v1638_v42  ;;  %v2735_v47 = vsub.f32 %v2710_v44, %v1638_v42  ;;  %v2738_v48 = vsub.f32 %v2712_v45, %v1638_v42  ;;  %v2740_v51 = vsub.f32 %v1353_v50, %v1638_v42 }
 0x243   :  { %v2746_v54 = vsub.f32 %v1392_v58, %v1638_v42  ;;  %v2750_v55 = vsub.f32 %v1394_v60, %v1638_v42  ;;  %v1645_v57 = vsub.f32 %v1433_v61, %v1638_v42  ;;  %v1646_v63 = vsub.f32 %v1435_v1, %v1638_v42 }
 0x244   :  { %v1655_v52 = vmul.f32 %v2732_v46, %v2732_v46  ;;  %v1656_v53 = vmul.f32 %v2735_v47, %v2735_v47  ;;  %v1657_v41 = vmul.f32 %v2738_v48, %v2738_v48  ;;  %v1658_v44 = vmul.f32 %v2740_v51, %v2740_v51 }
 0x245   :  { %v1659_v59 = vmul.f32 %v2746_v54, %v2746_v54  ;;  %v1660_v60 = vmul.f32 %v2750_v55, %v2750_v55  ;;  %v1647_v3 = vsub.f32 %v1474_v10, %v1638_v42  ;;  %v1661_v4 = vmul.f32 %v1645_v57, %v1645_v57 }
 0x246   :  { %v1671_v45 = vsel %vm1227_vm1, %v1655_v52, 0.0  ;;  %v1672_v50 = vsel %vm1227_vm1, %v1656_v53, 0.0  ;;  %v1674_v58 = vsel %vm1227_vm1, %v1657_v41, 0.0  ;;  %v1676_v0 = vsel %vm1227_vm1, %v1658_v44, 0.0 }
 0x247   :  { %v1673_v56 = vadd.f32 %v1672_v50, %v1671_v45  ;;  %v1678_v5 = vsel %vm1227_vm1, %v1659_v59, 0.0  ;;  %v1648_v7 = vsub.f32 %v1476_v12, %v1638_v42  ;;  %v1662_v61 = vmul.f32 %v1646_v63, %v1646_v63 }
 0x248   :  { %v1680_v8 = vsel %vm1227_vm1, %v1660_v60, 0.0  ;;  %v1649_v11 = vsub.f32 %v1515_v13, %v1638_v42  ;;  %v1663_v14 = vmul.f32 %v1647_v3, %v1647_v3  ;;  %v1682_v1 = vsel %vm1227_vm1, %v1661_v4, 0.0 }
 0x249   :  { %v1675_v62 = vadd.f32 %v1674_v58, %v1673_v56  ;;  %v1650_v16 = vsub.f32 %v1517_v17, %v1638_v42  ;;  %v1664_v18 = vmul.f32 %v1648_v7, %v1648_v7  ;;  %v1684_v19 = vsel %vm1227_vm1, %v1662_v61, 0.0 }
 0x24a   :  { %v1651_v10 = vsub.f32 %v1556_v43, %v1638_v42  ;;  %v1665_v21 = vmul.f32 %v1649_v11, %v1649_v11  ;;  %v1686_v22 = vsel %vm1227_vm1, %v1663_v14, 0.0  ;;  %v1652_v12 = vsub.f32 %v1558_v27, %v1638_v42 }
 0x24b   :  { %v1677_v2 = vadd.f32 %v1676_v0, %v1675_v62  ;;  %v1666_v24 = vmul.f32 %v1650_v16, %v1650_v16  ;;  %v1688_v25 = vsel %vm1227_vm1, %v1664_v18, 0.0  ;;  %v1653_v13 = vsub.f32 %v1597_v28, %v1638_v42 }
 0x24c   :  { %v1667_v29 = vmul.f32 %v1651_v10, %v1651_v10  ;;  %v1690_v30 = vsel %vm1227_vm1, %v1665_v21, 0.0  ;;  %v1654_v17 = vsub.f32 %v1599_v32, %v1638_v42  ;;  %v1668_v49 = vmul.f32 %v1652_v12, %v1652_v12 }
 0x24d   :  { %v1679_v6 = vadd.f32 %v1678_v5, %v1677_v2  ;;  %v1692_v33 = vsel %vm1227_vm1, %v1666_v24, 0.0  ;;  %v1669_v43 = vmul.f32 %v1653_v13, %v1653_v13 }
 0x24e   :  { %v1694_v35 = vsel %vm1227_vm1, %v1667_v29, 0.0  ;;  %v1670_v37 = vmul.f32 %v1654_v17, %v1654_v17  ;;  %v1696_v27 = vsel %vm1227_vm1, %v1668_v49, 0.0 }
 0x24f   :  { %v1681_v9 = vadd.f32 %v1680_v8, %v1679_v6  ;;  %v1698_v39 = vsel %vm1227_vm1, %v1669_v43, 0.0 }
 0x250   :  { %v1700_v40 = vsel %vm1227_vm1, %v1670_v37, 0.0 }
 0x251   :  { %v1683_v15 = vadd.f32 %v1682_v1, %v1681_v9 }
 0x253   :  { %v1685_v20 = vadd.f32 %v1684_v19, %v1683_v15 }
 0x255   :  { %v1687_v23 = vadd.f32 %v1686_v22, %v1685_v20 }
 0x257   :  { %v1689_v26 = vadd.f32 %v1688_v25, %v1687_v23 }
 0x259   :  { %v1691_v31 = vadd.f32 %v1690_v30, %v1689_v26 }
 0x25b   :  { %v1693_v34 = vadd.f32 %v1692_v33, %v1691_v31 }
 0x25d   :  { %v1695_v36 = vadd.f32 %v1694_v35, %v1693_v34 }
 0x25f   :  { %v1697_v38 = vadd.f32 %v1696_v27, %v1695_v36 }
 0x261   :  { %v1699_v28 = vadd.f32 %v1698_v39, %v1697_v38 }
 0x263   :  { %v1701_v52 = vadd.f32 %v1700_v40, %v1699_v28 }
 0x265   :  { %1702 = vadd.xlane.f32.xlu0 %v1701_v52 }
 0x2f2   :  { %v1703_v32 = vpop.xlane.xlu0 %1702 }
 0x2f3   :  { %v1704_v42 = vmul.f32 0.00048828125, %v1703_v32 }
 0x2f5   :  { %v1705_v53 = vadd.f32 0.0001, %v1704_v42 }
 0x2f7   :  { %2038 = vrsqrt.f32 %v1705_v53 }
 0x301   :  { %v2039_v41 = vpop.eup %2038 }
 0x302   :  { %v1707_v44 = vmul.f32 %v2039_v41, %v2732_v46  ;;  %v1708_v45 = vmul.f32 %v2039_v41, %v2735_v47  ;;  %v1709_v50 = vmul.f32 %v2039_v41, %v2738_v48  ;;  %v1710_v56 = vmul.f32 %v2039_v41, %v2740_v51 }
 0x303   :  { %v1711_v59 = vmul.f32 %v2039_v41, %v2746_v54  ;;  %v1712_v58 = vmul.f32 %v2039_v41, %v2750_v55  ;;  %v1713_v62 = vmul.f32 %v2039_v41, %v1645_v57  ;;  %v1714_v60 = vmul.f32 %v2039_v41, %v1646_v63 }
 0x304   :  { %v1715_v0 = vmul.f32 %v2039_v41, %v1647_v3  ;;  %v1716_v2 = vmul.f32 %v2039_v41, %v1648_v7  ;;  %v1717_v4 = vmul.f32 %v2039_v41, %v1649_v11  ;;  %v1718_v5 = vmul.f32 %v2039_v41, %v1650_v16 }
 0x305   :  { %v1719_v6 = vmul.f32 %v2039_v41, %v1651_v10  ;;  %v1720_v61 = vmul.f32 %v2039_v41, %v1652_v12  ;;  %v1721_v8 = vmul.f32 %v2039_v41, %v1653_v13  ;;  %v1722_v46 = vmul.f32 %v2039_v41, %v1654_v17 }
 0x306   :  { %vm1723_vm2 = vcmp.gt.f32.partialorder %v1707_v44, 0.0  ;;  %vm1724_vm3 = vcmp.gt.f32.partialorder %v1708_v45, 0.0  ;;  %vm1725_vm4 = vcmp.gt.f32.partialorder %v1709_v50, 0.0  ;;  %vm1726_vm5 = vcmp.gt.f32.partialorder %v1710_v56, 0.0 }
 0x307   :  { %vm1727_vm6 = vcmp.gt.f32.partialorder %v1711_v59, 0.0  ;;  %vm1728_vm7 = vcmp.gt.f32.partialorder %v1712_v58, 0.0  ;;  %vm1729_vm8 = vcmp.gt.f32.partialorder %v1713_v62, 0.0  ;;  %vm1730_vm9 = vcmp.gt.f32.partialorder %v1714_v60, 0.0 }
 0x308   :  { %vm1731_vm10 = vcmp.gt.f32.partialorder %v1715_v0, 0.0  ;;  %vm1732_vm11 = vcmp.gt.f32.partialorder %v1716_v2, 0.0  ;;  %vm1733_vm12 = vcmp.gt.f32.partialorder %v1717_v4, 0.0  ;;  %vm1734_vm13 = vcmp.gt.f32.partialorder %v1718_v5, 0.0 }
 0x309   :  { %vm1735_vm14 = vcmp.gt.f32.partialorder %v1719_v6, 0.0  ;;  %vm1736_vm15 = vcmp.gt.f32.partialorder %v1720_v61, 0.0  ;;  %vm1737_vm0 = vcmp.gt.f32.partialorder %v1721_v8, 0.0  ;;  %vm1738_vm1 = vcmp.gt.f32.partialorder %v1722_v46, 0.0 }
 0x30a   :  { %v1739_v47 = vmul.f32 0.01, %v1707_v44  ;;  %v1740_v48 = vmul.f32 0.01, %v1708_v45  ;;  %v1741_v51 = vmul.f32 0.01, %v1709_v50 }
 0x30b   :  { %v1742_v54 = vmul.f32 0.01, %v1710_v56  ;;  %v1743_v55 = vmul.f32 0.01, %v1711_v59  ;;  %v1744_v57 = vmul.f32 0.01, %v1712_v58 }
 0x30c   :  { %v1745_v63 = vmul.f32 0.01, %v1713_v62  ;;  %v1746_v3 = vmul.f32 0.01, %v1714_v60  ;;  %v1747_v7 = vmul.f32 0.01, %v1715_v0  ;;  %v1755_v9 = vsel %vm1723_vm2, %v1707_v44, %v1739_v47 }
 0x30d   :  { %v1748_v11 = vmul.f32 0.01, %v1716_v2  ;;  %v1749_v14 = vmul.f32 0.01, %v1717_v4  ;;  %v1750_v1 = vmul.f32 0.01, %v1718_v5  ;;  %v1756_v15 = vsel %vm1724_vm3, %v1708_v45, %v1740_v48 }
 0x30e   :  { %v1751_v16 = vmul.f32 0.01, %v1719_v6  ;;  %v1752_v18 = vmul.f32 0.01, %v1720_v61  ;;  %v1753_v19 = vmul.f32 0.01, %v1721_v8  ;;  %v1757_v20 = vsel %vm1725_vm4, %v1709_v50, %v1741_v51 }
 0x30f   :  { %v1754_v10 = vmul.f32 0.01, %v1722_v46  ;;  %v1758_v21 = vsel %vm1726_vm5, %v1710_v56, %v1742_v54  ;;  %v1759_v22 = vsel %vm1727_vm6, %v1711_v59, %v1743_v55  ;;  %v1760_v23 = vsel %vm1728_vm7, %v1712_v58, %v1744_v57 }
 0x310   :  { %v1761_v12 = vsel %vm1729_vm8, %v1713_v62, %v1745_v63  ;;  %v1762_v24 = vsel %vm1730_vm9, %v1714_v60, %v1746_v3  ;;  %v1763_v25 = vsel %vm1731_vm10, %v1715_v0, %v1747_v7  ;;  %v1764_v26 = vsel %vm1732_vm11, %v1716_v2, %v1748_v11 }
 0x311   :  { %v1765_v13 = vsel %vm1733_vm12, %v1717_v4, %v1749_v14  ;;  %v1766_v29 = vsel %vm1734_vm13, %v1718_v5, %v1750_v1  ;;  %v1767_v30 = vsel %vm1735_vm14, %v1719_v6, %v1751_v16  ;;  %v1768_v31 = vsel %vm1736_vm15, %v1720_v61, %v1752_v18 }
 0x312   :  { %v1769_v17 = vsel %vm1737_vm0, %v1721_v8, %v1753_v19  ;;  %v1770_v49 = vsel %vm1738_vm1, %v1722_v46, %v1754_v10  ;;  %v1771_v33 = vmax.f32 %v1755_v9, %v1759_v22  ;;  %v1772_v34 = vmax.f32 %v1756_v15, %v1760_v23 }
 0x313   :  { %v1773_v43 = vmax.f32 %v1757_v20, %v1761_v12  ;;  %v1774_v35 = vmax.f32 %v1758_v21, %v1762_v24  ;;  %v1775_v36 = vmax.f32 %v1763_v25, %v1767_v30  ;;  %v1776_v37 = vmax.f32 %v1764_v26, %v1768_v31 }
 0x314   :  { %v1777_v27 = vmax.f32 %v1765_v13, %v1769_v17  ;;  %v1778_v38 = vmax.f32 %v1766_v29, %v1770_v49 }
 0x315   :  { %v1779_v39 = vmax.f32 %v1771_v33, %v1775_v36  ;;  %v1780_v28 = vmax.f32 %v1772_v34, %v1776_v37 }
 0x316   :  { %v1781_v40 = vmax.f32 %v1773_v43, %v1777_v27  ;;  %v1782_v52 = vmax.f32 %v1774_v35, %v1778_v38 }
 0x317   :  { %v1787_v32 = vcombine.low %v1779_v39, %v1780_v28 }
 0x318   :  { %v1788_v42 = vcombine.low %v1781_v40, %v1782_v52 }
 0x319   :  { %1791 = vst [vmem:[%s2804_s2] sm:$0xff] %v1787_v32 }
 0x31a   :  { %1792 = vst [vmem:[%s2804_s2 + $0x8] sm:$0xff] %v1788_v42 }

// kernel: forward.8
= control target key start
LH: loop header
LB: loop body
LE: loop exit
PB: predicated region body
PF: predicated region fallthrough
CT: control target
= control target key end

     0   :  { %vm828_vm1 = vcmask 15360   ;;  %s1364_s1 = inlined_call_operand.vmem [shape: bf16[1024,2], index: 1, kind: input, shape index: {}]   ;;  %s1365_s0 = inlined_call_operand.vmem [shape: bf16[32,1024], index: 0, kind: input, shape index: {}]   ;;  %s1366_s2 = inlined_call_operand.vmem [shape: f32[32,2], index: 2, kind: output, shape index: {}]  }
   0x1   :  { %v1029_v0 = vld [vmem:[%s1364_s1 + $0x40] sm:$0xff]   ;;  %v1033_v4 = vld [vmem:[%s1364_s1 + $0x48] sm:$0xff]   ;;  %v1037_v8 = vld [vmem:[%s1364_s1 + $0x50] sm:$0xff]  }
   0x2   :  { %v1030_v1 = vld [vmem:[%s1364_s1 + $0xc0] sm:$0xff]   ;;  %917 = vmatprep.subr.bf16.mxu0 %v1029_v0  ;;  %v1034_v5 = vld [vmem:[%s1364_s1 + $0xc8] sm:$0xff]   ;;  %v1038_v9 = vld [vmem:[%s1364_s1 + $0xd0] sm:$0xff]  }
   0x3   :  { %v1031_v2 = vld [vmem:[%s1364_s1] sm:$0xff]   ;;  %945 = vmatprep.subr.bf16.mxu1 %v1030_v1  ;;  %v1035_v6 = vld [vmem:[%s1364_s1 + $0x8] sm:$0xff]   ;;  %v1039_v10 = vld [vmem:[%s1364_s1 + $0x10] sm:$0xff]  }
   0x4   :  { %v1032_v3 = vld [vmem:[%s1364_s1 + $0x80] sm:$0xff]   ;;  %918 = vmatpush3.bf16.msra.mxu0 %v1031_v2  ;;  %v1036_v7 = vld [vmem:[%s1364_s1 + $0x88] sm:$0xff]   ;;  %v1040_v11 = vld [vmem:[%s1364_s1 + $0x90] sm:$0xff]  }
   0x5   :  { %946 = vmatpush3.bf16.msra.mxu1 %v1032_v3  ;;  %919 = vmatprep.subr.bf16.mxu0 %v1033_v4  ;;  %v1041_v12 = vld [vmem:[%s1364_s1 + $0x58] sm:$0xff]   ;;  %v1045_v16 = vld [vmem:[%s1364_s1 + $0x60] sm:$0xff]   ;;  %v1049_v20 = vld [vmem:[%s1364_s1 + $0x68] sm:$0xff]  }
   0x6   :  { %947 = vmatprep.subr.bf16.mxu1 %v1034_v5  ;;  %v1042_v13 = vld [vmem:[%s1364_s1 + $0xd8] sm:$0xff]   ;;  %v1046_v17 = vld [vmem:[%s1364_s1 + $0xe0] sm:$0xff]   ;;  %v1050_v21 = vld [vmem:[%s1364_s1 + $0xe8] sm:$0xff]  }
   0x7   :  { %v1043_v14 = vld [vmem:[%s1364_s1 + $0x18] sm:$0xff]   ;;  %v1047_v18 = vld [vmem:[%s1364_s1 + $0x20] sm:$0xff]   ;;  %v1051_v22 = vld [vmem:[%s1364_s1 + $0x28] sm:$0xff]  }
   0x8   :  { %920 = vmatpush3.bf16.msra.mxu0 %v1035_v6  ;;  %v1044_v15 = vld [vmem:[%s1364_s1 + $0x98] sm:$0xff]   ;;  %v1048_v19 = vld [vmem:[%s1364_s1 + $0xa0] sm:$0xff]   ;;  %v1052_v23 = vld [vmem:[%s1364_s1 + $0xa8] sm:$0xff]  }
   0x9   :  { %948 = vmatpush3.bf16.msra.mxu1 %v1036_v7  ;;  %921 = vmatprep.subr.bf16.mxu0 %v1037_v8  ;;  %v1053_v24 = vld [vmem:[%s1364_s1 + $0x70] sm:$0xff]   ;;  %v1057_v28 = vld [vmem:[%s1364_s1 + $0x78] sm:$0xff]   ;;  %v12_v32 = vld [vmem:[%s1365_s0] sm:$0xff] }
   0xa   :  { %949 = vmatprep.subr.bf16.mxu1 %v1038_v9  ;;  %v1054_v25 = vld [vmem:[%s1364_s1 + $0xf0] sm:$0xff]   ;;  %v1058_v29 = vld [vmem:[%s1364_s1 + $0xf8] sm:$0xff]   ;;  %v16_v33 = vld [vmem:[%s1365_s0 + $0x20] sm:$0xff] }
   0xb   :  { %v1055_v26 = vld [vmem:[%s1364_s1 + $0x30] sm:$0xff]   ;;  %v1059_v30 = vld [vmem:[%s1364_s1 + $0x38] sm:$0xff]   ;;  %v13_v34 = vld [vmem:[%s1365_s0 + $0x8] sm:$0xff]  ;;  %v837_v35 = vcombine.low %v12_v32, %v16_v33  ;;  %v838_v36 = vcombine.high %v12_v32, %v16_v33 }
   0xc   :  { %922 = vmatpush3.bf16.msra.mxu0 %v1039_v10  ;;  %v1056_v27 = vld [vmem:[%s1364_s1 + $0xb0] sm:$0xff]   ;;  %v1060_v31 = vld [vmem:[%s1364_s1 + $0xb8] sm:$0xff]   ;;  %v17_v37 = vld [vmem:[%s1365_s0 + $0x28] sm:$0xff] }
   0xd   :  { %950 = vmatpush3.bf16.msra.mxu1 %v1040_v11  ;;  %923 = vmatprep.subr.bf16.mxu0 %v1041_v12  ;;  %v839_v38 = vcombine.low %v13_v34, %v17_v37  ;;  %v840_v39 = vcombine.high %v13_v34, %v17_v37  ;;  %v1061_v40 = vld [vmem:[%s1364_s1 + $0x140] sm:$0xff]   ;;  %v1065_v44 = vld [vmem:[%s1364_s1 + $0x148] sm:$0xff]   ;;  %v1069_v48 = vld [vmem:[%s1364_s1 + $0x150] sm:$0xff]  }
   0xe   :  { %951 = vmatprep.subr.bf16.mxu1 %v1042_v13  ;;  %652 = vmatprep.mubr.bf16.mxu0 %v838_v36  ;;  %v1062_v41 = vld [vmem:[%s1364_s1 + $0x1c0] sm:$0xff]   ;;  %v1066_v45 = vld [vmem:[%s1364_s1 + $0x1c8] sm:$0xff]   ;;  %v1070_v49 = vld [vmem:[%s1364_s1 + $0x1d0] sm:$0xff]  }
   0xf   :  { %701 = vmatprep.mubr.bf16.mxu1 %v840_v39  ;;  %v1063_v42 = vld [vmem:[%s1364_s1 + $0x100] sm:$0xff]   ;;  %v1067_v46 = vld [vmem:[%s1364_s1 + $0x108] sm:$0xff]   ;;  %v1071_v50 = vld [vmem:[%s1364_s1 + $0x110] sm:$0xff]  }
  0x10   :  { %924 = vmatpush3.bf16.msra.mxu0 %v1043_v14  ;;  %v1064_v43 = vld [vmem:[%s1364_s1 + $0x180] sm:$0xff]   ;;  %v1068_v47 = vld [vmem:[%s1364_s1 + $0x188] sm:$0xff]   ;;  %v1072_v51 = vld [vmem:[%s1364_s1 + $0x190] sm:$0xff]  }
  0x11   :  { %952 = vmatpush3.bf16.msra.mxu1 %v1044_v15  ;;  %925 = vmatprep.subr.bf16.mxu0 %v1045_v16  ;;  %v1073_v52 = vld [vmem:[%s1364_s1 + $0x158] sm:$0xff]   ;;  %v1077_v56 = vld [vmem:[%s1364_s1 + $0x160] sm:$0xff]   ;;  %v21_v63 = vld [vmem:[%s1365_s0 + $0x48] sm:$0xff] }
  0x12   :  { %953 = vmatprep.subr.bf16.mxu1 %v1046_v17  ;;  %v1074_v53 = vld [vmem:[%s1364_s1 + $0x1d8] sm:$0xff]   ;;  %v1078_v57 = vld [vmem:[%s1364_s1 + $0x1e0] sm:$0xff]   ;;  %v25_v0 = vld [vmem:[%s1365_s0 + $0x68] sm:$0xff] }
  0x13   :  { %v1075_v54 = vld [vmem:[%s1364_s1 + $0x118] sm:$0xff]   ;;  %v1079_v58 = vld [vmem:[%s1364_s1 + $0x120] sm:$0xff]   ;;  %v848_v2 = vcombine.high %v21_v63, %v25_v0  ;;  %v1081_v3 = vld [vmem:[%s1364_s1 + $0x168] sm:$0xff]   ;;  %v847_v4 = vcombine.low %v21_v63, %v25_v0 }
  0x14   :  { %926 = vmatpush3.bf16.msra.mxu0 %v1047_v18  ;;  %v1076_v55 = vld [vmem:[%s1364_s1 + $0x198] sm:$0xff]   ;;  %v1080_v59 = vld [vmem:[%s1364_s1 + $0x1a0] sm:$0xff]   ;;  %v1082_v5 = vld [vmem:[%s1364_s1 + $0x1e8] sm:$0xff]  }
  0x15   :  { %954 = vmatpush3.bf16.msra.mxu1 %v1048_v19  ;;  %927 = vmatprep.subr.bf16.mxu0 %v1049_v20  ;;  %v20_v60 = vld [vmem:[%s1365_s0 + $0x40] sm:$0xff]  ;;  %v1083_v6 = vld [vmem:[%s1364_s1 + $0x128] sm:$0xff]   ;;  %v1085_v8 = vld [vmem:[%s1364_s1 + $0x170] sm:$0xff]  }
  0x16   :  { %955 = vmatprep.subr.bf16.mxu1 %v1050_v21  ;;  %v24_v61 = vld [vmem:[%s1365_s0 + $0x60] sm:$0xff]  ;;  %v1084_v7 = vld [vmem:[%s1364_s1 + $0x1a8] sm:$0xff]   ;;  %v1086_v9 = vld [vmem:[%s1364_s1 + $0x1f0] sm:$0xff]  }
  0x17   :  { %v846_v62 = vcombine.high %v20_v60, %v24_v61  ;;  %v845_v1 = vcombine.low %v20_v60, %v24_v61  ;;  %v1087_v10 = vld [vmem:[%s1364_s1 + $0x130] sm:$0xff]   ;;  %v1089_v12 = vld [vmem:[%s1364_s1 + $0x178] sm:$0xff]  }
  0x18   :  { %928 = vmatpush3.bf16.msra.mxu0 %v1051_v22  ;;  %v1088_v11 = vld [vmem:[%s1364_s1 + $0x1b0] sm:$0xff]   ;;  %v1090_v13 = vld [vmem:[%s1364_s1 + $0x1f8] sm:$0xff]  }
  0x19   :  { %956 = vmatpush3.bf16.msra.mxu1 %v1052_v23  ;;  %929 = vmatprep.subr.bf16.mxu0 %v1053_v24  ;;  %v1091_v14 = vld [vmem:[%s1364_s1 + $0x138] sm:$0xff]   ;;  %v14_v16 = vld [vmem:[%s1365_s0 + $0x10] sm:$0xff] }
  0x1a   :  { %957 = vmatprep.subr.bf16.mxu1 %v1054_v25  ;;  %v1092_v15 = vld [vmem:[%s1364_s1 + $0x1b8] sm:$0xff]   ;;  %v18_v17 = vld [vmem:[%s1365_s0 + $0x30] sm:$0xff] }
  0x1b   :  { %v15_v18 = vld [vmem:[%s1365_s0 + $0x18] sm:$0xff]  ;;  %v841_v20 = vcombine.low %v14_v16, %v18_v17  ;;  %v842_v21 = vcombine.high %v14_v16, %v18_v17  ;;  %v22_v24 = vld [vmem:[%s1365_s0 + $0x50] sm:$0xff] }
  0x1c   :  { %930 = vmatpush3.bf16.msra.mxu0 %v1055_v26  ;;  %v19_v19 = vld [vmem:[%s1365_s0 + $0x38] sm:$0xff]  ;;  %v26_v25 = vld [vmem:[%s1365_s0 + $0x70] sm:$0xff] }
  0x1d   :  { %958 = vmatpush3.bf16.msra.mxu1 %v1056_v27  ;;  %931 = vmatprep.subr.bf16.mxu0 %v1057_v28  ;;  %v843_v22 = vcombine.low %v15_v18, %v19_v19  ;;  %v844_v23 = vcombine.high %v15_v18, %v19_v19  ;;  %v23_v26 = vld [vmem:[%s1365_s0 + $0x58] sm:$0xff]  ;;  %v850_v27 = vcombine.high %v22_v24, %v26_v25 }
  0x1e   :  { %959 = vmatprep.subr.bf16.mxu1 %v1058_v29  ;;  %v27_v28 = vld [vmem:[%s1365_s0 + $0x78] sm:$0xff] }
  0x1f   :  { %v852_v29 = vcombine.high %v23_v26, %v27_v28 }
  0x20   :  { %932 = vmatpush3.bf16.msra.mxu0 %v1059_v30  ;;  %v849_v30 = vcombine.low %v22_v24, %v26_v25 }
  0x21   :  { %960 = vmatpush3.bf16.msra.mxu1 %v1060_v31  ;;  %973 = vmatprep.subr.bf16.mxu0 %v1061_v40  ;;  %v851_v31 = vcombine.low %v23_v26, %v27_v28 }
  0x22   :  { %1001 = vmatprep.subr.bf16.mxu1 %v1062_v41 }
  0x23   :  { %653 = vmatmul.mubr.bf16.vlgmr.msra.gmra.mrb[0].mxu0 %v837_v35 }
  0x24   :  { %702 = vmatmul.mubr.bf16.vlgmr.msra.gmra.mrb[0].mxu1 %v839_v38  ;;  %974 = vmatpush3.bf16.msra.mxu0 %v1063_v42 }
  0x25   :  { %1002 = vmatpush3.bf16.msra.mxu1 %v1064_v43  ;;  %975 = vmatprep.subr.bf16.mxu0 %v1065_v44 }
  0x26   :  { %1003 = vmatprep.subr.bf16.mxu1 %v1066_v45  ;;  %660 = vmatprep.mubr.bf16.mxu0 %v846_v62 }
  0x27   :  { %709 = vmatprep.mubr.bf16.mxu1 %v848_v2 }
  0x28   :  { %976 = vmatpush3.bf16.msra.mxu0 %v1067_v46 }
  0x29   :  { %1004 = vmatpush3.bf16.msra.mxu1 %v1068_v47  ;;  %977 = vmatprep.subr.bf16.mxu0 %v1069_v48 }
  0x2a   :  { %1005 = vmatprep.subr.bf16.mxu1 %v1070_v49 }
  0x2b   :  { %661 = vmatmul.mubr.bf16.gmra.mrb[4].mxu0 %v845_v1 }
  0x2c   :  { %978 = vmatpush3.bf16.msra.mxu0 %v1071_v50  ;;  %710 = vmatmul.mubr.bf16.gmra.mrb[4].mxu1 %v847_v4 }
  0x2d   :  { %1006 = vmatpush3.bf16.msra.mxu1 %v1072_v51  ;;  %979 = vmatprep.subr.bf16.mxu0 %v1073_v52 }
  0x2e   :  { %1007 = vmatprep.subr.bf16.mxu1 %v1074_v53  ;;  %750 = vmatprep.mubr.bf16.mxu0 %v842_v21 }
  0x2f   :  { %799 = vmatprep.mubr.bf16.mxu1 %v844_v23 }
  0x30   :  { %980 = vmatpush3.bf16.msra.mxu0 %v1075_v54 }
  0x31   :  { %1008 = vmatpush3.bf16.msra.mxu1 %v1076_v55  ;;  %981 = vmatprep.subr.bf16.mxu0 %v1077_v56 }
  0x32   :  { %1009 = vmatprep.subr.bf16.mxu1 %v1078_v57 }
  0x34   :  { %982 = vmatpush3.bf16.msra.mxu0 %v1079_v58 }
  0x35   :  { %1010 = vmatpush3.bf16.msra.mxu1 %v1080_v59  ;;  %983 = vmatprep.subr.bf16.mxu0 %v1081_v3 }
  0x36   :  { %1011 = vmatprep.subr.bf16.mxu1 %v1082_v5 }
  0x38   :  { %984 = vmatpush3.bf16.msra.mxu0 %v1083_v6 }
  0x39   :  { %1012 = vmatpush3.bf16.msra.mxu1 %v1084_v7  ;;  %985 = vmatprep.subr.bf16.mxu0 %v1085_v8 }
  0x3a   :  { %1013 = vmatprep.subr.bf16.mxu1 %v1086_v9 }
  0x3c   :  { %986 = vmatpush3.bf16.msra.mxu0 %v1087_v10 }
  0x3d   :  { %1014 = vmatpush3.bf16.msra.mxu1 %v1088_v11  ;;  %987 = vmatprep.subr.bf16.mxu0 %v1089_v12 }
  0x3e   :  { %1015 = vmatprep.subr.bf16.mxu1 %v1090_v13 }
  0x40   :  { %988 = vmatpush3.bf16.msra.mxu0 %v1091_v14 }
  0x41   :  { %1016 = vmatpush3.bf16.msra.mxu1 %v1092_v15 }
  0x43   :  { %751 = vmatmul.mubr.bf16.vlgmr.msra.gmra.mrb[8].mxu0 %v841_v20 }
  0x44   :  { %800 = vmatmul.mubr.bf16.vlgmr.msra.gmra.mrb[8].mxu1 %v843_v22  ;;  %758 = vmatprep.mubr.bf16.mxu0 %v850_v27 }
  0x45   :  { %807 = vmatprep.mubr.bf16.mxu1 %v852_v29 }
  0x4b   :  { %759 = vmatmul.mubr.bf16.gmra.mrb[12].mxu0 %v849_v30 }
  0x4c   :  { %808 = vmatmul.mubr.bf16.gmra.mrb[12].mxu1 %v851_v31 }
  0xf6   :  { %v933_v32 = vpop.f32.mrb[0].mxu0 }
  0xf7   :  { %v961_v33 = vpop.f32.mrb[0].mxu1  ;;  %v934_v34 = vpop.f32.mrb[1].mxu0 }
  0xf8   :  { %v935_v35 = vadd.f32 %v934_v34, %v933_v32  ;;  %v962_v36 = vpop.f32.mrb[1].mxu1  ;;  %v936_v37 = vpop.f32.mrb[2].mxu0 }
  0xf9   :  { %v963_v38 = vadd.f32 %v962_v36, %v961_v33  ;;  %v964_v39 = vpop.f32.mrb[2].mxu1  ;;  %v937_v40 = vpop.f32.mrb[3].mxu0 }
  0xfa   :  { %v938_v41 = vadd.f32 %v937_v40, %v936_v37  ;;  %v965_v42 = vpop.f32.mrb[3].mxu1 }
  0xfb   :  { %v704_v43 = vadd.f32 %v963_v38, %v935_v35  ;;  %v966_v44 = vadd.f32 %v965_v42, %v964_v39 }
  0xfd   :  { %v707_v45 = vadd.f32 %v966_v44, %v938_v41 }
  0xfe   :  { %v939_v46 = vpop.f32.mrb[4].mxu0 }
  0xff   :  { %v967_v47 = vpop.f32.mrb[4].mxu1  ;;  %v940_v48 = vpop.f32.mrb[5].mxu0 }
 0x100   :  { %v941_v49 = vadd.f32 %v940_v48, %v939_v46  ;;  %v968_v50 = vpop.f32.mrb[5].mxu1  ;;  %v942_v51 = vpop.f32.mrb[6].mxu0 }
 0x101   :  { %v969_v52 = vadd.f32 %v968_v50, %v967_v47  ;;  %v970_v53 = vpop.f32.mrb[6].mxu1  ;;  %v943_v54 = vpop.f32.mrb[7].mxu0 }
 0x102   :  { %v944_v55 = vadd.f32 %v943_v54, %v942_v51  ;;  %v971_v56 = vpop.f32.mrb[7].mxu1 }
 0x103   :  { %v712_v57 = vadd.f32 %v969_v52, %v941_v49  ;;  %v972_v58 = vadd.f32 %v971_v56, %v970_v53 }
 0x105   :  { %v715_v59 = vadd.f32 %v972_v58, %v944_v55 }
 0x116   :  { %v989_v60 = vpop.f32.mrb[8].mxu0 }
 0x117   :  { %v1017_v61 = vpop.f32.mrb[8].mxu1  ;;  %v990_v62 = vpop.f32.mrb[9].mxu0 }
 0x118   :  { %v1018_v63 = vpop.f32.mrb[9].mxu1  ;;  %v991_v0 = vadd.f32 %v990_v62, %v989_v60  ;;  %v992_v2 = vpop.f32.mrb[10].mxu0 }
 0x119   :  { %v1019_v1 = vadd.f32 %v1018_v63, %v1017_v61  ;;  %v1020_v3 = vpop.f32.mrb[10].mxu1  ;;  %v993_v4 = vpop.f32.mrb[11].mxu0 }
 0x11a   :  { %v1021_v5 = vpop.f32.mrb[11].mxu1  ;;  %v753_v6 = vadd.f32 %v991_v0, %v704_v43  ;;  %v994_v7 = vadd.f32 %v993_v4, %v992_v2 }
 0x11b   :  { %v1022_v8 = vadd.f32 %v1021_v5, %v1020_v3 }
 0x11c   :  { %v802_v9 = vadd.f32 %v1019_v1, %v753_v6  ;;  %v756_v10 = vadd.f32 %v994_v7, %v707_v45 }
 0x11e   :  { %vm816_vm0 = vcmp.gt.f32.partialorder %v802_v9, 0.0  ;;  %v820_v11 = vmul.f32 0.01, %v802_v9  ;;  %v805_v12 = vadd.f32 %v1022_v8, %v756_v10  ;;  %v995_v13 = vpop.f32.mrb[12].mxu0 }
 0x11f   :  { %v1023_v14 = vpop.f32.mrb[12].mxu1  ;;  %v996_v15 = vpop.f32.mrb[13].mxu0 }
 0x120   :  { %v1024_v16 = vpop.f32.mrb[13].mxu1  ;;  %v824_v17 = vsel %vm816_vm0, %v802_v9, %v820_v11  ;;  %vm817_vm2 = vcmp.gt.f32.partialorder %v805_v12, 0.0  ;;  %v821_v18 = vmul.f32 0.01, %v805_v12  ;;  %v997_v19 = vadd.f32 %v996_v15, %v995_v13  ;;  %v998_v20 = vpop.f32.mrb[14].mxu0 }
 0x121   :  { %v1026_v21 = vpop.f32.mrb[14].mxu1  ;;  %829 = vst.msk [vmem:[%s1366_s2] sm:$0xff] %vm828_vm1, %v824_v17  ;;  %v1025_v22 = vadd.f32 %v1024_v16, %v1023_v14  ;;  %v999_v23 = vpop.f32.mrb[15].mxu0 }
 0x122   :  { %v1027_v24 = vpop.f32.mrb[15].mxu1  ;;  %v825_v25 = vsel %vm817_vm2, %v805_v12, %v821_v18  ;;  %v761_v26 = vadd.f32 %v997_v19, %v712_v57  ;;  %v1000_v27 = vadd.f32 %v999_v23, %v998_v20 }
 0x123   :  { %v1028_v28 = vadd.f32 %v1027_v24, %v1026_v21  ;;  %830 = vst.msk [vmem:[%s1366_s2 + $0x8] sm:$0xff] %vm828_vm1, %v825_v25 }
 0x124   :  { %v810_v29 = vadd.f32 %v1025_v22, %v761_v26  ;;  %v764_v30 = vadd.f32 %v1000_v27, %v715_v59 }
 0x126   :  { %vm818_vm3 = vcmp.gt.f32.partialorder %v810_v29, 0.0  ;;  %v822_v31 = vmul.f32 0.01, %v810_v29  ;;  %v813_v32 = vadd.f32 %v1028_v28, %v764_v30 }
 0x128   :  { %v826_v33 = vsel %vm818_vm3, %v810_v29, %v822_v31  ;;  %vm819_vm4 = vcmp.gt.f32.partialorder %v813_v32, 0.0  ;;  %v823_v34 = vmul.f32 0.01, %v813_v32 }
 0x129   :  { %831 = vst.msk [vmem:[%s1366_s2 + $0x10] sm:$0xff] %vm828_vm1, %v826_v33 }
 0x12a   :  { %v827_v35 = vsel %vm819_vm4, %v813_v32, %v823_v34 }
 0x12b   :  { %832 = vst.msk [vmem:[%s1366_s2 + $0x18] sm:$0xff] %vm828_vm1, %v827_v35 }

// kernel: forward.9
= control target key start
LH: loop header
LB: loop body
LE: loop exit
PB: predicated region body
PF: predicated region fallthrough
CT: control target
= control target key end

     0   :  { %v506_v22 = vmov 1983009808   ;;  %v82_v24 = vlaneseq  ;;  %vm371_vm0 = vcmask 257024   ;;  %s627_s1 = inlined_call_operand.vmem [shape: bf16[512,32], index: 1, kind: input, shape index: {}]   ;;  %s628_s0 = inlined_call_operand.vmem [shape: bf16[4,512], index: 0, kind: input, shape index: {}]   ;;  %s629_s2 = inlined_call_operand.vmem [shape: f32[4,32], index: 2, kind: output, shape index: {}]  }
   0x1   :  { %v471_v0 = vld [vmem:[%s627_s1 + $0x40] sm:$0xff]   ;;  %v475_v4 = vld [vmem:[%s627_s1 + $0x48] sm:$0xff]   ;;  %v479_v8 = vld [vmem:[%s627_s1 + $0x50] sm:$0xff]   ;;  %v80_v23 = vunpack.c.l.s4 %v506_v22 }
   0x2   :  { %v472_v1 = vld [vmem:[%s627_s1 + $0xc0] sm:$0xff]   ;;  %426 = vmatprep.subr.bf16.mxu0 %v471_v0  ;;  %v476_v5 = vld [vmem:[%s627_s1 + $0xc8] sm:$0xff]   ;;  %v480_v9 = vld [vmem:[%s627_s1 + $0xd0] sm:$0xff]   ;;  %v83_v30 = vshrl.u32 %v82_v24, 7 }
   0x3   :  { %v473_v2 = vld [vmem:[%s627_s1] sm:$0xff]   ;;  %448 = vmatprep.subr.bf16.mxu1 %v472_v1  ;;  %v477_v6 = vld [vmem:[%s627_s1 + $0x8] sm:$0xff]   ;;  %v481_v10 = vld [vmem:[%s627_s1 + $0x10] sm:$0xff]   ;;  %v81_v29 = vunpack.c.0.s8 %v80_v23 }
   0x4   :  { %v474_v3 = vld [vmem:[%s627_s1 + $0x80] sm:$0xff]   ;;  %427 = vmatpush3.bf16.msra.mxu0 %v473_v2  ;;  %v478_v7 = vld [vmem:[%s627_s1 + $0x88] sm:$0xff]   ;;  %v482_v11 = vld [vmem:[%s627_s1 + $0x90] sm:$0xff]  }
   0x5   :  { %449 = vmatpush3.bf16.msra.mxu1 %v474_v3  ;;  %428 = vmatprep.subr.bf16.mxu0 %v475_v4  ;;  %v483_v12 = vld [vmem:[%s627_s1 + $0x58] sm:$0xff]   ;;  %v487_v16 = vld [vmem:[%s627_s1 + $0x60] sm:$0xff]   ;;  %v491_v20 = vld [vmem:[%s627_s1 + $0x68] sm:$0xff]   ;;  %v84_v35 = vsub.s32 %v81_v29, %v83_v30 }
   0x6   :  { %450 = vmatprep.subr.bf16.mxu1 %v476_v5  ;;  %v484_v13 = vld [vmem:[%s627_s1 + $0xd8] sm:$0xff]   ;;  %v488_v17 = vld [vmem:[%s627_s1 + $0xe0] sm:$0xff]   ;;  %v492_v21 = vld [vmem:[%s627_s1 + $0xe8] sm:$0xff]  }
   0x7   :  { %v485_v14 = vld [vmem:[%s627_s1 + $0x18] sm:$0xff]   ;;  %v489_v18 = vld [vmem:[%s627_s1 + $0x20] sm:$0xff]   ;;  %v493_v25 = vld [vmem:[%s627_s1 + $0x28] sm:$0xff]  }
   0x8   :  { %429 = vmatpush3.bf16.msra.mxu0 %v477_v6  ;;  %v486_v15 = vld [vmem:[%s627_s1 + $0x98] sm:$0xff]   ;;  %v490_v19 = vld [vmem:[%s627_s1 + $0xa0] sm:$0xff]   ;;  %v494_v26 = vld [vmem:[%s627_s1 + $0xa8] sm:$0xff]  }
   0x9   :  { %451 = vmatpush3.bf16.msra.mxu1 %v478_v7  ;;  %430 = vmatprep.subr.bf16.mxu0 %v479_v8  ;;  %v495_v27 = vld [vmem:[%s627_s1 + $0x70] sm:$0xff]   ;;  %v499_v33 = vld [vmem:[%s627_s1 + $0x78] sm:$0xff]   ;;  %v12_v38 = vld [vmem:[%s628_s0] sm:$0xff] }
   0xa   :  { %452 = vmatprep.subr.bf16.mxu1 %v480_v9  ;;  %v496_v28 = vld [vmem:[%s627_s1 + $0xf0] sm:$0xff]   ;;  %v500_v34 = vld [vmem:[%s627_s1 + $0xf8] sm:$0xff]   ;;  %v85_v39 = vrot.slane %v12_v38, %v84_v35  ;;  %v78_v40 = vcombine.high %v12_v38, %v12_v38 }
   0xb   :  { %v497_v31 = vld [vmem:[%s627_s1 + $0x30] sm:$0xff]   ;;  %v501_v36 = vld [vmem:[%s627_s1 + $0x38] sm:$0xff]  }
   0xc   :  { %431 = vmatpush3.bf16.msra.mxu0 %v481_v10  ;;  %v498_v32 = vld [vmem:[%s627_s1 + $0xb0] sm:$0xff]   ;;  %v502_v37 = vld [vmem:[%s627_s1 + $0xb8] sm:$0xff]   ;;  %v93_v41 = vcombine.high %v85_v39, %v85_v39  ;;  %v92_v42 = vrot.slane %v78_v40, %v84_v35 }
   0xd   :  { %453 = vmatpush3.bf16.msra.mxu1 %v482_v11  ;;  %432 = vmatprep.subr.bf16.mxu0 %v483_v12 }
   0xe   :  { %454 = vmatprep.subr.bf16.mxu1 %v484_v13  ;;  %323 = vmatprep.mubr.bf16.mxu0 %v93_v41  ;;  %v94_v43 = vcombine.high %v92_v42, %v92_v42 }
  0x10   :  { %433 = vmatpush3.bf16.msra.mxu0 %v485_v14  ;;  %363 = vmatprep.mubr.bf16.mxu1 %v94_v43 }
  0x11   :  { %455 = vmatpush3.bf16.msra.mxu1 %v486_v15  ;;  %434 = vmatprep.subr.bf16.mxu0 %v487_v16 }
  0x12   :  { %456 = vmatprep.subr.bf16.mxu1 %v488_v17 }
  0x14   :  { %435 = vmatpush3.bf16.msra.mxu0 %v489_v18 }
  0x15   :  { %457 = vmatpush3.bf16.msra.mxu1 %v490_v19  ;;  %436 = vmatprep.subr.bf16.mxu0 %v491_v20 }
  0x16   :  { %458 = vmatprep.subr.bf16.mxu1 %v492_v21 }
  0x18   :  { %437 = vmatpush3.bf16.msra.mxu0 %v493_v25 }
  0x19   :  { %459 = vmatpush3.bf16.msra.mxu1 %v494_v26  ;;  %438 = vmatprep.subr.bf16.mxu0 %v495_v27 }
  0x1a   :  { %460 = vmatprep.subr.bf16.mxu1 %v496_v28 }
  0x1c   :  { %439 = vmatpush3.bf16.msra.mxu0 %v497_v31 }
  0x1d   :  { %461 = vmatpush3.bf16.msra.mxu1 %v498_v32  ;;  %440 = vmatprep.subr.bf16.mxu0 %v499_v33 }
  0x1e   :  { %462 = vmatprep.subr.bf16.mxu1 %v500_v34 }
  0x20   :  { %441 = vmatpush3.bf16.msra.mxu0 %v501_v36 }
  0x21   :  { %463 = vmatpush3.bf16.msra.mxu1 %v502_v37 }
  0x23   :  { %324 = vmatmul.mubr.bf16.vlgmr.msra.gmra.mrb[0].mxu0 %v85_v39 }
  0x24   :  { %364 = vmatmul.mubr.bf16.vlgmr.msra.gmra.mrb[0].mxu1 %v92_v42 }
  0xf6   :  { %v442_v44 = vpop.f32.mrb[0].mxu0 }
  0xf7   :  { %v443_v45 = vpop.f32.mrb[1].mxu0  ;;  %v464_v46 = vpop.f32.mrb[0].mxu1 }
  0xf8   :  { %v444_v47 = vadd.f32 %v443_v45, %v442_v44  ;;  %v445_v48 = vpop.f32.mrb[2].mxu0  ;;  %v465_v49 = vpop.f32.mrb[1].mxu1 }
  0xf9   :  { %v446_v50 = vpop.f32.mrb[3].mxu0  ;;  %v466_v51 = vadd.f32 %v465_v49, %v464_v46  ;;  %v467_v52 = vpop.f32.mrb[2].mxu1 }
  0xfa   :  { %v468_v53 = vpop.f32.mrb[3].mxu1 }
  0xfb   :  { %v366_v54 = vadd.f32 %v466_v51, %v444_v47 }
  0xfd   :  { %v372_v55 = vsel %vm371_vm0, %v366_v54, 0.0 }
  0xfe   :  { %373 = vadd.xlane.f32.xlu0 %v372_v55 }
 0x18b   :  { %v374_v56 = vpop.xlane.xlu0 %373 }
 0x18c   :  { %v376_v57 = vmul.f32 0.03125, %v374_v56 }
 0x18e   :  { %v377_v58 = vsub.f32 %v366_v54, %v376_v57 }
 0x190   :  { %v378_v59 = vmul.f32 %v377_v58, %v377_v58 }
 0x192   :  { %v379_v60 = vsel %vm371_vm0, %v378_v59, 0.0 }
 0x193   :  { %380 = vadd.xlane.f32.xlu0 %v379_v60 }
 0x220   :  { %v381_v61 = vpop.xlane.xlu0 %380 }
 0x221   :  { %v382_v62 = vmul.f32 0.03125, %v381_v61 }
 0x223   :  { %v383_v63 = vadd.f32 0.0001, %v382_v62 }
 0x225   :  { %504 = vrsqrt.f32 %v383_v63 }
 0x22f   :  { %v505_v0 = vpop.eup %504 }
 0x230   :  { %v385_v1 = vmul.f32 %v505_v0, %v377_v58 }
 0x232   :  { %vm386_vm1 = vcmp.gt.f32.partialorder %v385_v1, 0.0  ;;  %v387_v2 = vmul.f32 0.01, %v385_v1 }
 0x234   :  { %v388_v3 = vsel %vm386_vm1, %v385_v1, %v387_v2 }
 0x235   :  { %389 = vst.msk [vmem:[%s629_s2] sm:$0xf] %vm371_vm0, %v388_v3 }

// kernel: forward.10
= control target key start
LH: loop header
LB: loop body
LE: loop exit
PB: predicated region body
PF: predicated region fallthrough
CT: control target
= control target key end

     0   :  { %v287_v1 = vmov 0   ;;  %vm109_vm0 = vcmask 523264   ;;  %s366_s1 = inlined_call_operand.vmem [shape: bf16[64,512], index: 1, kind: input, shape index: {}]   ;;  %s367_s0 = inlined_call_operand.vmem [shape: bf16[8,64], index: 0, kind: input, shape index: {}]   ;;  %s368_s2 = inlined_call_operand.vmem [shape: f32[8,512], index: 2, kind: output, shape index: {}]  }
   0x1   :  { %v261_v0 = vld [vmem:[%s366_s1 + $0x4] ss:$16 sps:$4 sm:$0xff]   ;;  %145 = vmatprep.mubr.bf16.mxu0 %v287_v1  ;;  %186 = vmatprep.mubr.bf16.mxu1 %v287_v1  ;;  %v263_v2 = vld [vmem:[%s366_s1 + $0xc] ss:$16 sps:$4 sm:$0xff]   ;;  %v265_v3 = vld [vmem:[%s366_s1] ss:$16 sps:$4 sm:$0xff]  }
   0x2   :  { %113 = vmatprep.subr.bf16.mxu0 %v261_v0  ;;  %v266_v4 = vld [vmem:[%s366_s1 + $0x8] ss:$16 sps:$4 sm:$0xff]   ;;  %154 = vmatprep.subr.bf16.mxu1 %v263_v2  ;;  %v267_v5 = vld [vmem:[%s366_s1 + $0x24] ss:$16 sps:$4 sm:$0xff]   ;;  %v269_v6 = vld [vmem:[%s366_s1 + $0x2c] ss:$16 sps:$4 sm:$0xff]  }
   0x3   :  { %114 = vmatpush1.bf16.msra.mxu0 %v265_v3  ;;  %155 = vmatpush1.bf16.msra.mxu1 %v266_v4  ;;  %v271_v7 = vld [vmem:[%s366_s1 + $0x20] ss:$16 sps:$4 sm:$0xff]   ;;  %v272_v8 = vld [vmem:[%s366_s1 + $0x28] ss:$16 sps:$4 sm:$0xff]   ;;  %v273_v9 = vld [vmem:[%s366_s1 + $0x44] ss:$16 sps:$4 sm:$0xff]  }
   0x4   :  { %115 = vmatprep.subr.bf16.mxu0 %v267_v5  ;;  %156 = vmatprep.subr.bf16.mxu1 %v269_v6  ;;  %v275_v10 = vld [vmem:[%s366_s1 + $0x4c] ss:$16 sps:$4 sm:$0xff]   ;;  %v277_v11 = vld [vmem:[%s366_s1 + $0x40] ss:$16 sps:$4 sm:$0xff]   ;;  %v278_v12 = vld [vmem:[%s366_s1 + $0x48] ss:$16 sps:$4 sm:$0xff]  }
   0x5   :  { %v279_v13 = vld [vmem:[%s366_s1 + $0x64] ss:$16 sps:$4 sm:$0xff]   ;;  %v281_v14 = vld [vmem:[%s366_s1 + $0x6c] ss:$16 sps:$4 sm:$0xff]   ;;  %v283_v15 = vld [vmem:[%s366_s1 + $0x60] ss:$16 sps:$4 sm:$0xff]  }
   0x6   :  { %v284_v16 = vld [vmem:[%s366_s1 + $0x68] ss:$16 sps:$4 sm:$0xff]   ;;  %v12_v17 = vld [vmem:[%s367_s0] sm:$0xf] }
   0x7   :  { %116 = vmatpush1.bf16.msra.mxu0 %v271_v7  ;;  %157 = vmatpush1.bf16.msra.mxu1 %v272_v8 }
   0x8   :  { %117 = vmatprep.subr.bf16.mxu0 %v273_v9  ;;  %158 = vmatprep.subr.bf16.mxu1 %v275_v10 }
   0xb   :  { %118 = vmatpush1.bf16.msra.mxu0 %v277_v11  ;;  %159 = vmatpush1.bf16.msra.mxu1 %v278_v12 }
   0xc   :  { %119 = vmatprep.subr.bf16.mxu0 %v279_v13  ;;  %160 = vmatprep.subr.bf16.mxu1 %v281_v14 }
   0xf   :  { %120 = vmatpush1.bf16.msra.mxu0 %v283_v15  ;;  %161 = vmatpush1.bf16.msra.mxu1 %v284_v16 }
  0x12   :  { %258 = vmatmul.mubr.msk.bf16.vlgmr.msra.gmra.mrb[0].mxu0 %vm109_vm0, %v12_v17  ;;  %259 = vmatmul.mubr.msk.bf16.vlgmr.msra.gmra.mrb[0].mxu1 %vm109_vm0, %v12_v17 }
  0xe5   :  { %v147_v18 = vpop.f32.mrb[0].mxu0  ;;  %v188_v19 = vpop.f32.mrb[0].mxu1 }
  0xe6   :  { %v149_v20 = vpop.f32.mrb[1].mxu0  ;;  %v190_v21 = vpop.f32.mrb[1].mxu1 }
  0xe7   :  { %v195_v22 = vadd.f32 %v149_v20, %v147_v18  ;;  %v151_v23 = vpop.f32.mrb[2].mxu0  ;;  %v192_v24 = vpop.f32.mrb[2].mxu1 }
  0xe8   :  { %v152_v25 = vpop.f32.mrb[3].mxu0  ;;  %v193_v26 = vpop.f32.mrb[3].mxu1 }
  0xe9   :  { %v196_v27 = vadd.f32 %v195_v22, %v188_v19 }
  0xeb   :  { %v197_v28 = vadd.f32 %v196_v27, %v190_v21 }
  0xed   :  { %198 = vadd.xlane.f32.xlu0 %v197_v28 }
 0x17a   :  { %v199_v29 = vpop.xlane.xlu0 %198 }
 0x17b   :  { %v201_v30 = vmul.f32 0.001953125, %v199_v29 }
 0x17d   :  { %v202_v31 = vsub.f32 %v147_v18, %v201_v30  ;;  %v203_v32 = vsub.f32 %v149_v20, %v201_v30  ;;  %v204_v33 = vsub.f32 %v188_v19, %v201_v30  ;;  %v205_v34 = vsub.f32 %v190_v21, %v201_v30 }
 0x17f   :  { %v206_v35 = vmul.f32 %v202_v31, %v202_v31  ;;  %v207_v36 = vmul.f32 %v203_v32, %v203_v32  ;;  %v208_v37 = vmul.f32 %v204_v33, %v204_v33  ;;  %v209_v39 = vmul.f32 %v205_v34, %v205_v34 }
 0x181   :  { %v210_v38 = vadd.f32 %v207_v36, %v206_v35 }
 0x183   :  { %v211_v40 = vadd.f32 %v210_v38, %v208_v37 }
 0x185   :  { %v212_v41 = vadd.f32 %v211_v40, %v209_v39 }
 0x187   :  { %213 = vadd.xlane.f32.xlu0 %v212_v41 }
 0x214   :  { %v214_v42 = vpop.xlane.xlu0 %213 }
 0x215   :  { %v215_v43 = vmul.f32 0.001953125, %v214_v42 }
 0x217   :  { %v216_v44 = vadd.f32 0.0001, %v215_v43 }
 0x219   :  { %285 = vrsqrt.f32 %v216_v44 }
 0x223   :  { %v286_v45 = vpop.eup %285 }
 0x224   :  { %v218_v46 = vmul.f32 %v286_v45, %v202_v31  ;;  %v219_v47 = vmul.f32 %v286_v45, %v203_v32  ;;  %v220_v48 = vmul.f32 %v286_v45, %v204_v33  ;;  %v221_v49 = vmul.f32 %v286_v45, %v205_v34 }
 0x226   :  { %vm222_vm1 = vcmp.gt.f32.partialorder %v218_v46, 0.0  ;;  %vm223_vm2 = vcmp.gt.f32.partialorder %v219_v47, 0.0  ;;  %vm224_vm3 = vcmp.gt.f32.partialorder %v220_v48, 0.0  ;;  %vm225_vm4 = vcmp.gt.f32.partialorder %v221_v49, 0.0 }
 0x227   :  { %v226_v50 = vmul.f32 0.01, %v218_v46  ;;  %v227_v51 = vmul.f32 0.01, %v219_v47  ;;  %v228_v52 = vmul.f32 0.01, %v220_v48 }
 0x228   :  { %v229_v53 = vmul.f32 0.01, %v221_v49 }
 0x229   :  { %v230_v54 = vsel %vm222_vm1, %v218_v46, %v226_v50  ;;  %v231_v55 = vsel %vm223_vm2, %v219_v47, %v227_v51  ;;  %v232_v56 = vsel %vm224_vm3, %v220_v48, %v228_v52 }
 0x22a   :  { %v233_v57 = vsel %vm225_vm4, %v221_v49, %v229_v53  ;;  %234 = vst [vmem:[%s368_s2] sm:$0xff] %v230_v54  ;;  %235 = vst [vmem:[%s368_s2 + $0x8] sm:$0xff] %v231_v55 }
 0x22b   :  { %236 = vst [vmem:[%s368_s2 + $0x10] sm:$0xff] %v232_v56  ;;  %237 = vst [vmem:[%s368_s2 + $0x18] sm:$0xff] %v233_v57 }

// kernel: forward.11
= control target key start
LH: loop header
LB: loop body
LE: loop exit
PB: predicated region body
PF: predicated region fallthrough
CT: control target
= control target key end

     0   :  { %v6094_v3 = vmov 0   ;;  %s7841_s1 = inlined_call_operand.vmem [shape: bf16[128,8192], index: 1, kind: input, shape index: {}]   ;;  %s7842_s0 = inlined_call_operand.vmem [shape: bf16[1,128], index: 0, kind: input, shape index: {}]   ;;  %s7843_s2 = inlined_call_operand.vmem [shape: f32[1,8192], index: 2, kind: output, shape index: {}]  }
   0x1   :  { %v13_v0 = vld [vmem:[%s7841_s1] sm:$0xff]  ;;  %v14_v2 = vld [vmem:[%s7841_s1 + $0x8] sm:$0xff]  ;;  %3117 = vmatprep.mubr.bf16.mxu0 %v6094_v3  ;;  %3158 = vmatprep.mubr.bf16.mxu1 %v6094_v3  ;;  %v15_v63 = vld [vmem:[%s7841_s1 + $0x10] sm:$0xff] }
   0x2   :  { %v45_v1 = vld [vmem:[%s7841_s1 + $0x100] sm:$0xff]  ;;  %v46_v5 = vld [vmem:[%s7841_s1 + $0x108] sm:$0xff] }
   0x3   :  { %v5258_v4 = vcombine.high %v13_v0, %v45_v1  ;;  %v5257_v6 = vcombine.low %v13_v0, %v45_v1  ;;  %v77_v7 = vld [vmem:[%s7841_s1 + $0x200] sm:$0xff]  ;;  %v5260_v9 = vcombine.high %v14_v2, %v46_v5  ;;  %v5259_v10 = vcombine.low %v14_v2, %v46_v5  ;;  %v78_v12 = vld [vmem:[%s7841_s1 + $0x208] sm:$0xff]  ;;  %v47_v0 = vld [vmem:[%s7841_s1 + $0x110] sm:$0xff] }
   0x4   :  { %v109_v8 = vld [vmem:[%s7841_s1 + $0x300] sm:$0xff]  ;;  %v110_v13 = vld [vmem:[%s7841_s1 + $0x308] sm:$0xff]  ;;  %v16_v1 = vld [vmem:[%s7841_s1 + $0x18] sm:$0xff] }
   0x5   :  { %v5322_v11 = vcombine.high %v77_v7, %v109_v8  ;;  %v141_v14 = vld [vmem:[%s7841_s1 + $0x400] sm:$0xff]  ;;  %3085 = vmatprep.subr.bf16.mxu0 %v5258_v4  ;;  %v5324_v15 = vcombine.high %v78_v12, %v110_v13  ;;  %v142_v17 = vld [vmem:[%s7841_s1 + $0x408] sm:$0xff]  ;;  %3126 = vmatprep.subr.bf16.mxu1 %v5260_v9  ;;  %v5321_v19 = vcombine.low %v77_v7, %v109_v8  ;;  %v48_v2 = vld [vmem:[%s7841_s1 + $0x118] sm:$0xff] }
   0x6   :  { %v173_v16 = vld [vmem:[%s7841_s1 + $0x500] sm:$0xff]  ;;  %v174_v18 = vld [vmem:[%s7841_s1 + $0x508] sm:$0xff]  ;;  %3086 = vmatpush1.bf16.msra.mxu0 %v5257_v6  ;;  %3127 = vmatpush1.bf16.msra.mxu1 %v5259_v10  ;;  %v5323_v20 = vcombine.low %v78_v12, %v110_v13  ;;  %v5262_v6 = vcombine.high %v15_v63, %v47_v0  ;;  %v5264_v7 = vcombine.high %v16_v1, %v48_v2  ;;  %v79_v8 = vld [vmem:[%s7841_s1 + $0x210] sm:$0xff] }
   0x7   :  { %3087 = vmatprep.subr.bf16.mxu0 %v5322_v11  ;;  %v5386_v21 = vcombine.high %v141_v14, %v173_v16  ;;  %3128 = vmatprep.subr.bf16.mxu1 %v5324_v15  ;;  %v5388_v22 = vcombine.high %v142_v17, %v174_v18  ;;  %v205_v23 = vld [vmem:[%s7841_s1 + $0x600] sm:$0xff]  ;;  %v206_v25 = vld [vmem:[%s7841_s1 + $0x608] sm:$0xff]  ;;  %v5385_v27 = vcombine.low %v141_v14, %v173_v16  ;;  %v111_v9 = vld [vmem:[%s7841_s1 + $0x310] sm:$0xff] }
   0x8   :  { %v237_v24 = vld [vmem:[%s7841_s1 + $0x700] sm:$0xff]  ;;  %v238_v26 = vld [vmem:[%s7841_s1 + $0x708] sm:$0xff]  ;;  %v5387_v28 = vcombine.low %v142_v17, %v174_v18  ;;  %v80_v10 = vld [vmem:[%s7841_s1 + $0x218] sm:$0xff]  ;;  %v5261_v13 = vcombine.low %v15_v63, %v47_v0  ;;  %v5263_v14 = vcombine.low %v16_v1, %v48_v2  ;;  %v5326_v15 = vcombine.high %v79_v8, %v111_v9 }
   0x9   :  { %v5450_v29 = vcombine.high %v205_v23, %v237_v24  ;;  %v5452_v30 = vcombine.high %v206_v25, %v238_v26  ;;  %v269_v31 = vld [vmem:[%s7841_s1 + $0x800] sm:$0xff]  ;;  %v270_v33 = vld [vmem:[%s7841_s1 + $0x808] sm:$0xff]  ;;  %v5449_v35 = vcombine.low %v205_v23, %v237_v24  ;;  %v5451_v36 = vcombine.low %v206_v25, %v238_v26  ;;  %v112_v11 = vld [vmem:[%s7841_s1 + $0x318] sm:$0xff] }
   0xa   :  { %3088 = vmatpush1.bf16.msra.mxu0 %v5321_v19  ;;  %3129 = vmatpush1.bf16.msra.mxu1 %v5323_v20  ;;  %v301_v32 = vld [vmem:[%s7841_s1 + $0x900] sm:$0xff]  ;;  %v302_v34 = vld [vmem:[%s7841_s1 + $0x908] sm:$0xff]  ;;  %v5328_v16 = vcombine.high %v80_v10, %v112_v11  ;;  %v143_v17 = vld [vmem:[%s7841_s1 + $0x410] sm:$0xff] }
   0xb   :  { %3089 = vmatprep.subr.bf16.mxu0 %v5386_v21  ;;  %3130 = vmatprep.subr.bf16.mxu1 %v5388_v22  ;;  %v5514_v37 = vcombine.high %v269_v31, %v301_v32  ;;  %v5516_v38 = vcombine.high %v270_v33, %v302_v34  ;;  %v333_v39 = vld [vmem:[%s7841_s1 + $0xa00] sm:$0xff]  ;;  %v334_v41 = vld [vmem:[%s7841_s1 + $0xa08] sm:$0xff]  ;;  %v5513_v43 = vcombine.low %v269_v31, %v301_v32  ;;  %v175_v18 = vld [vmem:[%s7841_s1 + $0x510] sm:$0xff] }
   0xc   :  { %v365_v40 = vld [vmem:[%s7841_s1 + $0xb00] sm:$0xff]  ;;  %v366_v42 = vld [vmem:[%s7841_s1 + $0xb08] sm:$0xff]  ;;  %v5515_v44 = vcombine.low %v270_v33, %v302_v34  ;;  %v144_v19 = vld [vmem:[%s7841_s1 + $0x418] sm:$0xff]  ;;  %v5325_v21 = vcombine.low %v79_v8, %v111_v9  ;;  %v5327_v22 = vcombine.low %v80_v10, %v112_v11  ;;  %v5390_v23 = vcombine.high %v143_v17, %v175_v18 }
   0xd   :  { %v5578_v45 = vcombine.high %v333_v39, %v365_v40  ;;  %v5580_v46 = vcombine.high %v334_v41, %v366_v42  ;;  %v397_v47 = vld [vmem:[%s7841_s1 + $0xc00] sm:$0xff]  ;;  %v398_v49 = vld [vmem:[%s7841_s1 + $0xc08] sm:$0xff]  ;;  %v5577_v51 = vcombine.low %v333_v39, %v365_v40  ;;  %v5579_v52 = vcombine.low %v334_v41, %v366_v42  ;;  %v176_v20 = vld [vmem:[%s7841_s1 + $0x518] sm:$0xff] }
   0xe   :  { %3090 = vmatpush1.bf16.msra.mxu0 %v5385_v27  ;;  %3131 = vmatpush1.bf16.msra.mxu1 %v5387_v28  ;;  %v429_v48 = vld [vmem:[%s7841_s1 + $0xd00] sm:$0xff]  ;;  %v430_v50 = vld [vmem:[%s7841_s1 + $0xd08] sm:$0xff]  ;;  %v5392_v24 = vcombine.high %v144_v19, %v176_v20  ;;  %v207_v25 = vld [vmem:[%s7841_s1 + $0x610] sm:$0xff] }
   0xf   :  { %3091 = vmatprep.subr.bf16.mxu0 %v5450_v29  ;;  %3132 = vmatprep.subr.bf16.mxu1 %v5452_v30  ;;  %v5642_v53 = vcombine.high %v397_v47, %v429_v48  ;;  %v5644_v54 = vcombine.high %v398_v49, %v430_v50  ;;  %v461_v55 = vld [vmem:[%s7841_s1 + $0xe00] sm:$0xff]  ;;  %v462_v57 = vld [vmem:[%s7841_s1 + $0xe08] sm:$0xff]  ;;  %v5641_v59 = vcombine.low %v397_v47, %v429_v48  ;;  %v239_v26 = vld [vmem:[%s7841_s1 + $0x710] sm:$0xff] }
  0x10   :  { %v493_v56 = vld [vmem:[%s7841_s1 + $0xf00] sm:$0xff]  ;;  %v494_v58 = vld [vmem:[%s7841_s1 + $0xf08] sm:$0xff]  ;;  %v5643_v60 = vcombine.low %v398_v49, %v430_v50  ;;  %v208_v27 = vld [vmem:[%s7841_s1 + $0x618] sm:$0xff]  ;;  %v5389_v29 = vcombine.low %v143_v17, %v175_v18  ;;  %v5391_v30 = vcombine.low %v144_v19, %v176_v20  ;;  %v5454_v31 = vcombine.high %v207_v25, %v239_v26 }
  0x11   :  { %v5706_v61 = vcombine.high %v461_v55, %v493_v56  ;;  %v5708_v62 = vcombine.high %v462_v57, %v494_v58  ;;  %v5705_v4 = vcombine.low %v461_v55, %v493_v56  ;;  %v5707_v5 = vcombine.low %v462_v57, %v494_v58  ;;  %v6236_v12 = vld [vmem:[%s7842_s0] sm:$0x1]  ;;  %v240_v28 = vld [vmem:[%s7841_s1 + $0x718] sm:$0xff]  ;;  %v271_v33 = vld [vmem:[%s7841_s1 + $0x810] sm:$0xff] }
  0x12   :  { %3092 = vmatpush1.bf16.msra.mxu0 %v5449_v35  ;;  %3133 = vmatpush1.bf16.msra.mxu1 %v5451_v36  ;;  %v5456_v32 = vcombine.high %v208_v27, %v240_v28  ;;  %v303_v34 = vld [vmem:[%s7841_s1 + $0x910] sm:$0xff]  ;;  %v272_v35 = vld [vmem:[%s7841_s1 + $0x818] sm:$0xff]  ;;  %v17_v1 = vld [vmem:[%s7841_s1 + $0x20] sm:$0xff] }
  0x13   :  { %3093 = vmatprep.subr.bf16.mxu0 %v5514_v37  ;;  %3134 = vmatprep.subr.bf16.mxu1 %v5516_v38  ;;  %v304_v36 = vld [vmem:[%s7841_s1 + $0x918] sm:$0xff]  ;;  %v5453_v37 = vcombine.low %v207_v25, %v239_v26  ;;  %v5455_v38 = vcombine.low %v208_v27, %v240_v28  ;;  %v5518_v39 = vcombine.high %v271_v33, %v303_v34  ;;  %v335_v41 = vld [vmem:[%s7841_s1 + $0xa10] sm:$0xff]  ;;  %v49_v2 = vld [vmem:[%s7841_s1 + $0x120] sm:$0xff] }
  0x14   :  { %v5520_v40 = vcombine.high %v272_v35, %v304_v36  ;;  %v367_v42 = vld [vmem:[%s7841_s1 + $0xb10] sm:$0xff]  ;;  %v5266_v8 = vcombine.high %v17_v1, %v49_v2  ;;  %v81_v10 = vld [vmem:[%s7841_s1 + $0x220] sm:$0xff] }
  0x15   :  { %v5582_v47 = vcombine.high %v335_v41, %v367_v42  ;;  %v399_v49 = vld [vmem:[%s7841_s1 + $0xc10] sm:$0xff]  ;;  %v113_v11 = vld [vmem:[%s7841_s1 + $0x320] sm:$0xff] }
  0x16   :  { %3094 = vmatpush1.bf16.msra.mxu0 %v5513_v43  ;;  %3135 = vmatpush1.bf16.msra.mxu1 %v5515_v44  ;;  %v336_v43 = vld [vmem:[%s7841_s1 + $0xa18] sm:$0xff]  ;;  %v431_v50 = vld [vmem:[%s7841_s1 + $0xd10] sm:$0xff]  ;;  %v5330_v17 = vcombine.high %v81_v10, %v113_v11  ;;  %v145_v19 = vld [vmem:[%s7841_s1 + $0x420] sm:$0xff] }
  0x17   :  { %3095 = vmatprep.subr.bf16.mxu0 %v5578_v45  ;;  %3136 = vmatprep.subr.bf16.mxu1 %v5580_v46  ;;  %v368_v44 = vld [vmem:[%s7841_s1 + $0xb18] sm:$0xff]  ;;  %v5517_v45 = vcombine.low %v271_v33, %v303_v34  ;;  %v5519_v46 = vcombine.low %v272_v35, %v304_v36  ;;  %v5646_v55 = vcombine.high %v399_v49, %v431_v50  ;;  %v463_v57 = vld [vmem:[%s7841_s1 + $0xe10] sm:$0xff]  ;;  %v177_v20 = vld [vmem:[%s7841_s1 + $0x520] sm:$0xff] }
  0x18   :  { %v5584_v48 = vcombine.high %v336_v43, %v368_v44  ;;  %v495_v58 = vld [vmem:[%s7841_s1 + $0xf10] sm:$0xff]  ;;  %v5394_v25 = vcombine.high %v145_v19, %v177_v20  ;;  %v209_v27 = vld [vmem:[%s7841_s1 + $0x620] sm:$0xff] }
  0x19   :  { %v5710_v63 = vcombine.high %v463_v57, %v495_v58  ;;  %v241_v28 = vld [vmem:[%s7841_s1 + $0x720] sm:$0xff] }
  0x1a   :  { %3096 = vmatpush1.bf16.msra.mxu0 %v5577_v51  ;;  %3137 = vmatpush1.bf16.msra.mxu1 %v5579_v52  ;;  %v400_v51 = vld [vmem:[%s7841_s1 + $0xc18] sm:$0xff]  ;;  %v5458_v33 = vcombine.high %v209_v27, %v241_v28  ;;  %v273_v35 = vld [vmem:[%s7841_s1 + $0x820] sm:$0xff] }
  0x1b   :  { %3097 = vmatprep.subr.bf16.mxu0 %v5642_v53  ;;  %3138 = vmatprep.subr.bf16.mxu1 %v5644_v54  ;;  %v432_v52 = vld [vmem:[%s7841_s1 + $0xd18] sm:$0xff]  ;;  %v5581_v53 = vcombine.low %v335_v41, %v367_v42  ;;  %v5583_v54 = vcombine.low %v336_v43, %v368_v44  ;;  %v305_v36 = vld [vmem:[%s7841_s1 + $0x920] sm:$0xff] }
  0x1c   :  { %v5648_v56 = vcombine.high %v400_v51, %v432_v52  ;;  %v5522_v41 = vcombine.high %v273_v35, %v305_v36  ;;  %v337_v43 = vld [vmem:[%s7841_s1 + $0xa20] sm:$0xff] }
  0x1d   :  { %v369_v44 = vld [vmem:[%s7841_s1 + $0xb20] sm:$0xff] }
  0x1e   :  { %3098 = vmatpush1.bf16.msra.mxu0 %v5641_v59  ;;  %3139 = vmatpush1.bf16.msra.mxu1 %v5643_v60  ;;  %v464_v59 = vld [vmem:[%s7841_s1 + $0xe18] sm:$0xff] }
  0x1f   :  { %3099 = vmatprep.subr.bf16.mxu0 %v5706_v61  ;;  %3140 = vmatprep.subr.bf16.mxu1 %v5708_v62  ;;  %v496_v60 = vld [vmem:[%s7841_s1 + $0xf18] sm:$0xff]  ;;  %v5645_v61 = vcombine.low %v399_v49, %v431_v50  ;;  %v5647_v62 = vcombine.low %v400_v51, %v432_v52  ;;  %v5586_v49 = vcombine.high %v337_v43, %v369_v44  ;;  %v401_v51 = vld [vmem:[%s7841_s1 + $0xc20] sm:$0xff] }
  0x20   :  { %v5712_v0 = vcombine.high %v464_v59, %v496_v60  ;;  %v433_v52 = vld [vmem:[%s7841_s1 + $0xd20] sm:$0xff] }
  0x22   :  { %3100 = vmatpush1.bf16.msra.mxu0 %v5705_v4  ;;  %3141 = vmatpush1.bf16.msra.mxu1 %v5707_v5  ;;  %v18_v4 = vld [vmem:[%s7841_s1 + $0x28] sm:$0xff] }
  0x23   :  { %3167 = vmatprep.subr.bf16.mxu0 %v5262_v6  ;;  %3208 = vmatprep.subr.bf16.mxu1 %v5264_v7  ;;  %v50_v5 = vld [vmem:[%s7841_s1 + $0x128] sm:$0xff]  ;;  %v5709_v6 = vcombine.low %v463_v57, %v495_v58  ;;  %v5711_v7 = vcombine.low %v464_v59, %v496_v60  ;;  %v5650_v57 = vcombine.high %v401_v51, %v433_v52  ;;  %v465_v59 = vld [vmem:[%s7841_s1 + $0xe20] sm:$0xff] }
  0x24   :  { %v5268_v9 = vcombine.high %v18_v4, %v50_v5  ;;  %v497_v60 = vld [vmem:[%s7841_s1 + $0xf20] sm:$0xff] }
  0x25   :  { %3118 = vmatmul.mubr.bf16.vlgmr.msra.gmra.mrb[0].mxu0 %v6236_v12  ;;  %3159 = vmatmul.mubr.bf16.vlgmr.msra.gmra.mrb[0].mxu1 %v6236_v12 }
  0x26   :  { %3168 = vmatpush1.bf16.msra.mxu0 %v5261_v13  ;;  %3209 = vmatpush1.bf16.msra.mxu1 %v5263_v14  ;;  %v82_v13 = vld [vmem:[%s7841_s1 + $0x228] sm:$0xff] }
  0x27   :  { %3169 = vmatprep.subr.bf16.mxu0 %v5326_v15  ;;  %3210 = vmatprep.subr.bf16.mxu1 %v5328_v16  ;;  %v114_v14 = vld [vmem:[%s7841_s1 + $0x328] sm:$0xff]  ;;  %v5265_v15 = vcombine.low %v17_v1, %v49_v2  ;;  %v5267_v16 = vcombine.low %v18_v4, %v50_v5  ;;  %v5714_v1 = vcombine.high %v465_v59, %v497_v60  ;;  %v19_v4 = vld [vmem:[%s7841_s1 + $0x30] sm:$0xff] }
  0x28   :  { %3199 = vmatprep.mubr.bf16.mxu0 %v6094_v3  ;;  %3240 = vmatprep.mubr.bf16.mxu1 %v6094_v3  ;;  %v5332_v18 = vcombine.high %v82_v13, %v114_v14  ;;  %v51_v5 = vld [vmem:[%s7841_s1 + $0x130] sm:$0xff] }
  0x2a   :  { %3170 = vmatpush1.bf16.msra.mxu0 %v5325_v21  ;;  %3211 = vmatpush1.bf16.msra.mxu1 %v5327_v22  ;;  %v146_v21 = vld [vmem:[%s7841_s1 + $0x428] sm:$0xff] }
  0x2b   :  { %3171 = vmatprep.subr.bf16.mxu0 %v5390_v23  ;;  %3212 = vmatprep.subr.bf16.mxu1 %v5392_v24  ;;  %v178_v22 = vld [vmem:[%s7841_s1 + $0x528] sm:$0xff]  ;;  %v5329_v23 = vcombine.low %v81_v10, %v113_v11  ;;  %v5331_v24 = vcombine.low %v82_v13, %v114_v14  ;;  %v5270_v10 = vcombine.high %v19_v4, %v51_v5  ;;  %v83_v13 = vld [vmem:[%s7841_s1 + $0x230] sm:$0xff] }
  0x2c   :  { %v5396_v26 = vcombine.high %v146_v21, %v178_v22  ;;  %v115_v14 = vld [vmem:[%s7841_s1 + $0x330] sm:$0xff] }
  0x2e   :  { %3172 = vmatpush1.bf16.msra.mxu0 %v5389_v29  ;;  %3213 = vmatpush1.bf16.msra.mxu1 %v5391_v30  ;;  %v210_v29 = vld [vmem:[%s7841_s1 + $0x628] sm:$0xff] }
  0x2f   :  { %3173 = vmatprep.subr.bf16.mxu0 %v5454_v31  ;;  %3214 = vmatprep.subr.bf16.mxu1 %v5456_v32  ;;  %v242_v30 = vld [vmem:[%s7841_s1 + $0x728] sm:$0xff]  ;;  %v5393_v31 = vcombine.low %v145_v19, %v177_v20  ;;  %v5395_v32 = vcombine.low %v146_v21, %v178_v22  ;;  %v5334_v19 = vcombine.high %v83_v13, %v115_v14  ;;  %v147_v21 = vld [vmem:[%s7841_s1 + $0x430] sm:$0xff] }
  0x30   :  { %v5460_v34 = vcombine.high %v210_v29, %v242_v30  ;;  %v179_v22 = vld [vmem:[%s7841_s1 + $0x530] sm:$0xff] }
  0x32   :  { %3174 = vmatpush1.bf16.msra.mxu0 %v5453_v37  ;;  %3215 = vmatpush1.bf16.msra.mxu1 %v5455_v38  ;;  %v274_v37 = vld [vmem:[%s7841_s1 + $0x828] sm:$0xff] }
  0x33   :  { %3175 = vmatprep.subr.bf16.mxu0 %v5518_v39  ;;  %3216 = vmatprep.subr.bf16.mxu1 %v5520_v40  ;;  %v306_v38 = vld [vmem:[%s7841_s1 + $0x928] sm:$0xff]  ;;  %v5457_v39 = vcombine.low %v209_v27, %v241_v28  ;;  %v5459_v40 = vcombine.low %v210_v29, %v242_v30  ;;  %v5398_v27 = vcombine.high %v147_v21, %v179_v22  ;;  %v211_v29 = vld [vmem:[%s7841_s1 + $0x630] sm:$0xff] }
  0x34   :  { %v5524_v42 = vcombine.high %v274_v37, %v306_v38  ;;  %v243_v30 = vld [vmem:[%s7841_s1 + $0x730] sm:$0xff] }
  0x36   :  { %3176 = vmatpush1.bf16.msra.mxu0 %v5517_v45  ;;  %3217 = vmatpush1.bf16.msra.mxu1 %v5519_v46  ;;  %v338_v45 = vld [vmem:[%s7841_s1 + $0xa28] sm:$0xff] }
  0x37   :  { %3177 = vmatprep.subr.bf16.mxu0 %v5582_v47  ;;  %3218 = vmatprep.subr.bf16.mxu1 %v5584_v48  ;;  %v370_v46 = vld [vmem:[%s7841_s1 + $0xb28] sm:$0xff]  ;;  %v5521_v47 = vcombine.low %v273_v35, %v305_v36  ;;  %v5523_v48 = vcombine.low %v274_v37, %v306_v38  ;;  %v5462_v35 = vcombine.high %v211_v29, %v243_v30  ;;  %v275_v37 = vld [vmem:[%s7841_s1 + $0x830] sm:$0xff] }
  0x38   :  { %v5588_v50 = vcombine.high %v338_v45, %v370_v46  ;;  %v307_v38 = vld [vmem:[%s7841_s1 + $0x930] sm:$0xff] }
  0x3a   :  { %3178 = vmatpush1.bf16.msra.mxu0 %v5581_v53  ;;  %3219 = vmatpush1.bf16.msra.mxu1 %v5583_v54  ;;  %v402_v53 = vld [vmem:[%s7841_s1 + $0xc28] sm:$0xff] }
  0x3b   :  { %3179 = vmatprep.subr.bf16.mxu0 %v5646_v55  ;;  %3220 = vmatprep.subr.bf16.mxu1 %v5648_v56  ;;  %v434_v54 = vld [vmem:[%s7841_s1 + $0xd28] sm:$0xff]  ;;  %v5585_v55 = vcombine.low %v337_v43, %v369_v44  ;;  %v5587_v56 = vcombine.low %v338_v45, %v370_v46  ;;  %v5526_v43 = vcombine.high %v275_v37, %v307_v38  ;;  %v339_v45 = vld [vmem:[%s7841_s1 + $0xa30] sm:$0xff] }
  0x3c   :  { %v5652_v58 = vcombine.high %v402_v53, %v434_v54  ;;  %v371_v46 = vld [vmem:[%s7841_s1 + $0xb30] sm:$0xff] }
  0x3e   :  { %3180 = vmatpush1.bf16.msra.mxu0 %v5645_v61  ;;  %3221 = vmatpush1.bf16.msra.mxu1 %v5647_v62  ;;  %v466_v61 = vld [vmem:[%s7841_s1 + $0xe28] sm:$0xff] }
  0x3f   :  { %3181 = vmatprep.subr.bf16.mxu0 %v5710_v63  ;;  %3222 = vmatprep.subr.bf16.mxu1 %v5712_v0  ;;  %v498_v62 = vld [vmem:[%s7841_s1 + $0xf28] sm:$0xff]  ;;  %v5649_v63 = vcombine.low %v401_v51, %v433_v52  ;;  %v5651_v0 = vcombine.low %v402_v53, %v434_v54  ;;  %v5590_v51 = vcombine.high %v339_v45, %v371_v46  ;;  %v403_v53 = vld [vmem:[%s7841_s1 + $0xc30] sm:$0xff] }
  0x40   :  { %v5716_v2 = vcombine.high %v466_v61, %v498_v62  ;;  %v435_v54 = vld [vmem:[%s7841_s1 + $0xd30] sm:$0xff] }
  0x42   :  { %3182 = vmatpush1.bf16.msra.mxu0 %v5709_v6  ;;  %3223 = vmatpush1.bf16.msra.mxu1 %v5711_v7  ;;  %v20_v6 = vld [vmem:[%s7841_s1 + $0x38] sm:$0xff] }
  0x43   :  { %3249 = vmatprep.subr.bf16.mxu0 %v5266_v8  ;;  %3290 = vmatprep.subr.bf16.mxu1 %v5268_v9  ;;  %v52_v7 = vld [vmem:[%s7841_s1 + $0x138] sm:$0xff]  ;;  %v5713_v8 = vcombine.low %v465_v59, %v497_v60  ;;  %v5715_v9 = vcombine.low %v466_v61, %v498_v62  ;;  %v5654_v59 = vcombine.high %v403_v53, %v435_v54  ;;  %v467_v61 = vld [vmem:[%s7841_s1 + $0xe30] sm:$0xff] }
  0x44   :  { %v5272_v11 = vcombine.high %v20_v6, %v52_v7  ;;  %v499_v62 = vld [vmem:[%s7841_s1 + $0xf30] sm:$0xff] }
  0x45   :  { %3200 = vmatmul.mubr.bf16.vlgmr.msra.gmra.mrb[4].mxu0 %v6236_v12  ;;  %3241 = vmatmul.mubr.bf16.vlgmr.msra.gmra.mrb[4].mxu1 %v6236_v12 }
  0x46   :  { %3250 = vmatpush1.bf16.msra.mxu0 %v5265_v15  ;;  %3291 = vmatpush1.bf16.msra.mxu1 %v5267_v16  ;;  %v84_v15 = vld [vmem:[%s7841_s1 + $0x238] sm:$0xff] }
  0x47   :  { %3251 = vmatprep.subr.bf16.mxu0 %v5330_v17  ;;  %3292 = vmatprep.subr.bf16.mxu1 %v5332_v18  ;;  %v116_v16 = vld [vmem:[%s7841_s1 + $0x338] sm:$0xff]  ;;  %v5269_v17 = vcombine.low %v19_v4, %v51_v5  ;;  %v5271_v18 = vcombine.low %v20_v6, %v52_v7  ;;  %v5718_v4 = vcombine.high %v467_v61, %v499_v62  ;;  %v21_v6 = vld [vmem:[%s7841_s1 + $0x40] sm:$0xff] }
  0x48   :  { %3281 = vmatprep.mubr.bf16.mxu0 %v6094_v3  ;;  %3322 = vmatprep.mubr.bf16.mxu1 %v6094_v3  ;;  %v5336_v20 = vcombine.high %v84_v15, %v116_v16  ;;  %v53_v7 = vld [vmem:[%s7841_s1 + $0x140] sm:$0xff] }
  0x4a   :  { %3252 = vmatpush1.bf16.msra.mxu0 %v5329_v23  ;;  %3293 = vmatpush1.bf16.msra.mxu1 %v5331_v24  ;;  %v148_v23 = vld [vmem:[%s7841_s1 + $0x438] sm:$0xff] }
  0x4b   :  { %3253 = vmatprep.subr.bf16.mxu0 %v5394_v25  ;;  %3294 = vmatprep.subr.bf16.mxu1 %v5396_v26  ;;  %v180_v24 = vld [vmem:[%s7841_s1 + $0x538] sm:$0xff]  ;;  %v5333_v25 = vcombine.low %v83_v13, %v115_v14  ;;  %v5335_v26 = vcombine.low %v84_v15, %v116_v16  ;;  %v5274_v13 = vcombine.high %v21_v6, %v53_v7  ;;  %v85_v15 = vld [vmem:[%s7841_s1 + $0x240] sm:$0xff] }
  0x4c   :  { %v5400_v28 = vcombine.high %v148_v23, %v180_v24  ;;  %v117_v16 = vld [vmem:[%s7841_s1 + $0x340] sm:$0xff] }
  0x4e   :  { %3254 = vmatpush1.bf16.msra.mxu0 %v5393_v31  ;;  %3295 = vmatpush1.bf16.msra.mxu1 %v5395_v32  ;;  %v212_v31 = vld [vmem:[%s7841_s1 + $0x638] sm:$0xff] }
  0x4f   :  { %3255 = vmatprep.subr.bf16.mxu0 %v5458_v33  ;;  %3296 = vmatprep.subr.bf16.mxu1 %v5460_v34  ;;  %v244_v32 = vld [vmem:[%s7841_s1 + $0x738] sm:$0xff]  ;;  %v5397_v33 = vcombine.low %v147_v21, %v179_v22  ;;  %v5399_v34 = vcombine.low %v148_v23, %v180_v24  ;;  %v5338_v21 = vcombine.high %v85_v15, %v117_v16  ;;  %v149_v23 = vld [vmem:[%s7841_s1 + $0x440] sm:$0xff] }
  0x50   :  { %v5464_v36 = vcombine.high %v212_v31, %v244_v32  ;;  %v181_v24 = vld [vmem:[%s7841_s1 + $0x540] sm:$0xff] }
  0x52   :  { %3256 = vmatpush1.bf16.msra.mxu0 %v5457_v39  ;;  %3297 = vmatpush1.bf16.msra.mxu1 %v5459_v40  ;;  %v276_v39 = vld [vmem:[%s7841_s1 + $0x838] sm:$0xff] }
  0x53   :  { %3257 = vmatprep.subr.bf16.mxu0 %v5522_v41  ;;  %3298 = vmatprep.subr.bf16.mxu1 %v5524_v42  ;;  %v308_v40 = vld [vmem:[%s7841_s1 + $0x938] sm:$0xff]  ;;  %v5461_v41 = vcombine.low %v211_v29, %v243_v30  ;;  %v5463_v42 = vcombine.low %v212_v31, %v244_v32  ;;  %v5402_v29 = vcombine.high %v149_v23, %v181_v24  ;;  %v213_v31 = vld [vmem:[%s7841_s1 + $0x640] sm:$0xff] }
  0x54   :  { %v5528_v44 = vcombine.high %v276_v39, %v308_v40  ;;  %v245_v32 = vld [vmem:[%s7841_s1 + $0x740] sm:$0xff] }
  0x56   :  { %3258 = vmatpush1.bf16.msra.mxu0 %v5521_v47  ;;  %3299 = vmatpush1.bf16.msra.mxu1 %v5523_v48  ;;  %v340_v47 = vld [vmem:[%s7841_s1 + $0xa38] sm:$0xff] }
  0x57   :  { %3259 = vmatprep.subr.bf16.mxu0 %v5586_v49  ;;  %3300 = vmatprep.subr.bf16.mxu1 %v5588_v50  ;;  %v372_v48 = vld [vmem:[%s7841_s1 + $0xb38] sm:$0xff]  ;;  %v5525_v49 = vcombine.low %v275_v37, %v307_v38  ;;  %v5527_v50 = vcombine.low %v276_v39, %v308_v40  ;;  %v5466_v37 = vcombine.high %v213_v31, %v245_v32  ;;  %v277_v39 = vld [vmem:[%s7841_s1 + $0x840] sm:$0xff] }
  0x58   :  { %v5592_v52 = vcombine.high %v340_v47, %v372_v48  ;;  %v309_v40 = vld [vmem:[%s7841_s1 + $0x940] sm:$0xff] }
  0x5a   :  { %3260 = vmatpush1.bf16.msra.mxu0 %v5585_v55  ;;  %3301 = vmatpush1.bf16.msra.mxu1 %v5587_v56  ;;  %v404_v55 = vld [vmem:[%s7841_s1 + $0xc38] sm:$0xff] }
  0x5b   :  { %3261 = vmatprep.subr.bf16.mxu0 %v5650_v57  ;;  %3302 = vmatprep.subr.bf16.mxu1 %v5652_v58  ;;  %v436_v56 = vld [vmem:[%s7841_s1 + $0xd38] sm:$0xff]  ;;  %v5589_v57 = vcombine.low %v339_v45, %v371_v46  ;;  %v5591_v58 = vcombine.low %v340_v47, %v372_v48  ;;  %v5530_v45 = vcombine.high %v277_v39, %v309_v40  ;;  %v341_v47 = vld [vmem:[%s7841_s1 + $0xa40] sm:$0xff] }
  0x5c   :  { %v5656_v60 = vcombine.high %v404_v55, %v436_v56  ;;  %v373_v48 = vld [vmem:[%s7841_s1 + $0xb40] sm:$0xff] }
  0x5e   :  { %3262 = vmatpush1.bf16.msra.mxu0 %v5649_v63  ;;  %3303 = vmatpush1.bf16.msra.mxu1 %v5651_v0  ;;  %v468_v63 = vld [vmem:[%s7841_s1 + $0xe38] sm:$0xff] }
  0x5f   :  { %3263 = vmatprep.subr.bf16.mxu0 %v5714_v1  ;;  %3304 = vmatprep.subr.bf16.mxu1 %v5716_v2  ;;  %v500_v0 = vld [vmem:[%s7841_s1 + $0xf38] sm:$0xff]  ;;  %v5653_v1 = vcombine.low %v403_v53, %v435_v54  ;;  %v5655_v2 = vcombine.low %v404_v55, %v436_v56  ;;  %v5594_v53 = vcombine.high %v341_v47, %v373_v48  ;;  %v405_v55 = vld [vmem:[%s7841_s1 + $0xc40] sm:$0xff] }
  0x60   :  { %v5720_v5 = vcombine.high %v468_v63, %v500_v0  ;;  %v437_v56 = vld [vmem:[%s7841_s1 + $0xd40] sm:$0xff] }
  0x62   :  { %3264 = vmatpush1.bf16.msra.mxu0 %v5713_v8  ;;  %3305 = vmatpush1.bf16.msra.mxu1 %v5715_v9  ;;  %v22_v8 = vld [vmem:[%s7841_s1 + $0x48] sm:$0xff] }
  0x63   :  { %3331 = vmatprep.subr.bf16.mxu0 %v5270_v10  ;;  %3372 = vmatprep.subr.bf16.mxu1 %v5272_v11  ;;  %v54_v9 = vld [vmem:[%s7841_s1 + $0x148] sm:$0xff]  ;;  %v5717_v10 = vcombine.low %v467_v61, %v499_v62  ;;  %v5719_v11 = vcombine.low %v468_v63, %v500_v0  ;;  %v5658_v61 = vcombine.high %v405_v55, %v437_v56  ;;  %v469_v63 = vld [vmem:[%s7841_s1 + $0xe40] sm:$0xff] }
  0x64   :  { %v5276_v14 = vcombine.high %v22_v8, %v54_v9  ;;  %v501_v0 = vld [vmem:[%s7841_s1 + $0xf40] sm:$0xff] }
  0x65   :  { %3282 = vmatmul.mubr.bf16.vlgmr.msra.gmra.mrb[8].mxu0 %v6236_v12  ;;  %3323 = vmatmul.mubr.bf16.vlgmr.msra.gmra.mrb[8].mxu1 %v6236_v12 }
  0x66   :  { %3332 = vmatpush1.bf16.msra.mxu0 %v5269_v17  ;;  %3373 = vmatpush1.bf16.msra.mxu1 %v5271_v18  ;;  %v86_v17 = vld [vmem:[%s7841_s1 + $0x248] sm:$0xff] }
  0x67   :  { %3333 = vmatprep.subr.bf16.mxu0 %v5334_v19  ;;  %3374 = vmatprep.subr.bf16.mxu1 %v5336_v20  ;;  %v118_v18 = vld [vmem:[%s7841_s1 + $0x348] sm:$0xff]  ;;  %v5273_v19 = vcombine.low %v21_v6, %v53_v7  ;;  %v5275_v20 = vcombine.low %v22_v8, %v54_v9  ;;  %v5722_v6 = vcombine.high %v469_v63, %v501_v0  ;;  %v23_v8 = vld [vmem:[%s7841_s1 + $0x50] sm:$0xff] }
  0x68   :  { %3363 = vmatprep.mubr.bf16.mxu0 %v6094_v3  ;;  %3404 = vmatprep.mubr.bf16.mxu1 %v6094_v3  ;;  %v5340_v22 = vcombine.high %v86_v17, %v118_v18  ;;  %v55_v9 = vld [vmem:[%s7841_s1 + $0x150] sm:$0xff] }
  0x6a   :  { %3334 = vmatpush1.bf16.msra.mxu0 %v5333_v25  ;;  %3375 = vmatpush1.bf16.msra.mxu1 %v5335_v26  ;;  %v150_v25 = vld [vmem:[%s7841_s1 + $0x448] sm:$0xff] }
  0x6b   :  { %3335 = vmatprep.subr.bf16.mxu0 %v5398_v27  ;;  %3376 = vmatprep.subr.bf16.mxu1 %v5400_v28  ;;  %v182_v26 = vld [vmem:[%s7841_s1 + $0x548] sm:$0xff]  ;;  %v5337_v27 = vcombine.low %v85_v15, %v117_v16  ;;  %v5339_v28 = vcombine.low %v86_v17, %v118_v18  ;;  %v5278_v15 = vcombine.high %v23_v8, %v55_v9  ;;  %v87_v17 = vld [vmem:[%s7841_s1 + $0x250] sm:$0xff] }
  0x6c   :  { %v5404_v30 = vcombine.high %v150_v25, %v182_v26  ;;  %v119_v18 = vld [vmem:[%s7841_s1 + $0x350] sm:$0xff] }
  0x6e   :  { %3336 = vmatpush1.bf16.msra.mxu0 %v5397_v33  ;;  %3377 = vmatpush1.bf16.msra.mxu1 %v5399_v34  ;;  %v214_v33 = vld [vmem:[%s7841_s1 + $0x648] sm:$0xff] }
  0x6f   :  { %3337 = vmatprep.subr.bf16.mxu0 %v5462_v35  ;;  %3378 = vmatprep.subr.bf16.mxu1 %v5464_v36  ;;  %v246_v34 = vld [vmem:[%s7841_s1 + $0x748] sm:$0xff]  ;;  %v5401_v35 = vcombine.low %v149_v23, %v181_v24  ;;  %v5403_v36 = vcombine.low %v150_v25, %v182_v26  ;;  %v5342_v23 = vcombine.high %v87_v17, %v119_v18  ;;  %v151_v25 = vld [vmem:[%s7841_s1 + $0x450] sm:$0xff] }
  0x70   :  { %v5468_v38 = vcombine.high %v214_v33, %v246_v34  ;;  %v183_v26 = vld [vmem:[%s7841_s1 + $0x550] sm:$0xff] }
  0x72   :  { %3338 = vmatpush1.bf16.msra.mxu0 %v5461_v41  ;;  %3379 = vmatpush1.bf16.msra.mxu1 %v5463_v42  ;;  %v278_v41 = vld [vmem:[%s7841_s1 + $0x848] sm:$0xff] }
  0x73   :  { %3339 = vmatprep.subr.bf16.mxu0 %v5526_v43  ;;  %3380 = vmatprep.subr.bf16.mxu1 %v5528_v44  ;;  %v310_v42 = vld [vmem:[%s7841_s1 + $0x948] sm:$0xff]  ;;  %v5465_v43 = vcombine.low %v213_v31, %v245_v32  ;;  %v5467_v44 = vcombine.low %v214_v33, %v246_v34  ;;  %v5406_v31 = vcombine.high %v151_v25, %v183_v26  ;;  %v215_v33 = vld [vmem:[%s7841_s1 + $0x650] sm:$0xff] }
  0x74   :  { %v5532_v46 = vcombine.high %v278_v41, %v310_v42  ;;  %v247_v34 = vld [vmem:[%s7841_s1 + $0x750] sm:$0xff] }
  0x76   :  { %3340 = vmatpush1.bf16.msra.mxu0 %v5525_v49  ;;  %3381 = vmatpush1.bf16.msra.mxu1 %v5527_v50  ;;  %v342_v49 = vld [vmem:[%s7841_s1 + $0xa48] sm:$0xff] }
  0x77   :  { %3341 = vmatprep.subr.bf16.mxu0 %v5590_v51  ;;  %3382 = vmatprep.subr.bf16.mxu1 %v5592_v52  ;;  %v374_v50 = vld [vmem:[%s7841_s1 + $0xb48] sm:$0xff]  ;;  %v5529_v51 = vcombine.low %v277_v39, %v309_v40  ;;  %v5531_v52 = vcombine.low %v278_v41, %v310_v42  ;;  %v5470_v39 = vcombine.high %v215_v33, %v247_v34  ;;  %v279_v41 = vld [vmem:[%s7841_s1 + $0x850] sm:$0xff] }
  0x78   :  { %v5596_v54 = vcombine.high %v342_v49, %v374_v50  ;;  %v311_v42 = vld [vmem:[%s7841_s1 + $0x950] sm:$0xff] }
  0x7a   :  { %3342 = vmatpush1.bf16.msra.mxu0 %v5589_v57  ;;  %3383 = vmatpush1.bf16.msra.mxu1 %v5591_v58  ;;  %v406_v57 = vld [vmem:[%s7841_s1 + $0xc48] sm:$0xff] }
  0x7b   :  { %3343 = vmatprep.subr.bf16.mxu0 %v5654_v59  ;;  %3384 = vmatprep.subr.bf16.mxu1 %v5656_v60  ;;  %v438_v58 = vld [vmem:[%s7841_s1 + $0xd48] sm:$0xff]  ;;  %v5593_v59 = vcombine.low %v341_v47, %v373_v48  ;;  %v5595_v60 = vcombine.low %v342_v49, %v374_v50  ;;  %v5534_v47 = vcombine.high %v279_v41, %v311_v42  ;;  %v343_v49 = vld [vmem:[%s7841_s1 + $0xa50] sm:$0xff] }
  0x7c   :  { %v5660_v62 = vcombine.high %v406_v57, %v438_v58  ;;  %v375_v50 = vld [vmem:[%s7841_s1 + $0xb50] sm:$0xff] }
  0x7e   :  { %3344 = vmatpush1.bf16.msra.mxu0 %v5653_v1  ;;  %3385 = vmatpush1.bf16.msra.mxu1 %v5655_v2  ;;  %v470_v1 = vld [vmem:[%s7841_s1 + $0xe48] sm:$0xff] }
  0x7f   :  { %3345 = vmatprep.subr.bf16.mxu0 %v5718_v4  ;;  %3386 = vmatprep.subr.bf16.mxu1 %v5720_v5  ;;  %v502_v2 = vld [vmem:[%s7841_s1 + $0xf48] sm:$0xff]  ;;  %v5657_v4 = vcombine.low %v405_v55, %v437_v56  ;;  %v5659_v5 = vcombine.low %v406_v57, %v438_v58  ;;  %v5598_v55 = vcombine.high %v343_v49, %v375_v50  ;;  %v407_v57 = vld [vmem:[%s7841_s1 + $0xc50] sm:$0xff] }
  0x80   :  { %v5724_v7 = vcombine.high %v470_v1, %v502_v2  ;;  %v439_v58 = vld [vmem:[%s7841_s1 + $0xd50] sm:$0xff] }
  0x82   :  { %3346 = vmatpush1.bf16.msra.mxu0 %v5717_v10  ;;  %3387 = vmatpush1.bf16.msra.mxu1 %v5719_v11  ;;  %v24_v10 = vld [vmem:[%s7841_s1 + $0x58] sm:$0xff] }
  0x83   :  { %3413 = vmatprep.subr.bf16.mxu0 %v5274_v13  ;;  %3454 = vmatprep.subr.bf16.mxu1 %v5276_v14  ;;  %v56_v11 = vld [vmem:[%s7841_s1 + $0x158] sm:$0xff]  ;;  %v5721_v13 = vcombine.low %v469_v63, %v501_v0  ;;  %v5723_v14 = vcombine.low %v470_v1, %v502_v2  ;;  %v5662_v63 = vcombine.high %v407_v57, %v439_v58  ;;  %v471_v1 = vld [vmem:[%s7841_s1 + $0xe50] sm:$0xff] }
  0x84   :  { %v5280_v16 = vcombine.high %v24_v10, %v56_v11  ;;  %v503_v2 = vld [vmem:[%s7841_s1 + $0xf50] sm:$0xff] }
  0x85   :  { %3364 = vmatmul.mubr.bf16.vlgmr.msra.gmra.mrb[12].mxu0 %v6236_v12  ;;  %3405 = vmatmul.mubr.bf16.vlgmr.msra.gmra.mrb[12].mxu1 %v6236_v12 }
  0x86   :  { %3414 = vmatpush1.bf16.msra.mxu0 %v5273_v19  ;;  %3455 = vmatpush1.bf16.msra.mxu1 %v5275_v20  ;;  %v88_v19 = vld [vmem:[%s7841_s1 + $0x258] sm:$0xff] }
  0x87   :  { %3415 = vmatprep.subr.bf16.mxu0 %v5338_v21  ;;  %3456 = vmatprep.subr.bf16.mxu1 %v5340_v22  ;;  %v120_v20 = vld [vmem:[%s7841_s1 + $0x358] sm:$0xff]  ;;  %v5277_v21 = vcombine.low %v23_v8, %v55_v9  ;;  %v5279_v22 = vcombine.low %v24_v10, %v56_v11  ;;  %v5726_v8 = vcombine.high %v471_v1, %v503_v2  ;;  %v25_v10 = vld [vmem:[%s7841_s1 + $0x60] sm:$0xff] }
  0x88   :  { %3445 = vmatprep.mubr.bf16.mxu0 %v6094_v3  ;;  %3486 = vmatprep.mubr.bf16.mxu1 %v6094_v3  ;;  %v5344_v24 = vcombine.high %v88_v19, %v120_v20  ;;  %v57_v11 = vld [vmem:[%s7841_s1 + $0x160] sm:$0xff] }
  0x8a   :  { %3416 = vmatpush1.bf16.msra.mxu0 %v5337_v27  ;;  %3457 = vmatpush1.bf16.msra.mxu1 %v5339_v28  ;;  %v152_v27 = vld [vmem:[%s7841_s1 + $0x458] sm:$0xff] }
  0x8b   :  { %3417 = vmatprep.subr.bf16.mxu0 %v5402_v29  ;;  %3458 = vmatprep.subr.bf16.mxu1 %v5404_v30  ;;  %v184_v28 = vld [vmem:[%s7841_s1 + $0x558] sm:$0xff]  ;;  %v5341_v29 = vcombine.low %v87_v17, %v119_v18  ;;  %v5343_v30 = vcombine.low %v88_v19, %v120_v20  ;;  %v5282_v17 = vcombine.high %v25_v10, %v57_v11  ;;  %v89_v19 = vld [vmem:[%s7841_s1 + $0x260] sm:$0xff] }
  0x8c   :  { %v5408_v32 = vcombine.high %v152_v27, %v184_v28  ;;  %v121_v20 = vld [vmem:[%s7841_s1 + $0x360] sm:$0xff] }
  0x8e   :  { %3418 = vmatpush1.bf16.msra.mxu0 %v5401_v35  ;;  %3459 = vmatpush1.bf16.msra.mxu1 %v5403_v36  ;;  %v216_v35 = vld [vmem:[%s7841_s1 + $0x658] sm:$0xff] }
  0x8f   :  { %3419 = vmatprep.subr.bf16.mxu0 %v5466_v37  ;;  %3460 = vmatprep.subr.bf16.mxu1 %v5468_v38  ;;  %v248_v36 = vld [vmem:[%s7841_s1 + $0x758] sm:$0xff]  ;;  %v5405_v37 = vcombine.low %v151_v25, %v183_v26  ;;  %v5407_v38 = vcombine.low %v152_v27, %v184_v28  ;;  %v5346_v25 = vcombine.high %v89_v19, %v121_v20  ;;  %v153_v27 = vld [vmem:[%s7841_s1 + $0x460] sm:$0xff] }
  0x90   :  { %v5472_v40 = vcombine.high %v216_v35, %v248_v36  ;;  %v185_v28 = vld [vmem:[%s7841_s1 + $0x560] sm:$0xff] }
  0x92   :  { %3420 = vmatpush1.bf16.msra.mxu0 %v5465_v43  ;;  %3461 = vmatpush1.bf16.msra.mxu1 %v5467_v44  ;;  %v280_v43 = vld [vmem:[%s7841_s1 + $0x858] sm:$0xff] }
  0x93   :  { %3421 = vmatprep.subr.bf16.mxu0 %v5530_v45  ;;  %3462 = vmatprep.subr.bf16.mxu1 %v5532_v46  ;;  %v312_v44 = vld [vmem:[%s7841_s1 + $0x958] sm:$0xff]  ;;  %v5469_v45 = vcombine.low %v215_v33, %v247_v34  ;;  %v5471_v46 = vcombine.low %v216_v35, %v248_v36  ;;  %v5410_v33 = vcombine.high %v153_v27, %v185_v28  ;;  %v217_v35 = vld [vmem:[%s7841_s1 + $0x660] sm:$0xff] }
  0x94   :  { %v5536_v48 = vcombine.high %v280_v43, %v312_v44  ;;  %v249_v36 = vld [vmem:[%s7841_s1 + $0x760] sm:$0xff] }
  0x96   :  { %3422 = vmatpush1.bf16.msra.mxu0 %v5529_v51  ;;  %3463 = vmatpush1.bf16.msra.mxu1 %v5531_v52  ;;  %v344_v51 = vld [vmem:[%s7841_s1 + $0xa58] sm:$0xff] }
  0x97   :  { %3423 = vmatprep.subr.bf16.mxu0 %v5594_v53  ;;  %3464 = vmatprep.subr.bf16.mxu1 %v5596_v54  ;;  %v376_v52 = vld [vmem:[%s7841_s1 + $0xb58] sm:$0xff]  ;;  %v5533_v53 = vcombine.low %v279_v41, %v311_v42  ;;  %v5535_v54 = vcombine.low %v280_v43, %v312_v44  ;;  %v5474_v41 = vcombine.high %v217_v35, %v249_v36  ;;  %v281_v43 = vld [vmem:[%s7841_s1 + $0x860] sm:$0xff] }
  0x98   :  { %v5600_v56 = vcombine.high %v344_v51, %v376_v52  ;;  %v313_v44 = vld [vmem:[%s7841_s1 + $0x960] sm:$0xff] }
  0x9a   :  { %3424 = vmatpush1.bf16.msra.mxu0 %v5593_v59  ;;  %3465 = vmatpush1.bf16.msra.mxu1 %v5595_v60  ;;  %v408_v59 = vld [vmem:[%s7841_s1 + $0xc58] sm:$0xff] }
  0x9b   :  { %3425 = vmatprep.subr.bf16.mxu0 %v5658_v61  ;;  %3466 = vmatprep.subr.bf16.mxu1 %v5660_v62  ;;  %v440_v60 = vld [vmem:[%s7841_s1 + $0xd58] sm:$0xff]  ;;  %v5597_v61 = vcombine.low %v343_v49, %v375_v50  ;;  %v5599_v62 = vcombine.low %v344_v51, %v376_v52  ;;  %v5538_v49 = vcombine.high %v281_v43, %v313_v44  ;;  %v345_v51 = vld [vmem:[%s7841_s1 + $0xa60] sm:$0xff] }
  0x9c   :  { %v5664_v0 = vcombine.high %v408_v59, %v440_v60  ;;  %v377_v52 = vld [vmem:[%s7841_s1 + $0xb60] sm:$0xff] }
  0x9e   :  { %3426 = vmatpush1.bf16.msra.mxu0 %v5657_v4  ;;  %3467 = vmatpush1.bf16.msra.mxu1 %v5659_v5  ;;  %v472_v4 = vld [vmem:[%s7841_s1 + $0xe58] sm:$0xff] }
  0x9f   :  { %3427 = vmatprep.subr.bf16.mxu0 %v5722_v6  ;;  %3468 = vmatprep.subr.bf16.mxu1 %v5724_v7  ;;  %v504_v5 = vld [vmem:[%s7841_s1 + $0xf58] sm:$0xff]  ;;  %v5661_v6 = vcombine.low %v407_v57, %v439_v58  ;;  %v5663_v7 = vcombine.low %v408_v59, %v440_v60  ;;  %v5602_v57 = vcombine.high %v345_v51, %v377_v52  ;;  %v409_v59 = vld [vmem:[%s7841_s1 + $0xc60] sm:$0xff] }
  0xa0   :  { %v5728_v9 = vcombine.high %v472_v4, %v504_v5  ;;  %v441_v60 = vld [vmem:[%s7841_s1 + $0xd60] sm:$0xff] }
  0xa2   :  { %3428 = vmatpush1.bf16.msra.mxu0 %v5721_v13  ;;  %3469 = vmatpush1.bf16.msra.mxu1 %v5723_v14  ;;  %v26_v13 = vld [vmem:[%s7841_s1 + $0x68] sm:$0xff] }
  0xa3   :  { %3495 = vmatprep.subr.bf16.mxu0 %v5278_v15  ;;  %3536 = vmatprep.subr.bf16.mxu1 %v5280_v16  ;;  %v58_v14 = vld [vmem:[%s7841_s1 + $0x168] sm:$0xff]  ;;  %v5725_v15 = vcombine.low %v471_v1, %v503_v2  ;;  %v5727_v16 = vcombine.low %v472_v4, %v504_v5  ;;  %v5666_v1 = vcombine.high %v409_v59, %v441_v60  ;;  %v473_v4 = vld [vmem:[%s7841_s1 + $0xe60] sm:$0xff] }
  0xa4   :  { %v5284_v18 = vcombine.high %v26_v13, %v58_v14  ;;  %v505_v5 = vld [vmem:[%s7841_s1 + $0xf60] sm:$0xff] }
  0xa5   :  { %3446 = vmatmul.mubr.bf16.vlgmr.msra.gmra.mrb[16].mxu0 %v6236_v12  ;;  %3487 = vmatmul.mubr.bf16.vlgmr.msra.gmra.mrb[16].mxu1 %v6236_v12 }
  0xa6   :  { %3496 = vmatpush1.bf16.msra.mxu0 %v5277_v21  ;;  %3537 = vmatpush1.bf16.msra.mxu1 %v5279_v22  ;;  %v90_v21 = vld [vmem:[%s7841_s1 + $0x268] sm:$0xff] }
  0xa7   :  { %3497 = vmatprep.subr.bf16.mxu0 %v5342_v23  ;;  %3538 = vmatprep.subr.bf16.mxu1 %v5344_v24  ;;  %v122_v22 = vld [vmem:[%s7841_s1 + $0x368] sm:$0xff]  ;;  %v5281_v23 = vcombine.low %v25_v10, %v57_v11  ;;  %v5283_v24 = vcombine.low %v26_v13, %v58_v14  ;;  %v5730_v10 = vcombine.high %v473_v4, %v505_v5  ;;  %v27_v13 = vld [vmem:[%s7841_s1 + $0x70] sm:$0xff] }
  0xa8   :  { %3527 = vmatprep.mubr.bf16.mxu0 %v6094_v3  ;;  %3568 = vmatprep.mubr.bf16.mxu1 %v6094_v3  ;;  %v5348_v26 = vcombine.high %v90_v21, %v122_v22  ;;  %v59_v14 = vld [vmem:[%s7841_s1 + $0x170] sm:$0xff] }
  0xaa   :  { %3498 = vmatpush1.bf16.msra.mxu0 %v5341_v29  ;;  %3539 = vmatpush1.bf16.msra.mxu1 %v5343_v30  ;;  %v154_v29 = vld [vmem:[%s7841_s1 + $0x468] sm:$0xff] }
  0xab   :  { %3499 = vmatprep.subr.bf16.mxu0 %v5406_v31  ;;  %3540 = vmatprep.subr.bf16.mxu1 %v5408_v32  ;;  %v186_v30 = vld [vmem:[%s7841_s1 + $0x568] sm:$0xff]  ;;  %v6754_v31 = vld [vmem:[%s7842_s0] sm:$0x1]  ;;  %v5345_v32 = vcombine.low %v89_v19, %v121_v20  ;;  %v5286_v19 = vcombine.high %v27_v13, %v59_v14 }
  0xac   :  { %v5412_v34 = vcombine.high %v154_v29, %v186_v30 }
  0xae   :  { %3500 = vmatpush1.bf16.msra.mxu0 %v5405_v37  ;;  %3541 = vmatpush1.bf16.msra.mxu1 %v5407_v38  ;;  %v218_v37 = vld [vmem:[%s7841_s1 + $0x668] sm:$0xff] }
  0xaf   :  { %3501 = vmatprep.subr.bf16.mxu0 %v5470_v39  ;;  %3542 = vmatprep.subr.bf16.mxu1 %v5472_v40  ;;  %v250_v38 = vld [vmem:[%s7841_s1 + $0x768] sm:$0xff]  ;;  %v5409_v39 = vcombine.low %v153_v27, %v185_v28  ;;  %v5411_v40 = vcombine.low %v154_v29, %v186_v30  ;;  %v155_v29 = vld [vmem:[%s7841_s1 + $0x470] sm:$0xff] }
  0xb0   :  { %v5476_v42 = vcombine.high %v218_v37, %v250_v38  ;;  %v187_v30 = vld [vmem:[%s7841_s1 + $0x570] sm:$0xff] }
  0xb2   :  { %3502 = vmatpush1.bf16.msra.mxu0 %v5469_v45  ;;  %3543 = vmatpush1.bf16.msra.mxu1 %v5471_v46  ;;  %v282_v45 = vld [vmem:[%s7841_s1 + $0x868] sm:$0xff] }
  0xb3   :  { %3503 = vmatprep.subr.bf16.mxu0 %v5534_v47  ;;  %3544 = vmatprep.subr.bf16.mxu1 %v5536_v48  ;;  %v314_v46 = vld [vmem:[%s7841_s1 + $0x968] sm:$0xff]  ;;  %v5473_v47 = vcombine.low %v217_v35, %v249_v36  ;;  %v5475_v48 = vcombine.low %v218_v37, %v250_v38  ;;  %v5414_v35 = vcombine.high %v155_v29, %v187_v30  ;;  %v219_v37 = vld [vmem:[%s7841_s1 + $0x670] sm:$0xff] }
  0xb4   :  { %v5540_v50 = vcombine.high %v282_v45, %v314_v46  ;;  %v251_v38 = vld [vmem:[%s7841_s1 + $0x770] sm:$0xff] }
  0xb6   :  { %3504 = vmatpush1.bf16.msra.mxu0 %v5533_v53  ;;  %3545 = vmatpush1.bf16.msra.mxu1 %v5535_v54  ;;  %v346_v53 = vld [vmem:[%s7841_s1 + $0xa68] sm:$0xff] }
  0xb7   :  { %3505 = vmatprep.subr.bf16.mxu0 %v5598_v55  ;;  %3546 = vmatprep.subr.bf16.mxu1 %v5600_v56  ;;  %v378_v54 = vld [vmem:[%s7841_s1 + $0xb68] sm:$0xff]  ;;  %v5537_v55 = vcombine.low %v281_v43, %v313_v44  ;;  %v5539_v56 = vcombine.low %v282_v45, %v314_v46  ;;  %v5478_v43 = vcombine.high %v219_v37, %v251_v38  ;;  %v283_v45 = vld [vmem:[%s7841_s1 + $0x870] sm:$0xff] }
  0xb8   :  { %v5604_v58 = vcombine.high %v346_v53, %v378_v54  ;;  %v315_v46 = vld [vmem:[%s7841_s1 + $0x970] sm:$0xff] }
  0xba   :  { %3506 = vmatpush1.bf16.msra.mxu0 %v5597_v61  ;;  %3547 = vmatpush1.bf16.msra.mxu1 %v5599_v62  ;;  %v410_v61 = vld [vmem:[%s7841_s1 + $0xc68] sm:$0xff] }
  0xbb   :  { %3507 = vmatprep.subr.bf16.mxu0 %v5662_v63  ;;  %3548 = vmatprep.subr.bf16.mxu1 %v5664_v0  ;;  %v442_v62 = vld [vmem:[%s7841_s1 + $0xd68] sm:$0xff]  ;;  %v5601_v63 = vcombine.low %v345_v51, %v377_v52  ;;  %v5603_v0 = vcombine.low %v346_v53, %v378_v54  ;;  %v5542_v51 = vcombine.high %v283_v45, %v315_v46  ;;  %v347_v53 = vld [vmem:[%s7841_s1 + $0xa70] sm:$0xff] }
  0xbc   :  { %v5668_v2 = vcombine.high %v410_v61, %v442_v62  ;;  %v379_v54 = vld [vmem:[%s7841_s1 + $0xb70] sm:$0xff] }
  0xbe   :  { %3508 = vmatpush1.bf16.msra.mxu0 %v5661_v6  ;;  %3549 = vmatpush1.bf16.msra.mxu1 %v5663_v7  ;;  %v474_v6 = vld [vmem:[%s7841_s1 + $0xe68] sm:$0xff] }
  0xbf   :  { %3509 = vmatprep.subr.bf16.mxu0 %v5726_v8  ;;  %3550 = vmatprep.subr.bf16.mxu1 %v5728_v9  ;;  %v506_v7 = vld [vmem:[%s7841_s1 + $0xf68] sm:$0xff]  ;;  %v5665_v8 = vcombine.low %v409_v59, %v441_v60  ;;  %v5667_v9 = vcombine.low %v410_v61, %v442_v62  ;;  %v5606_v59 = vcombine.high %v347_v53, %v379_v54  ;;  %v411_v61 = vld [vmem:[%s7841_s1 + $0xc70] sm:$0xff] }
  0xc0   :  { %v5732_v11 = vcombine.high %v474_v6, %v506_v7  ;;  %v443_v62 = vld [vmem:[%s7841_s1 + $0xd70] sm:$0xff] }
  0xc2   :  { %3510 = vmatpush1.bf16.msra.mxu0 %v5725_v15  ;;  %3551 = vmatpush1.bf16.msra.mxu1 %v5727_v16  ;;  %v28_v15 = vld [vmem:[%s7841_s1 + $0x78] sm:$0xff] }
  0xc3   :  { %3577 = vmatprep.subr.bf16.mxu0 %v5282_v17  ;;  %3618 = vmatprep.subr.bf16.mxu1 %v5284_v18  ;;  %v60_v16 = vld [vmem:[%s7841_s1 + $0x178] sm:$0xff]  ;;  %v5729_v17 = vcombine.low %v473_v4, %v505_v5  ;;  %v5731_v18 = vcombine.low %v474_v6, %v506_v7  ;;  %v5670_v4 = vcombine.high %v411_v61, %v443_v62  ;;  %v475_v7 = vld [vmem:[%s7841_s1 + $0xe70] sm:$0xff] }
  0xc4   :  { %v5288_v20 = vcombine.high %v28_v15, %v60_v16 }
  0xc5   :  { %3528 = vmatmul.mubr.bf16.vlgmr.msra.gmra.mrb[20].mxu0 %v6236_v12  ;;  %3569 = vmatmul.mubr.bf16.vlgmr.msra.gmra.mrb[20].mxu1 %v6754_v31  ;;  %v5347_v12 = vcombine.low %v90_v21, %v122_v22  ;;  %v91_v21 = vld [vmem:[%s7841_s1 + $0x270] sm:$0xff] }
  0xc6   :  { %3578 = vmatpush1.bf16.msra.mxu0 %v5281_v23  ;;  %3619 = vmatpush1.bf16.msra.mxu1 %v5283_v24  ;;  %v123_v22 = vld [vmem:[%s7841_s1 + $0x370] sm:$0xff]  ;;  %v92_v23 = vld [vmem:[%s7841_s1 + $0x278] sm:$0xff] }
  0xc7   :  { %3579 = vmatprep.subr.bf16.mxu0 %v5346_v25  ;;  %3620 = vmatprep.subr.bf16.mxu1 %v5348_v26  ;;  %v124_v24 = vld [vmem:[%s7841_s1 + $0x378] sm:$0xff]  ;;  %v5285_v25 = vcombine.low %v27_v13, %v59_v14  ;;  %v5287_v26 = vcombine.low %v28_v15, %v60_v16  ;;  %v5350_v27 = vcombine.high %v91_v21, %v123_v22 }
  0xc8   :  { %3609 = vmatprep.mubr.bf16.mxu0 %v6094_v3  ;;  %3650 = vmatprep.mubr.bf16.mxu1 %v6094_v3  ;;  %v5352_v28 = vcombine.high %v92_v23, %v124_v24  ;;  %v476_v13 = vld [vmem:[%s7841_s1 + $0xe78] sm:$0xff] }
  0xc9   :  { %v508_v14 = vld [vmem:[%s7841_s1 + $0xf78] sm:$0xff] }
  0xca   :  { %3580 = vmatpush1.bf16.msra.mxu0 %v5345_v32  ;;  %3621 = vmatpush1.bf16.msra.mxu1 %v5347_v12  ;;  %v156_v32 = vld [vmem:[%s7841_s1 + $0x478] sm:$0xff] }
  0xcb   :  { %3581 = vmatprep.subr.bf16.mxu0 %v5410_v33  ;;  %3622 = vmatprep.subr.bf16.mxu1 %v5412_v34  ;;  %v188_v12 = vld [vmem:[%s7841_s1 + $0x578] sm:$0xff]  ;;  %v5349_v33 = vcombine.low %v91_v21, %v123_v22  ;;  %v5351_v34 = vcombine.low %v92_v23, %v124_v24 }
  0xcc   :  { %v5416_v36 = vcombine.high %v156_v32, %v188_v12 }
  0xce   :  { %3582 = vmatpush1.bf16.msra.mxu0 %v5409_v39  ;;  %3623 = vmatpush1.bf16.msra.mxu1 %v5411_v40  ;;  %v220_v39 = vld [vmem:[%s7841_s1 + $0x678] sm:$0xff] }
  0xcf   :  { %3583 = vmatprep.subr.bf16.mxu0 %v5474_v41  ;;  %3624 = vmatprep.subr.bf16.mxu1 %v5476_v42  ;;  %v252_v40 = vld [vmem:[%s7841_s1 + $0x778] sm:$0xff]  ;;  %v5413_v41 = vcombine.low %v155_v29, %v187_v30  ;;  %v5415_v42 = vcombine.low %v156_v32, %v188_v12  ;;  %v30_v29 = vld [vmem:[%s7841_s1 + $0x88] sm:$0xff]  ;;  %v5735_v12 = vcombine.low %v476_v13, %v508_v14 }
  0xd0   :  { %v5480_v44 = vcombine.high %v220_v39, %v252_v40  ;;  %v62_v30 = vld [vmem:[%s7841_s1 + $0x188] sm:$0xff] }
  0xd2   :  { %3584 = vmatpush1.bf16.msra.mxu0 %v5473_v47  ;;  %3625 = vmatpush1.bf16.msra.mxu1 %v5475_v48  ;;  %v284_v47 = vld [vmem:[%s7841_s1 + $0x878] sm:$0xff] }
  0xd3   :  { %3585 = vmatprep.subr.bf16.mxu0 %v5538_v49  ;;  %3626 = vmatprep.subr.bf16.mxu1 %v5540_v50  ;;  %v316_v48 = vld [vmem:[%s7841_s1 + $0x978] sm:$0xff]  ;;  %v5477_v49 = vcombine.low %v219_v37, %v251_v38  ;;  %v5479_v50 = vcombine.low %v220_v39, %v252_v40  ;;  %v94_v37 = vld [vmem:[%s7841_s1 + $0x288] sm:$0xff]  ;;  %v5291_v40 = vcombine.low %v30_v29, %v62_v30 }
  0xd4   :  { %v5544_v52 = vcombine.high %v284_v47, %v316_v48  ;;  %v126_v38 = vld [vmem:[%s7841_s1 + $0x388] sm:$0xff] }
  0xd6   :  { %3586 = vmatpush1.bf16.msra.mxu0 %v5537_v55  ;;  %3627 = vmatpush1.bf16.msra.mxu1 %v5539_v56  ;;  %v348_v55 = vld [vmem:[%s7841_s1 + $0xa78] sm:$0xff] }
  0xd7   :  { %3587 = vmatprep.subr.bf16.mxu0 %v5602_v57  ;;  %3628 = vmatprep.subr.bf16.mxu1 %v5604_v58  ;;  %v380_v56 = vld [vmem:[%s7841_s1 + $0xb78] sm:$0xff]  ;;  %v5541_v57 = vcombine.low %v283_v45, %v315_v46  ;;  %v5543_v58 = vcombine.low %v284_v47, %v316_v48  ;;  %v158_v46 = vld [vmem:[%s7841_s1 + $0x488] sm:$0xff] }
  0xd8   :  { %v5608_v60 = vcombine.high %v348_v55, %v380_v56  ;;  %v190_v47 = vld [vmem:[%s7841_s1 + $0x588] sm:$0xff] }
  0xda   :  { %3588 = vmatpush1.bf16.msra.mxu0 %v5601_v63  ;;  %3629 = vmatpush1.bf16.msra.mxu1 %v5603_v0  ;;  %v412_v63 = vld [vmem:[%s7841_s1 + $0xc78] sm:$0xff] }
  0xdb   :  { %3589 = vmatprep.subr.bf16.mxu0 %v5666_v1  ;;  %3630 = vmatprep.subr.bf16.mxu1 %v5668_v2  ;;  %v444_v0 = vld [vmem:[%s7841_s1 + $0xd78] sm:$0xff]  ;;  %v5605_v1 = vcombine.low %v347_v53, %v379_v54  ;;  %v5607_v2 = vcombine.low %v348_v55, %v380_v56  ;;  %v5355_v53 = vcombine.low %v94_v37, %v126_v38 }
  0xdc   :  { %v5672_v6 = vcombine.high %v412_v63, %v444_v0  ;;  %v5671_v23 = vcombine.low %v412_v63, %v444_v0  ;;  %v5419_v0 = vcombine.low %v158_v46, %v190_v47 }
  0xde   :  { %3590 = vmatpush1.bf16.msra.mxu0 %v5665_v8  ;;  %3631 = vmatpush1.bf16.msra.mxu1 %v5667_v9  ;;  %v507_v8 = vld [vmem:[%s7841_s1 + $0xf70] sm:$0xff] }
  0xdf   :  { %3591 = vmatprep.subr.bf16.mxu0 %v5730_v10  ;;  %3632 = vmatprep.subr.bf16.mxu1 %v5732_v11  ;;  %v5734_v24 = vcombine.high %v475_v7, %v507_v8  ;;  %v5733_v32 = vcombine.low %v475_v7, %v507_v8  ;;  %v285_v7 = vld [vmem:[%s7841_s1 + $0x880] sm:$0xff] }
  0xe0   :  { %v317_v8 = vld [vmem:[%s7841_s1 + $0x980] sm:$0xff] }
  0xe2   :  { %3592 = vmatpush1.bf16.msra.mxu0 %v5729_v17  ;;  %3633 = vmatpush1.bf16.msra.mxu1 %v5731_v18 }
  0xe3   :  { %3659 = vmatprep.subr.bf16.mxu0 %v5286_v19  ;;  %3700 = vmatprep.subr.bf16.mxu1 %v5288_v20  ;;  %v5669_v19 = vcombine.low %v411_v61, %v443_v62  ;;  %v222_v61 = vld [vmem:[%s7841_s1 + $0x688] sm:$0xff] }
  0xe4   :  { %v254_v62 = vld [vmem:[%s7841_s1 + $0x788] sm:$0xff] }
  0xe5   :  { %3610 = vmatmul.mubr.bf16.vlgmr.msra.gmra.mrb[24].mxu0 %v6754_v31  ;;  %3651 = vmatmul.mubr.bf16.vlgmr.msra.gmra.mrb[24].mxu1 %v6754_v31 }
  0xe6   :  { %3660 = vmatpush1.bf16.msra.mxu0 %v5285_v25  ;;  %3701 = vmatpush1.bf16.msra.mxu1 %v5287_v26  ;;  %v5736_v26 = vcombine.high %v476_v13, %v508_v14 }
  0xe7   :  { %3661 = vmatprep.subr.bf16.mxu0 %v5350_v27  ;;  %3702 = vmatprep.subr.bf16.mxu1 %v5352_v28  ;;  %v29_v27 = vld [vmem:[%s7841_s1 + $0x80] sm:$0xff] }
  0xe8   :  { %3691 = vmatprep.mubr.bf16.mxu0 %v6094_v3  ;;  %3732 = vmatprep.mubr.bf16.mxu1 %v6094_v3  ;;  %v61_v28 = vld [vmem:[%s7841_s1 + $0x180] sm:$0xff] }
  0xe9   :  { %v5289_v39 = vcombine.low %v29_v27, %v61_v28 }
  0xea   :  { %3662 = vmatpush1.bf16.msra.mxu0 %v5349_v33  ;;  %3703 = vmatpush1.bf16.msra.mxu1 %v5351_v34  ;;  %v5290_v33 = vcombine.high %v29_v27, %v61_v28  ;;  %v5292_v34 = vcombine.high %v30_v29, %v62_v30  ;;  %v413_v30 = vld [vmem:[%s7841_s1 + $0xc80] sm:$0xff] }
  0xeb   :  { %3663 = vmatprep.subr.bf16.mxu0 %v5414_v35  ;;  %3704 = vmatprep.subr.bf16.mxu1 %v5416_v36  ;;  %v93_v35 = vld [vmem:[%s7841_s1 + $0x280] sm:$0xff] }
  0xec   :  { %v125_v36 = vld [vmem:[%s7841_s1 + $0x380] sm:$0xff] }
  0xee   :  { %3664 = vmatpush1.bf16.msra.mxu0 %v5413_v41  ;;  %3705 = vmatpush1.bf16.msra.mxu1 %v5415_v42  ;;  %v5354_v41 = vcombine.high %v93_v35, %v125_v36  ;;  %v5356_v42 = vcombine.high %v94_v37, %v126_v38 }
  0xef   :  { %3665 = vmatprep.subr.bf16.mxu0 %v5478_v43  ;;  %3706 = vmatprep.subr.bf16.mxu1 %v5480_v44  ;;  %v157_v43 = vld [vmem:[%s7841_s1 + $0x480] sm:$0xff] }
  0xf0   :  { %v189_v44 = vld [vmem:[%s7841_s1 + $0x580] sm:$0xff] }
  0xf1   :  { %v5418_v54 = vcombine.high %v157_v43, %v189_v44  ;;  %v5417_v63 = vcombine.low %v157_v43, %v189_v44  ;;  %v477_v44 = vld [vmem:[%s7841_s1 + $0xe80] sm:$0xff] }
  0xf2   :  { %3666 = vmatpush1.bf16.msra.mxu0 %v5477_v49  ;;  %3707 = vmatpush1.bf16.msra.mxu1 %v5479_v50  ;;  %v5353_v50 = vcombine.low %v93_v35, %v125_v36  ;;  %v446_v35 = vld [vmem:[%s7841_s1 + $0xd88] sm:$0xff] }
  0xf3   :  { %3667 = vmatprep.subr.bf16.mxu0 %v5542_v51  ;;  %3708 = vmatprep.subr.bf16.mxu1 %v5544_v52 }
  0xf6   :  { %3668 = vmatpush1.bf16.msra.mxu0 %v5541_v57  ;;  %3709 = vmatpush1.bf16.msra.mxu1 %v5543_v58  ;;  %v5420_v57 = vcombine.high %v158_v46, %v190_v47  ;;  %v221_v58 = vld [vmem:[%s7841_s1 + $0x680] sm:$0xff] }
  0xf7   :  { %3669 = vmatprep.subr.bf16.mxu0 %v5606_v59  ;;  %3710 = vmatprep.subr.bf16.mxu1 %v5608_v60  ;;  %v253_v59 = vld [vmem:[%s7841_s1 + $0x780] sm:$0xff] }
  0xf8   :  { %v3119_v5 = vpop.f32.mrb[0].mxu0  ;;  %v3160_v10 = vpop.f32.mrb[0].mxu1 }
  0xf9   :  { %v5769_v9 = vmul.f32 -1.442695, %v3119_v5  ;;  %v3121_v11 = vpop.f32.mrb[1].mxu0  ;;  %v5771_v15 = vmul.f32 -1.442695, %v3160_v10  ;;  %v3162_v17 = vpop.f32.mrb[1].mxu1  ;;  %v5482_v5 = vcombine.high %v221_v58, %v253_v59 }
  0xfa   :  { %v5770_v16 = vmul.f32 -1.442695, %v3121_v11  ;;  %v3123_v18 = vpop.f32.mrb[2].mxu0  ;;  %3670 = vmatpush1.bf16.msra.mxu0 %v5605_v1  ;;  %v5772_v20 = vmul.f32 -1.442695, %v3162_v17  ;;  %v3164_v21 = vpop.f32.mrb[2].mxu1  ;;  %3711 = vmatpush1.bf16.msra.mxu1 %v5607_v2  ;;  %v5481_v11 = vcombine.low %v221_v58, %v253_v59 }
  0xfb   :  { %5835 = vpow2.f32 %v5769_v9  ;;  %v3124_v22 = vpop.f32.mrb[3].mxu0  ;;  %3671 = vmatprep.subr.bf16.mxu0 %v5670_v4  ;;  %v3165_v25 = vpop.f32.mrb[3].mxu1  ;;  %3712 = vmatprep.subr.bf16.mxu1 %v5672_v6  ;;  %v6095_v1 = vmov 1966171168   ;;  %v4852_v4 = vlaneseq  ;;  %v5484_v6 = vcombine.high %v222_v61, %v254_v62  ;;  %v286_v9 = vld [vmem:[%s7841_s1 + $0x888] sm:$0xff]  ;;  %v349_v18 = vld [vmem:[%s7841_s1 + $0xa80] sm:$0xff] }
  0xfc   :  { %5837 = vpow2.f32 %v5771_v15  ;;  %v4850_v2 = vunpack.c.l.s4 %v6095_v1  ;;  %v318_v10 = vld [vmem:[%s7841_s1 + $0x988] sm:$0xff]  ;;  %v5483_v15 = vcombine.low %v222_v61, %v254_v62  ;;  %v63_v1 = vld [vmem:[%s7841_s1 + $0x190] sm:$0xff] }
  0xfd   :  { %5839 = vpow2.f32 %v5770_v16  ;;  %v4853_v14 = vshrl.u32 %v4852_v4, 7  ;;  %v5546_v16 = vcombine.high %v285_v7, %v317_v8  ;;  %v5548_v17 = vcombine.high %v286_v9, %v318_v10  ;;  %v382_v21 = vld [vmem:[%s7841_s1 + $0xb88] sm:$0xff]  ;;  %v64_v4 = vld [vmem:[%s7841_s1 + $0x198] sm:$0xff] }
  0xfe   :  { %5841 = vpow2.f32 %v5772_v20  ;;  %3672 = vmatpush1.bf16.msra.mxu0 %v5669_v19  ;;  %3713 = vmatpush1.bf16.msra.mxu1 %v5671_v23  ;;  %v4851_v13 = vunpack.c.0.s8 %v4850_v2  ;;  %v381_v19 = vld [vmem:[%s7841_s1 + $0xb80] sm:$0xff]  ;;  %v350_v20 = vld [vmem:[%s7841_s1 + $0xa88] sm:$0xff]  ;;  %v5545_v23 = vcombine.low %v285_v7, %v317_v8  ;;  %v32_v2 = vld [vmem:[%s7841_s1 + $0x98] sm:$0xff] }
  0xff   :  { %3673 = vmatprep.subr.bf16.mxu0 %v5734_v24  ;;  %3714 = vmatprep.subr.bf16.mxu1 %v5736_v26  ;;  %v5547_v26 = vcombine.low %v286_v9, %v318_v10  ;;  %v5610_v27 = vcombine.high %v349_v18, %v381_v19  ;;  %v5612_v29 = vcombine.high %v350_v20, %v382_v21  ;;  %v95_v9 = vld [vmem:[%s7841_s1 + $0x290] sm:$0xff] }
 0x100   :  { %v6995_v25 = vsub.s32 %v4851_v13, %v4853_v14  ;;  %v5609_v37 = vcombine.low %v349_v18, %v381_v19  ;;  %v5296_v8 = vcombine.high %v32_v2, %v64_v4  ;;  %v127_v10 = vld [vmem:[%s7841_s1 + $0x390] sm:$0xff]  ;;  %v128_v13 = vld [vmem:[%s7841_s1 + $0x398] sm:$0xff] }
 0x101   :  { %v159_v18 = vld [vmem:[%s7841_s1 + $0x490] sm:$0xff] }
 0x102   :  { %3674 = vmatpush1.bf16.msra.mxu0 %v5733_v32  ;;  %3715 = vmatpush1.bf16.msra.mxu1 %v5735_v12  ;;  %v445_v32 = vld [vmem:[%s7841_s1 + $0xd80] sm:$0xff]  ;;  %v191_v19 = vld [vmem:[%s7841_s1 + $0x590] sm:$0xff] }
 0x103   :  { %3741 = vmatprep.subr.bf16.mxu0 %v5290_v33  ;;  %3782 = vmatprep.subr.bf16.mxu1 %v5292_v34  ;;  %v414_v34 = vld [vmem:[%s7841_s1 + $0xc88] sm:$0xff] }
 0x104   :  { %v5676_v43 = vcombine.high %v414_v34, %v446_v35 }
 0x105   :  { %v5836_v45 = vpop.eup %5835  ;;  %3692 = vmatmul.mubr.bf16.vlgmr.msra.gmra.mrb[28].mxu0 %v6754_v31  ;;  %3733 = vmatmul.mubr.bf16.vlgmr.msra.gmra.mrb[28].mxu1 %v6754_v31 }
 0x106   :  { %v5838_v48 = vpop.eup %5837  ;;  %v4589_v49 = vadd.f32 1.0, %v5836_v45  ;;  %3742 = vmatpush1.bf16.msra.mxu0 %v5289_v39  ;;  %3783 = vmatpush1.bf16.msra.mxu1 %v5291_v40  ;;  %v5611_v39 = vcombine.low %v350_v20, %v382_v21  ;;  %v5674_v40 = vcombine.high %v413_v30, %v445_v32  ;;  %v509_v45 = vld [vmem:[%s7841_s1 + $0xf80] sm:$0xff]  ;;  %v160_v21 = vld [vmem:[%s7841_s1 + $0x498] sm:$0xff] }
 0x107   :  { %v5840_v51 = vpop.eup %5839  ;;  %v4591_v52 = vadd.f32 1.0, %v5838_v48  ;;  %3743 = vmatprep.subr.bf16.mxu0 %v5354_v41  ;;  %3784 = vmatprep.subr.bf16.mxu1 %v5356_v42  ;;  %v5738_v61 = vcombine.high %v477_v44, %v509_v45 }
 0x108   :  { %v5842_v55 = vpop.eup %5841  ;;  %5843 = vrcp.f32 %v4589_v49  ;;  %v4590_v56 = vadd.f32 1.0, %v5840_v51  ;;  %3773 = vmatprep.mubr.bf16.mxu0 %v6094_v3  ;;  %3814 = vmatprep.mubr.bf16.mxu1 %v6094_v3  ;;  %v478_v49 = vld [vmem:[%s7841_s1 + $0xe88] sm:$0xff] }
 0x109   :  { %5845 = vrcp.f32 %v4591_v52  ;;  %v4592_v60 = vadd.f32 1.0, %v5842_v55 }
 0x10a   :  { %5847 = vrcp.f32 %v4590_v56  ;;  %3744 = vmatpush1.bf16.msra.mxu0 %v5353_v50  ;;  %3785 = vmatpush1.bf16.msra.mxu1 %v5355_v53  ;;  %v510_v50 = vld [vmem:[%s7841_s1 + $0xf88] sm:$0xff]  ;;  %v5673_v56 = vcombine.low %v413_v30, %v445_v32  ;;  %v5422_v30 = vcombine.high %v159_v18, %v191_v19 }
 0x10b   :  { %5849 = vrcp.f32 %v4592_v60  ;;  %3745 = vmatprep.subr.bf16.mxu0 %v5418_v54  ;;  %3786 = vmatprep.subr.bf16.mxu1 %v5420_v57  ;;  %v5675_v60 = vcombine.low %v414_v34, %v446_v35  ;;  %v223_v34 = vld [vmem:[%s7841_s1 + $0x690] sm:$0xff] }
 0x10c   :  { %v255_v35 = vld [vmem:[%s7841_s1 + $0x790] sm:$0xff] }
 0x10e   :  { %3746 = vmatpush1.bf16.msra.mxu0 %v5417_v63  ;;  %3787 = vmatpush1.bf16.msra.mxu1 %v5419_v0  ;;  %v5740_v63 = vcombine.high %v478_v49, %v510_v50  ;;  %v31_v0 = vld [vmem:[%s7841_s1 + $0x90] sm:$0xff] }
 0x10f   :  { %3747 = vmatprep.subr.bf16.mxu0 %v5482_v5  ;;  %3788 = vmatprep.subr.bf16.mxu1 %v5484_v6  ;;  %v5737_v5 = vcombine.low %v477_v44, %v509_v45  ;;  %v5739_v6 = vcombine.low %v478_v49, %v510_v50  ;;  %v5294_v7 = vcombine.high %v31_v0, %v63_v1  ;;  %v287_v45 = vld [vmem:[%s7841_s1 + $0x890] sm:$0xff] }
 0x110   :  { %v5293_v14 = vcombine.low %v31_v0, %v63_v1  ;;  %v5485_v49 = vcombine.low %v223_v34, %v255_v35  ;;  %v415_v1 = vld [vmem:[%s7841_s1 + $0xc90] sm:$0xff] }
 0x112   :  { %v5844_v22 = vpop.eup %5843  ;;  %3748 = vmatpush1.bf16.msra.mxu0 %v5481_v11  ;;  %3789 = vmatpush1.bf16.msra.mxu1 %v5483_v15  ;;  %v96_v11 = vld [vmem:[%s7841_s1 + $0x298] sm:$0xff]  ;;  %v5295_v15 = vcombine.low %v32_v2, %v64_v4  ;;  %v447_v2 = vld [vmem:[%s7841_s1 + $0xd90] sm:$0xff] }
 0x113   :  { %v5846_v24 = vpop.eup %5845  ;;  %3749 = vmatprep.subr.bf16.mxu0 %v5546_v16  ;;  %3790 = vmatprep.subr.bf16.mxu1 %v5548_v17  ;;  %v5358_v16 = vcombine.high %v95_v9, %v127_v10  ;;  %v5360_v17 = vcombine.high %v96_v11, %v128_v13 }
 0x114   :  { %v5848_v28 = vpop.eup %5847 }
 0x115   :  { %v5850_v12 = vpop.eup %5849  ;;  %v4845_v33 = vcombine.low %v5844_v22, %v5848_v28  ;;  %v192_v22 = vld [vmem:[%s7841_s1 + $0x598] sm:$0xff] }
 0x116   :  { %v4846_v36 = vcombine.low %v5846_v24, %v5850_v12  ;;  %3750 = vmatpush1.bf16.msra.mxu0 %v5545_v23  ;;  %3791 = vmatpush1.bf16.msra.mxu1 %v5547_v26  ;;  %v5357_v26 = vcombine.low %v95_v9, %v127_v10 }
 0x117   :  { %v7010_v38 = vrot.slane %v4845_v33, %v6995_v25  ;;  %3751 = vmatprep.subr.bf16.mxu0 %v5610_v27  ;;  %3792 = vmatprep.subr.bf16.mxu1 %v5612_v29  ;;  %v5359_v29 = vcombine.low %v96_v11, %v128_v13  ;;  %v5424_v33 = vcombine.high %v160_v21, %v192_v22 }
 0x118   :  { %v7013_v41 = vrot.slane %v4846_v36, %v6995_v25  ;;  %v3201_v42 = vpop.f32.mrb[4].mxu0  ;;  %v3242_v47 = vpop.f32.mrb[4].mxu1  ;;  %v5678_v13 = vcombine.high %v415_v1, %v447_v2 }
 0x119   :  { %v5773_v46 = vmul.f32 -1.442695, %v3201_v42  ;;  %v3203_v48 = vpop.f32.mrb[5].mxu0  ;;  %v5775_v52 = vmul.f32 -1.442695, %v3242_v47  ;;  %v3244_v54 = vpop.f32.mrb[5].mxu1  ;;  %v5423_v42 = vcombine.low %v160_v21, %v192_v22 }
 0x11a   :  { %v4877_v51 = vcombine.low %v7010_v38, %v7013_v41  ;;  %v5774_v53 = vmul.f32 -1.442695, %v3203_v48  ;;  %v3205_v55 = vpop.f32.mrb[6].mxu0  ;;  %3752 = vmatpush1.bf16.msra.mxu0 %v5609_v37  ;;  %v5776_v57 = vmul.f32 -1.442695, %v3244_v54  ;;  %v3246_v58 = vpop.f32.mrb[6].mxu1  ;;  %3793 = vmatpush1.bf16.msra.mxu1 %v5611_v39 }
 0x11b   :  { %5851 = vpow2.f32 %v5773_v46  ;;  %v3206_v59 = vpop.f32.mrb[7].mxu0  ;;  %3753 = vmatprep.subr.bf16.mxu0 %v5674_v40  ;;  %v3247_v62 = vpop.f32.mrb[7].mxu1  ;;  %3794 = vmatprep.subr.bf16.mxu1 %v5676_v43  ;;  %v224_v37 = vld [vmem:[%s7841_s1 + $0x698] sm:$0xff]  ;;  %v5421_v40 = vcombine.low %v159_v18, %v191_v19  ;;  %v5486_v43 = vcombine.high %v223_v34, %v255_v35  ;;  %v319_v46 = vld [vmem:[%s7841_s1 + $0x990] sm:$0xff]  ;;  %v34_v38 = vld [vmem:[%s7841_s1 + $0xa8] sm:$0xff] }
 0x11c   :  { %5853 = vpow2.f32 %v5775_v52  ;;  %v256_v39 = vld [vmem:[%s7841_s1 + $0x798] sm:$0xff]  ;;  %v5550_v52 = vcombine.high %v287_v45, %v319_v46  ;;  %v351_v54 = vld [vmem:[%s7841_s1 + $0xa90] sm:$0xff]  ;;  %v5549_v59 = vcombine.low %v287_v45, %v319_v46  ;;  %v66_v41 = vld [vmem:[%s7841_s1 + $0x1a8] sm:$0xff] }
 0x11d   :  { %5855 = vpow2.f32 %v5774_v53  ;;  %v5488_v44 = vcombine.high %v224_v37, %v256_v39  ;;  %v288_v47 = vld [vmem:[%s7841_s1 + $0x898] sm:$0xff]  ;;  %v5487_v50 = vcombine.low %v224_v37, %v256_v39  ;;  %v383_v55 = vld [vmem:[%s7841_s1 + $0xb90] sm:$0xff] }
 0x11e   :  { %5857 = vpow2.f32 %v5776_v57  ;;  %3754 = vmatpush1.bf16.msra.mxu0 %v5673_v56  ;;  %3795 = vmatpush1.bf16.msra.mxu1 %v5675_v60  ;;  %v320_v48 = vld [vmem:[%s7841_s1 + $0x998] sm:$0xff]  ;;  %v5614_v62 = vcombine.high %v351_v54, %v383_v55  ;;  %v5613_v9 = vcombine.low %v351_v54, %v383_v55  ;;  %v511_v18 = vld [vmem:[%s7841_s1 + $0xf90] sm:$0xff]  ;;  %v5299_v54 = vcombine.low %v34_v38, %v66_v41 }
 0x11f   :  { %3755 = vmatprep.subr.bf16.mxu0 %v5738_v61  ;;  %3796 = vmatprep.subr.bf16.mxu1 %v5740_v63  ;;  %v5552_v53 = vcombine.high %v288_v47, %v320_v48  ;;  %v352_v56 = vld [vmem:[%s7841_s1 + $0xa98] sm:$0xff]  ;;  %v5551_v61 = vcombine.low %v288_v47, %v320_v48  ;;  %v5300_v47 = vcombine.high %v34_v38, %v66_v41  ;;  %v97_v48 = vld [vmem:[%s7841_s1 + $0x2a0] sm:$0xff]  ;;  %v418_v38 = vld [vmem:[%s7841_s1 + $0xca8] sm:$0xff] }
 0x120   :  { %v384_v57 = vld [vmem:[%s7841_s1 + $0xb98] sm:$0xff]  ;;  %v450_v41 = vld [vmem:[%s7841_s1 + $0xda8] sm:$0xff] }
 0x121   :  { %v5616_v0 = vcombine.high %v352_v56, %v384_v57  ;;  %v5615_v11 = vcombine.low %v352_v56, %v384_v57  ;;  %v480_v22 = vld [vmem:[%s7841_s1 + $0xe98] sm:$0xff]  ;;  %v161_v57 = vld [vmem:[%s7841_s1 + $0x4a0] sm:$0xff] }
 0x122   :  { %3756 = vmatpush1.bf16.msra.mxu0 %v5737_v5  ;;  %3797 = vmatpush1.bf16.msra.mxu1 %v5739_v6  ;;  %v416_v6 = vld [vmem:[%s7841_s1 + $0xc98] sm:$0xff] }
 0x123   :  { %3823 = vmatprep.subr.bf16.mxu0 %v5294_v7  ;;  %3864 = vmatprep.subr.bf16.mxu1 %v5296_v8  ;;  %v448_v7 = vld [vmem:[%s7841_s1 + $0xd98] sm:$0xff] }
 0x124   :  { %v5679_v34 = vcombine.low %v416_v6, %v448_v7 }
 0x125   :  { %v5852_v20 = vpop.eup %5851  ;;  %3774 = vmatmul.mubr.bf16.vlgmr.msra.gmra.mrb[32].mxu0 %v6754_v31  ;;  %3815 = vmatmul.mubr.bf16.vlgmr.msra.gmra.mrb[32].mxu1 %v6754_v31 }
 0x126   :  { %v5854_v23 = vpop.eup %5853  ;;  %v4593_v24 = vadd.f32 1.0, %v5852_v20  ;;  %3824 = vmatpush1.bf16.msra.mxu0 %v5293_v14  ;;  %3865 = vmatpush1.bf16.msra.mxu1 %v5295_v15 }
 0x127   :  { %v5856_v27 = vpop.eup %5855  ;;  %v4595_v28 = vadd.f32 1.0, %v5854_v23  ;;  %3825 = vmatprep.subr.bf16.mxu0 %v5358_v16  ;;  %3866 = vmatprep.subr.bf16.mxu1 %v5360_v17  ;;  %v5680_v16 = vcombine.high %v416_v6, %v448_v7  ;;  %v479_v17 = vld [vmem:[%s7841_s1 + $0xe90] sm:$0xff]  ;;  %v512_v23 = vld [vmem:[%s7841_s1 + $0xf98] sm:$0xff] }
 0x128   :  { %v5858_v32 = vpop.eup %5857  ;;  %5859 = vrcp.f32 %v4593_v24  ;;  %v4594_v12 = vadd.f32 1.0, %v5856_v27  ;;  %3855 = vmatprep.mubr.bf16.mxu0 %v6094_v3  ;;  %3896 = vmatprep.mubr.bf16.mxu1 %v6094_v3  ;;  %v5742_v35 = vcombine.high %v479_v17, %v511_v18  ;;  %v5743_v45 = vcombine.low %v480_v22, %v512_v23 }
 0x129   :  { %5861 = vrcp.f32 %v4595_v28  ;;  %v4596_v36 = vadd.f32 1.0, %v5858_v32 }
 0x12a   :  { %5863 = vrcp.f32 %v4594_v12  ;;  %3826 = vmatpush1.bf16.msra.mxu0 %v5357_v26  ;;  %3867 = vmatpush1.bf16.msra.mxu1 %v5359_v29 }
 0x12b   :  { %5865 = vrcp.f32 %v4596_v36  ;;  %3827 = vmatprep.subr.bf16.mxu0 %v5422_v30  ;;  %3868 = vmatprep.subr.bf16.mxu1 %v5424_v33  ;;  %v5677_v30 = vcombine.low %v415_v1, %v447_v2  ;;  %v4885_v36 = vrot.slane %v4877_v51, %v6995_v25 }
 0x12e   :  { %3828 = vmatpush1.bf16.msra.mxu0 %v5421_v40  ;;  %3869 = vmatpush1.bf16.msra.mxu1 %v5423_v42  ;;  %v5744_v40 = vcombine.high %v480_v22, %v512_v23  ;;  %v33_v42 = vld [vmem:[%s7841_s1 + $0xa0] sm:$0xff] }
 0x12f   :  { %3829 = vmatprep.subr.bf16.mxu0 %v5486_v43  ;;  %3870 = vmatprep.subr.bf16.mxu1 %v5488_v44  ;;  %v65_v43 = vld [vmem:[%s7841_s1 + $0x1a0] sm:$0xff]  ;;  %v5741_v44 = vcombine.low %v479_v17, %v511_v18 }
 0x130   :  { %v5298_v46 = vcombine.high %v33_v42, %v65_v43  ;;  %v289_v18 = vld [vmem:[%s7841_s1 + $0x8a0] sm:$0xff] }
 0x132   :  { %v5860_v58 = vpop.eup %5859  ;;  %3830 = vmatpush1.bf16.msra.mxu0 %v5485_v49  ;;  %3871 = vmatpush1.bf16.msra.mxu1 %v5487_v50  ;;  %v129_v49 = vld [vmem:[%s7841_s1 + $0x3a0] sm:$0xff]  ;;  %v98_v50 = vld [vmem:[%s7841_s1 + $0x2a8] sm:$0xff] }
 0x133   :  { %v5862_v60 = vpop.eup %5861  ;;  %3831 = vmatprep.subr.bf16.mxu0 %v5550_v52  ;;  %3872 = vmatprep.subr.bf16.mxu1 %v5552_v53  ;;  %v130_v52 = vld [vmem:[%s7841_s1 + $0x3a8] sm:$0xff]  ;;  %v5297_v53 = vcombine.low %v33_v42, %v65_v43  ;;  %v5362_v55 = vcombine.high %v97_v48, %v129_v49 }
 0x134   :  { %v5864_v63 = vpop.eup %5863  ;;  %v5364_v56 = vcombine.high %v98_v50, %v130_v52 }
 0x135   :  { %v5866_v4 = vpop.eup %5865  ;;  %v4847_v5 = vcombine.low %v5860_v58, %v5864_v63  ;;  %v193_v58 = vld [vmem:[%s7841_s1 + $0x5a0] sm:$0xff] }
 0x136   :  { %v4848_v8 = vcombine.low %v5862_v60, %v5866_v4  ;;  %3832 = vmatpush1.bf16.msra.mxu0 %v5549_v59  ;;  %3873 = vmatpush1.bf16.msra.mxu1 %v5551_v61  ;;  %v162_v60 = vld [vmem:[%s7841_s1 + $0x4a8] sm:$0xff]  ;;  %v5363_v4 = vcombine.low %v98_v50, %v130_v52  ;;  %v5684_v50 = vcombine.high %v418_v38, %v450_v41  ;;  %v481_v52 = vld [vmem:[%s7841_s1 + $0xea0] sm:$0xff] }
 0x137   :  { %v4869_v10 = vrot.slane %v4847_v5, %v6995_v25  ;;  %3833 = vmatprep.subr.bf16.mxu0 %v5614_v62  ;;  %3874 = vmatprep.subr.bf16.mxu1 %v5616_v0  ;;  %v194_v61 = vld [vmem:[%s7841_s1 + $0x5a8] sm:$0xff]  ;;  %v5361_v0 = vcombine.low %v97_v48, %v129_v49  ;;  %v5426_v5 = vcombine.high %v161_v57, %v193_v58 }
 0x138   :  { %v4876_v14 = vrot.slane %v4848_v8, %v6995_v25  ;;  %v3283_v15 = vpop.f32.mrb[8].mxu0  ;;  %v3324_v20 = vpop.f32.mrb[8].mxu1  ;;  %v5428_v8 = vcombine.high %v162_v60, %v194_v61 }
 0x139   :  { %v5777_v19 = vmul.f32 -1.442695, %v3283_v15  ;;  %v3285_v21 = vpop.f32.mrb[9].mxu0  ;;  %v5779_v26 = vmul.f32 -1.442695, %v3324_v20  ;;  %v3326_v28 = vpop.f32.mrb[9].mxu1  ;;  %v5427_v15 = vcombine.low %v162_v60, %v194_v61 }
 0x13a   :  { %v4878_v24 = vcombine.low %v4869_v10, %v4876_v14  ;;  %v5778_v27 = vmul.f32 -1.442695, %v3285_v21  ;;  %v3287_v29 = vpop.f32.mrb[10].mxu0  ;;  %3834 = vmatpush1.bf16.msra.mxu0 %v5613_v9  ;;  %v5780_v32 = vmul.f32 -1.442695, %v3326_v28  ;;  %v3328_v12 = vpop.f32.mrb[10].mxu1  ;;  %3875 = vmatpush1.bf16.msra.mxu1 %v5615_v11  ;;  %v5425_v14 = vcombine.low %v161_v57, %v193_v58 }
 0x13b   :  { %5867 = vpow2.f32 %v5777_v19  ;;  %v3288_v33 = vpop.f32.mrb[11].mxu0  ;;  %3835 = vmatprep.subr.bf16.mxu0 %v5678_v13  ;;  %v3329_v39 = vpop.f32.mrb[11].mxu1  ;;  %3876 = vmatprep.subr.bf16.mxu1 %v5680_v16  ;;  %v225_v9 = vld [vmem:[%s7841_s1 + $0x6a0] sm:$0xff]  ;;  %v226_v11 = vld [vmem:[%s7841_s1 + $0x6a8] sm:$0xff] }
 0x13c   :  { %v4892_v37 = vrot.slane %v4878_v24, %v6995_v25  ;;  %5869 = vpow2.f32 %v5779_v26  ;;  %v258_v13 = vld [vmem:[%s7841_s1 + $0x7a8] sm:$0xff]  ;;  %v321_v19 = vld [vmem:[%s7841_s1 + $0x9a0] sm:$0xff] }
 0x13d   :  { %5871 = vpow2.f32 %v5778_v27  ;;  %v5492_v17 = vcombine.high %v226_v11, %v258_v13  ;;  %v290_v20 = vld [vmem:[%s7841_s1 + $0x8a8] sm:$0xff]  ;;  %v5491_v23 = vcombine.low %v226_v11, %v258_v13  ;;  %v5554_v24 = vcombine.high %v289_v18, %v321_v19  ;;  %v353_v27 = vld [vmem:[%s7841_s1 + $0xaa0] sm:$0xff]  ;;  %v68_v11 = vld [vmem:[%s7841_s1 + $0x1b8] sm:$0xff] }
 0x13e   :  { %v4893_v51 = vcombine.low %v4885_v36, %v4892_v37  ;;  %5873 = vpow2.f32 %v5780_v32  ;;  %3836 = vmatpush1.bf16.msra.mxu0 %v5677_v30  ;;  %3877 = vmatpush1.bf16.msra.mxu1 %v5679_v34  ;;  %v322_v21 = vld [vmem:[%s7841_s1 + $0x9a8] sm:$0xff]  ;;  %v385_v28 = vld [vmem:[%s7841_s1 + $0xba0] sm:$0xff]  ;;  %v5553_v12 = vcombine.low %v289_v18, %v321_v19  ;;  %v131_v18 = vld [vmem:[%s7841_s1 + $0x3b0] sm:$0xff] }
 0x13f   :  { %3837 = vmatprep.subr.bf16.mxu0 %v5742_v35  ;;  %3878 = vmatprep.subr.bf16.mxu1 %v5744_v40  ;;  %v5556_v26 = vcombine.high %v290_v20, %v322_v21  ;;  %v354_v29 = vld [vmem:[%s7841_s1 + $0xaa8] sm:$0xff]  ;;  %v5555_v34 = vcombine.low %v290_v20, %v322_v21  ;;  %v5618_v35 = vcombine.high %v353_v27, %v385_v28  ;;  %v417_v39 = vld [vmem:[%s7841_s1 + $0xca0] sm:$0xff]  ;;  %v100_v19 = vld [vmem:[%s7841_s1 + $0x2b8] sm:$0xff] }
 0x140   :  { %5245 = vst [vmem:[%s7843_s2] sm:$0xff] %v4893_v51  ;;  %v386_v30 = vld [vmem:[%s7841_s1 + $0xba8] sm:$0xff]  ;;  %v449_v40 = vld [vmem:[%s7841_s1 + $0xda0] sm:$0xff]  ;;  %v132_v20 = vld [vmem:[%s7841_s1 + $0x3b8] sm:$0xff] }
 0x141   :  { %v5620_v37 = vcombine.high %v354_v29, %v386_v30  ;;  %v482_v57 = vld [vmem:[%s7841_s1 + $0xea8] sm:$0xff] }
 0x142   :  { %3838 = vmatpush1.bf16.msra.mxu0 %v5741_v44  ;;  %3879 = vmatpush1.bf16.msra.mxu1 %v5743_v45  ;;  %v5617_v44 = vcombine.low %v353_v27, %v385_v28  ;;  %v514_v58 = vld [vmem:[%s7841_s1 + $0xfa8] sm:$0xff]  ;;  %v195_v27 = vld [vmem:[%s7841_s1 + $0x5b0] sm:$0xff] }
 0x143   :  { %3905 = vmatprep.subr.bf16.mxu0 %v5298_v46  ;;  %3946 = vmatprep.subr.bf16.mxu1 %v5300_v47  ;;  %v5619_v46 = vcombine.low %v354_v29, %v386_v30  ;;  %v5682_v47 = vcombine.high %v417_v39, %v449_v40  ;;  %v7280_v29 = vld [vmem:[%s7842_s0] sm:$0x1]  ;;  %v164_v30 = vld [vmem:[%s7841_s1 + $0x4b8] sm:$0xff] }
 0x145   :  { %v5868_v59 = vpop.eup %5867  ;;  %3856 = vmatmul.mubr.bf16.vlgmr.msra.gmra.mrb[36].mxu0 %v6754_v31  ;;  %3897 = vmatmul.mubr.bf16.vlgmr.msra.gmra.mrb[36].mxu1 %v6754_v31  ;;  %v257_v31 = vld [vmem:[%s7841_s1 + $0x7a0] sm:$0xff] }
 0x146   :  { %v5870_v62 = vpop.eup %5869  ;;  %v4597_v63 = vadd.f32 1.0, %v5868_v59  ;;  %3906 = vmatpush1.bf16.msra.mxu0 %v5297_v53  ;;  %3947 = vmatpush1.bf16.msra.mxu1 %v5299_v54  ;;  %v5490_v16 = vcombine.high %v225_v9, %v257_v31  ;;  %v5489_v22 = vcombine.low %v225_v9, %v257_v31  ;;  %v513_v53 = vld [vmem:[%s7841_s1 + $0xfa0] sm:$0xff]  ;;  %v35_v9 = vld [vmem:[%s7841_s1 + $0xb0] sm:$0xff] }
 0x147   :  { %v5872_v1 = vpop.eup %5871  ;;  %v4599_v2 = vadd.f32 1.0, %v5870_v62  ;;  %3907 = vmatprep.subr.bf16.mxu0 %v5362_v55  ;;  %3948 = vmatprep.subr.bf16.mxu1 %v5364_v56  ;;  %v67_v31 = vld [vmem:[%s7841_s1 + $0x1b0] sm:$0xff]  ;;  %v5745_v13 = vcombine.low %v481_v52, %v513_v53 }
 0x148   :  { %v5874_v6 = vpop.eup %5873  ;;  %5875 = vrcp.f32 %v4597_v63  ;;  %v4598_v7 = vadd.f32 1.0, %v5872_v1  ;;  %3937 = vmatprep.mubr.bf16.mxu0 %v6094_v3  ;;  %3978 = vmatprep.mubr.bf16.mxu1 %v6094_v3  ;;  %v5301_v21 = vcombine.low %v35_v9, %v67_v31 }
 0x149   :  { %5877 = vrcp.f32 %v4599_v2  ;;  %v4600_v10 = vadd.f32 1.0, %v5874_v6  ;;  %v5746_v6 = vcombine.high %v481_v52, %v513_v53  ;;  %v291_v53 = vld [vmem:[%s7841_s1 + $0x8b0] sm:$0xff] }
 0x14a   :  { %5879 = vrcp.f32 %v4598_v7  ;;  %3908 = vmatpush1.bf16.msra.mxu0 %v5361_v0  ;;  %3949 = vmatpush1.bf16.msra.mxu1 %v5363_v4  ;;  %v5681_v0 = vcombine.low %v417_v39, %v449_v40 }
 0x14b   :  { %5881 = vrcp.f32 %v4600_v10  ;;  %3909 = vmatprep.subr.bf16.mxu0 %v5426_v5  ;;  %3950 = vmatprep.subr.bf16.mxu1 %v5428_v8  ;;  %v5683_v5 = vcombine.low %v418_v38, %v450_v41  ;;  %v5748_v8 = vcombine.high %v482_v57, %v514_v58  ;;  %v36_v10 = vld [vmem:[%s7841_s1 + $0xb8] sm:$0xff]  ;;  %v227_v38 = vld [vmem:[%s7841_s1 + $0x6b0] sm:$0xff] }
 0x14c   :  { %v259_v41 = vld [vmem:[%s7841_s1 + $0x7b0] sm:$0xff] }
 0x14e   :  { %3910 = vmatpush1.bf16.msra.mxu0 %v5425_v14  ;;  %3951 = vmatpush1.bf16.msra.mxu1 %v5427_v15  ;;  %v5747_v14 = vcombine.low %v482_v57, %v514_v58  ;;  %v5302_v15 = vcombine.high %v35_v9, %v67_v31  ;;  %v5493_v57 = vcombine.low %v227_v38, %v259_v41  ;;  %v419_v31 = vld [vmem:[%s7841_s1 + $0xcb0] sm:$0xff] }
 0x14f   :  { %3911 = vmatprep.subr.bf16.mxu0 %v5490_v16  ;;  %3952 = vmatprep.subr.bf16.mxu1 %v5492_v17  ;;  %v5304_v16 = vcombine.high %v36_v10, %v68_v11  ;;  %v99_v17 = vld [vmem:[%s7841_s1 + $0x2b0] sm:$0xff] }
 0x152   :  { %v5876_v32 = vpop.eup %5875  ;;  %3912 = vmatpush1.bf16.msra.mxu0 %v5489_v22  ;;  %3953 = vmatpush1.bf16.msra.mxu1 %v5491_v23  ;;  %v5303_v22 = vcombine.low %v36_v10, %v68_v11  ;;  %v5366_v23 = vcombine.high %v99_v17, %v131_v18  ;;  %v451_v10 = vld [vmem:[%s7841_s1 + $0xdb0] sm:$0xff] }
 0x153   :  { %v5878_v33 = vpop.eup %5877  ;;  %3913 = vmatprep.subr.bf16.mxu0 %v5554_v24  ;;  %3954 = vmatprep.subr.bf16.mxu1 %v5556_v26  ;;  %v5368_v24 = vcombine.high %v100_v19, %v132_v20  ;;  %v163_v26 = vld [vmem:[%s7841_s1 + $0x4b0] sm:$0xff] }
 0x154   :  { %v5880_v36 = vpop.eup %5879  ;;  %v5430_v39 = vcombine.high %v163_v26, %v195_v27 }
 0x155   :  { %v5882_v42 = vpop.eup %5881  ;;  %v4894_v43 = vcombine.low %v5876_v32, %v5880_v36  ;;  %v196_v32 = vld [vmem:[%s7841_s1 + $0x5b8] sm:$0xff] }
 0x156   :  { %v4895_v51 = vcombine.low %v5878_v33, %v5882_v42  ;;  %3914 = vmatpush1.bf16.msra.mxu0 %v5553_v12  ;;  %3955 = vmatpush1.bf16.msra.mxu1 %v5555_v34  ;;  %v5365_v34 = vcombine.low %v99_v17, %v131_v18 }
 0x157   :  { %v7228_v45 = vrot.slane %v4894_v43, %v6995_v25  ;;  %3915 = vmatprep.subr.bf16.mxu0 %v5618_v35  ;;  %3956 = vmatprep.subr.bf16.mxu1 %v5620_v37  ;;  %v5367_v37 = vcombine.low %v100_v19, %v132_v20  ;;  %v5432_v43 = vcombine.high %v164_v30, %v196_v32 }
 0x158   :  { %v7231_v48 = vrot.slane %v4895_v51, %v6995_v25  ;;  %v3365_v49 = vpop.f32.mrb[12].mxu0  ;;  %v3406_v55 = vpop.f32.mrb[12].mxu1  ;;  %v5686_v20 = vcombine.high %v419_v31, %v451_v10 }
 0x159   :  { %v5781_v54 = vmul.f32 -1.442695, %v3365_v49  ;;  %v3367_v56 = vpop.f32.mrb[13].mxu0  ;;  %v5783_v60 = vmul.f32 -1.442695, %v3406_v55  ;;  %v3408_v62 = vpop.f32.mrb[13].mxu1  ;;  %v5431_v49 = vcombine.low %v164_v30, %v196_v32 }
 0x15a   :  { %v4926_v59 = vcombine.low %v7228_v45, %v7231_v48  ;;  %v5782_v61 = vmul.f32 -1.442695, %v3367_v56  ;;  %v3369_v63 = vpop.f32.mrb[14].mxu0  ;;  %3916 = vmatpush1.bf16.msra.mxu0 %v5617_v44  ;;  %v5784_v1 = vmul.f32 -1.442695, %v3408_v62  ;;  %v3410_v2 = vpop.f32.mrb[14].mxu1  ;;  %3957 = vmatpush1.bf16.msra.mxu1 %v5619_v46 }
 0x15b   :  { %5883 = vpow2.f32 %v5781_v54  ;;  %v3370_v4 = vpop.f32.mrb[15].mxu0  ;;  %3917 = vmatprep.subr.bf16.mxu0 %v5682_v47  ;;  %v3411_v7 = vpop.f32.mrb[15].mxu1  ;;  %3958 = vmatprep.subr.bf16.mxu1 %v5684_v50  ;;  %v228_v44 = vld [vmem:[%s7841_s1 + $0x6b8] sm:$0xff]  ;;  %v5429_v47 = vcombine.low %v163_v26, %v195_v27  ;;  %v5494_v50 = vcombine.high %v227_v38, %v259_v41  ;;  %v323_v54 = vld [vmem:[%s7841_s1 + $0x9b0] sm:$0xff]  ;;  %v38_v45 = vld [vmem:[%s7841_s1 + $0xc8] sm:$0xff] }
 0x15c   :  { %5885 = vpow2.f32 %v5783_v60  ;;  %v260_v46 = vld [vmem:[%s7841_s1 + $0x7b8] sm:$0xff]  ;;  %v5558_v60 = vcombine.high %v291_v53, %v323_v54  ;;  %v355_v62 = vld [vmem:[%s7841_s1 + $0xab0] sm:$0xff]  ;;  %v5557_v4 = vcombine.low %v291_v53, %v323_v54  ;;  %v70_v48 = vld [vmem:[%s7841_s1 + $0x1c8] sm:$0xff] }
 0x15d   :  { %5887 = vpow2.f32 %v5782_v61  ;;  %v5496_v52 = vcombine.high %v228_v44, %v260_v46  ;;  %v292_v55 = vld [vmem:[%s7841_s1 + $0x8b8] sm:$0xff]  ;;  %v5495_v58 = vcombine.low %v228_v44, %v260_v46  ;;  %v387_v63 = vld [vmem:[%s7841_s1 + $0xbb0] sm:$0xff] }
 0x15e   :  { %5889 = vpow2.f32 %v5784_v1  ;;  %3918 = vmatpush1.bf16.msra.mxu0 %v5681_v0  ;;  %3959 = vmatpush1.bf16.msra.mxu1 %v5683_v5  ;;  %v324_v56 = vld [vmem:[%s7841_s1 + $0x9b8] sm:$0xff]  ;;  %v5622_v7 = vcombine.high %v355_v62, %v387_v63  ;;  %v5621_v17 = vcombine.low %v355_v62, %v387_v63  ;;  %v515_v26 = vld [vmem:[%s7841_s1 + $0xfb0] sm:$0xff]  ;;  %v5307_v62 = vcombine.low %v38_v45, %v70_v48 }
 0x15f   :  { %3919 = vmatprep.subr.bf16.mxu0 %v5746_v6  ;;  %3960 = vmatprep.subr.bf16.mxu1 %v5748_v8  ;;  %v5560_v61 = vcombine.high %v292_v55, %v324_v56  ;;  %v356_v0 = vld [vmem:[%s7841_s1 + $0xab8] sm:$0xff]  ;;  %v5559_v6 = vcombine.low %v292_v55, %v324_v56  ;;  %v5308_v55 = vcombine.high %v38_v45, %v70_v48  ;;  %v101_v56 = vld [vmem:[%s7841_s1 + $0x2c0] sm:$0xff]  ;;  %v422_v48 = vld [vmem:[%s7841_s1 + $0xcc8] sm:$0xff] }
 0x160   :  { %v388_v1 = vld [vmem:[%s7841_s1 + $0xbb8] sm:$0xff] }
 0x161   :  { %v5624_v9 = vcombine.high %v356_v0, %v388_v1  ;;  %v5623_v19 = vcombine.low %v356_v0, %v388_v1  ;;  %v484_v32 = vld [vmem:[%s7841_s1 + $0xeb8] sm:$0xff]  ;;  %v165_v1 = vld [vmem:[%s7841_s1 + $0x4c0] sm:$0xff] }
 0x162   :  { %3920 = vmatpush1.bf16.msra.mxu0 %v5745_v13  ;;  %3961 = vmatpush1.bf16.msra.mxu1 %v5747_v14  ;;  %v420_v14 = vld [vmem:[%s7841_s1 + $0xcb8] sm:$0xff] }
 0x163   :  { %3987 = vmatprep.subr.bf16.mxu0 %v5302_v15  ;;  %4028 = vmatprep.subr.bf16.mxu1 %v5304_v16  ;;  %v452_v15 = vld [vmem:[%s7841_s1 + $0xdb8] sm:$0xff] }
 0x164   :  { %v5687_v38 = vcombine.low %v420_v14, %v452_v15 }
 0x165   :  { %v5884_v28 = vpop.eup %5883  ;;  %3938 = vmatmul.mubr.bf16.vlgmr.msra.gmra.mrb[40].mxu0 %v7280_v29  ;;  %3979 = vmatmul.mubr.bf16.vlgmr.msra.gmra.mrb[40].mxu1 %v7280_v29 }
 0x166   :  { %v5886_v12 = vpop.eup %5885  ;;  %v4601_v33 = vadd.f32 1.0, %v5884_v28  ;;  %3988 = vmatpush1.bf16.msra.mxu0 %v5301_v21  ;;  %4029 = vmatpush1.bf16.msra.mxu1 %v5303_v22 }
 0x167   :  { %v5888_v35 = vpop.eup %5887  ;;  %v4603_v36 = vadd.f32 1.0, %v5886_v12  ;;  %3989 = vmatprep.subr.bf16.mxu0 %v5366_v23  ;;  %4030 = vmatprep.subr.bf16.mxu1 %v5368_v24  ;;  %v5688_v23 = vcombine.high %v420_v14, %v452_v15  ;;  %v483_v24 = vld [vmem:[%s7841_s1 + $0xeb0] sm:$0xff]  ;;  %v516_v12 = vld [vmem:[%s7841_s1 + $0xfb8] sm:$0xff] }
 0x168   :  { %v5890_v40 = vpop.eup %5889  ;;  %5891 = vrcp.f32 %v4601_v33  ;;  %v4602_v42 = vadd.f32 1.0, %v5888_v35  ;;  %4019 = vmatprep.mubr.bf16.mxu0 %v6094_v3  ;;  %4060 = vmatprep.mubr.bf16.mxu1 %v6094_v3  ;;  %v5750_v41 = vcombine.high %v483_v24, %v515_v26  ;;  %v5751_v53 = vcombine.low %v484_v32, %v516_v12 }
 0x169   :  { %5893 = vrcp.f32 %v4603_v36  ;;  %v4604_v51 = vadd.f32 1.0, %v5890_v40 }
 0x16a   :  { %5895 = vrcp.f32 %v4602_v42  ;;  %3990 = vmatpush1.bf16.msra.mxu0 %v5365_v34  ;;  %4031 = vmatpush1.bf16.msra.mxu1 %v5367_v37 }
 0x16b   :  { %5897 = vrcp.f32 %v4604_v51  ;;  %3991 = vmatprep.subr.bf16.mxu0 %v5430_v39  ;;  %4032 = vmatprep.subr.bf16.mxu1 %v5432_v43  ;;  %v5685_v39 = vcombine.low %v419_v31, %v451_v10  ;;  %v4934_v51 = vrot.slane %v4926_v59, %v6995_v25 }
 0x16e   :  { %3992 = vmatpush1.bf16.msra.mxu0 %v5429_v47  ;;  %4033 = vmatpush1.bf16.msra.mxu1 %v5431_v49  ;;  %v5752_v47 = vcombine.high %v484_v32, %v516_v12  ;;  %v37_v49 = vld [vmem:[%s7841_s1 + $0xc0] sm:$0xff]  ;;  %v326_v32 = vld [vmem:[%s7841_s1 + $0x9c8] sm:$0xff] }
 0x16f   :  { %3993 = vmatprep.subr.bf16.mxu0 %v5494_v50  ;;  %4034 = vmatprep.subr.bf16.mxu1 %v5496_v52  ;;  %v69_v50 = vld [vmem:[%s7841_s1 + $0x1c0] sm:$0xff]  ;;  %v5749_v52 = vcombine.low %v483_v24, %v515_v26 }
 0x170   :  { %v5306_v54 = vcombine.high %v37_v49, %v69_v50 }
 0x172   :  { %v5892_v2 = vpop.eup %5891  ;;  %3994 = vmatpush1.bf16.msra.mxu0 %v5493_v57  ;;  %4035 = vmatpush1.bf16.msra.mxu1 %v5495_v58  ;;  %v133_v57 = vld [vmem:[%s7841_s1 + $0x3c0] sm:$0xff]  ;;  %v102_v58 = vld [vmem:[%s7841_s1 + $0x2c8] sm:$0xff] }
 0x173   :  { %v5894_v5 = vpop.eup %5893  ;;  %3995 = vmatprep.subr.bf16.mxu0 %v5558_v60  ;;  %4036 = vmatprep.subr.bf16.mxu1 %v5560_v61  ;;  %v134_v60 = vld [vmem:[%s7841_s1 + $0x3c8] sm:$0xff]  ;;  %v5305_v61 = vcombine.low %v37_v49, %v69_v50  ;;  %v5370_v63 = vcombine.high %v101_v56, %v133_v57  ;;  %v453_v49 = vld [vmem:[%s7841_s1 + $0xdc0] sm:$0xff] }
 0x174   :  { %v5896_v8 = vpop.eup %5895  ;;  %v5372_v0 = vcombine.high %v102_v58, %v134_v60 }
 0x175   :  { %v5898_v11 = vpop.eup %5897  ;;  %v4896_v13 = vcombine.low %v5892_v2, %v5896_v8  ;;  %v197_v2 = vld [vmem:[%s7841_s1 + $0x5c0] sm:$0xff] }
 0x176   :  { %v4897_v16 = vcombine.low %v5894_v5, %v5898_v11  ;;  %3996 = vmatpush1.bf16.msra.mxu0 %v5557_v4  ;;  %4037 = vmatpush1.bf16.msra.mxu1 %v5559_v6  ;;  %v166_v5 = vld [vmem:[%s7841_s1 + $0x4c8] sm:$0xff]  ;;  %v5371_v11 = vcombine.low %v102_v58, %v134_v60 }
 0x177   :  { %v4918_v18 = vrot.slane %v4896_v13, %v6995_v25  ;;  %3997 = vmatprep.subr.bf16.mxu0 %v5622_v7  ;;  %4038 = vmatprep.subr.bf16.mxu1 %v5624_v9  ;;  %v198_v6 = vld [vmem:[%s7841_s1 + $0x5c8] sm:$0xff]  ;;  %v5369_v9 = vcombine.low %v101_v56, %v133_v57  ;;  %v5434_v13 = vcombine.high %v165_v1, %v197_v2 }
 0x178   :  { %v4925_v21 = vrot.slane %v4897_v16, %v6995_v25  ;;  %v3447_v22 = vpop.f32.mrb[16].mxu0  ;;  %v3488_v28 = vpop.f32.mrb[16].mxu1  ;;  %v5436_v16 = vcombine.high %v166_v5, %v198_v6 }
 0x179   :  { %v5785_v27 = vmul.f32 -1.442695, %v3447_v22  ;;  %v3449_v30 = vpop.f32.mrb[17].mxu0  ;;  %v5787_v34 = vmul.f32 -1.442695, %v3488_v28  ;;  %v3490_v36 = vpop.f32.mrb[17].mxu1  ;;  %v5433_v22 = vcombine.low %v165_v1, %v197_v2 }
 0x17a   :  { %v4927_v33 = vcombine.low %v4918_v18, %v4925_v21  ;;  %v5786_v35 = vmul.f32 -1.442695, %v3449_v30  ;;  %v3451_v37 = vpop.f32.mrb[18].mxu0  ;;  %3998 = vmatpush1.bf16.msra.mxu0 %v5621_v17  ;;  %v5788_v40 = vmul.f32 -1.442695, %v3490_v36  ;;  %v3492_v42 = vpop.f32.mrb[18].mxu1  ;;  %4039 = vmatpush1.bf16.msra.mxu1 %v5623_v19 }
 0x17b   :  { %5899 = vpow2.f32 %v5785_v27  ;;  %v3452_v43 = vpop.f32.mrb[19].mxu0  ;;  %3999 = vmatprep.subr.bf16.mxu0 %v5686_v20  ;;  %v3493_v46 = vpop.f32.mrb[19].mxu1  ;;  %4040 = vmatprep.subr.bf16.mxu1 %v5688_v23  ;;  %v229_v17 = vld [vmem:[%s7841_s1 + $0x6c0] sm:$0xff]  ;;  %v230_v20 = vld [vmem:[%s7841_s1 + $0x6c8] sm:$0xff]  ;;  %v5435_v23 = vcombine.low %v166_v5, %v198_v6 }
 0x17c   :  { %v4941_v44 = vrot.slane %v4927_v33, %v6995_v25  ;;  %5901 = vpow2.f32 %v5787_v34  ;;  %v261_v18 = vld [vmem:[%s7841_s1 + $0x7c0] sm:$0xff]  ;;  %v262_v21 = vld [vmem:[%s7841_s1 + $0x7c8] sm:$0xff] }
 0x17d   :  { %5903 = vpow2.f32 %v5786_v35  ;;  %v5498_v24 = vcombine.high %v229_v17, %v261_v18  ;;  %v5500_v26 = vcombine.high %v230_v20, %v262_v21  ;;  %v293_v27 = vld [vmem:[%s7841_s1 + $0x8c0] sm:$0xff]  ;;  %v294_v30 = vld [vmem:[%s7841_s1 + $0x8c8] sm:$0xff]  ;;  %v5497_v12 = vcombine.low %v229_v17, %v261_v18  ;;  %v39_v18 = vld [vmem:[%s7841_s1 + $0xd0] sm:$0xff] }
 0x17e   :  { %v4942_v59 = vcombine.low %v4934_v51, %v4941_v44  ;;  %5905 = vpow2.f32 %v5788_v40  ;;  %4000 = vmatpush1.bf16.msra.mxu0 %v5685_v39  ;;  %4041 = vmatpush1.bf16.msra.mxu1 %v5687_v38  ;;  %v325_v28 = vld [vmem:[%s7841_s1 + $0x9c0] sm:$0xff]  ;;  %v5499_v33 = vcombine.low %v230_v20, %v262_v21  ;;  %v5564_v35 = vcombine.high %v294_v30, %v326_v32  ;;  %v358_v39 = vld [vmem:[%s7841_s1 + $0xac8] sm:$0xff]  ;;  %v40_v20 = vld [vmem:[%s7841_s1 + $0xd8] sm:$0xff] }
 0x17f   :  { %4001 = vmatprep.subr.bf16.mxu0 %v5750_v41  ;;  %4042 = vmatprep.subr.bf16.mxu1 %v5752_v47  ;;  %v5562_v34 = vcombine.high %v293_v27, %v325_v28  ;;  %v357_v36 = vld [vmem:[%s7841_s1 + $0xac0] sm:$0xff]  ;;  %v390_v40 = vld [vmem:[%s7841_s1 + $0xbc8] sm:$0xff]  ;;  %v5561_v43 = vcombine.low %v293_v27, %v325_v28  ;;  %v5563_v41 = vcombine.low %v294_v30, %v326_v32  ;;  %v72_v21 = vld [vmem:[%s7841_s1 + $0x1d8] sm:$0xff] }
 0x180   :  { %5246 = vst [vmem:[%s7843_s2 + $0x8] sm:$0xff] %v4942_v59  ;;  %v389_v37 = vld [vmem:[%s7841_s1 + $0xbc0] sm:$0xff]  ;;  %v5628_v46 = vcombine.high %v358_v39, %v390_v40  ;;  %v454_v59 = vld [vmem:[%s7841_s1 + $0xdc8] sm:$0xff]  ;;  %v103_v27 = vld [vmem:[%s7841_s1 + $0x2d0] sm:$0xff] }
 0x181   :  { %v5626_v51 = vcombine.high %v357_v36, %v389_v37  ;;  %v421_v47 = vld [vmem:[%s7841_s1 + $0xcc0] sm:$0xff]  ;;  %v5692_v60 = vcombine.high %v422_v48, %v454_v59  ;;  %v486_v2 = vld [vmem:[%s7841_s1 + $0xec8] sm:$0xff]  ;;  %v135_v28 = vld [vmem:[%s7841_s1 + $0x3d0] sm:$0xff] }
 0x182   :  { %4002 = vmatpush1.bf16.msra.mxu0 %v5749_v52  ;;  %4043 = vmatpush1.bf16.msra.mxu1 %v5751_v53  ;;  %v5625_v53 = vcombine.low %v357_v36, %v389_v37  ;;  %v5690_v56 = vcombine.high %v421_v47, %v453_v49  ;;  %v104_v30 = vld [vmem:[%s7841_s1 + $0x2d8] sm:$0xff]  ;;  %v167_v36 = vld [vmem:[%s7841_s1 + $0x4d0] sm:$0xff] }
 0x183   :  { %4069 = vmatprep.subr.bf16.mxu0 %v5306_v54  ;;  %4110 = vmatprep.subr.bf16.mxu1 %v5308_v55  ;;  %v5627_v55 = vcombine.low %v358_v39, %v390_v40  ;;  %v136_v32 = vld [vmem:[%s7841_s1 + $0x3d8] sm:$0xff]  ;;  %v199_v37 = vld [vmem:[%s7841_s1 + $0x5d0] sm:$0xff] }
 0x184   :  { %v168_v40 = vld [vmem:[%s7841_s1 + $0x4d8] sm:$0xff] }
 0x185   :  { %v5900_v4 = vpop.eup %5899  ;;  %4020 = vmatmul.mubr.bf16.vlgmr.msra.gmra.mrb[44].mxu0 %v7280_v29  ;;  %4061 = vmatmul.mubr.bf16.vlgmr.msra.gmra.mrb[44].mxu1 %v7280_v29 }
 0x186   :  { %v5902_v7 = vpop.eup %5901  ;;  %v4605_v8 = vadd.f32 1.0, %v5900_v4  ;;  %4070 = vmatpush1.bf16.msra.mxu0 %v5305_v61  ;;  %4111 = vmatpush1.bf16.msra.mxu1 %v5307_v62  ;;  %v485_v61 = vld [vmem:[%s7841_s1 + $0xec0] sm:$0xff]  ;;  %v518_v4 = vld [vmem:[%s7841_s1 + $0xfc8] sm:$0xff] }
 0x187   :  { %v5904_v31 = vpop.eup %5903  ;;  %v4607_v10 = vadd.f32 1.0, %v5902_v7  ;;  %4071 = vmatprep.subr.bf16.mxu0 %v5370_v63  ;;  %4112 = vmatprep.subr.bf16.mxu1 %v5372_v0  ;;  %v517_v62 = vld [vmem:[%s7841_s1 + $0xfc0] sm:$0xff]  ;;  %v5756_v17 = vcombine.high %v486_v2, %v518_v4 }
 0x188   :  { %v5906_v14 = vpop.eup %5905  ;;  %5907 = vrcp.f32 %v4605_v8  ;;  %v4606_v15 = vadd.f32 1.0, %v5904_v31  ;;  %4101 = vmatprep.mubr.bf16.mxu0 %v6094_v3  ;;  %4142 = vmatprep.mubr.bf16.mxu1 %v6094_v3  ;;  %v5689_v31 = vcombine.low %v421_v47, %v453_v49  ;;  %v5438_v47 = vcombine.high %v167_v36, %v199_v37 }
 0x189   :  { %5909 = vrcp.f32 %v4607_v10  ;;  %v4608_v19 = vadd.f32 1.0, %v5906_v14  ;;  %v5691_v14 = vcombine.low %v422_v48, %v454_v59  ;;  %v231_v48 = vld [vmem:[%s7841_s1 + $0x6d0] sm:$0xff] }
 0x18a   :  { %5911 = vrcp.f32 %v4606_v15  ;;  %4072 = vmatpush1.bf16.msra.mxu0 %v5369_v9  ;;  %4113 = vmatpush1.bf16.msra.mxu1 %v5371_v11  ;;  %v5754_v15 = vcombine.high %v485_v61, %v517_v62  ;;  %v263_v59 = vld [vmem:[%s7841_s1 + $0x7d0] sm:$0xff] }
 0x18b   :  { %5913 = vrcp.f32 %v4608_v19  ;;  %4073 = vmatprep.subr.bf16.mxu0 %v5434_v13  ;;  %4114 = vmatprep.subr.bf16.mxu1 %v5436_v16  ;;  %v71_v19 = vld [vmem:[%s7841_s1 + $0x1d0] sm:$0xff] }
 0x18e   :  { %4074 = vmatpush1.bf16.msra.mxu0 %v5433_v22  ;;  %4115 = vmatpush1.bf16.msra.mxu1 %v5435_v23  ;;  %v5753_v22 = vcombine.low %v485_v61, %v517_v62  ;;  %v5755_v23 = vcombine.low %v486_v2, %v518_v4  ;;  %v295_v62 = vld [vmem:[%s7841_s1 + $0x8d0] sm:$0xff]  ;;  %v5501_v2 = vcombine.low %v231_v48, %v263_v59 }
 0x18f   :  { %4075 = vmatprep.subr.bf16.mxu0 %v5498_v24  ;;  %4116 = vmatprep.subr.bf16.mxu1 %v5500_v26  ;;  %v5310_v24 = vcombine.high %v39_v18, %v71_v19  ;;  %v5312_v26 = vcombine.high %v40_v20, %v72_v21 }
 0x192   :  { %v5908_v42 = vpop.eup %5907  ;;  %4076 = vmatpush1.bf16.msra.mxu0 %v5497_v12  ;;  %4117 = vmatpush1.bf16.msra.mxu1 %v5499_v33  ;;  %v5309_v12 = vcombine.low %v39_v18, %v71_v19  ;;  %v5311_v33 = vcombine.low %v40_v20, %v72_v21  ;;  %v423_v19 = vld [vmem:[%s7841_s1 + $0xcd0] sm:$0xff] }
 0x193   :  { %v5910_v38 = vpop.eup %5909  ;;  %4077 = vmatprep.subr.bf16.mxu0 %v5562_v34  ;;  %4118 = vmatprep.subr.bf16.mxu1 %v5564_v35  ;;  %v5374_v34 = vcombine.high %v103_v27, %v135_v28  ;;  %v5376_v35 = vcombine.high %v104_v30, %v136_v32  ;;  %v455_v20 = vld [vmem:[%s7841_s1 + $0xdd0] sm:$0xff] }
 0x194   :  { %v5912_v44 = vpop.eup %5911 }
 0x195   :  { %v5914_v50 = vpop.eup %5913  ;;  %v4943_v45 = vcombine.low %v5908_v42, %v5912_v44  ;;  %v200_v42 = vld [vmem:[%s7841_s1 + $0x5d8] sm:$0xff] }
 0x196   :  { %v4944_v52 = vcombine.low %v5910_v38, %v5914_v50  ;;  %4078 = vmatpush1.bf16.msra.mxu0 %v5561_v43  ;;  %4119 = vmatpush1.bf16.msra.mxu1 %v5563_v41  ;;  %v5373_v41 = vcombine.low %v103_v27, %v135_v28 }
 0x197   :  { %v7451_v54 = vrot.slane %v4943_v45, %v6995_v25  ;;  %4079 = vmatprep.subr.bf16.mxu0 %v5626_v51  ;;  %4120 = vmatprep.subr.bf16.mxu1 %v5628_v46  ;;  %v5375_v46 = vcombine.low %v104_v30, %v136_v32  ;;  %v5440_v45 = vcombine.high %v168_v40, %v200_v42 }
 0x198   :  { %v7454_v57 = vrot.slane %v4944_v52, %v6995_v25  ;;  %v3529_v58 = vpop.f32.mrb[20].mxu0  ;;  %v3570_v0 = vpop.f32.mrb[20].mxu1  ;;  %v5694_v32 = vcombine.high %v423_v19, %v455_v20 }
 0x199   :  { %v5789_v63 = vmul.f32 -1.442695, %v3529_v58  ;;  %v3531_v1 = vpop.f32.mrb[21].mxu0  ;;  %v5791_v6 = vmul.f32 -1.442695, %v3570_v0  ;;  %v3572_v8 = vpop.f32.mrb[21].mxu1  ;;  %v5439_v58 = vcombine.low %v168_v40, %v200_v42 }
 0x19a   :  { %v4975_v5 = vcombine.low %v7451_v54, %v7454_v57  ;;  %v5790_v7 = vmul.f32 -1.442695, %v3531_v1  ;;  %v3533_v9 = vpop.f32.mrb[22].mxu0  ;;  %4080 = vmatpush1.bf16.msra.mxu0 %v5625_v53  ;;  %v5792_v10 = vmul.f32 -1.442695, %v3572_v8  ;;  %v3574_v11 = vpop.f32.mrb[22].mxu1  ;;  %4121 = vmatpush1.bf16.msra.mxu1 %v5627_v55 }
 0x19b   :  { %5915 = vpow2.f32 %v5789_v63  ;;  %v3534_v13 = vpop.f32.mrb[23].mxu0  ;;  %4081 = vmatprep.subr.bf16.mxu0 %v5690_v56  ;;  %v3575_v16 = vpop.f32.mrb[23].mxu1  ;;  %4122 = vmatprep.subr.bf16.mxu1 %v5692_v60  ;;  %v232_v53 = vld [vmem:[%s7841_s1 + $0x6d8] sm:$0xff]  ;;  %v5437_v56 = vcombine.low %v167_v36, %v199_v37  ;;  %v5502_v60 = vcombine.high %v231_v48, %v263_v59  ;;  %v327_v63 = vld [vmem:[%s7841_s1 + $0x9d0] sm:$0xff]  ;;  %v42_v54 = vld [vmem:[%s7841_s1 + $0xe8] sm:$0xff] }
 0x19c   :  { %5917 = vpow2.f32 %v5791_v6  ;;  %v264_v55 = vld [vmem:[%s7841_s1 + $0x7d8] sm:$0xff]  ;;  %v5566_v6 = vcombine.high %v295_v62, %v327_v63  ;;  %v359_v8 = vld [vmem:[%s7841_s1 + $0xad0] sm:$0xff]  ;;  %v5565_v13 = vcombine.low %v295_v62, %v327_v63  ;;  %v74_v57 = vld [vmem:[%s7841_s1 + $0x1e8] sm:$0xff] }
 0x19d   :  { %5919 = vpow2.f32 %v5790_v7  ;;  %v5504_v61 = vcombine.high %v232_v53, %v264_v55  ;;  %v296_v0 = vld [vmem:[%s7841_s1 + $0x8d8] sm:$0xff]  ;;  %v5503_v4 = vcombine.low %v232_v53, %v264_v55  ;;  %v391_v9 = vld [vmem:[%s7841_s1 + $0xbd0] sm:$0xff] }
 0x19e   :  { %5921 = vpow2.f32 %v5792_v10  ;;  %4082 = vmatpush1.bf16.msra.mxu0 %v5689_v31  ;;  %4123 = vmatpush1.bf16.msra.mxu1 %v5691_v14  ;;  %v328_v1 = vld [vmem:[%s7841_s1 + $0x9d8] sm:$0xff]  ;;  %v5630_v16 = vcombine.high %v359_v8, %v391_v9  ;;  %v5629_v27 = vcombine.low %v359_v8, %v391_v9  ;;  %v519_v36 = vld [vmem:[%s7841_s1 + $0xfd0] sm:$0xff]  ;;  %v5315_v8 = vcombine.low %v42_v54, %v74_v57 }
 0x19f   :  { %4083 = vmatprep.subr.bf16.mxu0 %v5754_v15  ;;  %4124 = vmatprep.subr.bf16.mxu1 %v5756_v17  ;;  %v5568_v7 = vcombine.high %v296_v0, %v328_v1  ;;  %v360_v31 = vld [vmem:[%s7841_s1 + $0xad8] sm:$0xff]  ;;  %v5567_v15 = vcombine.low %v296_v0, %v328_v1  ;;  %v5316_v0 = vcombine.high %v42_v54, %v74_v57  ;;  %v105_v1 = vld [vmem:[%s7841_s1 + $0x2e0] sm:$0xff]  ;;  %v426_v54 = vld [vmem:[%s7841_s1 + $0xce8] sm:$0xff] }
 0x1a0   :  { %v392_v10 = vld [vmem:[%s7841_s1 + $0xbd8] sm:$0xff]  ;;  %v458_v57 = vld [vmem:[%s7841_s1 + $0xde8] sm:$0xff] }
 0x1a1   :  { %v5632_v18 = vcombine.high %v360_v31, %v392_v10  ;;  %v5631_v30 = vcombine.low %v360_v31, %v392_v10  ;;  %v488_v42 = vld [vmem:[%s7841_s1 + $0xed8] sm:$0xff]  ;;  %v169_v10 = vld [vmem:[%s7841_s1 + $0x4e0] sm:$0xff] }
 0x1a2   :  { %4084 = vmatpush1.bf16.msra.mxu0 %v5753_v22  ;;  %4125 = vmatpush1.bf16.msra.mxu1 %v5755_v23  ;;  %v424_v23 = vld [vmem:[%s7841_s1 + $0xcd8] sm:$0xff] }
 0x1a3   :  { %4151 = vmatprep.subr.bf16.mxu0 %v5310_v24  ;;  %4192 = vmatprep.subr.bf16.mxu1 %v5312_v26  ;;  %v456_v24 = vld [vmem:[%s7841_s1 + $0xdd8] sm:$0xff] }
 0x1a4   :  { %v5695_v48 = vcombine.low %v424_v23, %v456_v24 }
 0x1a5   :  { %v5916_v39 = vpop.eup %5915  ;;  %4102 = vmatmul.mubr.bf16.vlgmr.msra.gmra.mrb[48].mxu0 %v7280_v29  ;;  %4143 = vmatmul.mubr.bf16.vlgmr.msra.gmra.mrb[48].mxu1 %v7280_v29 }
 0x1a6   :  { %v5918_v43 = vpop.eup %5917  ;;  %v4609_v38 = vadd.f32 1.0, %v5916_v39  ;;  %4152 = vmatpush1.bf16.msra.mxu0 %v5309_v12  ;;  %4193 = vmatpush1.bf16.msra.mxu1 %v5311_v33 }
 0x1a7   :  { %v5920_v51 = vpop.eup %5919  ;;  %v4611_v44 = vadd.f32 1.0, %v5918_v43  ;;  %4153 = vmatprep.subr.bf16.mxu0 %v5374_v34  ;;  %4194 = vmatprep.subr.bf16.mxu1 %v5376_v35  ;;  %v5696_v34 = vcombine.high %v424_v23, %v456_v24  ;;  %v487_v35 = vld [vmem:[%s7841_s1 + $0xed0] sm:$0xff]  ;;  %v520_v43 = vld [vmem:[%s7841_s1 + $0xfd8] sm:$0xff] }
 0x1a8   :  { %v5922_v49 = vpop.eup %5921  ;;  %5923 = vrcp.f32 %v4609_v38  ;;  %v4610_v50 = vadd.f32 1.0, %v5920_v51  ;;  %4183 = vmatprep.mubr.bf16.mxu0 %v6094_v3  ;;  %4224 = vmatprep.mubr.bf16.mxu1 %v6094_v3  ;;  %v5758_v59 = vcombine.high %v487_v35, %v519_v36  ;;  %v5759_v62 = vcombine.low %v488_v42, %v520_v43 }
 0x1a9   :  { %5925 = vrcp.f32 %v4611_v44  ;;  %v4612_v52 = vadd.f32 1.0, %v5922_v49 }
 0x1aa   :  { %5927 = vrcp.f32 %v4610_v50  ;;  %4154 = vmatpush1.bf16.msra.mxu0 %v5373_v41  ;;  %4195 = vmatpush1.bf16.msra.mxu1 %v5375_v46 }
 0x1ab   :  { %5929 = vrcp.f32 %v4612_v52  ;;  %4155 = vmatprep.subr.bf16.mxu0 %v5438_v47  ;;  %4196 = vmatprep.subr.bf16.mxu1 %v5440_v45  ;;  %v5693_v47 = vcombine.low %v423_v19, %v455_v20  ;;  %v4983_v52 = vrot.slane %v4975_v5, %v6995_v25 }
 0x1ae   :  { %4156 = vmatpush1.bf16.msra.mxu0 %v5437_v56  ;;  %4197 = vmatpush1.bf16.msra.mxu1 %v5439_v58  ;;  %v5760_v56 = vcombine.high %v488_v42, %v520_v43  ;;  %v41_v58 = vld [vmem:[%s7841_s1 + $0xe0] sm:$0xff] }
 0x1af   :  { %4157 = vmatprep.subr.bf16.mxu0 %v5502_v60  ;;  %4198 = vmatprep.subr.bf16.mxu1 %v5504_v61  ;;  %v73_v60 = vld [vmem:[%s7841_s1 + $0x1e0] sm:$0xff]  ;;  %v5757_v61 = vcombine.low %v487_v35, %v519_v36 }
 0x1b0   :  { %v5314_v63 = vcombine.high %v41_v58, %v73_v60  ;;  %v297_v36 = vld [vmem:[%s7841_s1 + $0x8e0] sm:$0xff] }
 0x1b2   :  { %v5924_v11 = vpop.eup %5923  ;;  %4158 = vmatpush1.bf16.msra.mxu0 %v5501_v2  ;;  %4199 = vmatpush1.bf16.msra.mxu1 %v5503_v4  ;;  %v137_v2 = vld [vmem:[%s7841_s1 + $0x3e0] sm:$0xff]  ;;  %v106_v4 = vld [vmem:[%s7841_s1 + $0x2e8] sm:$0xff] }
 0x1b3   :  { %v5926_v14 = vpop.eup %5925  ;;  %4159 = vmatprep.subr.bf16.mxu0 %v5566_v6  ;;  %4200 = vmatprep.subr.bf16.mxu1 %v5568_v7  ;;  %v138_v6 = vld [vmem:[%s7841_s1 + $0x3e8] sm:$0xff]  ;;  %v5313_v7 = vcombine.low %v41_v58, %v73_v60  ;;  %v5378_v9 = vcombine.high %v105_v1, %v137_v2 }
 0x1b4   :  { %v5928_v17 = vpop.eup %5927  ;;  %v5380_v31 = vcombine.high %v106_v4, %v138_v6 }
 0x1b5   :  { %v5930_v21 = vpop.eup %5929  ;;  %v4945_v22 = vcombine.low %v5924_v11, %v5928_v17  ;;  %v201_v11 = vld [vmem:[%s7841_s1 + $0x5e0] sm:$0xff] }
 0x1b6   :  { %v4946_v26 = vcombine.low %v5926_v14, %v5930_v21  ;;  %4160 = vmatpush1.bf16.msra.mxu0 %v5565_v13  ;;  %4201 = vmatpush1.bf16.msra.mxu1 %v5567_v15  ;;  %v170_v14 = vld [vmem:[%s7841_s1 + $0x4e8] sm:$0xff]  ;;  %v5379_v21 = vcombine.low %v106_v4, %v138_v6  ;;  %v5700_v4 = vcombine.high %v426_v54, %v458_v57  ;;  %v489_v6 = vld [vmem:[%s7841_s1 + $0xee0] sm:$0xff] }
 0x1b7   :  { %v4967_v28 = vrot.slane %v4945_v22, %v6995_v25  ;;  %4161 = vmatprep.subr.bf16.mxu0 %v5630_v16  ;;  %4202 = vmatprep.subr.bf16.mxu1 %v5632_v18  ;;  %v202_v15 = vld [vmem:[%s7841_s1 + $0x5e8] sm:$0xff]  ;;  %v5377_v18 = vcombine.low %v105_v1, %v137_v2  ;;  %v5442_v22 = vcombine.high %v169_v10, %v201_v11 }
 0x1b8   :  { %v4974_v12 = vrot.slane %v4946_v26, %v6995_v25  ;;  %v3611_v33 = vpop.f32.mrb[24].mxu0  ;;  %v3652_v39 = vpop.f32.mrb[24].mxu1  ;;  %v5444_v26 = vcombine.high %v170_v14, %v202_v15 }
 0x1b9   :  { %v5793_v37 = vmul.f32 -1.442695, %v3611_v33  ;;  %v3613_v40 = vpop.f32.mrb[25].mxu0  ;;  %v5795_v41 = vmul.f32 -1.442695, %v3652_v39  ;;  %v3654_v44 = vpop.f32.mrb[25].mxu1  ;;  %v5443_v33 = vcombine.low %v170_v14, %v202_v15 }
 0x1ba   :  { %v4976_v38 = vcombine.low %v4967_v28, %v4974_v12  ;;  %v5794_v51 = vmul.f32 -1.442695, %v3613_v40  ;;  %v3615_v46 = vpop.f32.mrb[26].mxu0  ;;  %4162 = vmatpush1.bf16.msra.mxu0 %v5629_v27  ;;  %v5796_v49 = vmul.f32 -1.442695, %v3654_v44  ;;  %v3656_v50 = vpop.f32.mrb[26].mxu1  ;;  %4203 = vmatpush1.bf16.msra.mxu1 %v5631_v30  ;;  %v5441_v12 = vcombine.low %v169_v10, %v201_v11 }
 0x1bb   :  { %5931 = vpow2.f32 %v5793_v37  ;;  %v3616_v45 = vpop.f32.mrb[27].mxu0  ;;  %4163 = vmatprep.subr.bf16.mxu0 %v5694_v32  ;;  %v3657_v55 = vpop.f32.mrb[27].mxu1  ;;  %4204 = vmatprep.subr.bf16.mxu1 %v5696_v34  ;;  %v233_v27 = vld [vmem:[%s7841_s1 + $0x6e0] sm:$0xff]  ;;  %v234_v30 = vld [vmem:[%s7841_s1 + $0x6e8] sm:$0xff] }
 0x1bc   :  { %v4990_v53 = vrot.slane %v4976_v38, %v6995_v25  ;;  %5933 = vpow2.f32 %v5795_v41  ;;  %v266_v32 = vld [vmem:[%s7841_s1 + $0x7e8] sm:$0xff]  ;;  %v329_v37 = vld [vmem:[%s7841_s1 + $0x9e0] sm:$0xff] }
 0x1bd   :  { %5935 = vpow2.f32 %v5794_v51  ;;  %v5508_v35 = vcombine.high %v234_v30, %v266_v32  ;;  %v298_v39 = vld [vmem:[%s7841_s1 + $0x8e8] sm:$0xff]  ;;  %v5507_v43 = vcombine.low %v234_v30, %v266_v32  ;;  %v5570_v38 = vcombine.high %v297_v36, %v329_v37  ;;  %v361_v51 = vld [vmem:[%s7841_s1 + $0xae0] sm:$0xff]  ;;  %v76_v30 = vld [vmem:[%s7841_s1 + $0x1f8] sm:$0xff] }
 0x1be   :  { %v4991_v5 = vcombine.low %v4983_v52, %v4990_v53  ;;  %5937 = vpow2.f32 %v5796_v49  ;;  %4164 = vmatpush1.bf16.msra.mxu0 %v5693_v47  ;;  %4205 = vmatpush1.bf16.msra.mxu1 %v5695_v48  ;;  %v330_v40 = vld [vmem:[%s7841_s1 + $0x9e8] sm:$0xff]  ;;  %v393_v44 = vld [vmem:[%s7841_s1 + $0xbe0] sm:$0xff]  ;;  %v5569_v50 = vcombine.low %v297_v36, %v329_v37  ;;  %v139_v36 = vld [vmem:[%s7841_s1 + $0x3f0] sm:$0xff] }
 0x1bf   :  { %4165 = vmatprep.subr.bf16.mxu0 %v5758_v59  ;;  %4206 = vmatprep.subr.bf16.mxu1 %v5760_v56  ;;  %v5572_v41 = vcombine.high %v298_v39, %v330_v40  ;;  %v362_v46 = vld [vmem:[%s7841_s1 + $0xae8] sm:$0xff]  ;;  %v5571_v48 = vcombine.low %v298_v39, %v330_v40  ;;  %v5634_v59 = vcombine.high %v361_v51, %v393_v44  ;;  %v425_v55 = vld [vmem:[%s7841_s1 + $0xce0] sm:$0xff]  ;;  %v108_v37 = vld [vmem:[%s7841_s1 + $0x2f8] sm:$0xff] }
 0x1c0   :  { %5247 = vst [vmem:[%s7843_s2 + $0x10] sm:$0xff] %v4991_v5  ;;  %v394_v47 = vld [vmem:[%s7841_s1 + $0xbe8] sm:$0xff]  ;;  %v457_v56 = vld [vmem:[%s7841_s1 + $0xde0] sm:$0xff]  ;;  %v140_v39 = vld [vmem:[%s7841_s1 + $0x3f8] sm:$0xff] }
 0x1c1   :  { %v5636_v53 = vcombine.high %v362_v46, %v394_v47  ;;  %v490_v10 = vld [vmem:[%s7841_s1 + $0xee8] sm:$0xff] }
 0x1c2   :  { %4166 = vmatpush1.bf16.msra.mxu0 %v5757_v61  ;;  %4207 = vmatpush1.bf16.msra.mxu1 %v5759_v62  ;;  %v5633_v61 = vcombine.low %v361_v51, %v393_v44  ;;  %v522_v11 = vld [vmem:[%s7841_s1 + $0xfe8] sm:$0xff]  ;;  %v203_v51 = vld [vmem:[%s7841_s1 + $0x5f0] sm:$0xff] }
 0x1c3   :  { %4233 = vmatprep.subr.bf16.mxu0 %v5314_v63  ;;  %4274 = vmatprep.subr.bf16.mxu1 %v5316_v0  ;;  %v5635_v63 = vcombine.low %v362_v46, %v394_v47  ;;  %v5698_v0 = vcombine.high %v425_v55, %v457_v56  ;;  %v7721_v46 = vld [vmem:[%s7842_s0] sm:$0x1]  ;;  %v172_v47 = vld [vmem:[%s7841_s1 + $0x4f8] sm:$0xff] }
 0x1c5   :  { %v5932_v13 = vpop.eup %5931  ;;  %4184 = vmatmul.mubr.bf16.vlgmr.msra.gmra.mrb[52].mxu0 %v7280_v29  ;;  %4225 = vmatmul.mubr.bf16.vlgmr.msra.gmra.mrb[52].mxu1 %v7280_v29  ;;  %v265_v29 = vld [vmem:[%s7841_s1 + $0x7e0] sm:$0xff] }
 0x1c6   :  { %v5934_v16 = vpop.eup %5933  ;;  %v4613_v17 = vadd.f32 1.0, %v5932_v13  ;;  %4234 = vmatpush1.bf16.msra.mxu0 %v5313_v7  ;;  %4275 = vmatpush1.bf16.msra.mxu1 %v5315_v8  ;;  %v5506_v34 = vcombine.high %v233_v27, %v265_v29  ;;  %v5505_v42 = vcombine.low %v233_v27, %v265_v29  ;;  %v521_v7 = vld [vmem:[%s7841_s1 + $0xfe0] sm:$0xff]  ;;  %v43_v27 = vld [vmem:[%s7841_s1 + $0xf0] sm:$0xff] }
 0x1c7   :  { %v5936_v19 = vpop.eup %5935  ;;  %v4615_v20 = vadd.f32 1.0, %v5934_v16  ;;  %4235 = vmatprep.subr.bf16.mxu0 %v5378_v9  ;;  %4276 = vmatprep.subr.bf16.mxu1 %v5380_v31  ;;  %v75_v29 = vld [vmem:[%s7841_s1 + $0x1f0] sm:$0xff]  ;;  %v5761_v32 = vcombine.low %v489_v6, %v521_v7 }
 0x1c8   :  { %v5938_v23 = vpop.eup %5937  ;;  %5939 = vrcp.f32 %v4613_v17  ;;  %v4614_v24 = vadd.f32 1.0, %v5936_v19  ;;  %4265 = vmatprep.mubr.bf16.mxu0 %v6094_v3  ;;  %4306 = vmatprep.mubr.bf16.mxu1 %v6094_v3  ;;  %v5317_v40 = vcombine.low %v43_v27, %v75_v29 }
 0x1c9   :  { %5941 = vrcp.f32 %v4615_v20  ;;  %v4616_v28 = vadd.f32 1.0, %v5938_v23  ;;  %v5762_v23 = vcombine.high %v489_v6, %v521_v7  ;;  %v299_v7 = vld [vmem:[%s7841_s1 + $0x8f0] sm:$0xff] }
 0x1ca   :  { %5943 = vrcp.f32 %v4614_v24  ;;  %4236 = vmatpush1.bf16.msra.mxu0 %v5377_v18  ;;  %4277 = vmatpush1.bf16.msra.mxu1 %v5379_v21  ;;  %v5697_v18 = vcombine.low %v425_v55, %v457_v56 }
 0x1cb   :  { %5945 = vrcp.f32 %v4616_v28  ;;  %4237 = vmatprep.subr.bf16.mxu0 %v5442_v22  ;;  %4278 = vmatprep.subr.bf16.mxu1 %v5444_v26  ;;  %v5699_v22 = vcombine.low %v426_v54, %v458_v57  ;;  %v5764_v26 = vcombine.high %v490_v10, %v522_v11  ;;  %v44_v28 = vld [vmem:[%s7841_s1 + $0xf8] sm:$0xff]  ;;  %v235_v54 = vld [vmem:[%s7841_s1 + $0x6f0] sm:$0xff] }
 0x1cc   :  { %v267_v57 = vld [vmem:[%s7841_s1 + $0x7f0] sm:$0xff] }
 0x1ce   :  { %4238 = vmatpush1.bf16.msra.mxu0 %v5441_v12  ;;  %4279 = vmatpush1.bf16.msra.mxu1 %v5443_v33  ;;  %v5763_v12 = vcombine.low %v490_v10, %v522_v11  ;;  %v5318_v33 = vcombine.high %v43_v27, %v75_v29  ;;  %v427_v27 = vld [vmem:[%s7841_s1 + $0xcf0] sm:$0xff] }
 0x1cf   :  { %4239 = vmatprep.subr.bf16.mxu0 %v5506_v34  ;;  %4280 = vmatprep.subr.bf16.mxu1 %v5508_v35  ;;  %v5320_v34 = vcombine.high %v44_v28, %v76_v30  ;;  %v107_v35 = vld [vmem:[%s7841_s1 + $0x2f0] sm:$0xff] }
 0x1d0   :  { %v459_v29 = vld [vmem:[%s7841_s1 + $0xdf0] sm:$0xff] }
 0x1d2   :  { %v5940_v49 = vpop.eup %5939  ;;  %4240 = vmatpush1.bf16.msra.mxu0 %v5505_v42  ;;  %4281 = vmatpush1.bf16.msra.mxu1 %v5507_v43  ;;  %v5319_v42 = vcombine.low %v44_v28, %v76_v30  ;;  %v5382_v43 = vcombine.high %v107_v35, %v139_v36 }
 0x1d3   :  { %v5942_v45 = vpop.eup %5941  ;;  %4241 = vmatprep.subr.bf16.mxu0 %v5570_v38  ;;  %4282 = vmatprep.subr.bf16.mxu1 %v5572_v41  ;;  %v5384_v38 = vcombine.high %v108_v37, %v140_v39  ;;  %v171_v41 = vld [vmem:[%s7841_s1 + $0x4f0] sm:$0xff] }
 0x1d4   :  { %v5944_v52 = vpop.eup %5943  ;;  %v5446_v55 = vcombine.high %v171_v41, %v203_v51 }
 0x1d5   :  { %v5946_v58 = vpop.eup %5945  ;;  %v4992_v60 = vcombine.low %v5940_v49, %v5944_v52  ;;  %v204_v49 = vld [vmem:[%s7841_s1 + $0x5f8] sm:$0xff] }
 0x1d6   :  { %v4993_v5 = vcombine.low %v5942_v45, %v5946_v58  ;;  %4242 = vmatpush1.bf16.msra.mxu0 %v5569_v50  ;;  %4283 = vmatpush1.bf16.msra.mxu1 %v5571_v48  ;;  %v5381_v48 = vcombine.low %v107_v35, %v139_v36 }
 0x1d7   :  { %v7669_v62 = vrot.slane %v4992_v60, %v6995_v25  ;;  %4243 = vmatprep.subr.bf16.mxu0 %v5634_v59  ;;  %4284 = vmatprep.subr.bf16.mxu1 %v5636_v53  ;;  %v5383_v53 = vcombine.low %v108_v37, %v140_v39  ;;  %v5448_v60 = vcombine.high %v172_v47, %v204_v49 }
 0x1d8   :  { %v7672_v1 = vrot.slane %v4993_v5, %v6995_v25  ;;  %v3693_v2 = vpop.f32.mrb[28].mxu0  ;;  %v3734_v9 = vpop.f32.mrb[28].mxu1  ;;  %v5702_v37 = vcombine.high %v427_v27, %v459_v29 }
 0x1d9   :  { %v5797_v8 = vmul.f32 -1.442695, %v3693_v2  ;;  %v3695_v31 = vpop.f32.mrb[29].mxu0  ;;  %v5799_v14 = vmul.f32 -1.442695, %v3734_v9  ;;  %v3736_v16 = vpop.f32.mrb[29].mxu1  ;;  %v5447_v2 = vcombine.low %v172_v47, %v204_v49 }
 0x1da   :  { %v5024_v13 = vcombine.low %v7669_v62, %v7672_v1  ;;  %v5798_v15 = vmul.f32 -1.442695, %v3695_v31  ;;  %v3697_v17 = vpop.f32.mrb[30].mxu0  ;;  %4244 = vmatpush1.bf16.msra.mxu0 %v5633_v61  ;;  %v5800_v19 = vmul.f32 -1.442695, %v3736_v16  ;;  %v3738_v20 = vpop.f32.mrb[30].mxu1  ;;  %4285 = vmatpush1.bf16.msra.mxu1 %v5635_v63  ;;  %v5509_v31 = vcombine.low %v235_v54, %v267_v57 }
 0x1db   :  { %5947 = vpow2.f32 %v5797_v8  ;;  %v3698_v21 = vpop.f32.mrb[31].mxu0  ;;  %4245 = vmatprep.subr.bf16.mxu0 %v5698_v0  ;;  %v3739_v24 = vpop.f32.mrb[31].mxu1  ;;  %4286 = vmatprep.subr.bf16.mxu1 %v5700_v4  ;;  %v236_v61 = vld [vmem:[%s7841_s1 + $0x6f8] sm:$0xff]  ;;  %v5445_v0 = vcombine.low %v171_v41, %v203_v51  ;;  %v5510_v4 = vcombine.high %v235_v54, %v267_v57  ;;  %v331_v8 = vld [vmem:[%s7841_s1 + $0x9f0] sm:$0xff] }
 0x1dc   :  { %5949 = vpow2.f32 %v5799_v14  ;;  %v268_v63 = vld [vmem:[%s7841_s1 + $0x7f8] sm:$0xff]  ;;  %v5574_v11 = vcombine.high %v299_v7, %v331_v8  ;;  %v395_v16 = vld [vmem:[%s7841_s1 + $0xbf0] sm:$0xff]  ;;  %v5573_v20 = vcombine.low %v299_v7, %v331_v8  ;;  %v5032_v57 = vrot.slane %v5024_v13, %v6995_v25 }
 0x1dd   :  { %5951 = vpow2.f32 %v5798_v15  ;;  %v5512_v6 = vcombine.high %v236_v61, %v268_v63  ;;  %v332_v9 = vld [vmem:[%s7841_s1 + $0x9f8] sm:$0xff]  ;;  %v5511_v10 = vcombine.low %v236_v61, %v268_v63  ;;  %v363_v15 = vld [vmem:[%s7841_s1 + $0xaf0] sm:$0xff] }
 0x1de   :  { %5953 = vpow2.f32 %v5800_v19  ;;  %4246 = vmatpush1.bf16.msra.mxu0 %v5697_v18  ;;  %4287 = vmatpush1.bf16.msra.mxu1 %v5699_v22  ;;  %v364_v17 = vld [vmem:[%s7841_s1 + $0xaf8] sm:$0xff] }
 0x1df   :  { %4247 = vmatprep.subr.bf16.mxu0 %v5762_v23  ;;  %4288 = vmatprep.subr.bf16.mxu1 %v5764_v26  ;;  %v396_v18 = vld [vmem:[%s7841_s1 + $0xbf8] sm:$0xff]  ;;  %v5638_v23 = vcombine.high %v363_v15, %v395_v16 }
 0x1e0   :  { %v5640_v26 = vcombine.high %v364_v17, %v396_v18  ;;  %v5639_v36 = vcombine.low %v364_v17, %v396_v18  ;;  %v492_v47 = vld [vmem:[%s7841_s1 + $0xef8] sm:$0xff] }
 0x1e1   :  { %v524_v49 = vld [vmem:[%s7841_s1 + $0xff8] sm:$0xff] }
 0x1e2   :  { %4248 = vmatpush1.bf16.msra.mxu0 %v5761_v32  ;;  %4289 = vmatpush1.bf16.msra.mxu1 %v5763_v12  ;;  %v428_v32 = vld [vmem:[%s7841_s1 + $0xcf8] sm:$0xff]  ;;  %v5768_v63 = vcombine.high %v492_v47, %v524_v49 }
 0x1e3   :  { %4315 = vmatprep.subr.bf16.mxu0 %v5318_v33  ;;  %4356 = vmatprep.subr.bf16.mxu1 %v5320_v34  ;;  %v460_v12 = vld [vmem:[%s7841_s1 + $0xdf8] sm:$0xff]  ;;  %v5637_v34 = vcombine.low %v363_v15, %v395_v16 }
 0x1e5   :  { %v5948_v44 = vpop.eup %5947  ;;  %4266 = vmatmul.mubr.bf16.vlgmr.msra.gmra.mrb[56].mxu0 %v7721_v46  ;;  %4307 = vmatmul.mubr.bf16.vlgmr.msra.gmra.mrb[56].mxu1 %v7721_v46 }
 0x1e6   :  { %v5950_v50 = vpop.eup %5949  ;;  %v4617_v45 = vadd.f32 1.0, %v5948_v44  ;;  %4316 = vmatpush1.bf16.msra.mxu0 %v5317_v40  ;;  %4357 = vmatpush1.bf16.msra.mxu1 %v5319_v42  ;;  %v5704_v42 = vcombine.high %v428_v32, %v460_v12 }
 0x1e7   :  { %v5952_v59 = vpop.eup %5951  ;;  %v4619_v52 = vadd.f32 1.0, %v5950_v50  ;;  %4317 = vmatprep.subr.bf16.mxu0 %v5382_v43  ;;  %4358 = vmatprep.subr.bf16.mxu1 %v5384_v38  ;;  %v491_v43 = vld [vmem:[%s7841_s1 + $0xef0] sm:$0xff] }
 0x1e8   :  { %v5954_v56 = vpop.eup %5953  ;;  %5955 = vrcp.f32 %v4617_v45  ;;  %v4618_v58 = vadd.f32 1.0, %v5952_v59  ;;  %4347 = vmatprep.mubr.bf16.mxu0 %v6094_v3  ;;  %4388 = vmatprep.mubr.bf16.mxu1 %v6094_v3  ;;  %v300_v3 = vld [vmem:[%s7841_s1 + $0x8f8] sm:$0xff]  ;;  %v523_v38 = vld [vmem:[%s7841_s1 + $0xff0] sm:$0xff] }
 0x1e9   :  { %5957 = vrcp.f32 %v4619_v52  ;;  %v4620_v5 = vadd.f32 1.0, %v5954_v56  ;;  %v5576_v14 = vcombine.high %v300_v3, %v332_v9  ;;  %v5575_v22 = vcombine.low %v300_v3, %v332_v9 }
 0x1ea   :  { %5959 = vrcp.f32 %v4618_v58  ;;  %4318 = vmatpush1.bf16.msra.mxu0 %v5381_v48  ;;  %4359 = vmatpush1.bf16.msra.mxu1 %v5383_v53  ;;  %v5701_v53 = vcombine.low %v427_v27, %v459_v29  ;;  %v5766_v54 = vcombine.high %v491_v43, %v523_v38 }
 0x1eb   :  { %5961 = vrcp.f32 %v4620_v5  ;;  %4319 = vmatprep.subr.bf16.mxu0 %v5446_v55  ;;  %4360 = vmatprep.subr.bf16.mxu1 %v5448_v60  ;;  %v5703_v60 = vcombine.low %v428_v32, %v460_v12 }
 0x1ee   :  { %4320 = vmatpush1.bf16.msra.mxu0 %v5445_v0  ;;  %4361 = vmatpush1.bf16.msra.mxu1 %v5447_v2  ;;  %v5765_v2 = vcombine.low %v491_v43, %v523_v38 }
 0x1ef   :  { %4321 = vmatprep.subr.bf16.mxu0 %v5510_v4  ;;  %4362 = vmatprep.subr.bf16.mxu1 %v5512_v6  ;;  %v5767_v4 = vcombine.low %v492_v47, %v524_v49 }
 0x1f2   :  { %v5956_v19 = vpop.eup %5955  ;;  %4322 = vmatpush1.bf16.msra.mxu0 %v5509_v31  ;;  %4363 = vmatpush1.bf16.msra.mxu1 %v5511_v10 }
 0x1f3   :  { %v5958_v21 = vpop.eup %5957  ;;  %4323 = vmatprep.subr.bf16.mxu0 %v5574_v11  ;;  %4364 = vmatprep.subr.bf16.mxu1 %v5576_v14 }
 0x1f4   :  { %v5960_v24 = vpop.eup %5959 }
 0x1f5   :  { %v5962_v28 = vpop.eup %5961  ;;  %v4994_v30 = vcombine.low %v5956_v19, %v5960_v24 }
 0x1f6   :  { %v4995_v33 = vcombine.low %v5958_v21, %v5962_v28  ;;  %4324 = vmatpush1.bf16.msra.mxu0 %v5573_v20  ;;  %4365 = vmatpush1.bf16.msra.mxu1 %v5575_v22 }
 0x1f7   :  { %v5016_v35 = vrot.slane %v4994_v30, %v6995_v25  ;;  %4325 = vmatprep.subr.bf16.mxu0 %v5638_v23  ;;  %4366 = vmatprep.subr.bf16.mxu1 %v5640_v26 }
 0x1f8   :  { %v5023_v39 = vrot.slane %v4995_v33, %v6995_v25  ;;  %v3775_v40 = vpop.f32.mrb[32].mxu0  ;;  %v3816_v51 = vpop.f32.mrb[32].mxu1 }
 0x1f9   :  { %v5801_v41 = vmul.f32 -1.442695, %v3775_v40  ;;  %v3777_v44 = vpop.f32.mrb[33].mxu0  ;;  %v5803_v45 = vmul.f32 -1.442695, %v3816_v51  ;;  %v3818_v59 = vpop.f32.mrb[33].mxu1 }
 0x1fa   :  { %v5025_v50 = vcombine.low %v5016_v35, %v5023_v39  ;;  %v5802_v48 = vmul.f32 -1.442695, %v3777_v44  ;;  %v3779_v52 = vpop.f32.mrb[34].mxu0  ;;  %4326 = vmatpush1.bf16.msra.mxu0 %v5637_v34  ;;  %v5804_v55 = vmul.f32 -1.442695, %v3818_v59  ;;  %v3820_v56 = vpop.f32.mrb[34].mxu1  ;;  %4367 = vmatpush1.bf16.msra.mxu1 %v5639_v36 }
 0x1fb   :  { %5963 = vpow2.f32 %v5801_v41  ;;  %v3780_v58 = vpop.f32.mrb[35].mxu0  ;;  %4327 = vmatprep.subr.bf16.mxu0 %v5702_v37  ;;  %v3821_v61 = vpop.f32.mrb[35].mxu1  ;;  %4368 = vmatprep.subr.bf16.mxu1 %v5704_v42 }
 0x1fc   :  { %v5039_v5 = vrot.slane %v5025_v50, %v6995_v25  ;;  %5965 = vpow2.f32 %v5803_v45 }
 0x1fd   :  { %5967 = vpow2.f32 %v5802_v48 }
 0x1fe   :  { %v5040_v0 = vcombine.low %v5032_v57, %v5039_v5  ;;  %5969 = vpow2.f32 %v5804_v55  ;;  %4328 = vmatpush1.bf16.msra.mxu0 %v5701_v53  ;;  %4369 = vmatpush1.bf16.msra.mxu1 %v5703_v60 }
 0x1ff   :  { %4329 = vmatprep.subr.bf16.mxu0 %v5766_v54  ;;  %4370 = vmatprep.subr.bf16.mxu1 %v5768_v63 }
 0x200   :  { %5248 = vst [vmem:[%s7843_s2 + $0x18] sm:$0xff] %v5040_v0 }
 0x202   :  { %4330 = vmatpush1.bf16.msra.mxu0 %v5765_v2  ;;  %4371 = vmatpush1.bf16.msra.mxu1 %v5767_v4 }
 0x205   :  { %v5964_v62 = vpop.eup %5963  ;;  %4348 = vmatmul.mubr.bf16.vlgmr.msra.gmra.mrb[60].mxu0 %v7721_v46  ;;  %4389 = vmatmul.mubr.bf16.vlgmr.msra.gmra.mrb[60].mxu1 %v7721_v46 }
 0x206   :  { %v5966_v1 = vpop.eup %5965  ;;  %v4621_v13 = vadd.f32 1.0, %v5964_v62 }
 0x207   :  { %v5968_v6 = vpop.eup %5967  ;;  %v4623_v7 = vadd.f32 1.0, %v5966_v1 }
 0x208   :  { %v5970_v8 = vpop.eup %5969  ;;  %5971 = vrcp.f32 %v4621_v13  ;;  %v4622_v3 = vadd.f32 1.0, %v5968_v6 }
 0x209   :  { %5973 = vrcp.f32 %v4623_v7  ;;  %v4624_v9 = vadd.f32 1.0, %v5970_v8 }
 0x20a   :  { %5975 = vrcp.f32 %v4622_v3 }
 0x20b   :  { %5977 = vrcp.f32 %v4624_v9 }
 0x212   :  { %v5972_v31 = vpop.eup %5971 }
 0x213   :  { %v5974_v10 = vpop.eup %5973 }
 0x214   :  { %v5976_v11 = vpop.eup %5975 }
 0x215   :  { %v5978_v14 = vpop.eup %5977  ;;  %v5041_v15 = vcombine.low %v5972_v31, %v5976_v11 }
 0x216   :  { %v5042_v16 = vcombine.low %v5974_v10, %v5978_v14 }
 0x217   :  { %v5051_v17 = vrot.slane %v5041_v15, %v6995_v25 }
 0x218   :  { %v5058_v18 = vrot.slane %v5042_v16, %v6995_v25  ;;  %v3857_v46 = vpop.f32.mrb[36].mxu0  ;;  %v3898_v20 = vpop.f32.mrb[36].mxu1 }
 0x219   :  { %v5805_v19 = vmul.f32 -1.442695, %v3857_v46  ;;  %v3859_v21 = vpop.f32.mrb[37].mxu0  ;;  %v5807_v23 = vmul.f32 -1.442695, %v3898_v20  ;;  %v3900_v26 = vpop.f32.mrb[37].mxu1 }
 0x21a   :  { %v5073_v22 = vcombine.low %v5051_v17, %v5058_v18  ;;  %v5806_v24 = vmul.f32 -1.442695, %v3859_v21  ;;  %v3861_v27 = vpop.f32.mrb[38].mxu0  ;;  %v5808_v29 = vmul.f32 -1.442695, %v3900_v26  ;;  %v3902_v28 = vpop.f32.mrb[38].mxu1 }
 0x21b   :  { %5979 = vpow2.f32 %v5805_v19  ;;  %v3862_v30 = vpop.f32.mrb[39].mxu0  ;;  %v3903_v32 = vpop.f32.mrb[39].mxu1 }
 0x21c   :  { %5981 = vpow2.f32 %v5807_v23  ;;  %v5081_v5 = vrot.slane %v5073_v22, %v6995_v25 }
 0x21d   :  { %5983 = vpow2.f32 %v5806_v24 }
 0x21e   :  { %5985 = vpow2.f32 %v5808_v29 }
 0x225   :  { %v5980_v12 = vpop.eup %5979 }
 0x226   :  { %v5982_v33 = vpop.eup %5981  ;;  %v4625_v34 = vadd.f32 1.0, %v5980_v12 }
 0x227   :  { %v5984_v35 = vpop.eup %5983  ;;  %v4627_v36 = vadd.f32 1.0, %v5982_v33 }
 0x228   :  { %v5986_v37 = vpop.eup %5985  ;;  %5987 = vrcp.f32 %v4625_v34  ;;  %v4626_v39 = vadd.f32 1.0, %v5984_v35 }
 0x229   :  { %5989 = vrcp.f32 %v4627_v36  ;;  %v4628_v40 = vadd.f32 1.0, %v5986_v37 }
 0x22a   :  { %5991 = vrcp.f32 %v4626_v39 }
 0x22b   :  { %5993 = vrcp.f32 %v4628_v40 }
 0x232   :  { %v5988_v42 = vpop.eup %5987 }
 0x233   :  { %v5990_v43 = vpop.eup %5989 }
 0x234   :  { %v5992_v38 = vpop.eup %5991 }
 0x235   :  { %v5994_v41 = vpop.eup %5993  ;;  %v5043_v51 = vcombine.low %v5988_v42, %v5992_v38 }
 0x236   :  { %v5044_v44 = vcombine.low %v5990_v43, %v5994_v41 }
 0x237   :  { %v5065_v47 = vrot.slane %v5043_v51, %v6995_v25 }
 0x238   :  { %v5072_v49 = vrot.slane %v5044_v44, %v6995_v25  ;;  %v3939_v50 = vpop.f32.mrb[40].mxu0  ;;  %v3980_v48 = vpop.f32.mrb[40].mxu1 }
 0x239   :  { %v5809_v45 = vmul.f32 -1.442695, %v3939_v50  ;;  %v3941_v59 = vpop.f32.mrb[41].mxu0  ;;  %v5811_v53 = vmul.f32 -1.442695, %v3980_v48  ;;  %v3982_v56 = vpop.f32.mrb[41].mxu1 }
 0x23a   :  { %v5074_v52 = vcombine.low %v5065_v47, %v5072_v49  ;;  %v5810_v55 = vmul.f32 -1.442695, %v3941_v59  ;;  %v3943_v58 = vpop.f32.mrb[42].mxu0  ;;  %v5812_v60 = vmul.f32 -1.442695, %v3982_v56  ;;  %v3984_v54 = vpop.f32.mrb[42].mxu1 }
 0x23b   :  { %5995 = vpow2.f32 %v5809_v45  ;;  %v3944_v57 = vpop.f32.mrb[43].mxu0  ;;  %v3985_v63 = vpop.f32.mrb[43].mxu1 }
 0x23c   :  { %v5088_v61 = vrot.slane %v5074_v52, %v6995_v25  ;;  %5997 = vpow2.f32 %v5811_v53 }
 0x23d   :  { %5999 = vpow2.f32 %v5810_v55 }
 0x23e   :  { %v5089_v0 = vcombine.low %v5081_v5, %v5088_v61  ;;  %6001 = vpow2.f32 %v5812_v60 }
 0x240   :  { %5249 = vst [vmem:[%s7843_s2 + $0x20] sm:$0xff] %v5089_v0 }
 0x245   :  { %v5996_v2 = vpop.eup %5995 }
 0x246   :  { %v5998_v4 = vpop.eup %5997  ;;  %v4629_v62 = vadd.f32 1.0, %v5996_v2 }
 0x247   :  { %v6000_v1 = vpop.eup %5999  ;;  %v4631_v13 = vadd.f32 1.0, %v5998_v4 }
 0x248   :  { %v6002_v6 = vpop.eup %6001  ;;  %6003 = vrcp.f32 %v4629_v62  ;;  %v4630_v7 = vadd.f32 1.0, %v6000_v1 }
 0x249   :  { %6005 = vrcp.f32 %v4631_v13  ;;  %v4632_v8 = vadd.f32 1.0, %v6002_v6 }
 0x24a   :  { %6007 = vrcp.f32 %v4630_v7 }
 0x24b   :  { %6009 = vrcp.f32 %v4632_v8 }
 0x252   :  { %v6004_v3 = vpop.eup %6003 }
 0x253   :  { %v6006_v9 = vpop.eup %6005 }
 0x254   :  { %v6008_v31 = vpop.eup %6007 }
 0x255   :  { %v6010_v10 = vpop.eup %6009  ;;  %v5090_v11 = vcombine.low %v6004_v3, %v6008_v31 }
 0x256   :  { %v5091_v14 = vcombine.low %v6006_v9, %v6010_v10 }
 0x257   :  { %v5100_v15 = vrot.slane %v5090_v11, %v6995_v25 }
 0x258   :  { %v5107_v16 = vrot.slane %v5091_v14, %v6995_v25  ;;  %v4021_v17 = vpop.f32.mrb[44].mxu0  ;;  %v4062_v46 = vpop.f32.mrb[44].mxu1 }
 0x259   :  { %v5813_v18 = vmul.f32 -1.442695, %v4021_v17  ;;  %v4023_v19 = vpop.f32.mrb[45].mxu0  ;;  %v5815_v21 = vmul.f32 -1.442695, %v4062_v46  ;;  %v4064_v23 = vpop.f32.mrb[45].mxu1 }
 0x25a   :  { %v5122_v20 = vcombine.low %v5100_v15, %v5107_v16  ;;  %v5814_v22 = vmul.f32 -1.442695, %v4023_v19  ;;  %v4025_v24 = vpop.f32.mrb[46].mxu0  ;;  %v5816_v26 = vmul.f32 -1.442695, %v4064_v23  ;;  %v4066_v27 = vpop.f32.mrb[46].mxu1 }
 0x25b   :  { %6011 = vpow2.f32 %v5813_v18  ;;  %v4026_v29 = vpop.f32.mrb[47].mxu0  ;;  %v4067_v28 = vpop.f32.mrb[47].mxu1 }
 0x25c   :  { %6013 = vpow2.f32 %v5815_v21  ;;  %v5130_v54 = vrot.slane %v5122_v20, %v6995_v25 }
 0x25d   :  { %6015 = vpow2.f32 %v5814_v22 }
 0x25e   :  { %6017 = vpow2.f32 %v5816_v26 }
 0x265   :  { %v6012_v30 = vpop.eup %6011 }
 0x266   :  { %v6014_v32 = vpop.eup %6013  ;;  %v4633_v12 = vadd.f32 1.0, %v6012_v30 }
 0x267   :  { %v6016_v33 = vpop.eup %6015  ;;  %v4635_v34 = vadd.f32 1.0, %v6014_v32 }
 0x268   :  { %v6018_v35 = vpop.eup %6017  ;;  %6019 = vrcp.f32 %v4633_v12  ;;  %v4634_v36 = vadd.f32 1.0, %v6016_v33 }
 0x269   :  { %6021 = vrcp.f32 %v4635_v34  ;;  %v4636_v37 = vadd.f32 1.0, %v6018_v35 }
 0x26a   :  { %6023 = vrcp.f32 %v4634_v36 }
 0x26b   :  { %6025 = vrcp.f32 %v4636_v37 }
 0x272   :  { %v6020_v39 = vpop.eup %6019 }
 0x273   :  { %v6022_v40 = vpop.eup %6021 }
 0x274   :  { %v6024_v42 = vpop.eup %6023 }
 0x275   :  { %v6026_v43 = vpop.eup %6025  ;;  %v5092_v38 = vcombine.low %v6020_v39, %v6024_v42 }
 0x276   :  { %v5093_v41 = vcombine.low %v6022_v40, %v6026_v43 }
 0x277   :  { %v5114_v51 = vrot.slane %v5092_v38, %v6995_v25 }
 0x278   :  { %v5121_v44 = vrot.slane %v5093_v41, %v6995_v25  ;;  %v4103_v47 = vpop.f32.mrb[48].mxu0  ;;  %v4144_v50 = vpop.f32.mrb[48].mxu1 }
 0x279   :  { %v5817_v49 = vmul.f32 -1.442695, %v4103_v47  ;;  %v4105_v45 = vpop.f32.mrb[49].mxu0  ;;  %v5819_v59 = vmul.f32 -1.442695, %v4144_v50  ;;  %v4146_v53 = vpop.f32.mrb[49].mxu1 }
 0x27a   :  { %v5123_v48 = vcombine.low %v5114_v51, %v5121_v44  ;;  %v5818_v52 = vmul.f32 -1.442695, %v4105_v45  ;;  %v4107_v55 = vpop.f32.mrb[50].mxu0  ;;  %v5820_v56 = vmul.f32 -1.442695, %v4146_v53  ;;  %v4148_v58 = vpop.f32.mrb[50].mxu1 }
 0x27b   :  { %6027 = vpow2.f32 %v5817_v49  ;;  %v4108_v60 = vpop.f32.mrb[51].mxu0  ;;  %v4149_v5 = vpop.f32.mrb[51].mxu1 }
 0x27c   :  { %v5137_v57 = vrot.slane %v5123_v48, %v6995_v25  ;;  %6029 = vpow2.f32 %v5819_v59 }
 0x27d   :  { %6031 = vpow2.f32 %v5818_v52 }
 0x27e   :  { %v5138_v61 = vcombine.low %v5130_v54, %v5137_v57  ;;  %6033 = vpow2.f32 %v5820_v56 }
 0x280   :  { %5250 = vst [vmem:[%s7843_s2 + $0x28] sm:$0xff] %v5138_v61 }
 0x285   :  { %v6028_v63 = vpop.eup %6027 }
 0x286   :  { %v6030_v0 = vpop.eup %6029  ;;  %v4637_v2 = vadd.f32 1.0, %v6028_v63 }
 0x287   :  { %v6032_v4 = vpop.eup %6031  ;;  %v4639_v62 = vadd.f32 1.0, %v6030_v0 }
 0x288   :  { %v6034_v1 = vpop.eup %6033  ;;  %6035 = vrcp.f32 %v4637_v2  ;;  %v4638_v13 = vadd.f32 1.0, %v6032_v4 }
 0x289   :  { %6037 = vrcp.f32 %v4639_v62  ;;  %v4640_v6 = vadd.f32 1.0, %v6034_v1 }
 0x28a   :  { %6039 = vrcp.f32 %v4638_v13 }
 0x28b   :  { %6041 = vrcp.f32 %v4640_v6 }
 0x292   :  { %v6036_v7 = vpop.eup %6035 }
 0x293   :  { %v6038_v8 = vpop.eup %6037 }
 0x294   :  { %v6040_v3 = vpop.eup %6039 }
 0x295   :  { %v6042_v9 = vpop.eup %6041  ;;  %v5139_v31 = vcombine.low %v6036_v7, %v6040_v3 }
 0x296   :  { %v5140_v10 = vcombine.low %v6038_v8, %v6042_v9 }
 0x297   :  { %v5149_v11 = vrot.slane %v5139_v31, %v6995_v25 }
 0x298   :  { %v5156_v14 = vrot.slane %v5140_v10, %v6995_v25  ;;  %v4185_v15 = vpop.f32.mrb[52].mxu0  ;;  %v4226_v17 = vpop.f32.mrb[52].mxu1 }
 0x299   :  { %v5821_v16 = vmul.f32 -1.442695, %v4185_v15  ;;  %v4187_v18 = vpop.f32.mrb[53].mxu0  ;;  %v5823_v19 = vmul.f32 -1.442695, %v4226_v17  ;;  %v4228_v21 = vpop.f32.mrb[53].mxu1 }
 0x29a   :  { %v5171_v46 = vcombine.low %v5149_v11, %v5156_v14  ;;  %v5822_v20 = vmul.f32 -1.442695, %v4187_v18  ;;  %v4189_v22 = vpop.f32.mrb[54].mxu0  ;;  %v5824_v23 = vmul.f32 -1.442695, %v4228_v21  ;;  %v4230_v24 = vpop.f32.mrb[54].mxu1 }
 0x29b   :  { %6043 = vpow2.f32 %v5821_v16  ;;  %v4190_v26 = vpop.f32.mrb[55].mxu0  ;;  %v4231_v27 = vpop.f32.mrb[55].mxu1 }
 0x29c   :  { %6045 = vpow2.f32 %v5823_v19  ;;  %v5179_v58 = vrot.slane %v5171_v46, %v6995_v25 }
 0x29d   :  { %6047 = vpow2.f32 %v5822_v20 }
 0x29e   :  { %6049 = vpow2.f32 %v5824_v23 }
 0x2a5   :  { %v6044_v29 = vpop.eup %6043 }
 0x2a6   :  { %v6046_v28 = vpop.eup %6045  ;;  %v4641_v30 = vadd.f32 1.0, %v6044_v29 }
 0x2a7   :  { %v6048_v32 = vpop.eup %6047  ;;  %v4643_v12 = vadd.f32 1.0, %v6046_v28 }
 0x2a8   :  { %v6050_v33 = vpop.eup %6049  ;;  %6051 = vrcp.f32 %v4641_v30  ;;  %v4642_v34 = vadd.f32 1.0, %v6048_v32 }
 0x2a9   :  { %6053 = vrcp.f32 %v4643_v12  ;;  %v4644_v35 = vadd.f32 1.0, %v6050_v33 }
 0x2aa   :  { %6055 = vrcp.f32 %v4642_v34 }
 0x2ab   :  { %6057 = vrcp.f32 %v4644_v35 }
 0x2b2   :  { %v6052_v36 = vpop.eup %6051 }
 0x2b3   :  { %v6054_v37 = vpop.eup %6053 }
 0x2b4   :  { %v6056_v39 = vpop.eup %6055 }
 0x2b5   :  { %v6058_v40 = vpop.eup %6057  ;;  %v5141_v42 = vcombine.low %v6052_v36, %v6056_v39 }
 0x2b6   :  { %v5142_v43 = vcombine.low %v6054_v37, %v6058_v40 }
 0x2b7   :  { %v5163_v38 = vrot.slane %v5141_v42, %v6995_v25 }
 0x2b8   :  { %v5170_v41 = vrot.slane %v5142_v43, %v6995_v25  ;;  %v4267_v51 = vpop.f32.mrb[56].mxu0  ;;  %v4308_v47 = vpop.f32.mrb[56].mxu1 }
 0x2b9   :  { %v5825_v44 = vmul.f32 -1.442695, %v4267_v51  ;;  %v4269_v49 = vpop.f32.mrb[57].mxu0  ;;  %v5827_v45 = vmul.f32 -1.442695, %v4308_v47  ;;  %v4310_v59 = vpop.f32.mrb[57].mxu1 }
 0x2ba   :  { %v5172_v50 = vcombine.low %v5163_v38, %v5170_v41  ;;  %v5826_v48 = vmul.f32 -1.442695, %v4269_v49  ;;  %v4271_v52 = vpop.f32.mrb[58].mxu0  ;;  %v5828_v53 = vmul.f32 -1.442695, %v4310_v59  ;;  %v4312_v55 = vpop.f32.mrb[58].mxu1 }
 0x2bb   :  { %6059 = vpow2.f32 %v5825_v44  ;;  %v4272_v56 = vpop.f32.mrb[59].mxu0  ;;  %v4313_v54 = vpop.f32.mrb[59].mxu1 }
 0x2bc   :  { %v5186_v60 = vrot.slane %v5172_v50, %v6995_v25  ;;  %6061 = vpow2.f32 %v5827_v45 }
 0x2bd   :  { %6063 = vpow2.f32 %v5826_v48 }
 0x2be   :  { %v5187_v57 = vcombine.low %v5179_v58, %v5186_v60  ;;  %6065 = vpow2.f32 %v5828_v53 }
 0x2c0   :  { %5251 = vst [vmem:[%s7843_s2 + $0x30] sm:$0xff] %v5187_v57 }
 0x2c5   :  { %v6060_v5 = vpop.eup %6059 }
 0x2c6   :  { %v6062_v61 = vpop.eup %6061  ;;  %v4645_v63 = vadd.f32 1.0, %v6060_v5 }
 0x2c7   :  { %v6064_v0 = vpop.eup %6063  ;;  %v4647_v2 = vadd.f32 1.0, %v6062_v61 }
 0x2c8   :  { %v6066_v4 = vpop.eup %6065  ;;  %6067 = vrcp.f32 %v4645_v63  ;;  %v4646_v62 = vadd.f32 1.0, %v6064_v0 }
 0x2c9   :  { %6069 = vrcp.f32 %v4647_v2  ;;  %v4648_v1 = vadd.f32 1.0, %v6066_v4 }
 0x2ca   :  { %6071 = vrcp.f32 %v4646_v62 }
 0x2cb   :  { %6073 = vrcp.f32 %v4648_v1 }
 0x2d2   :  { %v6068_v13 = vpop.eup %6067 }
 0x2d3   :  { %v6070_v6 = vpop.eup %6069 }
 0x2d4   :  { %v6072_v7 = vpop.eup %6071 }
 0x2d5   :  { %v6074_v8 = vpop.eup %6073  ;;  %v5188_v3 = vcombine.low %v6068_v13, %v6072_v7 }
 0x2d6   :  { %v5189_v9 = vcombine.low %v6070_v6, %v6074_v8 }
 0x2d7   :  { %v5198_v31 = vrot.slane %v5188_v3, %v6995_v25 }
 0x2d8   :  { %v5205_v10 = vrot.slane %v5189_v9, %v6995_v25  ;;  %v4349_v11 = vpop.f32.mrb[60].mxu0  ;;  %v4390_v15 = vpop.f32.mrb[60].mxu1 }
 0x2d9   :  { %v5829_v14 = vmul.f32 -1.442695, %v4349_v11  ;;  %v4351_v16 = vpop.f32.mrb[61].mxu0  ;;  %v5831_v18 = vmul.f32 -1.442695, %v4390_v15  ;;  %v4392_v19 = vpop.f32.mrb[61].mxu1 }
 0x2da   :  { %v5220_v17 = vcombine.low %v5198_v31, %v5205_v10  ;;  %v5830_v46 = vmul.f32 -1.442695, %v4351_v16  ;;  %v4353_v20 = vpop.f32.mrb[62].mxu0  ;;  %v5832_v21 = vmul.f32 -1.442695, %v4392_v19  ;;  %v4394_v22 = vpop.f32.mrb[62].mxu1 }
 0x2db   :  { %6075 = vpow2.f32 %v5829_v14  ;;  %v4354_v23 = vpop.f32.mrb[63].mxu0  ;;  %v4395_v24 = vpop.f32.mrb[63].mxu1 }
 0x2dc   :  { %6077 = vpow2.f32 %v5831_v18  ;;  %v5228_v41 = vrot.slane %v5220_v17, %v6995_v25 }
 0x2dd   :  { %6079 = vpow2.f32 %v5830_v46 }
 0x2de   :  { %6081 = vpow2.f32 %v5832_v21 }
 0x2e5   :  { %v6076_v26 = vpop.eup %6075 }
 0x2e6   :  { %v6078_v27 = vpop.eup %6077  ;;  %v4649_v29 = vadd.f32 1.0, %v6076_v26 }
 0x2e7   :  { %v6080_v28 = vpop.eup %6079  ;;  %v4651_v30 = vadd.f32 1.0, %v6078_v27 }
 0x2e8   :  { %v6082_v32 = vpop.eup %6081  ;;  %6083 = vrcp.f32 %v4649_v29  ;;  %v4650_v12 = vadd.f32 1.0, %v6080_v28 }
 0x2e9   :  { %6085 = vrcp.f32 %v4651_v30  ;;  %v4652_v33 = vadd.f32 1.0, %v6082_v32 }
 0x2ea   :  { %6087 = vrcp.f32 %v4650_v12 }
 0x2eb   :  { %6089 = vrcp.f32 %v4652_v33 }
 0x2f2   :  { %v6084_v34 = vpop.eup %6083 }
 0x2f3   :  { %v6086_v35 = vpop.eup %6085 }
 0x2f4   :  { %v6088_v36 = vpop.eup %6087 }
 0x2f5   :  { %v6090_v37 = vpop.eup %6089  ;;  %v5190_v39 = vcombine.low %v6084_v34, %v6088_v36 }
 0x2f6   :  { %v5191_v40 = vcombine.low %v6086_v35, %v6090_v37 }
 0x2f7   :  { %v5212_v42 = vrot.slane %v5190_v39, %v6995_v25 }
 0x2f8   :  { %v5219_v43 = vrot.slane %v5191_v40, %v6995_v25 }
 0x2fa   :  { %v5221_v38 = vcombine.low %v5212_v42, %v5219_v43 }
 0x2fc   :  { %v5235_v51 = vrot.slane %v5221_v38, %v6995_v25 }
 0x2fe   :  { %v5236_v44 = vcombine.low %v5228_v41, %v5235_v51 }
 0x300   :  { %5252 = vst [vmem:[%s7843_s2 + $0x38] sm:$0xff] %v5236_v44 }

</bundles_post_ra>
